<compile_context>
chip_gen: v7x
topology: tpu7x:2x2x1
jax: 0.10.0
libtpu: 0.0.40
codegen_flags: <defaults>
</compile_context>

<pallas_src>
import jax
import jax.numpy as jnp
import numpy as np
from jax.experimental import pallas as pl
from jax.experimental.pallas import tpu as pltpu

MXU_DTYPE = jnp.bfloat16   # MXU input dtype (accumulation is always f32)
KT = 3                     # 3x3 conv


# ------------------------------ helpers -------------------------------------

def _subsample(a, axis, start, count, stride):
    """a[..., start : start + stride*count : stride, ...] along `axis`.

    Implemented as unit-stride slice + reshape + unit slice, so neither the
    Pallas interpreter (state discharge) nor Mosaic ever sees a strided slice
    or strided ref load.  `start`, `count`, `stride` are Python ints.
    """
    if stride == 1:
        return jax.lax.slice_in_dim(a, start, start + count, axis=axis)
    a = jax.lax.slice_in_dim(a, start, start + stride * count, axis=axis)
    shape = a.shape[:axis] + (count, stride) + a.shape[axis + 1:]
    a = a.reshape(shape)
    return jax.lax.index_in_dim(a, 0, axis=axis + 1, keepdims=False)


def bn_affine(gamma, beta, mean, var, eps=1e-5):
    scale = gamma / jnp.sqrt(var + eps)
    bias = beta - mean * scale
    return scale, bias


def _pick_batch_block(N, H, W, Cin, Ho, Wo, Cout):
    """Largest batch block whose per-step VMEM footprint stays ~< 40 MiB,
    preferring >= 2 grid steps so v7x's two TensorCores both get work."""
    def step_bytes(nb):
        x_b = nb * H * W * Cin * 4                        # f32 input block
        o_b = nb * Ho * Wo * Cout * 4                     # f32 output block
        sx = nb * (H + 3) * (W + 3) * Cin * 2             # padded act scratch
        sh = nb * (Ho + 2) * (Wo + 2) * Cout * 2          # padded interm scratch
        w_b = KT * KT * (Cin + Cout) * Cout * 2           # resident bf16 weights
        return 2 * (x_b + o_b) + sx + sh + 2 * w_b        # 2x = double buffering
    cands = [nb for nb in (8, 4, 2, 1)
             if N % nb == 0 and step_bytes(nb) <= 40 * 1024 * 1024]
    if not cands:
        return 1
    multi = [nb for nb in cands if N // nb >= 2]
    return (multi or cands)[0]


# ----------------------------- Pallas kernel --------------------------------

def _wide_basic_kernel_factory(nb, stride, H, W, Ho, Wo, Cin, Cout,
                               Hp, Wp, has_sc_conv):
    """Fully fused WideBasic:
       relu(bn1(x)) -> conv1(3x3, stride) -> relu(bn2(.)) -> conv2(3x3, 1)
       + shortcut(x) (1x1 strided conv or identity)."""
    M = nb * Ho * Wo

    def body(x_ref, s1_ref, b1_ref, w1_ref, b2_ref, w2_ref, ws_ref,
             o_ref, xpad_ref, hpad_ref):
        x = x_ref[...]                                       # (nb,H,W,Cin) f32

        # ---- BN1 + ReLU prologue (hoisted out of all tap loops) ------------
        a1 = jnp.maximum(x * s1_ref[...] + b1_ref[...], 0.0)

        # ---- zero-padded, pre-activated conv1 input (VMEM only) ------------
        # reference semantics: relu(bn1(x)) first, THEN the conv's zero pad.
        xpad_ref[...] = jnp.zeros((nb, Hp, Wp, Cin), xpad_ref.dtype)
        xpad_ref[:, 1:H + 1, 1:W + 1, :] = a1.astype(xpad_ref.dtype)
        xp = xpad_ref[...]                                   # bf16

        # ---- conv1 (3x3, stride): 9 tap matmuls, f32 register accumulate ---
        w1 = w1_ref[...]                                     # (9,Cin,Cout) bf16
        acc = jnp.zeros((M, Cout), jnp.float32)
        for di in range(KT):
            rows = _subsample(xp, 1, di, Ho, stride)
            for dj in range(KT):
                a = _subsample(rows, 2, dj, Wo, stride).reshape(M, Cin)
                acc = acc + jnp.dot(a, w1[di * KT + dj],
                                    preferred_element_type=jnp.float32)

        # ---- BN2 (scale already folded into w1) + ReLU epilogue ------------
        h = jnp.maximum(acc + b2_ref[...], 0.0)

        # ---- padded conv2 input (VMEM only, never touches HBM) -------------
        hpad_ref[...] = jnp.zeros((nb, Ho + 2, Wo + 2, Cout), hpad_ref.dtype)
        hpad_ref[:, 1:Ho + 1, 1:Wo + 1, :] = (
            h.reshape(nb, Ho, Wo, Cout).astype(hpad_ref.dtype))
        hp = hpad_ref[...]

        # ---- shortcut initialises the conv2 accumulator ---------------------
        if has_sc_conv:                      # 1x1 conv, stride `stride`
            xs = _subsample(_subsample(x, 1, 0, Ho, stride), 2, 0, Wo, stride)
            acc2 = jnp.dot(xs.reshape(M, Cin).astype(MXU_DTYPE), ws_ref[...],
                           preferred_element_type=jnp.float32)
        else:                                # identity: stays f32, no MXU pass
            acc2 = x.reshape(M, Cout)

        # ---- conv2 (3x3, stride 1) + residual add ---------------------------
        w2 = w2_ref[...]                                     # (9,Cout,Cout) bf16
        for di in range(KT):
            for dj in range(KT):
                a = hp[:, di:di + Ho, dj:dj + Wo, :].reshape(M, Cout)
                acc2 = acc2 + jnp.dot(a, w2[di * KT + dj],
                                      preferred_element_type=jnp.float32)

        o_ref[...] = acc2.reshape(nb, Ho, Wo, Cout).astype(o_ref.dtype)

    if has_sc_conv:
        return body

    def body_identity(x_ref, s1_ref, b1_ref, w1_ref, b2_ref, w2_ref,
                      o_ref, xpad_ref, hpad_ref):
        return body(x_ref, s1_ref, b1_ref, w1_ref, b2_ref, w2_ref, None,
                    o_ref, xpad_ref, hpad_ref)

    return body_identity


# ------------------------------- JAX glue ------------------------------------

def wide_basic_forward_nhwc(x, p, stride):
    """WideBasic forward, NHWC.  x: (N,H,W,Cin) f32 -> (N,Ho,Wo,Cout) f32."""
    N, H, W, Cin = x.shape
    Cout = p["w1"].shape[-1]
    Ho = (H - 1) // stride + 1
    Wo = (W - 1) // stride + 1
    has_sc_conv = (stride != 1) or (Cin != Cout)
    if stride != 1:
        # TODO(synk): odd spatial dims with stride > 1 need a padded raw-x slab
        #             for the 1x1 shortcut; WRN always downsamples even dims.
        assert H % stride == 0 and W % stride == 0

    # eval-mode BN folded to per-channel scale/shift (f32); BN2's scale is
    # folded straight into w1's output channels.
    s1, b1 = bn_affine(p["g1"], p["b1"], p["m1"], p["v1"])
    s2, b2 = bn_affine(p["g2"], p["b2"], p["m2"], p["v2"])
    s1 = s1.reshape(1, Cin).astype(jnp.float32)
    b1 = b1.reshape(1, Cin).astype(jnp.float32)
    b2 = b2.reshape(1, Cout).astype(jnp.float32)

    # tap-major bf16 weights (half the DMA bytes, MXU-native)
    w1 = (p["w1"] * s2.reshape(1, 1, 1, Cout)).reshape(KT * KT, Cin, Cout)
    w1 = w1.astype(MXU_DTYPE)
    w2 = p["w2"].reshape(KT * KT, Cout, Cout).astype(MXU_DTYPE)

    nb = _pick_batch_block(N, H, W, Cin, Ho, Wo, Cout)

    # Padded-slab extents (>= H+2 / W+2; also covers odd dims for strided taps)
    Hp = max(H + 2, 2 + stride * Ho)
    Wp = max(W + 2, 2 + stride * Wo)

    kernel = _wide_basic_kernel_factory(nb, stride, H, W, Ho, Wo, Cin, Cout,
                                        Hp, Wp, has_sc_conv)

    inputs = [x, s1, b1, w1, b2, w2]
    in_specs = [
        pl.BlockSpec((nb, H, W, Cin), lambda n: (n, 0, 0, 0)),
        pl.BlockSpec((1, Cin), lambda n: (0, 0)),
        pl.BlockSpec((1, Cin), lambda n: (0, 0)),
        pl.BlockSpec((KT * KT, Cin, Cout), lambda n: (0, 0, 0)),    # resident
        pl.BlockSpec((1, Cout), lambda n: (0, 0)),
        pl.BlockSpec((KT * KT, Cout, Cout), lambda n: (0, 0, 0)),   # resident
    ]
    if has_sc_conv:
        ws = p["ws"].reshape(Cin, Cout).astype(MXU_DTYPE)
        inputs.append(ws)
        in_specs.append(pl.BlockSpec((Cin, Cout), lambda n: (0, 0)))

    out = pl.pallas_call(
        kernel,
        out_shape=jax.ShapeDtypeStruct((N, Ho, Wo, Cout), jnp.float32),
        grid_spec=pltpu.PrefetchScalarGridSpec(
            num_scalar_prefetch=0,
            grid=(N // nb,),
            in_specs=in_specs,
            out_specs=pl.BlockSpec((nb, Ho, Wo, Cout),
                                   lambda n: (n, 0, 0, 0)),
            scratch_shapes=[
                pltpu.VMEM((nb, Hp, Wp, Cin), MXU_DTYPE),            # padded act
                pltpu.VMEM((nb, Ho + 2, Wo + 2, Cout), MXU_DTYPE),   # padded h
            ],
        ),
        compiler_params=pltpu.CompilerParams(
            dimension_semantics=("parallel",),
            # safe on v7x's 64 MiB VMEM; raise to ~96 MiB (and raise the
            # picker's budget) on v5e/v6e's 128 MiB for larger batch blocks.
            vmem_limit_bytes=48 * 1024 * 1024),
    )(*inputs)
    return out


def wide_basic_forward(x_nchw, p, stride):
    # NCHW <-> NHWC only at the PyTorch boundary (hoisted outside in a full WRN)
    x = jnp.transpose(x_nchw, (0, 2, 3, 1))
    out = wide_basic_forward_nhwc(x, p, stride)
    return jnp.transpose(out, (0, 3, 1, 2))


# --------------------------- pure-JAX reference ------------------------------

def reference_forward(x_nchw, p, stride):
    x = jnp.transpose(x_nchw, (0, 2, 3, 1))
    dn = ("NHWC", "HWIO", "NHWC")
    s1, b1 = bn_affine(p["g1"], p["b1"], p["m1"], p["v1"])
    h = jnp.maximum(x * s1 + b1, 0.0)
    c1 = jax.lax.conv_general_dilated(h, p["w1"], (stride, stride),
                                      ((1, 1), (1, 1)), dimension_numbers=dn)
    s2, b2 = bn_affine(p["g2"], p["b2"], p["m2"], p["v2"])
    h2 = jnp.maximum(c1 * s2 + b2, 0.0)
    c2 = jax.lax.conv_general_dilated(h2, p["w2"], (1, 1),
                                      ((1, 1), (1, 1)), dimension_numbers=dn)
    cin, cout = p["w1"].shape[2], p["w1"].shape[3]
    if stride != 1 or cin != cout:
        sc = jax.lax.conv_general_dilated(x, p["ws"], (stride, stride),
                                          ((0, 0), (0, 0)), dimension_numbers=dn)
    else:
        sc = x
    return jnp.transpose(c2 + sc, (0, 3, 1, 2))


# --------------------------------- main --------------------------------------

def _make_params(key, cin, cout, stride):
    ks = jax.random.split(key, 12)
    p = {
        "g1": jax.random.normal(ks[0], (cin,), jnp.float32) * 0.1 + 1.0,
        "b1": jax.random.normal(ks[1], (cin,), jnp.float32) * 0.1,
        "m1": jax.random.normal(ks[2], (cin,), jnp.float32) * 0.1,
        "v1": jnp.abs(jax.random.normal(ks[3], (cin,), jnp.float32)) * 0.1 + 1.0,
        "w1": jax.random.normal(ks[4], (3, 3, cin, cout), jnp.float32) * 0.1,
        "g2": jax.random.normal(ks[5], (cout,), jnp.float32) * 0.1 + 1.0,
        "b2": jax.random.normal(ks[6], (cout,), jnp.float32) * 0.1,
        "m2": jax.random.normal(ks[7], (cout,), jnp.float32) * 0.1,
        "v2": jnp.abs(jax.random.normal(ks[8], (cout,), jnp.float32)) * 0.1 + 1.0,
        "w2": jax.random.normal(ks[9], (3, 3, cout, cout), jnp.float32) * 0.1,
    }
    if stride != 1 or cin != cout:
        p["ws"] = jax.random.normal(ks[10], (1, 1, cin, cout), jnp.float32) * 0.1
    return p, ks[11]


if __name__ == "__main__":
    key = jax.random.PRNGKey(0)
    fwd = jax.jit(wide_basic_forward, static_argnums=(2,))

    # dropout_rate = 0 -> Dropout branch not constructed (identity).
    # Config 1: strided block with a 1x1-conv shortcut (first block of a stage)
    N, Cin, H, W, Cout, stride = 2, 4, 16, 16, 8, 2
    p1, k1 = _make_params(key, Cin, Cout, stride)
    x1 = jax.random.normal(k1, (N, Cin, H, W), jnp.float32)
    out1 = jax.block_until_ready(fwd(x1, p1, stride))
    ref1 = jax.block_until_ready(reference_forward(x1, p1, stride))
    Ho = (H - 1) // stride + 1
    assert out1.shape == (N, Cout, Ho, Ho), out1.shape
    # bf16 MXU inputs + bf16 VMEM intermediate -> relaxed tolerance.
    np.testing.assert_allclose(np.asarray(out1), np.asarray(ref1),
                               atol=2e-2, rtol=2e-2)

    # Config 2: stride-1 block with identity shortcut.
    N2, C2, H2 = 2, 8, 8
    p2, k2 = _make_params(k1, C2, C2, 1)
    x2 = jax.random.normal(k2, (N2, C2, H2, H2), jnp.float32)
    out2 = jax.block_until_ready(fwd(x2, p2, 1))
    ref2 = jax.block_until_ready(reference_forward(x2, p2, 1))
    assert out2.shape == (N2, C2, H2, H2), out2.shape
    np.testing.assert_allclose(np.asarray(out2), np.asarray(ref2),
                               atol=2e-2, rtol=2e-2)

    print("KERNEL_OK")
</pallas_src>

<mosaic_0001>
module attributes {stable_mosaic.version = 11 : i64} {
  func.func @body(%arg0: i32, %arg1: memref<1x16x16x4xf32, #tpu.memory_space<vmem>>, %arg2: memref<1x4xf32, #tpu.memory_space<vmem>>, %arg3: memref<1x4xf32, #tpu.memory_space<vmem>>, %arg4: memref<9x4x8xbf16, #tpu.memory_space<vmem>>, %arg5: memref<1x8xf32, #tpu.memory_space<vmem>>, %arg6: memref<9x8x8xbf16, #tpu.memory_space<vmem>>, %arg7: memref<4x8xbf16, #tpu.memory_space<vmem>>, %arg8: memref<1x8x8x8xf32, #tpu.memory_space<vmem>>, %arg9: memref<1x18x18x4xbf16, #tpu.memory_space<vmem>>, %arg10: memref<1x10x10x8xbf16, #tpu.memory_space<vmem>>) attributes {dimension_semantics = [#tpu.dimension_semantics<parallel>], iteration_bounds = array<i64: 2>, scalar_prefetch = 0 : i64, scratch_operands = 2 : i64, tpu.core_type = #tpu.core_type<tc>, window_params = [{transform_indices = @transform_0, window_bounds = array<i64: 1, 16, 16, 4>}, {pipeline_mode = #tpu.pipeline_mode<synchronous>, transform_indices = @transform_1, window_bounds = array<i64: 1, 4>}, {pipeline_mode = #tpu.pipeline_mode<synchronous>, transform_indices = @transform_2, window_bounds = array<i64: 1, 4>}, {pipeline_mode = #tpu.pipeline_mode<synchronous>, transform_indices = @transform_3, window_bounds = array<i64: 9, 4, 8>}, {pipeline_mode = #tpu.pipeline_mode<synchronous>, transform_indices = @transform_4, window_bounds = array<i64: 1, 8>}, {pipeline_mode = #tpu.pipeline_mode<synchronous>, transform_indices = @transform_5, window_bounds = array<i64: 9, 8, 8>}, {pipeline_mode = #tpu.pipeline_mode<synchronous>, transform_indices = @transform_6, window_bounds = array<i64: 4, 8>}, {transform_indices = @transform_7, window_bounds = array<i64: 1, 8, 8, 8>}]} {
    %c0 = arith.constant 0 : index
    %c0_0 = arith.constant 0 : index
    %c0_1 = arith.constant 0 : index
    %c0_2 = arith.constant 0 : index
    %0 = vector.load %arg1[%c0, %c0_0, %c0_1, %c0_2] : memref<1x16x16x4xf32, #tpu.memory_space<vmem>>, vector<1x16x16x4xf32>
    %c0_3 = arith.constant 0 : index
    %c0_4 = arith.constant 0 : index
    %1 = vector.load %arg2[%c0_3, %c0_4] : memref<1x4xf32, #tpu.memory_space<vmem>>, vector<1x4xf32>
    %2 = vector.shape_cast %1 : vector<1x4xf32> to vector<1x1x1x4xf32>
    %3 = vector.broadcast %2 : vector<1x1x1x4xf32> to vector<1x16x16x4xf32>
    %4 = arith.mulf %0, %3 : vector<1x16x16x4xf32>
    %c0_5 = arith.constant 0 : index
    %c0_6 = arith.constant 0 : index
    %5 = vector.load %arg3[%c0_5, %c0_6] : memref<1x4xf32, #tpu.memory_space<vmem>>, vector<1x4xf32>
    %6 = vector.shape_cast %5 : vector<1x4xf32> to vector<1x1x1x4xf32>
    %7 = vector.broadcast %6 : vector<1x1x1x4xf32> to vector<1x16x16x4xf32>
    %8 = arith.addf %4, %7 : vector<1x16x16x4xf32>
    %cst = arith.constant 0.000000e+00 : f32
    %9 = vector.broadcast %cst : f32 to vector<1x16x16x4xf32>
    %10 = arith.maximumf %8, %9 : vector<1x16x16x4xf32>
    %cst_7 = arith.constant 0.000000e+00 : bf16
    %11 = vector.broadcast %cst_7 : bf16 to vector<1x18x18x4xbf16>
    %c0_8 = arith.constant 0 : index
    %c0_9 = arith.constant 0 : index
    %c0_10 = arith.constant 0 : index
    %c0_11 = arith.constant 0 : index
    %12 = vector.load %arg9[%c0_8, %c0_9, %c0_10, %c0_11] : memref<1x18x18x4xbf16, #tpu.memory_space<vmem>>, vector<1x18x18x4xbf16>
    tpu.vector_store %arg9[%c0_8, %c0_9, %c0_10, %c0_11], %11 {strides = array<i32>} : memref<1x18x18x4xbf16, #tpu.memory_space<vmem>>, vector<1x18x18x4xbf16>,
    %13 = arith.truncf %10 : vector<1x16x16x4xf32> to vector<1x16x16x4xbf16>
    %c0_12 = arith.constant 0 : index
    %c1 = arith.constant 1 : index
    %c1_13 = arith.constant 1 : index
    %c0_14 = arith.constant 0 : index
    %14 = vector.load %arg9[%c0_12, %c1, %c1_13, %c0_14] : memref<1x18x18x4xbf16, #tpu.memory_space<vmem>>, vector<1x16x16x4xbf16>
    tpu.vector_store %arg9[%c0_12, %c1, %c1_13, %c0_14], %13 {strides = array<i32>} : memref<1x18x18x4xbf16, #tpu.memory_space<vmem>>, vector<1x16x16x4xbf16>,
    %c0_15 = arith.constant 0 : index
    %c0_16 = arith.constant 0 : index
    %c0_17 = arith.constant 0 : index
    %c0_18 = arith.constant 0 : index
    %15 = vector.load %arg9[%c0_15, %c0_16, %c0_17, %c0_18] : memref<1x18x18x4xbf16, #tpu.memory_space<vmem>>, vector<1x18x18x4xbf16>
    %c0_19 = arith.constant 0 : index
    %c0_20 = arith.constant 0 : index
    %c0_21 = arith.constant 0 : index
    %16 = vector.load %arg4[%c0_19, %c0_20, %c0_21] : memref<9x4x8xbf16, #tpu.memory_space<vmem>>, vector<9x4x8xbf16>
    %cst_22 = arith.constant 0.000000e+00 : f32
    %17 = vector.broadcast %cst_22 : f32 to vector<64x8xf32>
    %18 = vector.extract_strided_slice %15 {offsets = [0, 0, 0, 0], sizes = [1, 16, 18, 4], strides = [1, 1, 1, 1]} : vector<1x18x18x4xbf16> to vector<1x16x18x4xbf16>
    %19 = vector.shape_cast %18 : vector<1x16x18x4xbf16> to vector<1x8x2x18x4xbf16>
    %20 = vector.extract_strided_slice %19 {offsets = [0, 0, 0, 0, 0], sizes = [1, 8, 1, 18, 4], strides = [1, 1, 1, 1, 1]} : vector<1x8x2x18x4xbf16> to vector<1x8x1x18x4xbf16>
    %21 = vector.shape_cast %20 : vector<1x8x1x18x4xbf16> to vector<1x8x18x4xbf16>
    %22 = vector.extract_strided_slice %21 {offsets = [0, 0, 0, 0], sizes = [1, 8, 16, 4], strides = [1, 1, 1, 1]} : vector<1x8x18x4xbf16> to vector<1x8x16x4xbf16>
    %23 = vector.shape_cast %22 : vector<1x8x16x4xbf16> to vector<1x8x8x2x4xbf16>
    %24 = vector.extract_strided_slice %23 {offsets = [0, 0, 0, 0, 0], sizes = [1, 8, 8, 1, 4], strides = [1, 1, 1, 1, 1]} : vector<1x8x8x2x4xbf16> to vector<1x8x8x1x4xbf16>
    %25 = vector.shape_cast %24 : vector<1x8x8x1x4xbf16> to vector<1x8x8x4xbf16>
    %26 = vector.shape_cast %25 : vector<1x8x8x4xbf16> to vector<64x4xbf16>
    %27 = vector.extract_strided_slice %16 {offsets = [0, 0, 0], sizes = [1, 4, 8], strides = [1, 1, 1]} : vector<9x4x8xbf16> to vector<1x4x8xbf16>
    %28 = vector.shape_cast %27 : vector<1x4x8xbf16> to vector<4x8xbf16>
    %cst_23 = arith.constant dense<0.000000e+00> : vector<64x8xf32>
    %29 = tpu.matmul %26, %28, %cst_23 {dimension_numbers = #tpu.dot_dimension_numbers<[1], [0], [0], [1], [0, 0, 1, 1], [], []>} : vector<64x4xbf16>, vector<4x8xbf16>, vector<64x8xf32> -> vector<64x8xf32>
    %30 = arith.addf %17, %29 : vector<64x8xf32>
    %31 = vector.extract_strided_slice %21 {offsets = [0, 0, 1, 0], sizes = [1, 8, 16, 4], strides = [1, 1, 1, 1]} : vector<1x8x18x4xbf16> to vector<1x8x16x4xbf16>
    %32 = vector.shape_cast %31 : vector<1x8x16x4xbf16> to vector<1x8x8x2x4xbf16>
    %33 = vector.extract_strided_slice %32 {offsets = [0, 0, 0, 0, 0], sizes = [1, 8, 8, 1, 4], strides = [1, 1, 1, 1, 1]} : vector<1x8x8x2x4xbf16> to vector<1x8x8x1x4xbf16>
    %34 = vector.shape_cast %33 : vector<1x8x8x1x4xbf16> to vector<1x8x8x4xbf16>
    %35 = vector.shape_cast %34 : vector<1x8x8x4xbf16> to vector<64x4xbf16>
    %36 = vector.extract_strided_slice %16 {offsets = [1, 0, 0], sizes = [1, 4, 8], strides = [1, 1, 1]} : vector<9x4x8xbf16> to vector<1x4x8xbf16>
    %37 = vector.shape_cast %36 : vector<1x4x8xbf16> to vector<4x8xbf16>
    %cst_24 = arith.constant dense<0.000000e+00> : vector<64x8xf32>
    %38 = tpu.matmul %35, %37, %cst_24 {dimension_numbers = #tpu.dot_dimension_numbers<[1], [0], [0], [1], [0, 0, 1, 1], [], []>} : vector<64x4xbf16>, vector<4x8xbf16>, vector<64x8xf32> -> vector<64x8xf32>
    %39 = arith.addf %30, %38 : vector<64x8xf32>
    %40 = vector.extract_strided_slice %21 {offsets = [0, 0, 2, 0], sizes = [1, 8, 16, 4], strides = [1, 1, 1, 1]} : vector<1x8x18x4xbf16> to vector<1x8x16x4xbf16>
    %41 = vector.shape_cast %40 : vector<1x8x16x4xbf16> to vector<1x8x8x2x4xbf16>
    %42 = vector.extract_strided_slice %41 {offsets = [0, 0, 0, 0, 0], sizes = [1, 8, 8, 1, 4], strides = [1, 1, 1, 1, 1]} : vector<1x8x8x2x4xbf16> to vector<1x8x8x1x4xbf16>
    %43 = vector.shape_cast %42 : vector<1x8x8x1x4xbf16> to vector<1x8x8x4xbf16>
    %44 = vector.shape_cast %43 : vector<1x8x8x4xbf16> to vector<64x4xbf16>
    %45 = vector.extract_strided_slice %16 {offsets = [2, 0, 0], sizes = [1, 4, 8], strides = [1, 1, 1]} : vector<9x4x8xbf16> to vector<1x4x8xbf16>
    %46 = vector.shape_cast %45 : vector<1x4x8xbf16> to vector<4x8xbf16>
    %cst_25 = arith.constant dense<0.000000e+00> : vector<64x8xf32>
    %47 = tpu.matmul %44, %46, %cst_25 {dimension_numbers = #tpu.dot_dimension_numbers<[1], [0], [0], [1], [0, 0, 1, 1], [], []>} : vector<64x4xbf16>, vector<4x8xbf16>, vector<64x8xf32> -> vector<64x8xf32>
    %48 = arith.addf %39, %47 : vector<64x8xf32>
    %49 = vector.extract_strided_slice %15 {offsets = [0, 1, 0, 0], sizes = [1, 16, 18, 4], strides = [1, 1, 1, 1]} : vector<1x18x18x4xbf16> to vector<1x16x18x4xbf16>
    %50 = vector.shape_cast %49 : vector<1x16x18x4xbf16> to vector<1x8x2x18x4xbf16>
    %51 = vector.extract_strided_slice %50 {offsets = [0, 0, 0, 0, 0], sizes = [1, 8, 1, 18, 4], strides = [1, 1, 1, 1, 1]} : vector<1x8x2x18x4xbf16> to vector<1x8x1x18x4xbf16>
    %52 = vector.shape_cast %51 : vector<1x8x1x18x4xbf16> to vector<1x8x18x4xbf16>
    %53 = vector.extract_strided_slice %52 {offsets = [0, 0, 0, 0], sizes = [1, 8, 16, 4], strides = [1, 1, 1, 1]} : vector<1x8x18x4xbf16> to vector<1x8x16x4xbf16>
    %54 = vector.shape_cast %53 : vector<1x8x16x4xbf16> to vector<1x8x8x2x4xbf16>
    %55 = vector.extract_strided_slice %54 {offsets = [0, 0, 0, 0, 0], sizes = [1, 8, 8, 1, 4], strides = [1, 1, 1, 1, 1]} : vector<1x8x8x2x4xbf16> to vector<1x8x8x1x4xbf16>
    %56 = vector.shape_cast %55 : vector<1x8x8x1x4xbf16> to vector<1x8x8x4xbf16>
    %57 = vector.shape_cast %56 : vector<1x8x8x4xbf16> to vector<64x4xbf16>
    %58 = vector.extract_strided_slice %16 {offsets = [3, 0, 0], sizes = [1, 4, 8], strides = [1, 1, 1]} : vector<9x4x8xbf16> to vector<1x4x8xbf16>
    %59 = vector.shape_cast %58 : vector<1x4x8xbf16> to vector<4x8xbf16>
    %cst_26 = arith.constant dense<0.000000e+00> : vector<64x8xf32>
    %60 = tpu.matmul %57, %59, %cst_26 {dimension_numbers = #tpu.dot_dimension_numbers<[1], [0], [0], [1], [0, 0, 1, 1], [], []>} : vector<64x4xbf16>, vector<4x8xbf16>, vector<64x8xf32> -> vector<64x8xf32>
    %61 = arith.addf %48, %60 : vector<64x8xf32>
    %62 = vector.extract_strided_slice %52 {offsets = [0, 0, 1, 0], sizes = [1, 8, 16, 4], strides = [1, 1, 1, 1]} : vector<1x8x18x4xbf16> to vector<1x8x16x4xbf16>
    %63 = vector.shape_cast %62 : vector<1x8x16x4xbf16> to vector<1x8x8x2x4xbf16>
    %64 = vector.extract_strided_slice %63 {offsets = [0, 0, 0, 0, 0], sizes = [1, 8, 8, 1, 4], strides = [1, 1, 1, 1, 1]} : vector<1x8x8x2x4xbf16> to vector<1x8x8x1x4xbf16>
    %65 = vector.shape_cast %64 : vector<1x8x8x1x4xbf16> to vector<1x8x8x4xbf16>
    %66 = vector.shape_cast %65 : vector<1x8x8x4xbf16> to vector<64x4xbf16>
    %67 = vector.extract_strided_slice %16 {offsets = [4, 0, 0], sizes = [1, 4, 8], strides = [1, 1, 1]} : vector<9x4x8xbf16> to vector<1x4x8xbf16>
    %68 = vector.shape_cast %67 : vector<1x4x8xbf16> to vector<4x8xbf16>
    %cst_27 = arith.constant dense<0.000000e+00> : vector<64x8xf32>
    %69 = tpu.matmul %66, %68, %cst_27 {dimension_numbers = #tpu.dot_dimension_numbers<[1], [0], [0], [1], [0, 0, 1, 1], [], []>} : vector<64x4xbf16>, vector<4x8xbf16>, vector<64x8xf32> -> vector<64x8xf32>
    %70 = arith.addf %61, %69 : vector<64x8xf32>
    %71 = vector.extract_strided_slice %52 {offsets = [0, 0, 2, 0], sizes = [1, 8, 16, 4], strides = [1, 1, 1, 1]} : vector<1x8x18x4xbf16> to vector<1x8x16x4xbf16>
    %72 = vector.shape_cast %71 : vector<1x8x16x4xbf16> to vector<1x8x8x2x4xbf16>
    %73 = vector.extract_strided_slice %72 {offsets = [0, 0, 0, 0, 0], sizes = [1, 8, 8, 1, 4], strides = [1, 1, 1, 1, 1]} : vector<1x8x8x2x4xbf16> to vector<1x8x8x1x4xbf16>
    %74 = vector.shape_cast %73 : vector<1x8x8x1x4xbf16> to vector<1x8x8x4xbf16>
    %75 = vector.shape_cast %74 : vector<1x8x8x4xbf16> to vector<64x4xbf16>
    %76 = vector.extract_strided_slice %16 {offsets = [5, 0, 0], sizes = [1, 4, 8], strides = [1, 1, 1]} : vector<9x4x8xbf16> to vector<1x4x8xbf16>
    %77 = vector.shape_cast %76 : vector<1x4x8xbf16> to vector<4x8xbf16>
    %cst_28 = arith.constant dense<0.000000e+00> : vector<64x8xf32>
    %78 = tpu.matmul %75, %77, %cst_28 {dimension_numbers = #tpu.dot_dimension_numbers<[1], [0], [0], [1], [0, 0, 1, 1], [], []>} : vector<64x4xbf16>, vector<4x8xbf16>, vector<64x8xf32> -> vector<64x8xf32>
    %79 = arith.addf %70, %78 : vector<64x8xf32>
    %80 = vector.extract_strided_slice %15 {offsets = [0, 2, 0, 0], sizes = [1, 16, 18, 4], strides = [1, 1, 1, 1]} : vector<1x18x18x4xbf16> to vector<1x16x18x4xbf16>
    %81 = vector.shape_cast %80 : vector<1x16x18x4xbf16> to vector<1x8x2x18x4xbf16>
    %82 = vector.extract_strided_slice %81 {offsets = [0, 0, 0, 0, 0], sizes = [1, 8, 1, 18, 4], strides = [1, 1, 1, 1, 1]} : vector<1x8x2x18x4xbf16> to vector<1x8x1x18x4xbf16>
    %83 = vector.shape_cast %82 : vector<1x8x1x18x4xbf16> to vector<1x8x18x4xbf16>
    %84 = vector.extract_strided_slice %83 {offsets = [0, 0, 0, 0], sizes = [1, 8, 16, 4], strides = [1, 1, 1, 1]} : vector<1x8x18x4xbf16> to vector<1x8x16x4xbf16>
    %85 = vector.shape_cast %84 : vector<1x8x16x4xbf16> to vector<1x8x8x2x4xbf16>
    %86 = vector.extract_strided_slice %85 {offsets = [0, 0, 0, 0, 0], sizes = [1, 8, 8, 1, 4], strides = [1, 1, 1, 1, 1]} : vector<1x8x8x2x4xbf16> to vector<1x8x8x1x4xbf16>
    %87 = vector.shape_cast %86 : vector<1x8x8x1x4xbf16> to vector<1x8x8x4xbf16>
    %88 = vector.shape_cast %87 : vector<1x8x8x4xbf16> to vector<64x4xbf16>
    %89 = vector.extract_strided_slice %16 {offsets = [6, 0, 0], sizes = [1, 4, 8], strides = [1, 1, 1]} : vector<9x4x8xbf16> to vector<1x4x8xbf16>
    %90 = vector.shape_cast %89 : vector<1x4x8xbf16> to vector<4x8xbf16>
    %cst_29 = arith.constant dense<0.000000e+00> : vector<64x8xf32>
    %91 = tpu.matmul %88, %90, %cst_29 {dimension_numbers = #tpu.dot_dimension_numbers<[1], [0], [0], [1], [0, 0, 1, 1], [], []>} : vector<64x4xbf16>, vector<4x8xbf16>, vector<64x8xf32> -> vector<64x8xf32>
    %92 = arith.addf %79, %91 : vector<64x8xf32>
    %93 = vector.extract_strided_slice %83 {offsets = [0, 0, 1, 0], sizes = [1, 8, 16, 4], strides = [1, 1, 1, 1]} : vector<1x8x18x4xbf16> to vector<1x8x16x4xbf16>
    %94 = vector.shape_cast %93 : vector<1x8x16x4xbf16> to vector<1x8x8x2x4xbf16>
    %95 = vector.extract_strided_slice %94 {offsets = [0, 0, 0, 0, 0], sizes = [1, 8, 8, 1, 4], strides = [1, 1, 1, 1, 1]} : vector<1x8x8x2x4xbf16> to vector<1x8x8x1x4xbf16>
    %96 = vector.shape_cast %95 : vector<1x8x8x1x4xbf16> to vector<1x8x8x4xbf16>
    %97 = vector.shape_cast %96 : vector<1x8x8x4xbf16> to vector<64x4xbf16>
    %98 = vector.extract_strided_slice %16 {offsets = [7, 0, 0], sizes = [1, 4, 8], strides = [1, 1, 1]} : vector<9x4x8xbf16> to vector<1x4x8xbf16>
    %99 = vector.shape_cast %98 : vector<1x4x8xbf16> to vector<4x8xbf16>
    %cst_30 = arith.constant dense<0.000000e+00> : vector<64x8xf32>
    %100 = tpu.matmul %97, %99, %cst_30 {dimension_numbers = #tpu.dot_dimension_numbers<[1], [0], [0], [1], [0, 0, 1, 1], [], []>} : vector<64x4xbf16>, vector<4x8xbf16>, vector<64x8xf32> -> vector<64x8xf32>
    %101 = arith.addf %92, %100 : vector<64x8xf32>
    %102 = vector.extract_strided_slice %83 {offsets = [0, 0, 2, 0], sizes = [1, 8, 16, 4], strides = [1, 1, 1, 1]} : vector<1x8x18x4xbf16> to vector<1x8x16x4xbf16>
    %103 = vector.shape_cast %102 : vector<1x8x16x4xbf16> to vector<1x8x8x2x4xbf16>
    %104 = vector.extract_strided_slice %103 {offsets = [0, 0, 0, 0, 0], sizes = [1, 8, 8, 1, 4], strides = [1, 1, 1, 1, 1]} : vector<1x8x8x2x4xbf16> to vector<1x8x8x1x4xbf16>
    %105 = vector.shape_cast %104 : vector<1x8x8x1x4xbf16> to vector<1x8x8x4xbf16>
    %106 = vector.shape_cast %105 : vector<1x8x8x4xbf16> to vector<64x4xbf16>
    %107 = vector.extract_strided_slice %16 {offsets = [8, 0, 0], sizes = [1, 4, 8], strides = [1, 1, 1]} : vector<9x4x8xbf16> to vector<1x4x8xbf16>
    %108 = vector.shape_cast %107 : vector<1x4x8xbf16> to vector<4x8xbf16>
    %cst_31 = arith.constant dense<0.000000e+00> : vector<64x8xf32>
    %109 = tpu.matmul %106, %108, %cst_31 {dimension_numbers = #tpu.dot_dimension_numbers<[1], [0], [0], [1], [0, 0, 1, 1], [], []>} : vector<64x4xbf16>, vector<4x8xbf16>, vector<64x8xf32> -> vector<64x8xf32>
    %110 = arith.addf %101, %109 : vector<64x8xf32>
    %c0_32 = arith.constant 0 : index
    %c0_33 = arith.constant 0 : index
    %111 = vector.load %arg5[%c0_32, %c0_33] : memref<1x8xf32, #tpu.memory_space<vmem>>, vector<1x8xf32>
    %112 = vector.broadcast %111 : vector<1x8xf32> to vector<64x8xf32>
    %113 = arith.addf %110, %112 : vector<64x8xf32>
    %cst_34 = arith.constant 0.000000e+00 : f32
    %114 = vector.broadcast %cst_34 : f32 to vector<64x8xf32>
    %115 = arith.maximumf %113, %114 : vector<64x8xf32>
    %cst_35 = arith.constant 0.000000e+00 : bf16
    %116 = vector.broadcast %cst_35 : bf16 to vector<1x10x10x8xbf16>
    %c0_36 = arith.constant 0 : index
    %c0_37 = arith.constant 0 : index
    %c0_38 = arith.constant 0 : index
    %c0_39 = arith.constant 0 : index
    %117 = vector.load %arg10[%c0_36, %c0_37, %c0_38, %c0_39] : memref<1x10x10x8xbf16, #tpu.memory_space<vmem>>, vector<1x10x10x8xbf16>
    tpu.vector_store %arg10[%c0_36, %c0_37, %c0_38, %c0_39], %116 {strides = array<i32>} : memref<1x10x10x8xbf16, #tpu.memory_space<vmem>>, vector<1x10x10x8xbf16>,
    %118 = vector.shape_cast %115 : vector<64x8xf32> to vector<1x8x8x8xf32>
    %119 = arith.truncf %118 : vector<1x8x8x8xf32> to vector<1x8x8x8xbf16>
    %c0_40 = arith.constant 0 : index
    %c1_41 = arith.constant 1 : index
    %c1_42 = arith.constant 1 : index
    %c0_43 = arith.constant 0 : index
    %120 = vector.load %arg10[%c0_40, %c1_41, %c1_42, %c0_43] : memref<1x10x10x8xbf16, #tpu.memory_space<vmem>>, vector<1x8x8x8xbf16>
    tpu.vector_store %arg10[%c0_40, %c1_41, %c1_42, %c0_43], %119 {strides = array<i32>} : memref<1x10x10x8xbf16, #tpu.memory_space<vmem>>, vector<1x8x8x8xbf16>,
    %c0_44 = arith.constant 0 : index
    %c0_45 = arith.constant 0 : index
    %c0_46 = arith.constant 0 : index
    %c0_47 = arith.constant 0 : index
    %121 = vector.load %arg10[%c0_44, %c0_45, %c0_46, %c0_47] : memref<1x10x10x8xbf16, #tpu.memory_space<vmem>>, vector<1x10x10x8xbf16>
    %122 = vector.extract_strided_slice %0 {offsets = [0, 0, 0, 0], sizes = [1, 16, 16, 4], strides = [1, 1, 1, 1]} : vector<1x16x16x4xf32> to vector<1x16x16x4xf32>
    %123 = vector.shape_cast %122 : vector<1x16x16x4xf32> to vector<1x8x2x16x4xf32>
    %124 = vector.extract_strided_slice %123 {offsets = [0, 0, 0, 0, 0], sizes = [1, 8, 1, 16, 4], strides = [1, 1, 1, 1, 1]} : vector<1x8x2x16x4xf32> to vector<1x8x1x16x4xf32>
    %125 = vector.shape_cast %124 : vector<1x8x1x16x4xf32> to vector<1x8x16x4xf32>
    %126 = vector.extract_strided_slice %125 {offsets = [0, 0, 0, 0], sizes = [1, 8, 16, 4], strides = [1, 1, 1, 1]} : vector<1x8x16x4xf32> to vector<1x8x16x4xf32>
    %127 = vector.shape_cast %126 : vector<1x8x16x4xf32> to vector<1x8x8x2x4xf32>
    %128 = vector.extract_strided_slice %127 {offsets = [0, 0, 0, 0, 0], sizes = [1, 8, 8, 1, 4], strides = [1, 1, 1, 1, 1]} : vector<1x8x8x2x4xf32> to vector<1x8x8x1x4xf32>
    %129 = vector.shape_cast %128 : vector<1x8x8x1x4xf32> to vector<1x8x8x4xf32>
    %130 = vector.shape_cast %129 : vector<1x8x8x4xf32> to vector<64x4xf32>
    %131 = arith.truncf %130 : vector<64x4xf32> to vector<64x4xbf16>
    %c0_48 = arith.constant 0 : index
    %c0_49 = arith.constant 0 : index
    %132 = vector.load %arg7[%c0_48, %c0_49] : memref<4x8xbf16, #tpu.memory_space<vmem>>, vector<4x8xbf16>
    %cst_50 = arith.constant dense<0.000000e+00> : vector<64x8xf32>
    %133 = tpu.matmul %131, %132, %cst_50 {dimension_numbers = #tpu.dot_dimension_numbers<[1], [0], [0], [1], [0, 0, 1, 1], [], []>} : vector<64x4xbf16>, vector<4x8xbf16>, vector<64x8xf32> -> vector<64x8xf32>
    %c0_51 = arith.constant 0 : index
    %c0_52 = arith.constant 0 : index
    %c0_53 = arith.constant 0 : index
    %134 = vector.load %arg6[%c0_51, %c0_52, %c0_53] : memref<9x8x8xbf16, #tpu.memory_space<vmem>>, vector<9x8x8xbf16>
    %135 = vector.extract_strided_slice %121 {offsets = [0, 0, 0, 0], sizes = [1, 8, 8, 8], strides = [1, 1, 1, 1]} : vector<1x10x10x8xbf16> to vector<1x8x8x8xbf16>
    %136 = vector.shape_cast %135 : vector<1x8x8x8xbf16> to vector<64x8xbf16>
    %137 = vector.extract_strided_slice %134 {offsets = [0, 0, 0], sizes = [1, 8, 8], strides = [1, 1, 1]} : vector<9x8x8xbf16> to vector<1x8x8xbf16>
    %138 = vector.shape_cast %137 : vector<1x8x8xbf16> to vector<8x8xbf16>
    %cst_54 = arith.constant dense<0.000000e+00> : vector<64x8xf32>
    %139 = tpu.matmul %136, %138, %cst_54 {dimension_numbers = #tpu.dot_dimension_numbers<[1], [0], [0], [1], [0, 0, 1, 1], [], []>} : vector<64x8xbf16>, vector<8x8xbf16>, vector<64x8xf32> -> vector<64x8xf32>
    %140 = arith.addf %133, %139 : vector<64x8xf32>
    %141 = vector.extract_strided_slice %121 {offsets = [0, 0, 1, 0], sizes = [1, 8, 8, 8], strides = [1, 1, 1, 1]} : vector<1x10x10x8xbf16> to vector<1x8x8x8xbf16>
    %142 = vector.shape_cast %141 : vector<1x8x8x8xbf16> to vector<64x8xbf16>
    %143 = vector.extract_strided_slice %134 {offsets = [1, 0, 0], sizes = [1, 8, 8], strides = [1, 1, 1]} : vector<9x8x8xbf16> to vector<1x8x8xbf16>
    %144 = vector.shape_cast %143 : vector<1x8x8xbf16> to vector<8x8xbf16>
    %cst_55 = arith.constant dense<0.000000e+00> : vector<64x8xf32>
    %145 = tpu.matmul %142, %144, %cst_55 {dimension_numbers = #tpu.dot_dimension_numbers<[1], [0], [0], [1], [0, 0, 1, 1], [], []>} : vector<64x8xbf16>, vector<8x8xbf16>, vector<64x8xf32> -> vector<64x8xf32>
    %146 = arith.addf %140, %145 : vector<64x8xf32>
    %147 = vector.extract_strided_slice %121 {offsets = [0, 0, 2, 0], sizes = [1, 8, 8, 8], strides = [1, 1, 1, 1]} : vector<1x10x10x8xbf16> to vector<1x8x8x8xbf16>
    %148 = vector.shape_cast %147 : vector<1x8x8x8xbf16> to vector<64x8xbf16>
    %149 = vector.extract_strided_slice %134 {offsets = [2, 0, 0], sizes = [1, 8, 8], strides = [1, 1, 1]} : vector<9x8x8xbf16> to vector<1x8x8xbf16>
    %150 = vector.shape_cast %149 : vector<1x8x8xbf16> to vector<8x8xbf16>
    %cst_56 = arith.constant dense<0.000000e+00> : vector<64x8xf32>
    %151 = tpu.matmul %148, %150, %cst_56 {dimension_numbers = #tpu.dot_dimension_numbers<[1], [0], [0], [1], [0, 0, 1, 1], [], []>} : vector<64x8xbf16>, vector<8x8xbf16>, vector<64x8xf32> -> vector<64x8xf32>
    %152 = arith.addf %146, %151 : vector<64x8xf32>
    %153 = vector.extract_strided_slice %121 {offsets = [0, 1, 0, 0], sizes = [1, 8, 8, 8], strides = [1, 1, 1, 1]} : vector<1x10x10x8xbf16> to vector<1x8x8x8xbf16>
    %154 = vector.shape_cast %153 : vector<1x8x8x8xbf16> to vector<64x8xbf16>
    %155 = vector.extract_strided_slice %134 {offsets = [3, 0, 0], sizes = [1, 8, 8], strides = [1, 1, 1]} : vector<9x8x8xbf16> to vector<1x8x8xbf16>
    %156 = vector.shape_cast %155 : vector<1x8x8xbf16> to vector<8x8xbf16>
    %cst_57 = arith.constant dense<0.000000e+00> : vector<64x8xf32>
    %157 = tpu.matmul %154, %156, %cst_57 {dimension_numbers = #tpu.dot_dimension_numbers<[1], [0], [0], [1], [0, 0, 1, 1], [], []>} : vector<64x8xbf16>, vector<8x8xbf16>, vector<64x8xf32> -> vector<64x8xf32>
    %158 = arith.addf %152, %157 : vector<64x8xf32>
    %159 = vector.extract_strided_slice %121 {offsets = [0, 1, 1, 0], sizes = [1, 8, 8, 8], strides = [1, 1, 1, 1]} : vector<1x10x10x8xbf16> to vector<1x8x8x8xbf16>
    %160 = vector.shape_cast %159 : vector<1x8x8x8xbf16> to vector<64x8xbf16>
    %161 = vector.extract_strided_slice %134 {offsets = [4, 0, 0], sizes = [1, 8, 8], strides = [1, 1, 1]} : vector<9x8x8xbf16> to vector<1x8x8xbf16>
    %162 = vector.shape_cast %161 : vector<1x8x8xbf16> to vector<8x8xbf16>
    %cst_58 = arith.constant dense<0.000000e+00> : vector<64x8xf32>
    %163 = tpu.matmul %160, %162, %cst_58 {dimension_numbers = #tpu.dot_dimension_numbers<[1], [0], [0], [1], [0, 0, 1, 1], [], []>} : vector<64x8xbf16>, vector<8x8xbf16>, vector<64x8xf32> -> vector<64x8xf32>
    %164 = arith.addf %158, %163 : vector<64x8xf32>
    %165 = vector.extract_strided_slice %121 {offsets = [0, 1, 2, 0], sizes = [1, 8, 8, 8], strides = [1, 1, 1, 1]} : vector<1x10x10x8xbf16> to vector<1x8x8x8xbf16>
    %166 = vector.shape_cast %165 : vector<1x8x8x8xbf16> to vector<64x8xbf16>
    %167 = vector.extract_strided_slice %134 {offsets = [5, 0, 0], sizes = [1, 8, 8], strides = [1, 1, 1]} : vector<9x8x8xbf16> to vector<1x8x8xbf16>
    %168 = vector.shape_cast %167 : vector<1x8x8xbf16> to vector<8x8xbf16>
    %cst_59 = arith.constant dense<0.000000e+00> : vector<64x8xf32>
    %169 = tpu.matmul %166, %168, %cst_59 {dimension_numbers = #tpu.dot_dimension_numbers<[1], [0], [0], [1], [0, 0, 1, 1], [], []>} : vector<64x8xbf16>, vector<8x8xbf16>, vector<64x8xf32> -> vector<64x8xf32>
    %170 = arith.addf %164, %169 : vector<64x8xf32>
    %171 = vector.extract_strided_slice %121 {offsets = [0, 2, 0, 0], sizes = [1, 8, 8, 8], strides = [1, 1, 1, 1]} : vector<1x10x10x8xbf16> to vector<1x8x8x8xbf16>
    %172 = vector.shape_cast %171 : vector<1x8x8x8xbf16> to vector<64x8xbf16>
    %173 = vector.extract_strided_slice %134 {offsets = [6, 0, 0], sizes = [1, 8, 8], strides = [1, 1, 1]} : vector<9x8x8xbf16> to vector<1x8x8xbf16>
    %174 = vector.shape_cast %173 : vector<1x8x8xbf16> to vector<8x8xbf16>
    %cst_60 = arith.constant dense<0.000000e+00> : vector<64x8xf32>
    %175 = tpu.matmul %172, %174, %cst_60 {dimension_numbers = #tpu.dot_dimension_numbers<[1], [0], [0], [1], [0, 0, 1, 1], [], []>} : vector<64x8xbf16>, vector<8x8xbf16>, vector<64x8xf32> -> vector<64x8xf32>
    %176 = arith.addf %170, %175 : vector<64x8xf32>
    %177 = vector.extract_strided_slice %121 {offsets = [0, 2, 1, 0], sizes = [1, 8, 8, 8], strides = [1, 1, 1, 1]} : vector<1x10x10x8xbf16> to vector<1x8x8x8xbf16>
    %178 = vector.shape_cast %177 : vector<1x8x8x8xbf16> to vector<64x8xbf16>
    %179 = vector.extract_strided_slice %134 {offsets = [7, 0, 0], sizes = [1, 8, 8], strides = [1, 1, 1]} : vector<9x8x8xbf16> to vector<1x8x8xbf16>
    %180 = vector.shape_cast %179 : vector<1x8x8xbf16> to vector<8x8xbf16>
    %cst_61 = arith.constant dense<0.000000e+00> : vector<64x8xf32>
    %181 = tpu.matmul %178, %180, %cst_61 {dimension_numbers = #tpu.dot_dimension_numbers<[1], [0], [0], [1], [0, 0, 1, 1], [], []>} : vector<64x8xbf16>, vector<8x8xbf16>, vector<64x8xf32> -> vector<64x8xf32>
    %182 = arith.addf %176, %181 : vector<64x8xf32>
    %183 = vector.extract_strided_slice %121 {offsets = [0, 2, 2, 0], sizes = [1, 8, 8, 8], strides = [1, 1, 1, 1]} : vector<1x10x10x8xbf16> to vector<1x8x8x8xbf16>
    %184 = vector.shape_cast %183 : vector<1x8x8x8xbf16> to vector<64x8xbf16>
    %185 = vector.extract_strided_slice %134 {offsets = [8, 0, 0], sizes = [1, 8, 8], strides = [1, 1, 1]} : vector<9x8x8xbf16> to vector<1x8x8xbf16>
    %186 = vector.shape_cast %185 : vector<1x8x8xbf16> to vector<8x8xbf16>
    %cst_62 = arith.constant dense<0.000000e+00> : vector<64x8xf32>
    %187 = tpu.matmul %184, %186, %cst_62 {dimension_numbers = #tpu.dot_dimension_numbers<[1], [0], [0], [1], [0, 0, 1, 1], [], []>} : vector<64x8xbf16>, vector<8x8xbf16>, vector<64x8xf32> -> vector<64x8xf32>
    %188 = arith.addf %182, %187 : vector<64x8xf32>
    %189 = vector.shape_cast %188 : vector<64x8xf32> to vector<1x8x8x8xf32>
    %c0_63 = arith.constant 0 : index
    %c0_64 = arith.constant 0 : index
    %c0_65 = arith.constant 0 : index
    %c0_66 = arith.constant 0 : index
    %190 = vector.load %arg8[%c0_63, %c0_64, %c0_65, %c0_66] : memref<1x8x8x8xf32, #tpu.memory_space<vmem>>, vector<1x8x8x8xf32>
    tpu.vector_store %arg8[%c0_63, %c0_64, %c0_65, %c0_66], %189 {strides = array<i32>} : memref<1x8x8x8xf32, #tpu.memory_space<vmem>>, vector<1x8x8x8xf32>,
    return
  }
  func.func @transform_0(%arg0: i32) -> (i32, i32, i32, i32) {
    %c0_i32 = arith.constant 0 : i32
    %c0_i32_0 = arith.constant 0 : i32
    %c0_i32_1 = arith.constant 0 : i32
    %c0_i32_2 = arith.constant 0 : i32
    return %arg0, %c0_i32, %c0_i32_0, %c0_i32_1 : i32, i32, i32, i32
  }
  func.func @transform_1(%arg0: i32) -> (i32, i32) {
    %c0_i32 = arith.constant 0 : i32
    %c0_i32_0 = arith.constant 0 : i32
    %c0_i32_1 = arith.constant 0 : i32
    return %c0_i32, %c0_i32_0 : i32, i32
  }
  func.func @transform_2(%arg0: i32) -> (i32, i32) {
    %c0_i32 = arith.constant 0 : i32
    %c0_i32_0 = arith.constant 0 : i32
    %c0_i32_1 = arith.constant 0 : i32
    return %c0_i32, %c0_i32_0 : i32, i32
  }
  func.func @transform_3(%arg0: i32) -> (i32, i32, i32) {
    %c0_i32 = arith.constant 0 : i32
    %c0_i32_0 = arith.constant 0 : i32
    %c0_i32_1 = arith.constant 0 : i32
    %c0_i32_2 = arith.constant 0 : i32
    return %c0_i32, %c0_i32_0, %c0_i32_1 : i32, i32, i32
  }
  func.func @transform_4(%arg0: i32) -> (i32, i32) {
    %c0_i32 = arith.constant 0 : i32
    %c0_i32_0 = arith.constant 0 : i32
    %c0_i32_1 = arith.constant 0 : i32
    return %c0_i32, %c0_i32_0 : i32, i32
  }
  func.func @transform_5(%arg0: i32) -> (i32, i32, i32) {
    %c0_i32 = arith.constant 0 : i32
    %c0_i32_0 = arith.constant 0 : i32
    %c0_i32_1 = arith.constant 0 : i32
    %c0_i32_2 = arith.constant 0 : i32
    return %c0_i32, %c0_i32_0, %c0_i32_1 : i32, i32, i32
  }
  func.func @transform_6(%arg0: i32) -> (i32, i32) {
    %c0_i32 = arith.constant 0 : i32
    %c0_i32_0 = arith.constant 0 : i32
    %c0_i32_1 = arith.constant 0 : i32
    return %c0_i32, %c0_i32_0 : i32, i32
  }
  func.func @transform_7(%arg0: i32) -> (i32, i32, i32, i32) {
    %c0_i32 = arith.constant 0 : i32
    %c0_i32_0 = arith.constant 0 : i32
    %c0_i32_1 = arith.constant 0 : i32
    %c0_i32_2 = arith.constant 0 : i32
    return %arg0, %c0_i32, %c0_i32_0, %c0_i32_1 : i32, i32, i32, i32
  }
}

</mosaic_0001>

<bundles_post_ra>
// kernel: wide_basic_forward.1
= control target key start
LH: loop header
LB: loop body
LE: loop exit
PB: predicated region body
PF: predicated region fallthrough
CT: control target
= control target key end

     0   :  { %s12166_s24 = smov 0   ;;  %s16860_s0 = inlined_call_operand.vmem [shape: f32[2,16,16,4], index: 0, kind: input, shape index: {}]   ;;  %s16861_s1 = inlined_call_operand.vmem [shape: f32[1,4], index: 1, kind: input, shape index: {}]   ;;  %s16862_s2 = inlined_call_operand.vmem [shape: f32[1,4], index: 2, kind: input, shape index: {}]   ;;  %s16863_s3 = inlined_call_operand.vmem [shape: bf16[9,4,8], index: 3, kind: input, shape index: {}]   ;;  %s16864_s4 = inlined_call_operand.vmem [shape: f32[1,8], index: 4, kind: input, shape index: {}]   ;;  %s16865_s5 = inlined_call_operand.vmem [shape: bf16[9,8,8], index: 5, kind: input, shape index: {}]   ;;  %s16866_s6 = inlined_call_operand.vmem [shape: bf16[4,8], index: 6, kind: input, shape index: {}]   ;;  %s16867_s7 = inlined_call_operand.vmem [shape: f32[2,8,8,8], index: 7, kind: output, shape index: {}]  }
   0x1 LB: > { %s11233_s25 = sadd.s32 4294967295, %s12121_s24   ;;  %p11237_p0 = scmp.ge.s32.totalorder %s12121_s24, 1  ;;  %s12121_s24 = sphi %s12166_s24, %s17_s24  }
   0x2   : > { %p237_p1 = scmp.lt.s32.totalorder %s12121_s24, 3 }
   0x4   : > { %p238_p2 = pnand %p11237_p0, %p237_p1 }
   0x6   : > { %241 = sbr.rel (%p238_p2) target bundleno = 1353 (0x549), region = 48 }
   0xd   : > { %v1067_v0 = vld [vmem:[%s16863_s3 + $0x2] sm:$0x3]  ;;  %vm3224_vm0 = vcmask 1041408   ;;  %p269_p3 = scmp.lt.s32.totalorder %s11233_s25, 1  ;;  %v1102_v1 = vlaneseq  ;;  %vm422_vm1 = vcmask 27648   ;;  %vm425_vm2 = vcmask 24576  }
   0xe   : > { %12052 = vmatprep.subr.msk.bf16.mxu0 %vm3224_vm0, %v1067_v0  ;;  %v3226_v2 = vsel %vm3224_vm0, %v1067_v0, 0  ;;  %v16868_v3 = vmov 0   ;;  %v11242_v4 = vld [vmem:[%s16861_s1] ss:$0 sm:$0xff]  ;;  %v12124_v5 = vmov 1966171168  }
   0xf   : > { %11725 = vmatpush3.bf16.msra.mxu0 %v3226_v2  ;;  %s17789_s25 = smov (!%p269_p3, %s11233_s25), 1  ;;  %423 = vst.msk [vmem:[#allocation2] sm:$0xf] %vm422_vm1, %v16868_v3  ;;  %424 = vst.msk [vmem:[#allocation2 + $0x4] sm:$0xf] %vm422_vm1, %v16868_v3  ;;  %v1100_v6 = vunpack.c.l.s4 %v12124_v5  ;;  %v12287_v7 = vshrl.u32 %v1102_v1, 7 }
  0x10   : > { %426 = vst.msk [vmem:[#allocation2 + $0x8] sm:$0x1] %vm425_vm2, %v16868_v3  ;;  %432 = vst.msk [vmem:[#allocation2 + $0x20] sm:$0x1] %vm425_vm2, %v16868_v3  ;;  %s11587_s28 = sshll.u32 %s17789_s25, 8  ;;  %s11588_s26 = sshll.u32 %s17789_s25, 6 }
  0x11   : > { %430 = vst.msk [vmem:[#allocation2 + $0x18] sm:$0xf] %vm422_vm1, %v16868_v3  ;;  %431 = vst.msk [vmem:[#allocation2 + $0x1c] sm:$0xf] %vm422_vm1, %v16868_v3  ;;  %s12292_s10 = scalar_lea.vmem %s16860_s0, %s11587_s28  ;;  %v11243_v8 = vld [vmem:[%s16862_s2] ss:$0 sm:$0xff]  ;;  %v1101_v12 = vunpack.c.0.s8 %v1100_v6  ;;  %s278_s29 = scalar_lea.vmem %s16867_s7, %s11588_s26 }
  0x12   : > { %436 = vst.msk [vmem:[#allocation2 + $0x30] sm:$0xf] %vm422_vm1, %v16868_v3  ;;  %437 = vst.msk [vmem:[#allocation2 + $0x34] sm:$0xf] %vm422_vm1, %v16868_v3  ;;  %v282_v9 = vld [vmem:[%s12292_s10 + $0x10] sm:$0xff]  ;;  %v283_v10 = vld [vmem:[%s12292_s10 + $0x18] sm:$0xff] }
  0x13   : > { %438 = vst.msk [vmem:[#allocation2 + $0x38] sm:$0x1] %vm425_vm2, %v16868_v3  ;;  %444 = vst.msk [vmem:[#allocation2 + $0x50] sm:$0x1] %vm425_vm2, %v16868_v3  ;;  %v286_v11 = vld [vmem:[%s12292_s10 + $0x30] sm:$0xff]  ;;  %v287_v13 = vld [vmem:[%s12292_s10 + $0x38] sm:$0xff]  ;;  %v321_v16 = vmul.f32 %v11242_v4, %v282_v9  ;;  %v322_v17 = vmul.f32 %v11242_v4, %v283_v10  ;;  %v12306_v24 = vsub.s32 %v1101_v12, %v12287_v7 }
  0x14   : > { %442 = vst.msk [vmem:[#allocation2 + $0x48] sm:$0xf] %vm422_vm1, %v16868_v3  ;;  %443 = vst.msk [vmem:[#allocation2 + $0x4c] sm:$0xf] %vm422_vm1, %v16868_v3  ;;  %vm574_vm3 = vsmask.f32 256  ;;  %v325_v18 = vmul.f32 %v11242_v4, %v286_v11  ;;  %v326_v21 = vmul.f32 %v11242_v4, %v287_v13 }
  0x15   : > { %448 = vst.msk [vmem:[#allocation2 + $0x60] sm:$0xf] %vm422_vm1, %v16868_v3  ;;  %449 = vst.msk [vmem:[#allocation2 + $0x64] sm:$0xf] %vm422_vm1, %v16868_v3  ;;  %vm1595_vm4 = vsmask.f32 1284  ;;  %v360_v27 = vadd.f32 %v11243_v8, %v321_v16  ;;  %v361_v28 = vadd.f32 %v11243_v8, %v322_v17 }
  0x16   : > { %450 = vst.msk [vmem:[#allocation2 + $0x68] sm:$0x1] %vm425_vm2, %v16868_v3  ;;  %429 = vst.msk [vmem:[#allocation2 + $0x14] sm:$0x1] %vm425_vm2, %v16868_v3  ;;  %v290_v14 = vld [vmem:[%s12292_s10 + $0x50] sm:$0xff]  ;;  %v291_v15 = vld [vmem:[%s12292_s10 + $0x58] sm:$0xff]  ;;  %v364_v29 = vadd.f32 %v11243_v8, %v325_v18  ;;  %v365_v30 = vadd.f32 %v11243_v8, %v326_v21 }
  0x17   : > { %427 = vst.msk [vmem:[#allocation2 + $0xc] sm:$0xf] %vm422_vm1, %v16868_v3  ;;  %428 = vst.msk [vmem:[#allocation2 + $0x10] sm:$0xf] %vm422_vm1, %v16868_v3  ;;  %vm1597_vm5 = vsmask.f32 2312  ;;  %v329_v22 = vmul.f32 %v11242_v4, %v290_v14  ;;  %v330_v23 = vmul.f32 %v11242_v4, %v291_v15 }
  0x18   : > { %433 = vst.msk [vmem:[#allocation2 + $0x24] sm:$0xf] %vm422_vm1, %v16868_v3  ;;  %434 = vst.msk [vmem:[#allocation2 + $0x28] sm:$0xf] %vm422_vm1, %v16868_v3  ;;  %v294_v19 = vld [vmem:[%s12292_s10 + $0x70] sm:$0xff]  ;;  %v295_v20 = vld [vmem:[%s12292_s10 + $0x78] sm:$0xff] }
  0x19   : > { %435 = vst.msk [vmem:[#allocation2 + $0x2c] sm:$0x1] %vm425_vm2, %v16868_v3  ;;  %441 = vst.msk [vmem:[#allocation2 + $0x44] sm:$0x1] %vm425_vm2, %v16868_v3  ;;  %vm575_vm6 = vsmask.f32 4368  ;;  %v333_v25 = vmul.f32 %v11242_v4, %v294_v19  ;;  %v334_v26 = vmul.f32 %v11242_v4, %v295_v20  ;;  %v368_v31 = vadd.f32 %v11243_v8, %v329_v22 }
  0x1a   : > { %439 = vst.msk [vmem:[#allocation2 + $0x3c] sm:$0xf] %vm422_vm1, %v16868_v3  ;;  %440 = vst.msk [vmem:[#allocation2 + $0x40] sm:$0xf] %vm422_vm1, %v16868_v3  ;;  %vm899_vm7 = vsmask.f32 7938  ;;  %v369_v32 = vadd.f32 %v11243_v8, %v330_v23 }
  0x1b   : > { %445 = vst.msk [vmem:[#allocation2 + $0x54] sm:$0xf] %vm422_vm1, %v16868_v3  ;;  %446 = vst.msk [vmem:[#allocation2 + $0x58] sm:$0xf] %vm422_vm1, %v16868_v3  ;;  %vm1599_vm8 = vsmask.f32 3340  ;;  %v372_v33 = vadd.f32 %v11243_v8, %v333_v25  ;;  %v373_v34 = vadd.f32 %v11243_v8, %v334_v26 }
  0x1c   : > { %447 = vst.msk [vmem:[#allocation2 + $0x5c] sm:$0x1] %vm425_vm2, %v16868_v3  ;;  %453 = vst.msk [vmem:[#allocation2 + $0x74] sm:$0x1] %vm425_vm2, %v16868_v3  ;;  %v392_v35 = vmax.f32 %v360_v27, 0.0  ;;  %v393_v36 = vmax.f32 %v361_v28, 0.0 }
  0x1d   : > { %451 = vst.msk [vmem:[#allocation2 + $0x6c] sm:$0xf] %vm422_vm1, %v16868_v3  ;;  %452 = vst.msk [vmem:[#allocation2 + $0x70] sm:$0xf] %vm422_vm1, %v16868_v3  ;;  %v396_v37 = vmax.f32 %v364_v29, 0.0  ;;  %v397_v38 = vmax.f32 %v365_v30, 0.0 }
  0x1e   : > { %454 = vst.msk [vmem:[#allocation2 + $0x78] sm:$0xf] %vm422_vm1, %v16868_v3  ;;  %455 = vst.msk [vmem:[#allocation2 + $0x7c] sm:$0xf] %vm422_vm1, %v16868_v3  ;;  %v400_v39 = vmax.f32 %v368_v31, 0.0  ;;  %v401_v40 = vmax.f32 %v369_v32, 0.0  ;;  %v11591_v44 = vpack.c.bf16 %v392_v35, %v392_v35  ;;  %v11592_v45 = vpack.c.bf16 %v393_v36, %v393_v36 }
  0x1f   : > { %456 = vst.msk [vmem:[#allocation2 + $0x80] sm:$0x1] %vm425_vm2, %v16868_v3  ;;  %459 = vst.msk [vmem:[#allocation2 + $0x8c] sm:$0x1] %vm425_vm2, %v16868_v3  ;;  %v12311_v41 = vld [vmem:[%s16863_s3] sm:$0x3]  ;;  %v11595_v46 = vpack.c.bf16 %v396_v37, %v396_v37  ;;  %v11596_v47 = vpack.c.bf16 %v397_v38, %v397_v38 }
  0x20   : > { %457 = vst.msk [vmem:[#allocation2 + $0x84] sm:$0xf] %vm422_vm1, %v16868_v3  ;;  %458 = vst.msk [vmem:[#allocation2 + $0x88] sm:$0xf] %vm422_vm1, %v16868_v3  ;;  %v404_v42 = vmax.f32 %v372_v33, 0.0  ;;  %v405_v43 = vmax.f32 %v373_v34, 0.0  ;;  %12053 = vmatprep.subr.msk.bf16.mxu0 %vm3224_vm0, %v12311_v41  ;;  %v11599_v48 = vpack.c.bf16 %v400_v39, %v400_v39  ;;  %v11600_v49 = vpack.c.bf16 %v401_v40, %v401_v40 }
  0x21   : > { %460 = vst.msk [vmem:[#allocation2 + $0x90] sm:$0xf] %vm422_vm1, %v16868_v3  ;;  %461 = vst.msk [vmem:[#allocation2 + $0x94] sm:$0xf] %vm422_vm1, %v16868_v3  ;;  %v595_v52 = vshrl.u32 %v11591_v44, 16  ;;  %v598_v53 = vshll.u32 %v11591_v44, 16 }
  0x22   : > { %462 = vst.msk [vmem:[#allocation2 + $0x98] sm:$0x1] %vm425_vm2, %v16868_v3  ;;  %465 = vst.msk [vmem:[#allocation2 + $0xa4] sm:$0x1] %vm425_vm2, %v16868_v3  ;;  %v12315_v50 = vpack.c.bf16 %v404_v42, %v404_v42  ;;  %v12317_v51 = vpack.c.bf16 %v405_v43, %v405_v43  ;;  %v603_v54 = vshrl.u32 %v11592_v45, 16  ;;  %v606_v55 = vshll.u32 %v11592_v45, 16 }
  0x23   : > { %463 = vst.msk [vmem:[#allocation2 + $0x9c] sm:$0xf] %vm422_vm1, %v16868_v3  ;;  %464 = vst.msk [vmem:[#allocation2 + $0xa0] sm:$0xf] %vm422_vm1, %v16868_v3  ;;  %v629_v56 = vshrl.u32 %v11595_v46, 16  ;;  %v632_v57 = vshll.u32 %v11595_v46, 16 }
  0x24   : > { %466 = vst.msk [vmem:[#allocation2 + $0xa8] sm:$0xf] %vm422_vm1, %v16868_v3  ;;  %467 = vst.msk [vmem:[#allocation2 + $0xac] sm:$0xf] %vm422_vm1, %v16868_v3  ;;  %vm1602_vm10 = vsmask.f32 5396 }
  0x25   : > { %468 = vst.msk [vmem:[#allocation2 + $0xb0] sm:$0x1] %vm425_vm2, %v16868_v3  ;;  %471 = vst.msk [vmem:[#allocation2 + $0xbc] sm:$0x1] %vm425_vm2, %v16868_v3  ;;  %v597_v58 = vrot.slane %v595_v52, 7  ;;  %v637_v59 = vshrl.u32 %v11596_v47, 16 }
  0x26   : > { %469 = vst.msk [vmem:[#allocation2 + $0xb4] sm:$0xf] %vm422_vm1, %v16868_v3  ;;  %470 = vst.msk [vmem:[#allocation2 + $0xb8] sm:$0xf] %vm422_vm1, %v16868_v3  ;;  %v640_v60 = vshll.u32 %v11596_v47, 16  ;;  %v663_v61 = vshrl.u32 %v11599_v48, 16 }
  0x27   : > { %472 = vst.msk [vmem:[#allocation2 + $0xc0] sm:$0xf] %vm422_vm1, %v16868_v3  ;;  %473 = vst.msk [vmem:[#allocation2 + $0xc4] sm:$0xf] %vm422_vm1, %v16868_v3  ;;  %v605_v62 = vrot.slane %v603_v54, 7  ;;  %v631_v63 = vrot.slane %v629_v56, 7  ;;  %v600_v5 = vor.u32 %v598_v53, %v597_v58 }
  0x28   : > { %474 = vst.msk [vmem:[#allocation2 + $0xc8] sm:$0x1] %vm425_vm2, %v16868_v3  ;;  %17138 = vst [vmem:[#allocation4_spill] sm:$0xff] %v12287_v7  ;;  %v666_v0 = vshll.u32 %v11599_v48, 16  ;;  %v671_v1 = vshrl.u32 %v11600_v49, 16  ;;  %v17141_v4 = vmov 0 }
  0x29   : > { %vm1596_vm9 = vmor %vm574_vm3, %vm1595_vm4  ;;  %v601_v6 = vrot.slane %v597_v58, 4  ;;  %v639_v8 = vrot.slane %v637_v59, 7  ;;  %v665_v9 = vrot.slane %v663_v61, 7  ;;  %v910_v10 = vld [vmem:[#allocation2 + $0x18] sm:$0xf]  ;;  %v608_v11 = vor.u32 %v606_v55, %v605_v62 }
  0x2a   : > { %vm12322_vm11 = vmor %vm1596_vm9, %vm1597_vm5  ;;  %vm1604_vm13 = vsmask.f32 6424  ;;  %v610_v12 = vrot.slane %v605_v62, 4  ;;  %v634_v13 = vor.u32 %v632_v57, %v631_v63  ;;  %v635_v14 = vrot.slane %v631_v63, 4  ;;  %v914_v16 = vld [vmem:[#allocation2 + $0x20] sm:$0x1] }
  0x2b   : > { %vm12328_vm12 = vmor %vm574_vm3, %vm575_vm6  ;;  %v17144_v15 = vmov 0  ;;  %v924_v17 = vld [vmem:[#allocation2 + $0x30] sm:$0xf]  ;;  %v642_v18 = vor.u32 %v640_v60, %v639_v8  ;;  %v644_v19 = vrot.slane %v639_v8, 4  ;;  %v668_v20 = vor.u32 %v666_v0, %v665_v9  ;;  %v928_v22 = vld [vmem:[#allocation2 + $0x38] sm:$0x1] }
  0x2c   : > { %v17142_v4 = vsel %vm12328_vm12, 4294967295, %v17141_v4  ;;  %vm12334_vm14 = vmand %vm422_vm1, %vm899_vm7  ;;  %v669_v21 = vrot.slane %v665_v9, 4  ;;  %v938_v23 = vld [vmem:[#allocation2 + $0x48] sm:$0xf]  ;;  %v609_v26 = vsel %vm12328_vm12, %v601_v6, %v608_v11  ;;  %v673_v27 = vrot.slane %v671_v1, 7 }
  0x2d   : > { %17143 = vst [vmem:[#allocation5_spill] sm:$0xff] %v17142_v4  ;;  %v17145_v15 = vsel %vm12334_vm14, 4294967295, %v17144_v15  ;;  %vm12341_vm15 = vmor %vm12322_vm11, %vm1599_vm8  ;;  %v674_v28 = vshll.u32 %v11600_v49, 16  ;;  %v697_v29 = vshrl.u32 %v12315_v50, 16  ;;  %v17149_v30 = vmov 0 }
  0x2e   : > { %17146 = vst [vmem:[#allocation6_spill] sm:$0xff] %v17145_v15  ;;  %vm12350_vm4 = vmand %vm425_vm2, %vm574_vm3  ;;  %v942_v31 = vld [vmem:[#allocation2 + $0x50] sm:$0x1]  ;;  %vm1606_vm5 = vsmask.f32 7452  ;;  %v643_v32 = vsel %vm12328_vm12, %v635_v14, %v642_v18  ;;  %v700_v33 = vshll.u32 %v12315_v50, 16  ;;  %v911_v40 = vsel %vm12334_vm14, %v600_v5, %v910_v10 }
  0x2f   : > { %v17150_v30 = vsel %vm12350_vm4, 4294967295, %v17149_v30  ;;  %v705_v34 = vshrl.u32 %v12317_v51, 16  ;;  %v708_v35 = vshll.u32 %v12317_v51, 16  ;;  %913 = vst.msk [vmem:[#allocation2 + $0x1c] sm:$0xf] %vm422_vm1, %v609_v26  ;;  %v676_v37 = vor.u32 %v674_v28, %v673_v27  ;;  %vm12366_vm2 = vmor %vm12341_vm15, %vm575_vm6 }
  0x30   : > { %17151 = vst [vmem:[#allocation7_spill] sm:$0xff] %v17150_v30  ;;  %v952_v36 = vld [vmem:[#allocation2 + $0x60] sm:$0xf]  ;;  %v678_v38 = vrot.slane %v673_v27, 4  ;;  %v699_v39 = vrot.slane %v697_v29, 7  ;;  %v915_v46 = vsel %vm12350_vm4, %v610_v12, %v914_v16  ;;  %v925_v47 = vsel %vm12334_vm14, %v634_v13, %v924_v17  ;;  %vm12386_vm6 = vmor %vm12366_vm2, %vm1602_vm10 }
  0x31   : > { %927 = vst.msk [vmem:[#allocation2 + $0x34] sm:$0xf] %vm422_vm1, %v643_v32  ;;  %v956_v42 = vld [vmem:[#allocation2 + $0x68] sm:$0x1]  ;;  %v707_v45 = vrot.slane %v705_v34, 7  ;;  %v929_v48 = vsel %vm12350_vm4, %v644_v19, %v928_v22  ;;  %v677_v50 = vsel %vm12328_vm12, %v669_v21, %v676_v37  ;;  %v939_v53 = vsel %vm12334_vm14, %v668_v20, %v938_v23  ;;  %vm12423_vm8 = vmor %vm12386_vm6, %vm1604_vm13 }
  0x32   : > { %v11276_v43 = vld.sshfl [vmem:[#allocation2] sm:$0x33 pattern:$0x75316420]  ;;  %912 = vst [vmem:[#allocation2 + $0x18] sm:$0xf] %v911_v40  ;;  %v702_v51 = vor.u32 %v700_v33, %v699_v39  ;;  %v943_v57 = vsel %vm12350_vm4, %v678_v38, %v942_v31  ;;  %vm12457_vm9 = vmor %vm12423_vm8, %vm1606_vm5 }
  0x33   : > { %v11277_v49 = vld.sshfl [vmem:[#allocation2 + $0x4] sm:$0x33 pattern:$0x75316420]  ;;  %v703_v52 = vrot.slane %v699_v39, 4  ;;  %v710_v55 = vor.u32 %v708_v35, %v707_v45  ;;  %v712_v56 = vrot.slane %v707_v45, 4  ;;  %v1098_v58 = vcombine.high %v11276_v43, %v11276_v43 }
  0x34   : > { %916 = vst [vmem:[#allocation2 + $0x20] sm:$0x1] %v915_v46  ;;  %926 = vst [vmem:[#allocation2 + $0x30] sm:$0xf] %v925_v47  ;;  %v953_v60 = vsel %vm12334_vm14, %v702_v51, %v952_v36  ;;  %v12393_v61 = vrot.slane %v11276_v43, %v12306_v24  ;;  %v1122_v62 = vcombine.high %v11277_v49, %v11277_v49  ;;  %v17171_v31 = vmov 0 }
  0x35   : > { %930 = vst [vmem:[#allocation2 + $0x38] sm:$0x1] %v929_v48  ;;  %v11292_v54 = vld.sshfl [vmem:[#allocation2 + $0x8] sm:$0x1 pattern:$0x75316420]  ;;  %v12396_v63 = vrot.slane %v11277_v49, %v12306_v24  ;;  %v711_v0 = vsel %vm12328_vm12, %v703_v52, %v710_v55  ;;  %v957_v1 = vsel %vm12350_vm4, %v712_v56, %v956_v42  ;;  %v12403_v2 = vrot.slane %v1098_v58, %v12306_v24 }
  0x36   : > { %940 = vst [vmem:[#allocation2 + $0x48] sm:$0xf] %v939_v53  ;;  %941 = vst.msk [vmem:[#allocation2 + $0x4c] sm:$0xf] %vm422_vm1, %v677_v50  ;;  %v12406_v5 = vrot.slane %v11292_v54, %v12306_v24  ;;  %v12411_v8 = vcombine.high %v12393_v61, %v12393_v61  ;;  %v12414_v9 = vrot.slane %v1122_v62, %v12306_v24  ;;  %v1609_v12 = vshrl.u32 %v12393_v61, 16 }
  0x37   : > { %944 = vst [vmem:[#allocation2 + $0x50] sm:$0x1] %v943_v57  ;;  %17156 = vst [vmem:[#allocation8_spill] sm:$0xff] %v12396_v63  ;;  %v12418_v10 = vcombine.high %v12396_v63, %v12396_v63  ;;  %v12430_v14 = vcombine.high %v12403_v2, %v12403_v2  ;;  %v1614_v18 = vshll.u32 %v12403_v2, 16  ;;  %v1617_v23 = vshrl.u32 %v12403_v2, 16 }
  0x38   : > { %954 = vst [vmem:[#allocation2 + $0x60] sm:$0xf] %v953_v60  ;;  %17157 = vst [vmem:[#allocation9_spill] sm:$0xff] %v12403_v2  ;;  %v12438_v20 = vcombine.high %v12414_v9, %v12414_v9  ;;  %v17172_v31 = vsel %vm12457_vm9, 4294967295, %v17171_v31  ;;  %v1622_v47 = vshll.u32 %v12411_v8, 16  ;;  %vm3089_vm10 = vcmask 1041409  }
  0x39   : > { %17158 = vst [vmem:[#allocation10_spill] sm:$0xff] %v12406_v5  ;;  %955 = vst.msk [vmem:[#allocation2 + $0x64] sm:$0xf] %vm422_vm1, %v711_v0  ;;  %v12473_v36 = vsel %vm12457_vm9, %v1609_v12, %v1614_v18  ;;  %vm3092_vm11 = vcmask 1042434   ;;  %vm3095_vm13 = vcmask 1043459   ;;  %vm3098_vm15 = vcmask 1044484  }
  0x3a   : > { %958 = vst [vmem:[#allocation2 + $0x68] sm:$0x1] %v957_v1  ;;  %v11279_v6 = vld.sshfl [vmem:[#allocation2 + $0x1c] sm:$0x33 pattern:$0x75316420]  ;;  %v12516_v57 = vsel %vm12457_vm9, %v1617_v23, %v1622_v47 }
  0x3b   : > { %17159 = vst [vmem:[#allocation11_spill] sm:$0xff] %v12411_v8  ;;  %17160 = vst [vmem:[#allocation12_spill] sm:$0xff] %v12414_v9  ;;  %v11281_v13 = vld.sshfl [vmem:[#allocation2 + $0x34] sm:$0x33 pattern:$0x75316420]  ;;  %v1170_v16 = vcombine.high %v11279_v6, %v11279_v6  ;;  %v12433_v17 = vrot.slane %v11279_v6, %v12306_v24 }
  0x3c   : > { %17161 = vst [vmem:[#allocation13_spill] sm:$0xff] %v12418_v10  ;;  %17164 = vst [vmem:[#allocation14_spill] sm:$0xff] %v12430_v14  ;;  %v11278_v19 = vld.sshfl [vmem:[#allocation2 + $0x18] sm:$0x33 pattern:$0x75316420]  ;;  %v1218_v21 = vcombine.high %v11281_v13, %v11281_v13  ;;  %v12441_v22 = vrot.slane %v11281_v13, %v12306_v24 }
  0x3d   : > { %17165 = vst [vmem:[#allocation15_spill] sm:$0xff] %v12433_v17  ;;  %17166 = vst [vmem:[#allocation16_spill] sm:$0xff] %v12438_v20  ;;  %v11293_v25 = vld.sshfl [vmem:[#allocation2 + $0x20] sm:$0x1 pattern:$0x75316420]  ;;  %v1146_v26 = vcombine.high %v11278_v19, %v11278_v19  ;;  %v12445_v27 = vrot.slane %v11278_v19, %v12306_v24  ;;  %v12448_v28 = vrot.slane %v1170_v16, %v12306_v24 }
  0x3e   : > { %17167 = vst [vmem:[#allocation17_spill] sm:$0xff] %v12441_v22  ;;  %v12452_v29 = vcombine.high %v12433_v17, %v12433_v17  ;;  %17173 = vst [vmem:[#allocation21_spill] sm:$0xff] %v17172_v31  ;;  %v11280_v32 = vld.sshfl [vmem:[#allocation2 + $0x30] sm:$0x33 pattern:$0x75316420]  ;;  %v12462_v33 = vrot.slane %v1218_v21, %v12306_v24  ;;  %v12466_v34 = vcombine.high %v12441_v22, %v12441_v22 }
  0x3f   : > { %17168 = vst [vmem:[#allocation18_spill] sm:$0xff] %v12445_v27  ;;  %17169 = vst [vmem:[#allocation19_spill] sm:$0xff] %v12448_v28  ;;  %v12469_v35 = vrot.slane %v11293_v25, %v12306_v24  ;;  %v11294_v37 = vld.sshfl [vmem:[#allocation2 + $0x38] sm:$0x1 pattern:$0x75316420]  ;;  %v12476_v38 = vrot.slane %v1146_v26, %v12306_v24  ;;  %v12480_v39 = vcombine.high %v12445_v27, %v12445_v27 }
  0x40   : > { %17170 = vst [vmem:[#allocation20_spill] sm:$0xff] %v12452_v29  ;;  %17174 = vst [vmem:[#allocation22_spill] sm:$0xff] %v12462_v33  ;;  %v12484_v40 = vcombine.high %v12448_v28, %v12448_v28  ;;  %v1194_v42 = vcombine.high %v11280_v32, %v11280_v32  ;;  %v11282_v43 = vld.sshfl [vmem:[#allocation2 + $0x48] sm:$0x33 pattern:$0x75316420]  ;;  %v12487_v44 = vrot.slane %v11280_v32, %v12306_v24 }
  0x41   : > { %17175 = vst [vmem:[#allocation23_spill] sm:$0xff] %v12469_v35  ;;  %17176 = vst [vmem:[#allocation24_spill] sm:$0xff] %v12476_v38  ;;  %v12491_v45 = vcombine.high %v12462_v33, %v12462_v33  ;;  %v12494_v46 = vrot.slane %v11294_v37, %v12306_v24  ;;  %v11283_v48 = vld.sshfl [vmem:[#allocation2 + $0x4c] sm:$0x33 pattern:$0x75316420]  ;;  %v12499_v49 = vcombine.high %v12476_v38, %v12476_v38 }
  0x42   : > { %17177 = vst [vmem:[#allocation25_spill] sm:$0xff] %v12480_v39  ;;  %17178 = vst [vmem:[#allocation26_spill] sm:$0xff] %v12484_v40  ;;  %v12502_v50 = vrot.slane %v1194_v42, %v12306_v24  ;;  %v1242_v51 = vcombine.high %v11282_v43, %v11282_v43  ;;  %v12505_v52 = vrot.slane %v11282_v43, %v12306_v24  ;;  %v11295_v53 = vld.sshfl [vmem:[#allocation2 + $0x50] sm:$0x1 pattern:$0x75316420] }
  0x43   : > { %17179 = vst [vmem:[#allocation27_spill] sm:$0xff] %v12487_v44  ;;  %17180 = vst [vmem:[#allocation28_spill] sm:$0xff] %v12499_v49  ;;  %v12509_v54 = vcombine.high %v12487_v44, %v12487_v44  ;;  %v1266_v55 = vcombine.high %v11283_v48, %v11283_v48  ;;  %v12512_v56 = vrot.slane %v11283_v48, %v12306_v24  ;;  %v11284_v58 = vld.sshfl [vmem:[#allocation2 + $0x60] sm:$0x33 pattern:$0x75316420] }
  0x44   : > { %17181 = vst [vmem:[#allocation29_spill] sm:$0xff] %v12502_v50  ;;  %17182 = vst [vmem:[#allocation30_spill] sm:$0xff] %v12505_v52  ;;  %v12520_v59 = vcombine.high %v12502_v50, %v12502_v50  ;;  %v12523_v60 = vrot.slane %v1242_v51, %v12306_v24  ;;  %v12527_v62 = vcombine.high %v12505_v52, %v12505_v52  ;;  %v11285_v1 = vld.sshfl [vmem:[#allocation2 + $0x64] sm:$0x33 pattern:$0x75316420] }
  0x45   : > { %17183 = vst [vmem:[#allocation31_spill] sm:$0xff] %v12512_v56  ;;  %v12530_v0 = vrot.slane %v11295_v53, %v12306_v24  ;;  %v12533_v6 = vrot.slane %v1266_v55, %v12306_v24  ;;  %v12537_v11 = vcombine.high %v12512_v56, %v12512_v56  ;;  %v1290_v12 = vcombine.high %v11284_v58, %v11284_v58  ;;  %v11296_v16 = vld.sshfl [vmem:[#allocation2 + $0x68] sm:$0x1 pattern:$0x75316420] }
  0x46   : > { %17184 = vst [vmem:[#allocation32_spill] sm:$0xff] %v12523_v60  ;;  %17185 = vst [vmem:[#allocation33_spill] sm:$0xff] %v12527_v62  ;;  %v12540_v13 = vrot.slane %v11284_v58, %v12306_v24  ;;  %v12544_v18 = vcombine.high %v12523_v60, %v12523_v60  ;;  %v1314_v19 = vcombine.high %v11285_v1, %v11285_v1  ;;  %v1625_v23 = vshrl.u32 %v12411_v8, 16 }
  0x47   : > { %17186 = vst [vmem:[#allocation34_spill] sm:$0xff] %v12530_v0  ;;  %17187 = vst [vmem:[#allocation35_spill] sm:$0xff] %v12533_v6  ;;  %v12547_v21 = vrot.slane %v11285_v1, %v12306_v24  ;;  %v12552_v25 = vcombine.high %v12533_v6, %v12533_v6  ;;  %v12555_v26 = vrot.slane %v1290_v12, %v12306_v24  ;;  %v1630_v47 = vshll.u32 %v12430_v14, 16 }
  0x48   : > { %17188 = vst [vmem:[#allocation36_spill] sm:$0xff] %v12537_v11  ;;  %17189 = vst [vmem:[#allocation37_spill] sm:$0xff] %v12540_v13  ;;  %v12559_v32 = vcombine.high %v12540_v13, %v12540_v13  ;;  %v12562_v37 = vrot.slane %v11296_v16, %v12306_v24  ;;  %v12565_v42 = vrot.slane %v1314_v19, %v12306_v24  ;;  %v1633_v48 = vshrl.u32 %v12430_v14, 16 }
  0x49   : > { %17190 = vst [vmem:[#allocation38_spill] sm:$0xff] %v12544_v18  ;;  %17191 = vst [vmem:[#allocation39_spill] sm:$0xff] %v12547_v21  ;;  %v12569_v43 = vcombine.high %v12547_v21, %v12547_v21  ;;  %v12575_v51 = vcombine.high %v12555_v26, %v12555_v26  ;;  %v1638_v53 = vshll.u32 %v12396_v63, 16  ;;  %v1641_v55 = vshrl.u32 %v12396_v63, 16 }
  0x4a   : > { %17192 = vst [vmem:[#allocation40_spill] sm:$0xff] %v12552_v25  ;;  %17193 = vst [vmem:[#allocation41_spill] sm:$0xff] %v12555_v26  ;;  %v1646_v58 = vshll.u32 %v12414_v9, 16  ;;  %v12582_v1 = vcombine.high %v12565_v42, %v12565_v42  ;;  %v12586_v12 = vsel %vm12457_vm9, %v1625_v23, %v1630_v47  ;;  %v1649_v16 = vshrl.u32 %v12414_v9, 16 }
  0x4b   : > { %17194 = vst [vmem:[#allocation42_spill] sm:$0xff] %v12559_v32  ;;  %17195 = vst [vmem:[#allocation43_spill] sm:$0xff] %v12562_v37  ;;  %v1654_v19 = vshll.u32 %v12418_v10, 16  ;;  %v12592_v3 = vsel %vm12457_vm9, %v1633_v48, %v1638_v53  ;;  %v1657_v63 = vshrl.u32 %v12418_v10, 16  ;;  %v1662_v14 = vshll.u32 %v12438_v20, 16 }
  0x4c   : > { %17196 = vst [vmem:[#allocation44_spill] sm:$0xff] %v12565_v42  ;;  %17197 = vst [vmem:[#allocation45_spill] sm:$0xff] %v12569_v43  ;;  %v12596_v7 = vsel %vm12457_vm9, %v1641_v55, %v1646_v58  ;;  %v1665_v47 = vshrl.u32 %v12438_v20, 16  ;;  %v1670_v9 = vshll.u32 %v12406_v5, 16  ;;  %v1674_v30 = vshrl.u32 %v12445_v27, 16 }
  0x4d   : > { %17198 = vst [vmem:[#allocation46_spill] sm:$0xff] %v12575_v51  ;;  %17199 = vst [vmem:[#allocation47_spill] sm:$0xff] %v12582_v1  ;;  %v12602_v23 = vsel %vm12457_vm9, %v1649_v16, %v1654_v19  ;;  %v12609_v48 = vsel %vm12457_vm9, %v1657_v63, %v1662_v14  ;;  %v1679_v53 = vshll.u32 %v12476_v38, 16  ;;  %v1682_v55 = vshrl.u32 %v12476_v38, 16 }
  0x4e   : > { %v1687_v58 = vshll.u32 %v12480_v39, 16  ;;  %v12616_v16 = vsel %vm12457_vm9, %v1665_v47, %v1670_v9  ;;  %v1690_v19 = vshrl.u32 %v12480_v39, 16  ;;  %v1695_v5 = vshll.u32 %v12499_v49, 16 }
  0x4f   : > { %v1698_v27 = vshrl.u32 %v12499_v49, 16  ;;  %v12623_v63 = vsel %vm12457_vm9, %v1674_v30, %v1679_v53  ;;  %v1703_v38 = vshll.u32 %v12433_v17, 16  ;;  %v1706_v20 = vshrl.u32 %v12433_v17, 16 }
  0x50   : > { %v12627_v14 = vsel %vm12457_vm9, %v1682_v55, %v1687_v58  ;;  %v12633_v9 = vsel %vm12457_vm9, %v1690_v19, %v1695_v5  ;;  %v1711_v47 = vshll.u32 %v12448_v28, 16  ;;  %v1714_v49 = vshrl.u32 %v12448_v28, 16 }
  0x51   : > { %v1719_v39 = vshll.u32 %v12452_v29, 16  ;;  %v12640_v30 = vsel %vm12457_vm9, %v1698_v27, %v1703_v38  ;;  %v1722_v53 = vshrl.u32 %v12452_v29, 16  ;;  %v1727_v55 = vshll.u32 %v12484_v40, 16 }
  0x52   : > { %v1730_v58 = vshrl.u32 %v12484_v40, 16  ;;  %v12647_v5 = vsel %vm12457_vm9, %v1706_v20, %v1711_v47  ;;  %v1735_v28 = vshll.u32 %v12469_v35, 16  ;;  %v1739_v17 = vshrl.u32 %v12487_v44, 16 }
  0x53   : > { %v12651_v19 = vsel %vm12457_vm9, %v1714_v49, %v1719_v39  ;;  %v12657_v27 = vsel %vm12457_vm9, %v1722_v53, %v1727_v55  ;;  %v1744_v38 = vshll.u32 %v12502_v50, 16  ;;  %v1747_v40 = vshrl.u32 %v12502_v50, 16 }
  0x54   : > { %v1752_v29 = vshll.u32 %v12509_v54, 16  ;;  %v12664_v20 = vsel %vm12457_vm9, %v1730_v58, %v1735_v28  ;;  %v1755_v39 = vshrl.u32 %v12509_v54, 16  ;;  %v1760_v49 = vshll.u32 %v12520_v59, 16 }
  0x55   : > { %v1763_v47 = vshrl.u32 %v12520_v59, 16  ;;  %v12671_v53 = vsel %vm12457_vm9, %v1739_v17, %v1744_v38  ;;  %v1768_v35 = vshll.u32 %v12441_v22, 16  ;;  %v1771_v50 = vshrl.u32 %v12441_v22, 16 }
  0x56   : > { %v12675_v55 = vsel %vm12457_vm9, %v1747_v40, %v1752_v29  ;;  %v12681_v28 = vsel %vm12457_vm9, %v1755_v39, %v1760_v49  ;;  %v1776_v58 = vshll.u32 %v12462_v33, 16  ;;  %v1779_v44 = vshrl.u32 %v12462_v33, 16 }
  0x57   : > { %v1784_v10 = vshll.u32 %v12466_v34, 16  ;;  %v12688_v17 = vsel %vm12457_vm9, %v1763_v47, %v1768_v35  ;;  %v1787_v29 = vshrl.u32 %v12466_v34, 16  ;;  %v1792_v40 = vshll.u32 %v12491_v45, 16 }
  0x58   : > { %v1795_v38 = vshrl.u32 %v12491_v45, 16  ;;  %v12695_v39 = vsel %vm12457_vm9, %v1771_v50, %v1776_v58  ;;  %v1800_v33 = vshll.u32 %v12494_v46, 16  ;;  %v1804_v22 = vshrl.u32 %v12505_v52, 16 }
  0x59   : > { %v12699_v49 = vsel %vm12457_vm9, %v1779_v44, %v1784_v10  ;;  %v12705_v35 = vsel %vm12457_vm9, %v1787_v29, %v1792_v40  ;;  %v1809_v47 = vshll.u32 %v12523_v60, 16  ;;  %v1812_v4 = vshrl.u32 %v12523_v60, 16 }
  0x5a   : > { %v1817_v15 = vshll.u32 %v12527_v62, 16  ;;  %v12712_v50 = vsel %vm12457_vm9, %v1795_v38, %v1800_v33  ;;  %v1820_v10 = vshrl.u32 %v12527_v62, 16  ;;  %v1825_v44 = vshll.u32 %v12544_v18, 16 }
  0x5b   : > { %v1828_v58 = vshrl.u32 %v12544_v18, 16  ;;  %v12719_v29 = vsel %vm12457_vm9, %v1804_v22, %v1809_v47  ;;  %v1833_v60 = vshll.u32 %v12512_v56, 16  ;;  %v1836_v52 = vshrl.u32 %v12512_v56, 16 }
  0x5c   : > { %v12723_v40 = vsel %vm12457_vm9, %v1812_v4, %v1817_v15  ;;  %v12729_v33 = vsel %vm12457_vm9, %v1820_v10, %v1825_v44  ;;  %v1841_v38 = vshll.u32 %v12533_v6, 16  ;;  %v1844_v18 = vshrl.u32 %v12533_v6, 16 }
  0x5d   : > { %v1849_v62 = vshll.u32 %v12537_v11, 16  ;;  %v12736_v22 = vsel %vm12457_vm9, %v1828_v58, %v1833_v60  ;;  %v1852_v4 = vshrl.u32 %v12537_v11, 16  ;;  %v1857_v15 = vshll.u32 %v12552_v25, 16 }
  0x5e   : > { %v1860_v47 = vshrl.u32 %v12552_v25, 16  ;;  %v12743_v10 = vsel %vm12457_vm9, %v1836_v52, %v1841_v38  ;;  %v1865_v6 = vshll.u32 %v12530_v0, 16  ;;  %v1869_v56 = vshrl.u32 %v12540_v13, 16 }
  0x5f   : > { %v12747_v44 = vsel %vm12457_vm9, %v1844_v18, %v1849_v62  ;;  %v12753_v60 = vsel %vm12457_vm9, %v1852_v4, %v1857_v15  ;;  %v1874_v58 = vshll.u32 %v12555_v26, 16  ;;  %v1877_v25 = vshrl.u32 %v12555_v26, 16 }
  0x60   : > { %v1882_v11 = vshll.u32 %v12559_v32, 16  ;;  %v12760_v52 = vsel %vm12457_vm9, %v1860_v47, %v1865_v6  ;;  %v1885_v62 = vshrl.u32 %v12559_v32, 16  ;;  %v1890_v18 = vshll.u32 %v12575_v51, 16 }
  0x61   : > { %v1893_v38 = vshrl.u32 %v12575_v51, 16  ;;  %v12767_v4 = vsel %vm12457_vm9, %v1869_v56, %v1874_v58  ;;  %v1898_v26 = vshll.u32 %v12547_v21, 16  ;;  %v1901_v13 = vshrl.u32 %v12547_v21, 16 }
  0x62   : > { %v12771_v15 = vsel %vm12457_vm9, %v1877_v25, %v1882_v11  ;;  %v12777_v6 = vsel %vm12457_vm9, %v1885_v62, %v1890_v18  ;;  %v1906_v47 = vshll.u32 %v12565_v42, 16  ;;  %v1909_v51 = vshrl.u32 %v12565_v42, 16 }
  0x63   : > { %v1914_v32 = vshll.u32 %v12569_v43, 16  ;;  %v12784_v56 = vsel %vm12457_vm9, %v1893_v38, %v1898_v26  ;;  %v1917_v11 = vshrl.u32 %v12569_v43, 16  ;;  %v1922_v25 = vshll.u32 %v12582_v1, 16 }
  0x64   : > { %v1925_v58 = vshrl.u32 %v12582_v1, 16  ;;  %v12791_v62 = vsel %vm12457_vm9, %v1901_v13, %v1906_v47  ;;  %v1930_v42 = vshll.u32 %v12562_v37, 16  ;;  %v2134_v26 = vrot.slane %v12473_v36, %v12306_v24 }
  0x65   : > { %v12795_v18 = vsel %vm12457_vm9, %v1909_v51, %v1914_v32  ;;  %v12802_v38 = vsel %vm12457_vm9, %v1917_v11, %v1922_v25  ;;  %v2148_v1 = vrot.slane %v12516_v57, %v12306_v24  ;;  %v2162_v13 = vrot.slane %v12586_v12, %v12306_v24 }
  0x66   : > { %v2176_v47 = vrot.slane %v12592_v3, %v12306_v24  ;;  %v12812_v32 = vsel %vm12457_vm9, %v1925_v58, %v1930_v42  ;;  %v12815_v51 = vrot.slane %v2134_v26, %v12306_v24  ;;  %v2190_v36 = vrot.slane %v12596_v7, %v12306_v24 }
  0x67   : > { %v2204_v11 = vrot.slane %v12602_v23, %v12306_v24  ;;  %v12822_v57 = vrot.slane %v2148_v1, %v12306_v24  ;;  %v12825_v12 = vrot.slane %v2162_v13, %v12306_v24  ;;  %v2218_v42 = vrot.slane %v12609_v48, %v12306_v24 }
  0x68   : > { %v12828_v3 = vrot.slane %v2176_v47, %v12306_v24  ;;  %v12833_v25 = vrot.slane %v2190_v36, %v12306_v24  ;;  %v2232_v23 = vrot.slane %v12616_v16, %v12306_v24  ;;  %v2246_v1 = vrot.slane %v12623_v63, %v12306_v24 }
  0x69   : > { %v12836_v7 = vrot.slane %v2204_v11, %v12306_v24  ;;  %v12843_v58 = vrot.slane %v2218_v42, %v12306_v24  ;;  %v2260_v26 = vrot.slane %v12627_v14, %v12306_v24  ;;  %v2274_v48 = vrot.slane %v12633_v9, %v12306_v24 }
  0x6a   : > { %v2288_v13 = vrot.slane %v12640_v30, %v12306_v24  ;;  %v12852_v47 = vrot.slane %v2232_v23, %v12306_v24  ;;  %v12855_v16 = vrot.slane %v2246_v1, %v12306_v24  ;;  %v2302_v63 = vrot.slane %v12647_v5, %v12306_v24 }
  0x6b   : > { %v2316_v36 = vrot.slane %v12651_v19, %v12306_v24  ;;  %v12862_v14 = vrot.slane %v2260_v26, %v12306_v24  ;;  %v12865_v9 = vrot.slane %v2274_v48, %v12306_v24  ;;  %v2330_v11 = vrot.slane %v12657_v27, %v12306_v24 }
  0x6c   : > { %v12868_v30 = vrot.slane %v2288_v13, %v12306_v24  ;;  %v12873_v42 = vrot.slane %v2302_v63, %v12306_v24  ;;  %v2344_v19 = vrot.slane %v12664_v20, %v12306_v24  ;;  %v2358_v23 = vrot.slane %v12671_v53, %v12306_v24 }
  0x6d   : > { %v12876_v5 = vrot.slane %v2316_v36, %v12306_v24  ;;  %v12883_v1 = vrot.slane %v2330_v11, %v12306_v24  ;;  %v2372_v26 = vrot.slane %v12675_v55, %v12306_v24  ;;  %v2386_v27 = vrot.slane %v12681_v28, %v12306_v24 }
  0x6e   : > { %v2400_v48 = vrot.slane %v12688_v17, %v12306_v24  ;;  %v12892_v13 = vrot.slane %v2344_v19, %v12306_v24  ;;  %v12895_v20 = vrot.slane %v2358_v23, %v12306_v24  ;;  %v2414_v53 = vrot.slane %v12695_v39, %v12306_v24 }
  0x6f   : > { %v2428_v63 = vrot.slane %v12699_v49, %v12306_v24  ;;  %v12902_v55 = vrot.slane %v2372_v26, %v12306_v24  ;;  %v12905_v28 = vrot.slane %v2386_v27, %v12306_v24  ;;  %v2442_v36 = vrot.slane %v12705_v35, %v12306_v24 }
  0x70   : > { %v12908_v17 = vrot.slane %v2400_v48, %v12306_v24  ;;  %v12913_v11 = vrot.slane %v2414_v53, %v12306_v24  ;;  %v2456_v49 = vrot.slane %v12712_v50, %v12306_v24  ;;  %v2470_v19 = vrot.slane %v12719_v29, %v12306_v24 }
  0x71   : > { %v12916_v39 = vrot.slane %v2428_v63, %v12306_v24  ;;  %v12923_v23 = vrot.slane %v2442_v36, %v12306_v24  ;;  %v2484_v26 = vrot.slane %v12723_v40, %v12306_v24  ;;  %v2498_v35 = vrot.slane %v12729_v33, %v12306_v24 }
  0x72   : > { %v2512_v27 = vrot.slane %v12736_v22, %v12306_v24  ;;  %v12932_v48 = vrot.slane %v2456_v49, %v12306_v24  ;;  %v12935_v50 = vrot.slane %v2470_v19, %v12306_v24  ;;  %v2526_v29 = vrot.slane %v12743_v10, %v12306_v24 }
  0x73   : > { %v2540_v53 = vrot.slane %v12747_v44, %v12306_v24  ;;  %v12942_v40 = vrot.slane %v2484_v26, %v12306_v24  ;;  %v12945_v33 = vrot.slane %v2498_v35, %v12306_v24  ;;  %v2554_v63 = vrot.slane %v12753_v60, %v12306_v24 }
  0x74   : > { %v12948_v22 = vrot.slane %v2512_v27, %v12306_v24  ;;  %v12953_v36 = vrot.slane %v2526_v29, %v12306_v24  ;;  %v2568_v44 = vrot.slane %v12760_v52, %v12306_v24  ;;  %v2582_v49 = vrot.slane %v12767_v4, %v12306_v24 }
  0x75   : > { %v12956_v10 = vrot.slane %v2540_v53, %v12306_v24  ;;  %v12963_v19 = vrot.slane %v2554_v63, %v12306_v24  ;;  %v2596_v26 = vrot.slane %v12771_v15, %v12306_v24  ;;  %v2610_v60 = vrot.slane %v12777_v6, %v12306_v24 }
  0x76   : > { %v2624_v35 = vrot.slane %v12784_v56, %v12306_v24  ;;  %v12972_v27 = vrot.slane %v2568_v44, %v12306_v24  ;;  %v12975_v52 = vrot.slane %v2582_v49, %v12306_v24  ;;  %v2638_v4 = vrot.slane %v12791_v62, %v12306_v24 }
  0x77   : > { %v2652_v29 = vrot.slane %v12795_v18, %v12306_v24  ;;  %v12982_v15 = vrot.slane %v2596_v26, %v12306_v24  ;;  %v12985_v6 = vrot.slane %v2610_v60, %v12306_v24  ;;  %v2666_v53 = vrot.slane %v12802_v38, %v12306_v24 }
  0x78   : > { %v12988_v56 = vrot.slane %v2624_v35, %v12306_v24  ;;  %v12993_v63 = vrot.slane %v2638_v4, %v12306_v24  ;;  %v2680_v18 = vrot.slane %v12812_v32, %v12306_v24  ;;  %v3024_v44 = vunpack.c.l.b16 %v12815_v51 }
  0x79   : > { %v12996_v62 = vrot.slane %v2652_v29, %v12306_v24  ;;  %v13002_v49 = vrot.slane %v2666_v53, %v12306_v24  ;;  %v3025_v26 = vunpack.c.l.b16 %v12822_v57  ;;  %v3026_v60 = vunpack.c.l.b16 %v12825_v12 }
  0x7a   : > { %v3027_v38 = vunpack.c.l.b16 %v12828_v3  ;;  %v13008_v35 = vrot.slane %v2680_v18, %v12306_v24  ;;  %v3028_v4 = vunpack.c.l.b16 %v12833_v25  ;;  %v3029_v29 = vunpack.c.l.b16 %v12836_v7 }
  0x7b   : > { %v3030_v32 = vunpack.c.l.b16 %v12843_v58  ;;  %v3031_v51 = vunpack.c.l.b16 %v12852_v47  ;;  %v3032_v53 = vunpack.c.l.b16 %v12855_v16  ;;  %v3033_v57 = vunpack.c.l.b16 %v12862_v14 }
  0x7c   : > { %v3034_v12 = vunpack.c.l.b16 %v12865_v9  ;;  %v3035_v3 = vunpack.c.l.b16 %v12868_v30  ;;  %v3036_v18 = vunpack.c.l.b16 %v12873_v42  ;;  %v3037_v25 = vunpack.c.l.b16 %v12876_v5 }
  0x7d   : > { %v3038_v7 = vunpack.c.l.b16 %v12883_v1  ;;  %v3039_v58 = vunpack.c.l.b16 %v12892_v13  ;;  %v3040_v47 = vunpack.c.l.b16 %v12895_v20  ;;  %v3041_v16 = vunpack.c.l.b16 %v12902_v55 }
  0x7e   : > { %v3042_v14 = vunpack.c.l.b16 %v12905_v28  ;;  %v3043_v9 = vunpack.c.l.b16 %v12908_v17  ;;  %v3044_v30 = vunpack.c.l.b16 %v12913_v11  ;;  %v3045_v42 = vunpack.c.l.b16 %v12916_v39 }
  0x7f   : > { %v3046_v5 = vunpack.c.l.b16 %v12923_v23  ;;  %vm3101_vm5 = vcmask 1045509   ;;  %v3047_v1 = vunpack.c.l.b16 %v12932_v48  ;;  %v3049_v20 = vunpack.c.l.b16 %v12942_v40 }
  0x80   : > { %v3050_v55 = vunpack.c.l.b16 %v12945_v33  ;;  %v3051_v28 = vunpack.c.l.b16 %v12948_v22  ;;  %v3052_v37 = vunpack.c.l.b16 %v12953_v36  ;;  %v3053_v17 = vunpack.c.l.b16 %v12956_v10 }
  0x81   : > { %v3054_v11 = vunpack.c.l.b16 %v12963_v19  ;;  %v3055_v39 = vunpack.c.l.b16 %v12972_v27  ;;  %v3057_v48 = vunpack.c.l.b16 %v12982_v15  ;;  %v3058_v13 = vunpack.c.l.b16 %v12985_v6 }
  0x82   : > { %v3059_v40 = vunpack.c.l.b16 %v12988_v56  ;;  %v3060_v33 = vunpack.c.l.b16 %v12993_v63  ;;  %v3061_v22 = vunpack.c.l.b16 %v12996_v62  ;;  %v3063_v10 = vunpack.c.l.b16 %v13008_v35 }
  0x83   : > { %v3088_v43 = vrot.slane %v3025_v26, 7  ;;  %v3091_v19 = vrot.slane %v3026_v60, 6  ;;  %v3094_v21 = vrot.slane %v3027_v38, 5  ;;  %v3097_v27 = vrot.slane %v3028_v4, 4 }
  0x84   : > { %v3100_v31 = vrot.slane %v3029_v29, 3  ;;  %v3103_v23 = vrot.slane %v3030_v32, 2  ;;  %vm3104_vm2 = vcmask 1046534   ;;  %v3106_v6 = vrot.slane %v3031_v51, 1 }
  0x85   : > { %v3090_v15 = vsel %vm3089_vm10, %v3088_v43, %v3024_v44  ;;  %vm3107_vm6 = vcmask 1047559   ;;  %v3109_v56 = vrot.slane %v3033_v57, 7  ;;  %v3111_v8 = vrot.slane %v3034_v12, 6 }
  0x86   : > { %v3093_v63 = vsel %vm3092_vm11, %v3091_v19, %v3090_v15  ;;  %v3113_v62 = vrot.slane %v3035_v3, 5  ;;  %v3115_v2 = vrot.slane %v3036_v18, 4  ;;  %v3117_v60 = vrot.slane %v3037_v25, 3 }
  0x87   : > { %v3096_v36 = vsel %vm3095_vm13, %v3094_v21, %v3093_v63  ;;  %v3110_v26 = vsel %vm3089_vm10, %v3109_v56, %v3032_v53  ;;  %v3119_v38 = vrot.slane %v3038_v7, 2  ;;  %v3121_v32 = vrot.slane %v3039_v58, 1 }
  0x88   : > { %v3099_v4 = vsel %vm3098_vm15, %v3097_v27, %v3096_v36  ;;  %v3112_v29 = vsel %vm3092_vm11, %v3111_v8, %v3110_v26  ;;  %v3123_v43 = vrot.slane %v3041_v16, 7  ;;  %v3125_v57 = vrot.slane %v3042_v14, 6 }
  0x89   : > { %v3102_v44 = vsel %vm3101_vm5, %v3100_v31, %v3099_v4  ;;  %v3114_v51 = vsel %vm3095_vm13, %v3113_v62, %v3112_v29  ;;  %v3127_v12 = vrot.slane %v3043_v9, 5  ;;  %v3129_v18 = vrot.slane %v3044_v30, 4 }
  0x8a   : > { %v3105_v3 = vsel %vm3104_vm2, %v3103_v23, %v3102_v44  ;;  %v3116_v21 = vsel %vm3098_vm15, %v3115_v2, %v3114_v51  ;;  %v3124_v53 = vsel %vm3089_vm10, %v3123_v43, %v3040_v47  ;;  %v3131_v58 = vrot.slane %v3045_v42, 3  ;;  %v299_v44 = vld [vmem:[%s12292_s10 + $0x98] sm:$0xff]  ;;  %v302_v51 = vld [vmem:[%s12292_s10 + $0xb0] sm:$0xff] }
  0x8b   : > { %v3108_v25 = vsel %vm3107_vm6, %v3106_v6, %v3105_v3  ;;  %v3118_v7 = vsel %vm3101_vm5, %v3117_v60, %v3116_v21  ;;  %v3126_v8 = vsel %vm3092_vm11, %v3125_v57, %v3124_v53  ;;  %v3133_v14 = vrot.slane %v3046_v5, 2  ;;  %v303_v53 = vld [vmem:[%s12292_s10 + $0xb8] sm:$0xff] }
  0x8c   : > { %v3120_v31 = vsel %vm3104_vm2, %v3119_v38, %v3118_v7  ;;  %v3128_v16 = vsel %vm3095_vm13, %v3127_v12, %v3126_v8  ;;  %v3135_v9 = vrot.slane %v3047_v1, 1  ;;  %v3137_v47 = vrot.slane %v3049_v20, 7 }
  0x8d   : > { %v13063_v23 = vsel %vm3107_vm6, %v3121_v32, %v3120_v31  ;;  %v3130_v2 = vsel %vm3098_vm15, %v3129_v18, %v3128_v16  ;;  %v3139_v30 = vrot.slane %v3050_v55, 6  ;;  %v3141_v19 = vrot.slane %v3051_v28, 5  ;;  %v306_v18 = vld [vmem:[%s12292_s10 + $0xd0] sm:$0xff]  ;;  %v307_v16 = vld [vmem:[%s12292_s10 + $0xd8] sm:$0xff] }
  0x8e   : > { %17200 = vst [vmem:[#allocation48_spill] sm:$0xff] %v13063_v23  ;;  %v3132_v36 = vsel %vm3101_vm5, %v3131_v58, %v3130_v2  ;;  %v3143_v27 = vrot.slane %v3052_v37, 4  ;;  %v3145_v15 = vrot.slane %v3053_v17, 3  ;;  %v17201_v6 = vunpack.c.l.b16 %v12935_v50  ;;  %v12092_v58 = vld [vmem:[%s16861_s1] ss:$0 sm:$0xff] }
  0x8f   : > { %v3134_v42 = vsel %vm3104_vm2, %v3133_v14, %v3132_v36  ;;  %v3147_v5 = vrot.slane %v3054_v11, 2  ;;  %v3149_v1 = vrot.slane %v3055_v39, 1  ;;  %v3151_v20 = vrot.slane %v3057_v48, 7 }
  0x90   : > { %v3138_v56 = vsel %vm3089_vm10, %v3137_v47, %v17201_v6  ;;  %v13072_v63 = vsel %vm3107_vm6, %v3135_v9, %v3134_v42  ;;  %v3153_v55 = vrot.slane %v3058_v13, 6  ;;  %v3155_v37 = vrot.slane %v3059_v40, 5 }
  0x91   : > { %17202 = vst [vmem:[#allocation49_spill] sm:$0xff] %v13072_v63  ;;  %v3140_v62 = vsel %vm3092_vm11, %v3139_v30, %v3138_v56  ;;  %v3157_v28 = vrot.slane %v3060_v33, 4  ;;  %v3159_v17 = vrot.slane %v3061_v22, 3  ;;  %v17203_v50 = vunpack.c.l.b16 %v12975_v52  ;;  %v12093_v30 = vld [vmem:[%s16862_s2] ss:$0 sm:$0xff] }
  0x92   : > { %v3142_v26 = vsel %vm3095_vm13, %v3141_v19, %v3140_v62  ;;  %v17204_v39 = vunpack.c.l.b16 %v13002_v49  ;;  %v3163_v48 = vrot.slane %v3063_v10, 1  ;;  %v3207_v33 = vpack.c.b16 %v13063_v23, %v3108_v25  ;;  %v298_v10 = vld [vmem:[%s12292_s10 + $0x90] sm:$0xff] }
  0x93   : > { %v3144_v60 = vsel %vm3098_vm15, %v3143_v27, %v3142_v26  ;;  %v3152_v11 = vsel %vm3089_vm10, %v3151_v20, %v17203_v50  ;;  %vm3211_vm8 = vcmask 31744   ;;  %v4483_v3 = vrot.slane %v12494_v46, %v12306_v24  ;;  %v13126_v46 = vld [vmem:[%s16863_s3 + $0x4] sm:$0x3]  ;;  %v17208_v20 = vld [vmem:[#allocation9_spill] sm:$0xff] }
  0x94   : > { %v3161_v38 = vrot.slane %v17204_v39, 2  ;;  %v3146_v13 = vsel %vm3101_vm5, %v3145_v15, %v3144_v60  ;;  %v3154_v40 = vsel %vm3092_vm11, %v3153_v55, %v3152_v11  ;;  %11726 = vmatprep.mubr.msk.bf16.mxu0 %vm3211_vm8, %v3207_v33  ;;  %v4382_v8 = vsel %vm3224_vm0, %v12311_v41, 0 }
  0x95   : > { %v3148_v22 = vsel %vm3104_vm2, %v3147_v5, %v3146_v13  ;;  %v3156_v52 = vsel %vm3095_vm13, %v3155_v37, %v3154_v40  ;;  %v337_v31 = vmul.f32 %v12092_v58, %v298_v10  ;;  %v13132_v9 = vrot.slane %v4483_v3, %v12306_v24  ;;  %v17209_v13 = vld [vmem:[#allocation11_spill] sm:$0xff] }
  0x96   : > { %v13095_v4 = vsel %vm3107_vm6, %v3149_v1, %v3148_v22  ;;  %v3158_v29 = vsel %vm3098_vm15, %v3157_v28, %v3156_v52  ;;  %v338_v41 = vmul.f32 %v12092_v58, %v299_v44  ;;  %v341_v2 = vmul.f32 %v12092_v58, %v302_v51 }
  0x97   : > { %17205 = vst [vmem:[#allocation50_spill] sm:$0xff] %v13095_v4  ;;  %v3160_v57 = vsel %vm3101_vm5, %v3159_v17, %v3158_v29  ;;  %v3208_v12 = vpack.c.b16 %v13095_v4, %v13072_v63  ;;  %17207 = vst [vmem:[#allocation52_spill] sm:$0xff] %v13132_v9  ;;  %v376_v36 = vadd.f32 %v12093_v30, %v337_v31 }
  0x98   : > { %v3162_v25 = vsel %vm3104_vm2, %v3161_v38, %v3160_v57  ;;  %v342_v19 = vmul.f32 %v12092_v58, %v303_v53  ;;  %v345_v27 = vmul.f32 %v12092_v58, %v306_v18  ;;  %v377_v15 = vadd.f32 %v12093_v30, %v338_v41 }
  0x99   : > { %v13129_v14 = vsel %vm3107_vm6, %v3163_v48, %v3162_v25  ;;  %11727 = vmatmul.mubr.msk.bf16.vlgmr.msra.gmra.mrb[0].mxu0 %vm3211_vm8, %v3208_v12  ;;  %v346_v42 = vmul.f32 %v12092_v58, %v307_v16  ;;  %v380_v6 = vadd.f32 %v12093_v30, %v341_v2  ;;  %v3299_v56 = vrot.slane %v12393_v61, %v12306_v24 }
  0x9a   : > { %17206 = vst [vmem:[#allocation51_spill] sm:$0xff] %v13129_v14  ;;  %11735 = vmatpush3.bf16.msra.mxu0 %v4382_v8  ;;  %v408_v5 = vmax.f32 %v376_v36, 0.0  ;;  %v381_v1 = vadd.f32 %v12093_v30, %v342_v19  ;;  %v384_v62 = vadd.f32 %v12093_v30, %v345_v27  ;;  %v3313_v55 = vrot.slane %v17208_v20, %v12306_v24  ;;  %v966_v8 = vld [vmem:[#allocation2 + $0x78] sm:$0xf] }
  0x9b   : > { %12054 = vmatprep.subr.msk.bf16.mxu0 %vm3224_vm0, %v13126_v46  ;;  %v409_v26 = vmax.f32 %v377_v15, 0.0  ;;  %v385_v37 = vadd.f32 %v12093_v30, %v346_v42  ;;  %v412_v28 = vmax.f32 %v380_v6, 0.0  ;;  %v13147_v17 = vrot.slane %v3299_v56, %v12306_v24  ;;  %v970_v30 = vld [vmem:[#allocation2 + $0x80] sm:$0x1]  ;;  %v980_v56 = vld [vmem:[#allocation2 + $0x90] sm:$0xf] }
  0x9c   : > { %v11607_v60 = vpack.c.bf16 %v408_v5, %v408_v5  ;;  %v413_v50 = vmax.f32 %v381_v1, 0.0  ;;  %v416_v11 = vmax.f32 %v384_v62, 0.0  ;;  %v13150_v61 = vrot.slane %v3313_v55, %v12306_v24 }
  0x9d   : > { %v11608_v39 = vpack.c.bf16 %v409_v26, %v409_v26  ;;  %v417_v38 = vmax.f32 %v385_v37, 0.0  ;;  %v11611_v48 = vpack.c.bf16 %v412_v28, %v412_v28  ;;  %v3327_v40 = vrot.slane %v17209_v13, %v12306_v24  ;;  %v984_v26 = vld [vmem:[#allocation2 + $0x98] sm:$0x1] }
  0x9e   : > { %v731_v33 = vshrl.u32 %v11607_v60, 16  ;;  %v734_v22 = vshll.u32 %v11607_v60, 16  ;;  %v11612_v52 = vpack.c.bf16 %v413_v50, %v413_v50  ;;  %v11615_v10 = vpack.c.bf16 %v416_v11, %v416_v11 }
  0x9f   : > { %v739_v29 = vshrl.u32 %v11608_v39, 16  ;;  %v742_v44 = vshll.u32 %v11608_v39, 16  ;;  %v11616_v51 = vpack.c.bf16 %v417_v38, %v417_v38  ;;  %v765_v57 = vshrl.u32 %v11611_v48, 16  ;;  %v994_v38 = vld [vmem:[#allocation2 + $0xa8] sm:$0xf] }
  0xa0   : > { %v733_v12 = vrot.slane %v731_v33, 7  ;;  %v768_v3 = vshll.u32 %v11611_v48, 16  ;;  %v773_v53 = vshrl.u32 %v11612_v52, 16  ;;  %v776_v18 = vshll.u32 %v11612_v52, 16  ;;  %v998_v52 = vld [vmem:[#allocation2 + $0xb0] sm:$0x1] }
  0xa1   : > { %v741_v25 = vrot.slane %v739_v29, 7  ;;  %v767_v58 = vrot.slane %v765_v57, 7  ;;  %v799_v31 = vshrl.u32 %v11615_v10, 16  ;;  %v802_v16 = vshll.u32 %v11615_v10, 16 }
  0xa2   : > { %v736_v41 = vor.u32 %v734_v22, %v733_v12  ;;  %v737_v2 = vrot.slane %v733_v12, 4  ;;  %v775_v36 = vrot.slane %v773_v53, 7  ;;  %v807_v19 = vshrl.u32 %v11616_v51, 16  ;;  %v17213_v12 = vld [vmem:[#allocation14_spill] sm:$0xff]  ;;  %v17214_v53 = vld [vmem:[#allocation8_spill] sm:$0xff] }
  0xa3   : > { %v744_v27 = vor.u32 %v742_v44, %v741_v25  ;;  %v746_v15 = vrot.slane %v741_v25, 4  ;;  %v770_v42 = vor.u32 %v768_v3, %v767_v58  ;;  %v771_v6 = vrot.slane %v767_v58, 4  ;;  %v17215_v25 = vld [vmem:[#allocation12_spill] sm:$0xff] }
  0xa4   : > { %v967_v1 = vsel %vm12334_vm14, %v736_v41, %v966_v8  ;;  %v778_v62 = vor.u32 %v776_v18, %v775_v36  ;;  %v780_v20 = vrot.slane %v775_v36, 4  ;;  %v801_v55 = vrot.slane %v799_v31, 7  ;;  %v17216_v31 = vld [vmem:[#allocation13_spill] sm:$0xff]  ;;  %v17217_v41 = vld [vmem:[#allocation16_spill] sm:$0xff] }
  0xa5   : > { %v745_v28 = vsel %vm12328_vm12, %v737_v2, %v744_v27  ;;  %968 = vst [vmem:[#allocation2 + $0x78] sm:$0xf] %v967_v1  ;;  %v971_v50 = vsel %vm12350_vm4, %v746_v15, %v970_v30  ;;  %v809_v11 = vrot.slane %v807_v19, 7  ;;  %v810_v39 = vshll.u32 %v11616_v51, 16  ;;  %v17218_v27 = vld [vmem:[#allocation18_spill] sm:$0xff] }
  0xa6   : > { %969 = vst.msk [vmem:[#allocation2 + $0x7c] sm:$0xf] %vm422_vm1, %v745_v28  ;;  %972 = vst [vmem:[#allocation2 + $0x80] sm:$0x1] %v971_v50  ;;  %v779_v48 = vsel %vm12328_vm12, %v771_v6, %v778_v62  ;;  %v804_v13 = vor.u32 %v802_v16, %v801_v55  ;;  %v805_v33 = vrot.slane %v801_v55, 4  ;;  %v981_v22 = vsel %vm12334_vm14, %v770_v42, %v980_v56  ;;  %v17219_v56 = vld [vmem:[#allocation24_spill] sm:$0xff] }
  0xa7   : > { %v812_v10 = vor.u32 %v810_v39, %v809_v11  ;;  %v814_v29 = vrot.slane %v809_v11, 4  ;;  %982 = vst [vmem:[#allocation2 + $0x90] sm:$0xf] %v981_v22  ;;  %983 = vst.msk [vmem:[#allocation2 + $0x94] sm:$0xf] %vm422_vm1, %v779_v48  ;;  %v985_v44 = vsel %vm12350_vm4, %v780_v20, %v984_v26  ;;  %v13169_v51 = vrot.slane %v3327_v40, %v12306_v24  ;;  %v17220_v62 = vld [vmem:[#allocation25_spill] sm:$0xff] }
  0xa8   : > { %986 = vst [vmem:[#allocation2 + $0x98] sm:$0x1] %v985_v44  ;;  %v995_v57 = vsel %vm12334_vm14, %v804_v13, %v994_v38  ;;  %v3341_v3 = vrot.slane %v17213_v12, %v12306_v24  ;;  %v3355_v18 = vrot.slane %v17214_v53, %v12306_v24  ;;  %v3369_v8 = vrot.slane %v17215_v25, %v12306_v24  ;;  %v17221_v28 = vld [vmem:[#allocation28_spill] sm:$0xff]  ;;  %v17222_v11 = vld [vmem:[#allocation15_spill] sm:$0xff] }
  0xa9   : > { %v813_v58 = vsel %vm12328_vm12, %v805_v33, %v812_v10  ;;  %996 = vst [vmem:[#allocation2 + $0xa8] sm:$0xf] %v995_v57  ;;  %v999_v40 = vsel %vm12350_vm4, %v814_v29, %v998_v52  ;;  %v3383_v16 = vrot.slane %v17216_v31, %v12306_v24  ;;  %v3397_v2 = vrot.slane %v17217_v41, %v12306_v24  ;;  %v17223_v38 = vld [vmem:[#allocation19_spill] sm:$0xff] }
  0xaa   : > { %997 = vst.msk [vmem:[#allocation2 + $0xac] sm:$0xf] %vm422_vm1, %v813_v58  ;;  %1000 = vst [vmem:[#allocation2 + $0xb0] sm:$0x1] %v999_v40  ;;  %v13189_v30 = vrot.slane %v3341_v3, %v12306_v24  ;;  %v13192_v36 = vrot.slane %v3355_v18, %v12306_v24  ;;  %v13195_v19 = vrot.slane %v3369_v8, %v12306_v24 }
  0xab   : > { %v3411_v15 = vrot.slane %v17218_v27, %v12306_v24  ;;  %v13200_v42 = vrot.slane %v3383_v16, %v12306_v24  ;;  %v13203_v6 = vrot.slane %v3397_v2, %v12306_v24  ;;  %v3425_v1 = vrot.slane %v17219_v56, %v12306_v24 }
  0xac   : > { %v3439_v20 = vrot.slane %v17220_v62, %v12306_v24  ;;  %v11286_v55 = vld.sshfl [vmem:[#allocation2 + $0x78] sm:$0x33 pattern:$0x75316420]  ;;  %v3453_v50 = vrot.slane %v17221_v28, %v12306_v24  ;;  %v3467_v39 = vrot.slane %v17222_v11, %v12306_v24 }
  0xad   : > { %v13210_v26 = vrot.slane %v3411_v15, %v12306_v24  ;;  %v11287_v13 = vld.sshfl [vmem:[#allocation2 + $0x7c] sm:$0x33 pattern:$0x75316420]  ;;  %v1338_v33 = vcombine.high %v11286_v55, %v11286_v55  ;;  %v13219_v22 = vrot.slane %v11286_v55, %v12306_v24  ;;  %v13222_v52 = vrot.slane %v3425_v1, %v12306_v24 }
  0xae   : > { %v13225_v10 = vrot.slane %v3439_v20, %v12306_v24  ;;  %v11297_v29 = vld.sshfl [vmem:[#allocation2 + $0x80] sm:$0x1 pattern:$0x75316420]  ;;  %v1362_v44 = vcombine.high %v11287_v13, %v11287_v13  ;;  %v13228_v57 = vrot.slane %v11287_v13, %v12306_v24  ;;  %v13231_v12 = vrot.slane %v3453_v50, %v12306_v24 }
  0xaf   : > { %v13234_v3 = vrot.slane %v3467_v39, %v12306_v24  ;;  %v13237_v53 = vrot.slane %v1338_v33, %v12306_v24  ;;  %v13241_v18 = vcombine.high %v13219_v22, %v13219_v22  ;;  %v13244_v25 = vrot.slane %v11297_v29, %v12306_v24  ;;  %v11289_v32 = vld.sshfl [vmem:[#allocation2 + $0x94] sm:$0x33 pattern:$0x75316420] }
  0xb0   : > { %v1934_v8 = vshrl.u32 %v13219_v22, 16  ;;  %v13248_v58 = vrot.slane %v1362_v44, %v12306_v24  ;;  %v13252_v40 = vcombine.high %v13228_v57, %v13228_v57  ;;  %v1963_v31 = vshll.u32 %v13228_v57, 16  ;;  %v11290_v49 = vld.sshfl [vmem:[#allocation2 + $0xa8] sm:$0x33 pattern:$0x75316420] }
  0xb1   : > { %17224 = vst [vmem:[#allocation9_spill] sm:$0xff] %v13244_v25  ;;  %v1966_v16 = vshrl.u32 %v13228_v57, 16  ;;  %v13258_v41 = vcombine.high %v13237_v53, %v13237_v53  ;;  %v1939_v2 = vshll.u32 %v13237_v53, 16  ;;  %v1942_v27 = vshrl.u32 %v13237_v53, 16 }
  0xb2   : > { %v1947_v15 = vshll.u32 %v13241_v18, 16  ;;  %v13265_v56 = vcombine.high %v13248_v58, %v13248_v58  ;;  %v1950_v1 = vshrl.u32 %v13241_v18, 16  ;;  %v1971_v62 = vshll.u32 %v13248_v58, 16 }
  0xb3   : > { %v1974_v20 = vshrl.u32 %v13248_v58, 16  ;;  %v1941_v28 = vsel %vm12457_vm9, %v1934_v8, %v1939_v2  ;;  %v1955_v11 = vshll.u32 %v13258_v41, 16  ;;  %v1958_v39 = vshrl.u32 %v13258_v41, 16 }
  0xb4   : > { %v1949_v50 = vsel %vm12457_vm9, %v1942_v27, %v1947_v15  ;;  %v1973_v13 = vsel %vm12457_vm9, %v1966_v16, %v1971_v62  ;;  %v1979_v33 = vshll.u32 %v13252_v40, 16  ;;  %v1982_v29 = vshrl.u32 %v13252_v40, 16 }
  0xb5   : > { %v1987_v44 = vshll.u32 %v13265_v56, 16  ;;  %v1957_v47 = vsel %vm12457_vm9, %v1950_v1, %v1955_v11  ;;  %v1965_v8 = vsel %vm12457_vm9, %v1958_v39, %v1963_v31  ;;  %v1990_v2 = vshrl.u32 %v13265_v56, 16 }
  0xb6   : > { %v1995_v27 = vshll.u32 %v13244_v25, 16  ;;  %v1981_v15 = vsel %vm12457_vm9, %v1974_v20, %v1979_v33  ;;  %v2694_v62 = vrot.slane %v1941_v28, %v12306_v24  ;;  %v2708_v7 = vrot.slane %v1949_v50, %v12306_v24 }
  0xb7   : > { %v1989_v16 = vsel %vm12457_vm9, %v1982_v29, %v1987_v44  ;;  %v2722_v11 = vrot.slane %v1957_v47, %v12306_v24  ;;  %v2736_v31 = vrot.slane %v1965_v8, %v12306_v24  ;;  %v2750_v39 = vrot.slane %v1973_v13, %v12306_v24 }
  0xb8   : > { %v1997_v1 = vsel %vm12457_vm9, %v1990_v2, %v1995_v27  ;;  %v2701_v21 = vrot.slane %v2694_v62, %v12306_v24  ;;  %v2715_v20 = vrot.slane %v2708_v7, %v12306_v24  ;;  %v2764_v33 = vrot.slane %v1981_v15, %v12306_v24  ;;  %v11288_v2 = vld.sshfl [vmem:[#allocation2 + $0x90] sm:$0x33 pattern:$0x75316420] }
  0xb9   : > { %v2778_v29 = vrot.slane %v1989_v16, %v12306_v24  ;;  %v2729_v28 = vrot.slane %v2722_v11, %v12306_v24  ;;  %v2743_v50 = vrot.slane %v2736_v31, %v12306_v24  ;;  %v2757_v44 = vrot.slane %v2750_v39, %v12306_v24 }
  0xba   : > { %v2792_v47 = vrot.slane %v1997_v1, %v12306_v24  ;;  %v2771_v8 = vrot.slane %v2764_v33, %v12306_v24  ;;  %v3064_v27 = vunpack.c.l.b16 %v2701_v21  ;;  %v3065_v62 = vunpack.c.l.b16 %v2715_v20 }
  0xbb   : > { %v2785_v13 = vrot.slane %v2778_v29, %v12306_v24  ;;  %v3066_v15 = vunpack.c.l.b16 %v2729_v28  ;;  %v3067_v43 = vunpack.c.l.b16 %v2743_v50  ;;  %v3068_v16 = vunpack.c.l.b16 %v2757_v44  ;;  %v11291_v44 = vld.sshfl [vmem:[#allocation2 + $0xac] sm:$0x33 pattern:$0x75316420] }
  0xbc   : > { %v2799_v7 = vrot.slane %v2792_v47, %v12306_v24  ;;  %v3069_v11 = vunpack.c.l.b16 %v2771_v8  ;;  %v3165_v31 = vrot.slane %v3065_v62, 7  ;;  %v1386_v39 = vcombine.high %v11288_v2, %v11288_v2  ;;  %v11298_v62 = vld.sshfl [vmem:[#allocation2 + $0x98] sm:$0x1 pattern:$0x75316420] }
  0xbd   : > { %v3070_v35 = vunpack.c.l.b16 %v2785_v13  ;;  %v3167_v1 = vrot.slane %v3066_v15, 6  ;;  %v3169_v4 = vrot.slane %v3067_v43, 5  ;;  %v3171_v23 = vrot.slane %v3068_v16, 4 }
  0xbe   : > { %v3071_v48 = vunpack.c.l.b16 %v2799_v7  ;;  %v3166_v33 = vsel %vm3089_vm10, %v3165_v31, %v3064_v27  ;;  %v3173_v29 = vrot.slane %v3069_v11, 3  ;;  %v13311_v20 = vrot.slane %v11288_v2, %v12306_v24  ;;  %v11299_v16 = vld.sshfl [vmem:[#allocation2 + $0xb0] sm:$0x1 pattern:$0x75316420] }
  0xbf   : > { %v3175_v21 = vrot.slane %v3070_v35, 2  ;;  %v3168_v28 = vsel %vm3092_vm11, %v3167_v1, %v3166_v33  ;;  %v13315_v47 = vrot.slane %v1386_v39, %v12306_v24  ;;  %v1410_v8 = vcombine.high %v11289_v32, %v11289_v32 }
  0xc0   : > { %17226 = vst [vmem:[#allocation11_spill] sm:$0xff] %v13311_v20  ;;  %v3177_v50 = vrot.slane %v3071_v48, 1  ;;  %v3170_v13 = vsel %vm3095_vm13, %v3169_v4, %v3168_v28  ;;  %v13320_v43 = vcombine.high %v13311_v20, %v13311_v20  ;;  %v13323_v27 = vrot.slane %v11289_v32, %v12306_v24 }
  0xc1   : > { %17227 = vst [vmem:[#allocation14_spill] sm:$0xff] %v13315_v47  ;;  %v1434_v35 = vcombine.high %v11290_v49, %v11290_v49  ;;  %v3172_v2 = vsel %vm3098_vm15, %v3171_v23, %v3170_v13  ;;  %v13328_v48 = vcombine.high %v13315_v47, %v13315_v47  ;;  %v13331_v7 = vrot.slane %v1410_v8, %v12306_v24 }
  0xc2   : > { %17228 = vst [vmem:[#allocation8_spill] sm:$0xff] %v13320_v43  ;;  %17229 = vst [vmem:[#allocation12_spill] sm:$0xff] %v13323_v27  ;;  %v13334_v4 = vrot.slane %v11290_v49, %v12306_v24  ;;  %v3174_v15 = vsel %vm3101_vm5, %v3173_v29, %v3172_v2  ;;  %v13339_v32 = vcombine.high %v13323_v27, %v13323_v27  ;;  %v1999_v13 = vshrl.u32 %v13311_v20, 16 }
  0xc3   : > { %17230 = vst [vmem:[#allocation13_spill] sm:$0xff] %v13328_v48  ;;  %17231 = vst [vmem:[#allocation16_spill] sm:$0xff] %v13331_v7  ;;  %v13342_v23 = vrot.slane %v1434_v35, %v12306_v24  ;;  %v1458_v11 = vcombine.high %v11291_v44, %v11291_v44  ;;  %v3176_v31 = vsel %vm3104_vm2, %v3175_v21, %v3174_v15  ;;  %v2004_v2 = vshll.u32 %v13315_v47, 16 }
  0xc4   : > { %17232 = vst [vmem:[#allocation18_spill] sm:$0xff] %v13334_v4  ;;  %17233 = vst [vmem:[#allocation24_spill] sm:$0xff] %v13339_v32  ;;  %v13347_v39 = vcombine.high %v13331_v7, %v13331_v7  ;;  %v13351_v49 = vcombine.high %v13334_v4, %v13334_v4  ;;  %v13354_v1 = vrot.slane %v11291_v44, %v12306_v24  ;;  %v2012_v15 = vshll.u32 %v13320_v43, 16 }
  0xc5   : > { %17234 = vst [vmem:[#allocation25_spill] sm:$0xff] %v13342_v23  ;;  %v13357_v33 = vsel %vm3107_vm6, %v3177_v50, %v3176_v31  ;;  %v13361_v29 = vcombine.high %v13342_v23, %v13342_v23  ;;  %v13364_v21 = vrot.slane %v1458_v11, %v12306_v24  ;;  %v13367_v28 = vrot.slane %v11298_v62, %v12306_v24 }
  0xc6   : > { %17235 = vst [vmem:[#allocation28_spill] sm:$0xff] %v13347_v39  ;;  %17236 = vst [vmem:[#allocation15_spill] sm:$0xff] %v13351_v49  ;;  %v3209_v8 = vpack.c.b16 %v13357_v33, %v13129_v14  ;;  %v13373_v44 = vcombine.high %v13354_v1, %v13354_v1  ;;  %v13376_v50 = vrot.slane %v11299_v16, %v12306_v24  ;;  %v2007_v62 = vshrl.u32 %v13315_v47, 16 }
  0xc7   : > { %17237 = vst [vmem:[#allocation19_spill] sm:$0xff] %v13354_v1  ;;  %17238 = vst [vmem:[#allocation53_spill] sm:$0xff] %v13357_v33  ;;  %v13381_v35 = vcombine.high %v13364_v21, %v13364_v21  ;;  %v2015_v11 = vshrl.u32 %v13320_v43, 16  ;;  %v2020_v31 = vshll.u32 %v13328_v48, 16  ;;  %v2023_v16 = vshrl.u32 %v13328_v48, 16 }
  0xc8   : > { %17239 = vst [vmem:[#allocation54_spill] sm:$0xff] %v13361_v29  ;;  %17240 = vst [vmem:[#allocation55_spill] sm:$0xff] %v13364_v21  ;;  %11730 = vmatprep.mubr.msk.bf16.mxu0 %vm3211_vm8, %v3209_v8  ;;  %v2028_v14 = vshll.u32 %v13323_v27, 16  ;;  %v2006_v33 = vsel %vm12457_vm9, %v1999_v13, %v2004_v2  ;;  %v2014_v63 = vsel %vm12457_vm9, %v2007_v62, %v2012_v15  ;;  %v2031_v60 = vshrl.u32 %v13323_v27, 16 }
  0xc9   : > { %17241 = vst [vmem:[#allocation56_spill] sm:$0xff] %v13367_v28  ;;  %17242 = vst [vmem:[#allocation57_spill] sm:$0xff] %v13373_v44  ;;  %v2036_v5 = vshll.u32 %v13331_v7, 16  ;;  %v2022_v8 = vsel %vm12457_vm9, %v2015_v11, %v2020_v31  ;;  %v2039_v25 = vshrl.u32 %v13331_v7, 16  ;;  %v2044_v9 = vshll.u32 %v13339_v32, 16 }
  0xca   : > { %17243 = vst [vmem:[#allocation58_spill] sm:$0xff] %v13376_v50  ;;  %17244 = vst [vmem:[#allocation59_spill] sm:$0xff] %v13381_v35  ;;  %v2030_v37 = vsel %vm12457_vm9, %v2023_v16, %v2028_v14  ;;  %v2047_v2 = vshrl.u32 %v13339_v32, 16  ;;  %v2052_v62 = vshll.u32 %v13347_v39, 16  ;;  %v2055_v15 = vshrl.u32 %v13347_v39, 16 }
  0xcb   : > { %v2038_v13 = vsel %vm12457_vm9, %v2031_v60, %v2036_v5  ;;  %v2046_v0 = vsel %vm12457_vm9, %v2039_v25, %v2044_v9  ;;  %v2060_v11 = vshll.u32 %v13367_v28, 16  ;;  %v2064_v14 = vshrl.u32 %v13334_v4, 16 }
  0xcc   : > { %v2069_v31 = vshll.u32 %v13342_v23, 16  ;;  %v2054_v16 = vsel %vm12457_vm9, %v2047_v2, %v2052_v62  ;;  %v2072_v5 = vshrl.u32 %v13342_v23, 16  ;;  %v2077_v60 = vshll.u32 %v13351_v49, 16 }
  0xcd   : > { %v2080_v32 = vshrl.u32 %v13351_v49, 16  ;;  %v2062_v39 = vsel %vm12457_vm9, %v2055_v15, %v2060_v11  ;;  %v2085_v25 = vshll.u32 %v13361_v29, 16  ;;  %v2088_v28 = vshrl.u32 %v13361_v29, 16 }
  0xce   : > { %v2071_v9 = vsel %vm12457_vm9, %v2064_v14, %v2069_v31  ;;  %v2079_v4 = vsel %vm12457_vm9, %v2072_v5, %v2077_v60  ;;  %v2093_v2 = vshll.u32 %v13354_v1, 16  ;;  %v2096_v62 = vshrl.u32 %v13354_v1, 16 }
  0xcf   : > { %v2101_v23 = vshll.u32 %v13364_v21, 16  ;;  %v2087_v49 = vsel %vm12457_vm9, %v2080_v32, %v2085_v25  ;;  %v2104_v15 = vshrl.u32 %v13364_v21, 16  ;;  %v2109_v11 = vshll.u32 %v13373_v44, 16 }
  0xd0   : > { %v2112_v14 = vshrl.u32 %v13373_v44, 16  ;;  %v2095_v31 = vsel %vm12457_vm9, %v2088_v28, %v2093_v2  ;;  %v2117_v60 = vshll.u32 %v13381_v35, 16  ;;  %v2120_v1 = vshrl.u32 %v13381_v35, 16 }
  0xd1   : > { %v2103_v5 = vsel %vm12457_vm9, %v2096_v62, %v2101_v23  ;;  %v2111_v29 = vsel %vm12457_vm9, %v2104_v15, %v2109_v11  ;;  %v2125_v32 = vshll.u32 %v13376_v50, 16  ;;  %v2806_v25 = vrot.slane %v2006_v33, %v12306_v24 }
  0xd2   : > { %v2820_v21 = vrot.slane %v2014_v63, %v12306_v24  ;;  %v2119_v44 = vsel %vm12457_vm9, %v2112_v14, %v2117_v60  ;;  %v2834_v28 = vrot.slane %v2022_v8, %v12306_v24  ;;  %v2848_v23 = vrot.slane %v2030_v37, %v12306_v24 }
  0xd3   : > { %v2862_v2 = vrot.slane %v2038_v13, %v12306_v24  ;;  %v2127_v62 = vsel %vm12457_vm9, %v2120_v1, %v2125_v32  ;;  %v2813_v15 = vrot.slane %v2806_v25, %v12306_v24  ;;  %v2876_v33 = vrot.slane %v2046_v0, %v12306_v24 }
  0xd4   : > { %v2827_v11 = vrot.slane %v2820_v21, %v12306_v24  ;;  %v2841_v63 = vrot.slane %v2834_v28, %v12306_v24  ;;  %v2855_v50 = vrot.slane %v2848_v23, %v12306_v24  ;;  %v2890_v8 = vrot.slane %v2054_v16, %v12306_v24 }
  0xd5   : > { %v2869_v14 = vrot.slane %v2862_v2, %v12306_v24  ;;  %v2883_v37 = vrot.slane %v2876_v33, %v12306_v24  ;;  %v2904_v13 = vrot.slane %v2062_v39, %v12306_v24  ;;  %v2918_v1 = vrot.slane %v2071_v9, %v12306_v24 }
  0xd6   : > { %v2932_v60 = vrot.slane %v2079_v4, %v12306_v24  ;;  %v2897_v21 = vrot.slane %v2890_v8, %v12306_v24  ;;  %v2946_v0 = vrot.slane %v2087_v49, %v12306_v24  ;;  %v2960_v32 = vrot.slane %v2095_v31, %v12306_v24 }
  0xd7   : > { %v2974_v25 = vrot.slane %v2103_v5, %v12306_v24  ;;  %v2911_v28 = vrot.slane %v2904_v13, %v12306_v24  ;;  %v2925_v16 = vrot.slane %v2918_v1, %v12306_v24  ;;  %v2988_v39 = vrot.slane %v2111_v29, %v12306_v24 }
  0xd8   : > { %v2939_v23 = vrot.slane %v2932_v60, %v12306_v24  ;;  %v2953_v9 = vrot.slane %v2946_v0, %v12306_v24  ;;  %v2967_v4 = vrot.slane %v2960_v32, %v12306_v24  ;;  %v3002_v49 = vrot.slane %v2119_v44, %v12306_v24 }
  0xd9   : > { %v2981_v2 = vrot.slane %v2974_v25, %v12306_v24  ;;  %v2995_v31 = vrot.slane %v2988_v39, %v12306_v24  ;;  %v3016_v5 = vrot.slane %v2127_v62, %v12306_v24  ;;  %v3072_v33 = vunpack.c.l.b16 %v2813_v15 }
  0xda   : > { %v3073_v8 = vunpack.c.l.b16 %v2827_v11  ;;  %v3009_v13 = vrot.slane %v3002_v49, %v12306_v24  ;;  %v3074_v1 = vunpack.c.l.b16 %v2841_v63  ;;  %v3075_v60 = vunpack.c.l.b16 %v2855_v50 }
  0xdb   : > { %v3076_v55 = vunpack.c.l.b16 %v2869_v14  ;;  %v3023_v29 = vrot.slane %v3016_v5, %v12306_v24  ;;  %v3077_v0 = vunpack.c.l.b16 %v2883_v37  ;;  %v3078_v35 = vunpack.c.l.b16 %v2897_v21 }
  0xdc   : > { %v3079_v32 = vunpack.c.l.b16 %v2911_v28  ;;  %v3080_v7 = vunpack.c.l.b16 %v2925_v16  ;;  %v3081_v25 = vunpack.c.l.b16 %v2939_v23  ;;  %v3082_v27 = vunpack.c.l.b16 %v2953_v9 }
  0xdd   : > { %v3083_v44 = vunpack.c.l.b16 %v2967_v4  ;;  %v3084_v48 = vunpack.c.l.b16 %v2981_v2  ;;  %v3085_v39 = vunpack.c.l.b16 %v2995_v31  ;;  %v3086_v43 = vunpack.c.l.b16 %v3009_v13 }
  0xde   : > { %v3087_v62 = vunpack.c.l.b16 %v3023_v29  ;;  %v3179_v15 = vrot.slane %v3073_v8, 7  ;;  %v3181_v11 = vrot.slane %v3074_v1, 6  ;;  %v3183_v47 = vrot.slane %v3075_v60, 5 }
  0xdf   : > { %v3185_v49 = vrot.slane %v3076_v55, 4  ;;  %v3187_v63 = vrot.slane %v3077_v0, 3  ;;  %v3189_v50 = vrot.slane %v3078_v35, 2  ;;  %v3191_v14 = vrot.slane %v3079_v32, 1 }
  0xe0   : > { %v3193_v20 = vrot.slane %v3081_v25, 7  ;;  %v3180_v37 = vsel %vm3089_vm10, %v3179_v15, %v3072_v33  ;;  %v3195_v21 = vrot.slane %v3082_v27, 6  ;;  %v3197_v28 = vrot.slane %v3083_v44, 5  ;;  %v17246_v33 = vld [vmem:[#allocation20_spill] sm:$0xff] }
  0xe1   : > { %v3199_v16 = vrot.slane %v3084_v48, 4  ;;  %v3182_v23 = vsel %vm3092_vm11, %v3181_v11, %v3180_v37  ;;  %v3201_v4 = vrot.slane %v3085_v39, 3  ;;  %v3203_v2 = vrot.slane %v3086_v43, 2  ;;  %v17247_v43 = vld [vmem:[#allocation26_spill] sm:$0xff] }
  0xe2   : > { %v3194_v9 = vsel %vm3089_vm10, %v3193_v20, %v3080_v7  ;;  %v3184_v31 = vsel %vm3095_vm13, %v3183_v47, %v3182_v23  ;;  %v3205_v55 = vrot.slane %v3087_v62, 1  ;;  %v17245_v35 = vrot.slane %v17223_v38, %v12306_v24 }
  0xe3   : > { %v3196_v5 = vsel %vm3092_vm11, %v3195_v21, %v3194_v9  ;;  %v3186_v27 = vsel %vm3098_vm15, %v3185_v49, %v3184_v31  ;;  %v3495_v20 = vrot.slane %v17246_v33, %v12306_v24  ;;  %v3509_v7 = vrot.slane %v17247_v43, %v12306_v24 }
  0xe4   : > { %v13488_v8 = vrot.slane %v17245_v35, %v12306_v24  ;;  %v3198_v48 = vsel %vm3095_vm13, %v3197_v28, %v3196_v5  ;;  %v3188_v47 = vsel %vm3101_vm5, %v3187_v63, %v3186_v27  ;;  %v4189_v1 = vunpack.c.l.b16 %v13147_v17 }
  0xe5   : > { %v3200_v13 = vsel %vm3098_vm15, %v3199_v16, %v3198_v48  ;;  %v16958_v38 = vunpack.c.l.b16 %v13150_v61  ;;  %v3190_v60 = vsel %vm3104_vm2, %v3189_v50, %v3188_v47  ;;  %v13503_v0 = vrot.slane %v3495_v20, %v12306_v24 }
  0xe6   : > { %v3202_v29 = vsel %vm3101_vm5, %v3201_v4, %v3200_v13  ;;  %v13506_v32 = vrot.slane %v3509_v7, %v12306_v24  ;;  %v13509_v25 = vsel %vm3107_vm6, %v3191_v14, %v3190_v60  ;;  %v16960_v39 = vunpack.c.l.b16 %v13169_v51 }
  0xe7   : > { %17248 = vst [vmem:[#allocation20_spill] sm:$0xff] %v13509_v25  ;;  %v3204_v44 = vsel %vm3104_vm2, %v3203_v2, %v3202_v29  ;;  %v16959_v17 = vunpack.c.l.b16 %v13189_v30  ;;  %v16957_v15 = vunpack.c.l.b16 %v13192_v36  ;;  %v16956_v11 = vunpack.c.l.b16 %v13195_v19 }
  0xe8   : > { %v13515_v62 = vsel %vm3107_vm6, %v3205_v55, %v3204_v44  ;;  %v16955_v49 = vunpack.c.l.b16 %v13200_v42  ;;  %v16954_v50 = vunpack.c.l.b16 %v13203_v6  ;;  %v4197_v14 = vunpack.c.l.b16 %v13210_v26 }
  0xe9   : > { %17249 = vst [vmem:[#allocation26_spill] sm:$0xff] %v13515_v62  ;;  %v3210_v63 = vpack.c.b16 %v13515_v62, %v13509_v25  ;;  %v16947_v37 = vunpack.c.l.b16 %v13222_v52  ;;  %v16953_v21 = vunpack.c.l.b16 %v13225_v10  ;;  %v16952_v28 = vunpack.c.l.b16 %v13231_v12 }
  0xea   : > { %v16951_v16 = vunpack.c.l.b16 %v13234_v3  ;;  %v16948_v23 = vunpack.c.l.b16 %v13488_v8  ;;  %v16950_v9 = vunpack.c.l.b16 %v13503_v0  ;;  %v16949_v4 = vunpack.c.l.b16 %v13506_v32 }
  0xeb   : > { %11731 = vmatmul.mubr.msk.bf16.gmra.mrb[4].mxu0 %vm3211_vm8, %v3210_v63  ;;  %v4253_v2 = vrot.slane %v16958_v38, 7  ;;  %v4255_v26 = vrot.slane %v16960_v39, 6  ;;  %v4257_v31 = vrot.slane %v16959_v17, 5  ;;  %v4259_v5 = vrot.slane %v16957_v15, 4 }
  0xec   : > { %v4261_v55 = vrot.slane %v16956_v11, 3  ;;  %v4263_v35 = vrot.slane %v16955_v49, 2  ;;  %v4265_v48 = vrot.slane %v16954_v50, 1  ;;  %v4267_v33 = vrot.slane %v16947_v37, 7  ;;  %v17251_v37 = vld [vmem:[#allocation29_spill] sm:$0xff] }
  0xed   : > { %v4254_v27 = vsel %vm3089_vm10, %v4253_v2, %v4189_v1  ;;  %v4269_v20 = vrot.slane %v16953_v21, 6  ;;  %v4271_v7 = vrot.slane %v16952_v28, 5  ;;  %v4273_v47 = vrot.slane %v16951_v16, 4 }
  0xee   : > { %v4256_v43 = vsel %vm3092_vm11, %v4255_v26, %v4254_v27  ;;  %v4275_v13 = vrot.slane %v16948_v23, 3  ;;  %v4268_v60 = vsel %vm3089_vm10, %v4267_v33, %v4197_v14  ;;  %v4277_v29 = vrot.slane %v16950_v9, 2  ;;  %v17250_v26 = vld [vmem:[#allocation27_spill] sm:$0xff] }
  0xef   : > { %v4258_v1 = vsel %vm3095_vm13, %v4257_v31, %v4256_v43  ;;  %v4279_v44 = vrot.slane %v16949_v4, 1  ;;  %v4270_v2 = vsel %vm3092_vm11, %v4269_v20, %v4268_v60  ;;  %v3523_v27 = vrot.slane %v17250_v26, %v12306_v24 }
  0xf0   : > { %v4260_v63 = vsel %vm3098_vm15, %v4259_v5, %v4258_v1  ;;  %v3537_v23 = vrot.slane %v17251_v37, %v12306_v24  ;;  %v4272_v14 = vsel %vm3095_vm13, %v4271_v7, %v4270_v2  ;;  %v17252_v33 = vrot.slane %v12509_v54, %v12306_v24 }
  0xf1   : > { %v4262_v31 = vsel %vm3101_vm5, %v4261_v55, %v4260_v63  ;;  %v17253_v5 = vrot.slane %v12520_v59, %v12306_v24  ;;  %v4274_v37 = vsel %vm3098_vm15, %v4273_v47, %v4272_v14  ;;  %v3530_v55 = vrot.slane %v3523_v27, %v12306_v24  ;;  %v17254_v63 = vld [vmem:[#allocation17_spill] sm:$0xff]  ;;  %v17255_v59 = vld [vmem:[#allocation22_spill] sm:$0xff] }
  0xf2   : > { %v13576_v43 = vrot.slane %v17252_v33, %v12306_v24  ;;  %v4264_v1 = vsel %vm3104_vm2, %v4263_v35, %v4262_v31  ;;  %v13588_v7 = vrot.slane %v3537_v23, %v12306_v24  ;;  %v4276_v54 = vsel %vm3101_vm5, %v4275_v13, %v4274_v37  ;;  %v17258_v13 = vld [vmem:[#allocation30_spill] sm:$0xff]  ;;  %v17261_v37 = vld [vmem:[#allocation33_spill] sm:$0xff] }
  0xf3   : > { %v13582_v20 = vrot.slane %v17253_v5, %v12306_v24  ;;  %v4266_v60 = vsel %vm3107_vm6, %v4265_v48, %v4264_v1  ;;  %v3579_v2 = vrot.slane %v17254_v63, %v12306_v24  ;;  %v3593_v26 = vrot.slane %v17255_v59, %v12306_v24  ;;  %v17262_v63 = vld [vmem:[#allocation38_spill] sm:$0xff] }
  0xf4   : > { %v4278_v33 = vsel %vm3104_vm2, %v4277_v29, %v4276_v54  ;;  %v17256_v35 = vrot.slane %v12466_v34, %v12306_v24  ;;  %v17257_v23 = vrot.slane %v12491_v45, %v12306_v24  ;;  %v3635_v27 = vrot.slane %v17258_v13, %v12306_v24  ;;  %v17260_v34 = vld [vmem:[#allocation32_spill] sm:$0xff] }
  0xf5   : > { %v13612_v31 = vsel %vm3107_vm6, %v4279_v44, %v4278_v33  ;;  %v13615_v29 = vrot.slane %v3579_v2, %v12306_v24  ;;  %v13618_v14 = vrot.slane %v3593_v26, %v12306_v24  ;;  %v3649_v5 = vrot.slane %v17260_v34, %v12306_v24  ;;  %v17263_v2 = vld [vmem:[#allocation31_spill] sm:$0xff]  ;;  %v17266_v34 = vld [vmem:[#allocation40_spill] sm:$0xff] }
  0xf6   : > { %v13601_v47 = vrot.slane %v17256_v35, %v12306_v24  ;;  %v13607_v48 = vrot.slane %v17257_v23, %v12306_v24  ;;  %17259 = vst [vmem:[#allocation27_spill] sm:$0xff] %v13612_v31  ;;  %v4365_v1 = vpack.c.b16 %v13612_v31, %v4266_v60  ;;  %v3642_v45 = vrot.slane %v3635_v27, %v12306_v24  ;;  %v17264_v33 = vld [vmem:[#allocation35_spill] sm:$0xff]  ;;  %v17265_v23 = vld [vmem:[#allocation36_spill] sm:$0xff] }
  0xf7   : > { %v3663_v54 = vrot.slane %v17261_v37, %v12306_v24  ;;  %v3677_v44 = vrot.slane %v17262_v63, %v12306_v24  ;;  %v13629_v59 = vrot.slane %v3649_v5, %v12306_v24  ;;  %v3691_v26 = vrot.slane %v17263_v2, %v12306_v24 }
  0xf8   : > { %v3705_v35 = vrot.slane %v17264_v33, %v12306_v24  ;;  %v3719_v60 = vrot.slane %v17265_v23, %v12306_v24  ;;  %11736 = vmatprep.mubr.msk.bf16.mxu0 %vm3211_vm8, %v4365_v1  ;;  %v3733_v5 = vrot.slane %v17266_v34, %v12306_v24  ;;  %v4205_v37 = vunpack.c.l.b16 %v3530_v55 }
  0xf9   : > { %v13639_v13 = vrot.slane %v3663_v54, %v12306_v24  ;;  %v13642_v27 = vrot.slane %v3677_v44, %v12306_v24  ;;  %v13647_v63 = vrot.slane %v3691_v26, %v12306_v24  ;;  %v16961_v1 = vunpack.c.l.b16 %v13588_v7 }
  0xfa   : > { %v13650_v2 = vrot.slane %v3705_v35, %v12306_v24  ;;  %v13653_v33 = vrot.slane %v3719_v60, %v12306_v24  ;;  %v13657_v54 = vrot.slane %v3733_v5, %v12306_v24  ;;  %v16962_v44 = vunpack.c.l.b16 %v13576_v43 }
  0xfb   : > { %v16963_v23 = vunpack.c.l.b16 %v13582_v20  ;;  %v16964_v55 = vunpack.c.l.b16 %v13615_v29  ;;  %v16973_v26 = vunpack.c.l.b16 %v13618_v14  ;;  %v16965_v34 = vunpack.c.l.b16 %v13601_v47 }
  0xfc   : > { %v16966_v35 = vunpack.c.l.b16 %v13607_v48  ;;  %v4213_v4 = vunpack.c.l.b16 %v3642_v45  ;;  %v16967_v60 = vunpack.c.l.b16 %v13629_v59  ;;  %v16968_v9 = vunpack.c.l.b16 %v13639_v13 }
  0xfd   : > { %v16969_v5 = vunpack.c.l.b16 %v13642_v27  ;;  %v16970_v16 = vunpack.c.l.b16 %v13647_v63  ;;  %v16971_v28 = vunpack.c.l.b16 %v13650_v2  ;;  %v16972_v21 = vunpack.c.l.b16 %v13653_v33 }
  0xfe   : > { %v4281_v49 = vrot.slane %v16961_v1, 7  ;;  %v4283_v45 = vrot.slane %v16962_v44, 6  ;;  %v4285_v11 = vrot.slane %v16963_v23, 5  ;;  %v4287_v15 = vrot.slane %v16964_v55, 4 }
  0xff   : > { %v4289_v38 = vrot.slane %v16973_v26, 3  ;;  %v4291_v39 = vrot.slane %v16965_v34, 2  ;;  %v4293_v1 = vrot.slane %v16966_v35, 1  ;;  %v4295_v44 = vrot.slane %v16967_v60, 7 }
 0x100   : > { %v4282_v17 = vsel %vm3089_vm10, %v4281_v49, %v4205_v37  ;;  %v4297_v23 = vrot.slane %v16968_v9, 6  ;;  %v4299_v55 = vrot.slane %v16969_v5, 5  ;;  %v4301_v49 = vrot.slane %v16970_v16, 4 }
 0x101   : > { %v4284_v50 = vsel %vm3092_vm11, %v4283_v45, %v4282_v17  ;;  %v4296_v34 = vsel %vm3089_vm10, %v4295_v44, %v4213_v4  ;;  %v4303_v35 = vrot.slane %v16971_v28, 3  ;;  %v4305_v60 = vrot.slane %v16972_v21, 2  ;;  %v17268_v4 = vld [vmem:[#allocation37_spill] sm:$0xff] }
 0x102   : > { %v4286_v37 = vsel %vm3095_vm13, %v4285_v11, %v4284_v50  ;;  %v4298_v45 = vsel %vm3092_vm11, %v4297_v23, %v4296_v34  ;;  %v17267_v9 = vunpack.c.l.b16 %v13657_v54  ;;  %v4698_v16 = vsel %vm3224_vm0, %v13126_v46, 0  ;;  %v17269_v28 = vld [vmem:[#allocation41_spill] sm:$0xff]  ;;  %v17270_v34 = vld [vmem:[#allocation42_spill] sm:$0xff] }
 0x103   : > { %v4288_v17 = vsel %vm3098_vm15, %v4287_v15, %v4286_v37  ;;  %v4300_v50 = vsel %vm3095_vm13, %v4299_v55, %v4298_v45  ;;  %v3747_v44 = vrot.slane %v17268_v4, %v12306_v24  ;;  %v3761_v21 = vrot.slane %v17269_v28, %v12306_v24  ;;  %v17271_v37 = vld [vmem:[#allocation46_spill] sm:$0xff] }
 0x104   : > { %v4307_v5 = vrot.slane %v17267_v9, 1  ;;  %v4290_v11 = vsel %vm3101_vm5, %v4289_v38, %v4288_v17  ;;  %v4302_v23 = vsel %vm3098_vm15, %v4301_v49, %v4300_v50  ;;  %v3775_v9 = vrot.slane %v17270_v34, %v12306_v24 }
 0x105   : > { %v4292_v15 = vsel %vm3104_vm2, %v4291_v39, %v4290_v11  ;;  %v3789_v46 = vrot.slane %v17271_v37, %v12306_v24  ;;  %v4304_v55 = vsel %vm3101_vm5, %v4303_v35, %v4302_v23  ;;  %v3754_v17 = vrot.slane %v3747_v44, %v12306_v24  ;;  %v17274_v11 = vld [vmem:[#allocation39_spill] sm:$0xff]  ;;  %v17276_v35 = vld [vmem:[#allocation44_spill] sm:$0xff] }
 0x106   : > { %v13721_v38 = vsel %vm3107_vm6, %v4293_v1, %v4292_v15  ;;  %v13726_v45 = vrot.slane %v3761_v21, %v12306_v24  ;;  %v4306_v39 = vsel %vm3104_vm2, %v4305_v60, %v4304_v55  ;;  %v13730_v28 = vrot.slane %v3775_v9, %v12306_v24  ;;  %v17277_v21 = vld [vmem:[#allocation45_spill] sm:$0xff]  ;;  %v17278_v60 = vld [vmem:[#allocation47_spill] sm:$0xff] }
 0x107   : > { %17272 = vst [vmem:[#allocation29_spill] sm:$0xff] %v13721_v38  ;;  %v13733_v49 = vrot.slane %v3789_v46, %v12306_v24  ;;  %v3803_v50 = vrot.slane %v17274_v11, %v12306_v24  ;;  %v13738_v1 = vsel %vm3107_vm6, %v4307_v5, %v4306_v39  ;;  %v3817_v4 = vrot.slane %v17276_v35, %v12306_v24  ;;  %v13769_v11 = vld [vmem:[%s16863_s3 + $0x6] sm:$0x3] }
 0x108   : > { %17273 = vst [vmem:[#allocation17_spill] sm:$0xff] %v13726_v45  ;;  %17275 = vst [vmem:[#allocation22_spill] sm:$0xff] %v13738_v1  ;;  %v3831_v44 = vrot.slane %v17277_v21, %v12306_v24  ;;  %v3845_v15 = vrot.slane %v17278_v60, %v12306_v24  ;;  %v4366_v23 = vpack.c.b16 %v13738_v1, %v13721_v38 }
 0x109   : > { %v13749_v34 = vrot.slane %v3803_v50, %v12306_v24  ;;  %v3859_v9 = vrot.slane %v13219_v22, %v12306_v24  ;;  %v3873_v5 = vrot.slane %v13237_v53, %v12306_v24  ;;  %v13756_v37 = vrot.slane %v3817_v4, %v12306_v24 }
 0x10a   : > { %v13759_v46 = vrot.slane %v3831_v44, %v12306_v24  ;;  %v13762_v55 = vrot.slane %v3845_v15, %v12306_v24  ;;  %v3887_v39 = vrot.slane %v13241_v18, %v12306_v24  ;;  %11737 = vmatmul.mubr.msk.bf16.vlgmr.msra.gmra.mrb[0].mxu0 %vm3211_vm8, %v4366_v23  ;;  %v3901_v50 = vrot.slane %v13258_v41, %v12306_v24 }
 0x10b   : > { %v3866_v22 = vrot.slane %v3859_v9, %v12306_v24  ;;  %v13774_v53 = vrot.slane %v3873_v5, %v12306_v24  ;;  %v3915_v35 = vrot.slane %v13228_v57, %v12306_v24  ;;  %11745 = vmatpush3.bf16.msra.mxu0 %v4698_v16  ;;  %v3929_v4 = vrot.slane %v13248_v58, %v12306_v24 }
 0x10c   : > { %17279 = vst [vmem:[#allocation30_spill] sm:$0xff] %v13759_v46  ;;  %17280 = vst [vmem:[#allocation32_spill] sm:$0xff] %v13762_v55  ;;  %v13781_v18 = vrot.slane %v3887_v39, %v12306_v24  ;;  %v3943_v21 = vrot.slane %v13252_v40, %v12306_v24  ;;  %v3957_v44 = vrot.slane %v13265_v56, %v12306_v24  ;;  %v4221_v57 = vunpack.c.l.b16 %v3754_v17 }
 0x10d   : > { %17281 = vst [vmem:[#allocation33_spill] sm:$0xff] %v13774_v53  ;;  %v13790_v60 = vrot.slane %v3901_v50, %v12306_v24  ;;  %v13793_v41 = vrot.slane %v3915_v35, %v12306_v24  ;;  %v16975_v16 = vunpack.c.l.b16 %v13726_v45  ;;  %12055 = vmatprep.subr.msk.bf16.mxu0 %vm3224_vm0, %v13769_v11  ;;  %v13799_v58 = vrot.slane %v3929_v4, %v12306_v24 }
 0x10e   : > { %v13802_v40 = vrot.slane %v3943_v21, %v12306_v24  ;;  %v13805_v56 = vrot.slane %v3957_v44, %v12306_v24  ;;  %v16977_v15 = vunpack.c.l.b16 %v13730_v28  ;;  %v16981_v9 = vunpack.c.l.b16 %v13756_v37 }
 0x10f   : > { %17282 = vst [vmem:[#allocation38_spill] sm:$0xff] %v13790_v60  ;;  %17283 = vst [vmem:[#allocation31_spill] sm:$0xff] %v13793_v41  ;;  %v4229_v50 = vunpack.c.l.b16 %v3866_v22  ;;  %v4309_v5 = vrot.slane %v16975_v16, 7  ;;  %v17287_v35 = vunpack.c.l.b16 %v13733_v49  ;;  %v17288_v4 = vunpack.c.l.b16 %v13749_v34 }
 0x110   : > { %17284 = vst [vmem:[#allocation35_spill] sm:$0xff] %v13799_v58  ;;  %17285 = vst [vmem:[#allocation36_spill] sm:$0xff] %v13802_v40  ;;  %v4311_v22 = vrot.slane %v16977_v15, 6  ;;  %v4317_v44 = vrot.slane %v16981_v9, 3  ;;  %v17289_v26 = vunpack.c.l.b16 %v13759_v46  ;;  %v17290_v17 = vunpack.c.l.b16 %v13762_v55 }
 0x111   : > { %17286 = vst [vmem:[#allocation40_spill] sm:$0xff] %v13805_v56  ;;  %v4313_v39 = vrot.slane %v17287_v35, 5  ;;  %v4315_v21 = vrot.slane %v17288_v4, 4  ;;  %v4310_v16 = vsel %vm3089_vm10, %v4309_v5, %v4221_v57  ;;  %v17291_v25 = vunpack.c.l.b16 %v13774_v53 }
 0x112   : > { %v4319_v23 = vrot.slane %v17289_v26, 2  ;;  %v4321_v62 = vrot.slane %v17290_v17, 1  ;;  %v17292_v38 = vunpack.c.l.b16 %v13781_v18  ;;  %v17293_v31 = vunpack.c.l.b16 %v13790_v60 }
 0x113   : > { %v4323_v15 = vrot.slane %v17291_v25, 7  ;;  %v4312_v45 = vsel %vm3092_vm11, %v4311_v22, %v4310_v16  ;;  %v17294_v9 = vunpack.c.l.b16 %v13793_v41  ;;  %v17295_v26 = vunpack.c.l.b16 %v13799_v58  ;;  %v17299_v22 = vld [vmem:[#allocation14_spill] sm:$0xff] }
 0x114   : > { %v4325_v35 = vrot.slane %v17292_v38, 6  ;;  %v4327_v4 = vrot.slane %v17293_v31, 5  ;;  %v17296_v17 = vunpack.c.l.b16 %v13802_v40  ;;  %v4314_v5 = vsel %vm3095_vm13, %v4313_v39, %v4312_v45  ;;  %v17298_v31 = vld [vmem:[#allocation11_spill] sm:$0xff]  ;;  %v17300_v40 = vld [vmem:[#allocation8_spill] sm:$0xff] }
 0x115   : > { %v4329_v46 = vrot.slane %v17294_v9, 4  ;;  %v4331_v55 = vrot.slane %v17295_v26, 3  ;;  %v4324_v25 = vsel %vm3089_vm10, %v4323_v15, %v4229_v50  ;;  %v17297_v38 = vunpack.c.l.b16 %v13805_v56  ;;  %v17301_v50 = vld [vmem:[#allocation13_spill] sm:$0xff] }
 0x116   : > { %v4333_v57 = vrot.slane %v17296_v17, 2  ;;  %v3971_v60 = vrot.slane %v17298_v31, %v12306_v24  ;;  %v4316_v16 = vsel %vm3098_vm15, %v4315_v21, %v4314_v5  ;;  %v4326_v9 = vsel %vm3092_vm11, %v4325_v35, %v4324_v25 }
 0x117   : > { %v4335_v53 = vrot.slane %v17297_v38, 1  ;;  %v3985_v26 = vrot.slane %v17299_v22, %v12306_v24  ;;  %v3999_v17 = vrot.slane %v17300_v40, %v12306_v24  ;;  %v4318_v45 = vsel %vm3101_vm5, %v4317_v44, %v4316_v16  ;;  %v17307_v16 = vld [vmem:[#allocation16_spill] sm:$0xff] }
 0x118   : > { %v4328_v15 = vsel %vm3095_vm13, %v4327_v4, %v4326_v9  ;;  %v3978_v39 = vrot.slane %v3971_v60, %v12306_v24  ;;  %v4013_v38 = vrot.slane %v17301_v50, %v12306_v24  ;;  %v4320_v31 = vsel %vm3104_vm2, %v4319_v23, %v4318_v45  ;;  %v17306_v4 = vld [vmem:[#allocation12_spill] sm:$0xff] }
 0x119   : > { %v4330_v21 = vsel %vm3098_vm15, %v4329_v46, %v4328_v15  ;;  %v13868_v35 = vrot.slane %v3985_v26, %v12306_v24  ;;  %v13871_v5 = vrot.slane %v3999_v17, %v12306_v24  ;;  %v13874_v40 = vsel %vm3107_vm6, %v4321_v62, %v4320_v31  ;;  %v17308_v22 = vld [vmem:[#allocation24_spill] sm:$0xff] }
 0x11a   : > { %17304 = vst [vmem:[#allocation42_spill] sm:$0xff] %v13874_v40  ;;  %v4332_v44 = vsel %vm3101_vm5, %v4331_v55, %v4330_v21  ;;  %v13878_v60 = vrot.slane %v4013_v38, %v12306_v24  ;;  %v4027_v25 = vrot.slane %v17306_v4, %v12306_v24  ;;  %v4041_v9 = vrot.slane %v17307_v16, %v12306_v24  ;;  %v17311_v17 = vld [vmem:[#allocation28_spill] sm:$0xff]  ;;  %v17317_v16 = vld [vmem:[#allocation54_spill] sm:$0xff] }
 0x11b   : > { %17302 = vst [vmem:[#allocation37_spill] sm:$0xff] %v13868_v35  ;;  %17303 = vst [vmem:[#allocation41_spill] sm:$0xff] %v13871_v5  ;;  %v4334_v23 = vsel %vm3104_vm2, %v4333_v57, %v4332_v44  ;;  %v4055_v62 = vrot.slane %v17308_v22, %v12306_v24  ;;  %v4069_v45 = vrot.slane %v17311_v17, %v12306_v24  ;;  %v17312_v57 = vld [vmem:[#allocation18_spill] sm:$0xff] }
 0x11c   : > { %17305 = vst [vmem:[#allocation46_spill] sm:$0xff] %v13878_v60  ;;  %v13890_v26 = vsel %vm3107_vm6, %v4335_v53, %v4334_v23  ;;  %v13893_v55 = vrot.slane %v4027_v25, %v12306_v24  ;;  %v4083_v15 = vrot.slane %v17312_v57, %v12306_v24  ;;  %v13902_v38 = vrot.slane %v4041_v9, %v12306_v24  ;;  %v17314_v53 = vld [vmem:[#allocation25_spill] sm:$0xff]  ;;  %v17316_v25 = vld [vmem:[#allocation15_spill] sm:$0xff] }
 0x11d   : > { %17309 = vst [vmem:[#allocation39_spill] sm:$0xff] %v13890_v26  ;;  %v4367_v50 = vpack.c.b16 %v13890_v26, %v13874_v40  ;;  %v13905_v31 = vrot.slane %v4055_v62, %v12306_v24  ;;  %v4097_v21 = vrot.slane %v17314_v53, %v12306_v24  ;;  %v13910_v44 = vrot.slane %v4069_v45, %v12306_v24  ;;  %v17319_v62 = vld [vmem:[#allocation19_spill] sm:$0xff]  ;;  %v17321_v53 = vld [vmem:[#allocation57_spill] sm:$0xff] }
 0x11e   : > { %17310 = vst [vmem:[#allocation44_spill] sm:$0xff] %v13893_v55  ;;  %17313 = vst [vmem:[#allocation45_spill] sm:$0xff] %v13902_v38  ;;  %v4090_v4 = vrot.slane %v4083_v15, %v12306_v24  ;;  %v4111_v23 = vrot.slane %v17316_v25, %v12306_v24  ;;  %v4125_v22 = vrot.slane %v17317_v16, %v12306_v24  ;;  %v17320_v57 = vld [vmem:[#allocation55_spill] sm:$0xff]  ;;  %v17328_v56 = vunpack.c.l.b16 %v13902_v38 }
 0x11f   : > { %17315 = vst [vmem:[#allocation47_spill] sm:$0xff] %v13910_v44  ;;  %11740 = vmatprep.mubr.msk.bf16.mxu0 %vm3211_vm8, %v4367_v50  ;;  %v13919_v9 = vrot.slane %v4097_v21, %v12306_v24  ;;  %v4139_v17 = vrot.slane %v17319_v62, %v12306_v24  ;;  %v4153_v45 = vrot.slane %v17320_v57, %v12306_v24  ;;  %v17322_v50 = vld [vmem:[#allocation59_spill] sm:$0xff]  ;;  %v4237_v21 = vunpack.c.l.b16 %v3978_v39 }
 0x120   : > { %v4167_v15 = vrot.slane %v17321_v53, %v12306_v24  ;;  %v13928_v46 = vrot.slane %v4111_v23, %v12306_v24  ;;  %v13931_v25 = vrot.slane %v4125_v22, %v12306_v24  ;;  %v4181_v16 = vrot.slane %v17322_v50, %v12306_v24 }
 0x121   : > { %17318 = vst [vmem:[#allocation11_spill] sm:$0xff] %v13919_v9  ;;  %v13936_v1 = vrot.slane %v4139_v17, %v12306_v24  ;;  %v13939_v62 = vrot.slane %v4153_v45, %v12306_v24  ;;  %v4245_v26 = vunpack.c.l.b16 %v4090_v4  ;;  %v17324_v17 = vunpack.c.l.b16 %v13868_v35 }
 0x122   : > { %v13942_v57 = vrot.slane %v4167_v15, %v12306_v24  ;;  %v13946_v23 = vrot.slane %v4181_v16, %v12306_v24  ;;  %v17325_v45 = vunpack.c.l.b16 %v13871_v5  ;;  %v17326_v15 = vunpack.c.l.b16 %v13878_v60 }
 0x123   : > { %17323 = vst [vmem:[#allocation14_spill] sm:$0xff] %v13936_v1  ;;  %v4337_v50 = vrot.slane %v17324_v17, 7  ;;  %v17327_v53 = vunpack.c.l.b16 %v13893_v55  ;;  %v4345_v41 = vrot.slane %v17328_v56, 3  ;;  %v17329_v40 = vunpack.c.l.b16 %v13905_v31 }
 0x124   : > { %v4339_v4 = vrot.slane %v17325_v45, 6  ;;  %v4341_v58 = vrot.slane %v17326_v15, 5  ;;  %v17330_v35 = vunpack.c.l.b16 %v13910_v44  ;;  %v17331_v5 = vunpack.c.l.b16 %v13919_v9 }
 0x125   : > { %v4343_v16 = vrot.slane %v17327_v53, 4  ;;  %v4338_v22 = vsel %vm3089_vm10, %v4337_v50, %v4237_v21  ;;  %v4347_v39 = vrot.slane %v17329_v40, 2  ;;  %v17332_v15 = vunpack.c.l.b16 %v13928_v46 }
 0x126   : > { %v4349_v17 = vrot.slane %v17330_v35, 1  ;;  %v4351_v45 = vrot.slane %v17331_v5, 7  ;;  %v4340_v60 = vsel %vm3092_vm11, %v4339_v4, %v4338_v22  ;;  %v17333_v53 = vunpack.c.l.b16 %v13931_v25 }
 0x127   : > { %v4353_v55 = vrot.slane %v17332_v15, 6  ;;  %v17334_v56 = vunpack.c.l.b16 %v13936_v1  ;;  %v4342_v50 = vsel %vm3095_vm13, %v4341_v58, %v4340_v60  ;;  %v17335_v35 = vunpack.c.l.b16 %v13939_v62  ;;  %v17338_v1 = vld [vmem:[#allocation10_spill] sm:$0xff] }
 0x128   : > { %v4355_v38 = vrot.slane %v17333_v53, 5  ;;  %v4352_v40 = vsel %vm3089_vm10, %v4351_v45, %v4245_v26  ;;  %v17336_v5 = vunpack.c.l.b16 %v13942_v57  ;;  %v4344_v22 = vsel %vm3098_vm15, %v4343_v16, %v4342_v50  ;;  %v17339_v26 = vld [vmem:[#allocation23_spill] sm:$0xff] }
 0x129   : > { %v4357_v21 = vrot.slane %v17334_v56, 4  ;;  %v4359_v44 = vrot.slane %v17335_v35, 3  ;;  %v4354_v4 = vsel %vm3092_vm11, %v4353_v55, %v4352_v40  ;;  %v17337_v15 = vunpack.c.l.b16 %v13946_v23 }
 0x12a   : > { %v4361_v9 = vrot.slane %v17336_v5, 2  ;;  %v4455_v56 = vrot.slane %v17338_v1, %v12306_v24  ;;  %v4346_v58 = vsel %vm3101_vm5, %v4345_v41, %v4344_v22  ;;  %v4356_v60 = vsel %vm3095_vm13, %v4355_v38, %v4354_v4 }
 0x12b   : > { %v4363_v53 = vrot.slane %v17337_v15, 1  ;;  %v4469_v45 = vrot.slane %v17339_v26, %v12306_v24  ;;  %v17340_v35 = vunpack.c.l.b16 %v13169_v51  ;;  %v4348_v16 = vsel %vm3104_vm2, %v4347_v39, %v4346_v58 }
 0x12c   : > { %v4358_v55 = vsel %vm3098_vm15, %v4357_v21, %v4356_v60  ;;  %v4462_v50 = vrot.slane %v4455_v56, %v12306_v24  ;;  %v17341_v40 = vunpack.c.l.b16 %v13189_v30  ;;  %v14009_v1 = vsel %vm3107_vm6, %v4349_v17, %v4348_v16 }
 0x12d   : > { %v4569_v5 = vrot.slane %v17340_v35, 7  ;;  %17342 = vst [vmem:[#allocation8_spill] sm:$0xff] %v14009_v1  ;;  %v4360_v41 = vsel %vm3101_vm5, %v4359_v44, %v4358_v55  ;;  %v4476_v38 = vrot.slane %v4469_v45, %v12306_v24  ;;  %v17343_v22 = vunpack.c.l.b16 %v13150_v61 }
 0x12e   : > { %v4571_v15 = vrot.slane %v17341_v40, 6  ;;  %v4362_v39 = vsel %vm3104_vm2, %v4361_v9, %v4360_v41  ;;  %v4561_v4 = vunpack.c.l.b16 %v4462_v50  ;;  %v17344_v56 = vunpack.c.l.b16 %v13192_v36 }
 0x12f   : > { %v4570_v51 = vsel %vm3089_vm10, %v4569_v5, %v17343_v22  ;;  %v14021_v58 = vsel %vm3107_vm6, %v4363_v53, %v4362_v39  ;;  %v4562_v17 = vunpack.c.l.b16 %v4476_v38  ;;  %v17346_v44 = vunpack.c.l.b16 %v13195_v19 }
 0x130   : > { %v4572_v21 = vsel %vm3092_vm11, %v4571_v15, %v4570_v51  ;;  %v4573_v30 = vrot.slane %v17344_v56, 5  ;;  %17345 = vst [vmem:[#allocation13_spill] sm:$0xff] %v14021_v58  ;;  %v17347_v26 = vunpack.c.l.b16 %v13200_v42  ;;  %v4368_v45 = vpack.c.b16 %v14021_v58, %v14009_v1 }
 0x131   : > { %v4575_v60 = vrot.slane %v17346_v44, 4  ;;  %v17348_v35 = vunpack.c.l.b16 %v13203_v6  ;;  %v4581_v36 = vrot.slane %v4561_v4, 1  ;;  %v17349_v53 = vunpack.c.l.b16 %v13225_v10  ;;  %v17358_v44 = vld [vmem:[#allocation52_spill] sm:$0xff] }
 0x132   : > { %v4577_v61 = vrot.slane %v17347_v26, 3  ;;  %v4574_v9 = vsel %vm3095_vm13, %v4573_v30, %v4572_v21  ;;  %v17350_v19 = vunpack.c.l.b16 %v13231_v12  ;;  %v17351_v42 = vunpack.c.l.b16 %v13234_v3  ;;  %11741 = vmatmul.mubr.msk.bf16.gmra.mrb[4].mxu0 %vm3211_vm8, %v4368_v45  ;;  %v17356_v21 = vld [vmem:[#allocation34_spill] sm:$0xff] }
 0x133   : > { %v4579_v5 = vrot.slane %v17348_v35, 2  ;;  %v4576_v16 = vsel %vm3098_vm15, %v4575_v60, %v4574_v9  ;;  %v4583_v55 = vrot.slane %v17349_v53, 7  ;;  %v17352_v41 = vunpack.c.l.b16 %v13488_v8 }
 0x134   : > { %v4585_v50 = vrot.slane %v17350_v19, 6  ;;  %v4587_v40 = vrot.slane %v17351_v42, 5  ;;  %v4578_v15 = vsel %vm3101_vm5, %v4577_v61, %v4576_v16  ;;  %v17353_v38 = vunpack.c.l.b16 %v13503_v0 }
 0x135   : > { %v4589_v6 = vrot.slane %v17352_v41, 4  ;;  %v17354_v51 = vunpack.c.l.b16 %v13506_v32  ;;  %v4580_v39 = vsel %vm3104_vm2, %v4579_v5, %v4578_v15  ;;  %v17355_v12 = vunpack.c.l.b16 %v13222_v52 }
 0x136   : > { %v4591_v22 = vrot.slane %v17353_v38, 3  ;;  %v4595_v4 = vrot.slane %v4562_v17, 1  ;;  %v17357_v56 = vrot.slane %v17356_v21, %v12306_v24  ;;  %v4582_v8 = vsel %vm3107_vm6, %v4581_v36, %v4580_v39 }
 0x137   : > { %v4593_v10 = vrot.slane %v17354_v51, 2  ;;  %v4584_v3 = vsel %vm3089_vm10, %v4583_v55, %v17355_v12  ;;  %v4563_v60 = vunpack.c.l.b16 %v17358_v44  ;;  %v17359_v32 = vunpack.c.l.b16 %v13576_v43 }
 0x138   : > { %v4504_v30 = vrot.slane %v17357_v56, %v12306_v24  ;;  %v4586_v0 = vsel %vm3092_vm11, %v4585_v50, %v4584_v3  ;;  %v17360_v45 = vunpack.c.l.b16 %v13582_v20  ;;  %v17361_v9 = vunpack.c.l.b16 %v13615_v29 }
 0x139   : > { %v4597_v26 = vrot.slane %v17359_v32, 7  ;;  %v4588_v61 = vsel %vm3095_vm13, %v4587_v40, %v4586_v0  ;;  %v17362_v36 = vunpack.c.l.b16 %v13588_v7  ;;  %v17363_v53 = vunpack.c.l.b16 %v13618_v14 }
 0x13a   : > { %v4564_v52 = vunpack.c.l.b16 %v4504_v30  ;;  %v4599_v17 = vrot.slane %v17360_v45, 6  ;;  %v4601_v35 = vrot.slane %v17361_v9, 5  ;;  %v4590_v5 = vsel %vm3098_vm15, %v4589_v6, %v4588_v61 }
 0x13b   : > { %v4598_v16 = vsel %vm3089_vm10, %v4597_v26, %v17362_v36  ;;  %v4603_v55 = vrot.slane %v17363_v53, 4  ;;  %v17364_v43 = vunpack.c.l.b16 %v13601_v47  ;;  %v4592_v50 = vsel %vm3101_vm5, %v4591_v22, %v4590_v5  ;;  %v17376_v26 = vld [vmem:[#allocation9_spill] sm:$0xff] }
 0x13c   : > { %v4600_v20 = vsel %vm3092_vm11, %v4599_v17, %v4598_v16  ;;  %v17365_v42 = vunpack.c.l.b16 %v13607_v48  ;;  %v4609_v40 = vrot.slane %v4563_v60, 1  ;;  %v4594_v15 = vsel %vm3104_vm2, %v4593_v10, %v4592_v50 }
 0x13d   : > { %v4605_v19 = vrot.slane %v17364_v43, 3  ;;  %v4602_v7 = vsel %vm3095_vm13, %v4601_v35, %v4600_v20  ;;  %v17366_v41 = vunpack.c.l.b16 %v13639_v13  ;;  %v17367_v14 = vunpack.c.l.b16 %v13642_v27  ;;  %v17381_v43 = vld [vmem:[#allocation17_spill] sm:$0xff] }
 0x13e   : > { %v4607_v29 = vrot.slane %v17365_v42, 2  ;;  %v14084_v47 = vsel %vm3107_vm6, %v4595_v4, %v4594_v15  ;;  %v4604_v22 = vsel %vm3098_vm15, %v4603_v55, %v4602_v7  ;;  %v17369_v51 = vunpack.c.l.b16 %v13647_v63 }
 0x13f   : > { %v4611_v6 = vrot.slane %v17366_v41, 7  ;;  %v4613_v38 = vrot.slane %v17367_v14, 6  ;;  %17368 = vst [vmem:[#allocation12_spill] sm:$0xff] %v14084_v47  ;;  %v17370_v39 = vunpack.c.l.b16 %v13650_v2  ;;  %v4681_v10 = vpack.c.b16 %v14084_v47, %v4582_v8 }
 0x140   : > { %v4615_v48 = vrot.slane %v17369_v51, 5  ;;  %v4606_v3 = vsel %vm3101_vm5, %v4605_v19, %v4604_v22  ;;  %v17371_v13 = vunpack.c.l.b16 %v13629_v59  ;;  %v17372_v21 = vunpack.c.l.b16 %v13653_v33  ;;  %v17375_v33 = vld [vmem:[#allocation43_spill] sm:$0xff] }
 0x141   : > { %v4617_v12 = vrot.slane %v17370_v39, 4  ;;  %v4608_v56 = vsel %vm3104_vm2, %v4607_v29, %v4606_v3  ;;  %v17373_v63 = vunpack.c.l.b16 %v13657_v54  ;;  %v4623_v2 = vrot.slane %v4564_v52, 1  ;;  %11746 = vmatprep.mubr.msk.bf16.mxu0 %vm3211_vm8, %v4681_v10  ;;  %v17391_v10 = vld [vmem:[#allocation31_spill] sm:$0xff] }
 0x142   : > { %v4612_v27 = vsel %vm3089_vm10, %v4611_v6, %v17371_v13  ;;  %v4619_v4 = vrot.slane %v17372_v21, 3  ;;  %v14104_v8 = vsel %vm3107_vm6, %v4609_v40, %v4608_v56  ;;  %v6262_v44 = vsel %vm3224_vm0, %v13769_v11, 0  ;;  %v17386_v40 = vld [vmem:[#allocation32_spill] sm:$0xff] }
 0x143   : > { %v4614_v30 = vsel %vm3092_vm11, %v4613_v38, %v4612_v27  ;;  %v4621_v0 = vrot.slane %v17373_v63, 2  ;;  %17374 = vst [vmem:[#allocation16_spill] sm:$0xff] %v14104_v8  ;;  %v4511_v60 = vrot.slane %v17375_v33, %v12306_v24  ;;  %v4525_v54 = vrot.slane %v17376_v26, %v12306_v24  ;;  %v14150_v27 = vld [vmem:[%s16863_s3 + $0x8] sm:$0x3] }
 0x144   : > { %v4616_v59 = vsel %vm3095_vm13, %v4615_v48, %v4614_v30  ;;  %v17377_v61 = vunpack.c.l.b16 %v13730_v28  ;;  %v17378_v45 = vunpack.c.l.b16 %v13733_v49  ;;  %v17379_v11 = vunpack.c.l.b16 %v13749_v34  ;;  %v17383_v49 = vld [vmem:[#allocation30_spill] sm:$0xff]  ;;  %v17395_v30 = vld [vmem:[#allocation35_spill] sm:$0xff]  ;;  %v17399_v26 = vld [vmem:[#allocation40_spill] sm:$0xff] }
 0x145   : > { %v4618_v32 = vsel %vm3098_vm15, %v4617_v12, %v4616_v59  ;;  %v4518_v35 = vrot.slane %v4511_v60, %v12306_v24  ;;  %v17380_v36 = vunpack.c.l.b16 %v13756_v37  ;;  %v4532_v55 = vrot.slane %v4525_v54, %v12306_v24  ;;  %v17389_v48 = vld [vmem:[#allocation38_spill] sm:$0xff] }
 0x146   : > { %v4625_v52 = vrot.slane %v17377_v61, 7  ;;  %v4627_v17 = vrot.slane %v17378_v45, 6  ;;  %v4620_v9 = vsel %vm3101_vm5, %v4619_v4, %v4618_v32  ;;  %v4629_v5 = vrot.slane %v17379_v11, 5  ;;  %v17403_v11 = vld [vmem:[#allocation58_spill] sm:$0xff] }
 0x147   : > { %v4631_v16 = vrot.slane %v17380_v36, 4  ;;  %v4622_v53 = vsel %vm3104_vm2, %v4621_v0, %v4620_v9  ;;  %v17382_v28 = vunpack.c.l.b16 %v17381_v43  ;;  %v17384_v50 = vunpack.c.l.b16 %v17383_v49  ;;  %v17402_v9 = vld [vmem:[#allocation56_spill] sm:$0xff]  ;;  %v17406_v43 = vld [vmem:[#allocation46_spill] sm:$0xff] }
 0x148   : > { %v14132_v42 = vsel %vm3107_vm6, %v4623_v2, %v4622_v53  ;;  %v4565_v29 = vunpack.c.l.b16 %v4518_v35  ;;  %v17387_v37 = vunpack.c.l.b16 %v17386_v40  ;;  %v4566_v41 = vunpack.c.l.b16 %v4532_v55  ;;  %v17397_v2 = vld [vmem:[#allocation36_spill] sm:$0xff] }
 0x149   : > { %v4626_v19 = vsel %vm3089_vm10, %v4625_v52, %v17382_v28  ;;  %v4633_v20 = vrot.slane %v17384_v50, 3  ;;  %17385 = vst [vmem:[#allocation24_spill] sm:$0xff] %v14132_v42  ;;  %v4682_v7 = vpack.c.b16 %v14132_v42, %v14104_v8  ;;  %v17388_v14 = vunpack.c.l.b16 %v13781_v18  ;;  %v17393_v18 = vld [vmem:[#allocation33_spill] sm:$0xff] }
 0x14a   : > { %v4628_v34 = vsel %vm3092_vm11, %v4627_v17, %v4626_v19  ;;  %v4635_v15 = vrot.slane %v17387_v37, 2  ;;  %v4637_v51 = vrot.slane %v4565_v29, 1  ;;  %v17390_v39 = vunpack.c.l.b16 %v17389_v48  ;;  %v17408_v29 = vld [vmem:[#allocation44_spill] sm:$0xff] }
 0x14b   : > { %v4630_v6 = vsel %vm3095_vm13, %v4629_v5, %v4628_v34  ;;  %v4639_v38 = vrot.slane %v17388_v14, 7  ;;  %v17392_v3 = vunpack.c.l.b16 %v17391_v10  ;;  %11747 = vmatmul.mubr.msk.bf16.vlgmr.msra.gmra.mrb[0].mxu0 %vm3211_vm8, %v4682_v7  ;;  %v17394_v4 = vunpack.c.l.b16 %v17393_v18 }
 0x14c   : > { %v4632_v22 = vsel %vm3098_vm15, %v4631_v16, %v4630_v6  ;;  %v4641_v12 = vrot.slane %v17390_v39, 6  ;;  %v17396_v63 = vunpack.c.l.b16 %v17395_v30  ;;  %v17398_v59 = vunpack.c.l.b16 %v17397_v2  ;;  %11755 = vmatpush3.bf16.msra.mxu0 %v6262_v44  ;;  %v17404_v16 = vld [vmem:[#allocation41_spill] sm:$0xff] }
 0x14d   : > { %v4643_v13 = vrot.slane %v17392_v3, 5  ;;  %v4634_v21 = vsel %vm3101_vm5, %v4633_v20, %v4632_v22  ;;  %v4640_v56 = vsel %vm3089_vm10, %v4639_v38, %v17394_v4  ;;  %v17400_v54 = vunpack.c.l.b16 %v17399_v26  ;;  %12056 = vmatprep.subr.msk.bf16.mxu0 %vm3224_vm0, %v14150_v27  ;;  %v17412_v6 = vld [vmem:[#allocation45_spill] sm:$0xff]  ;;  %v281_v26 = vld [vmem:[%s12292_s10 + $0x8] sm:$0xff] }
 0x14e   : > { %v4645_v0 = vrot.slane %v17396_v63, 4  ;;  %v4647_v33 = vrot.slane %v17398_v59, 3  ;;  %v4636_v60 = vsel %vm3104_vm2, %v4635_v15, %v4634_v21  ;;  %v4642_v32 = vsel %vm3092_vm11, %v4641_v12, %v4640_v56  ;;  %v17410_v15 = vld [vmem:[#allocation37_spill] sm:$0xff]  ;;  %v17416_v21 = vld [vmem:[#allocation47_spill] sm:$0xff]  ;;  %v17420_v59 = vld [vmem:[#allocation14_spill] sm:$0xff] }
 0x14f   : > { %v4649_v61 = vrot.slane %v17400_v54, 2  ;;  %v4651_v52 = vrot.slane %v4566_v41, 1  ;;  %v14166_v45 = vsel %vm3107_vm6, %v4637_v51, %v4636_v60  ;;  %v4644_v17 = vsel %vm3095_vm13, %v4643_v13, %v4642_v32  ;;  %v280_v32 = vld [vmem:[%s12292_s10] sm:$0xff] }
 0x150   : > { %17401 = vst [vmem:[#allocation28_spill] sm:$0xff] %v14166_v45  ;;  %v4539_v35 = vrot.slane %v17402_v9, %v12306_v24  ;;  %v4553_v5 = vrot.slane %v17403_v11, %v12306_v24  ;;  %v4646_v44 = vsel %vm3098_vm15, %v4645_v0, %v4644_v17  ;;  %v17405_v53 = vunpack.c.l.b16 %v17404_v16  ;;  %v284_v11 = vld [vmem:[%s12292_s10 + $0x20] sm:$0xff] }
 0x151   : > { %v17407_v28 = vunpack.c.l.b16 %v17406_v43  ;;  %v4648_v49 = vsel %vm3101_vm5, %v4647_v33, %v4646_v44  ;;  %v17409_v34 = vunpack.c.l.b16 %v17408_v29  ;;  %v17411_v7 = vunpack.c.l.b16 %v17410_v15  ;;  %v288_v44 = vld [vmem:[%s12292_s10 + $0x40] sm:$0xff] }
 0x152   : > { %v4653_v55 = vrot.slane %v17405_v53, 7  ;;  %v4546_v50 = vrot.slane %v4539_v35, %v12306_v24  ;;  %v4560_v20 = vrot.slane %v4553_v5, %v12306_v24  ;;  %v4650_v37 = vsel %vm3104_vm2, %v4649_v61, %v4648_v49  ;;  %v17422_v61 = vld [vmem:[#allocation11_spill] sm:$0xff]  ;;  %v285_v5 = vld [vmem:[%s12292_s10 + $0x28] sm:$0xff] }
 0x153   : > { %v4655_v19 = vrot.slane %v17407_v28, 6  ;;  %v4657_v40 = vrot.slane %v17409_v34, 5  ;;  %v17413_v14 = vunpack.c.l.b16 %v17412_v6  ;;  %v17414_v22 = vunpack.c.l.b16 %v13905_v31  ;;  %v292_v29 = vld [vmem:[%s12292_s10 + $0x60] sm:$0xff] }
 0x154   : > { %v4654_v41 = vsel %vm3089_vm10, %v4653_v55, %v17411_v7  ;;  %v14196_v48 = vsel %vm3107_vm6, %v4651_v52, %v4650_v37  ;;  %v4567_v39 = vunpack.c.l.b16 %v4546_v50  ;;  %v4568_v12 = vunpack.c.l.b16 %v4560_v20  ;;  %v293_v37 = vld [vmem:[%s12292_s10 + $0x68] sm:$0xff] }
 0x155   : > { %v4659_v38 = vrot.slane %v17413_v14, 4  ;;  %v4661_v51 = vrot.slane %v17414_v22, 3  ;;  %17415 = vst [vmem:[#allocation18_spill] sm:$0xff] %v14196_v48  ;;  %v4656_v10 = vsel %vm3092_vm11, %v4655_v19, %v4654_v41  ;;  %v4683_v3 = vpack.c.b16 %v14196_v48, %v14166_v45  ;;  %v289_v19 = vld [vmem:[%s12292_s10 + $0x48] sm:$0xff]  ;;  %v14251_v41 = vld [vmem:[%s16862_s2] ss:$0 sm:$0xff] }
 0x156   : > { %v4658_v13 = vsel %vm3095_vm13, %v4657_v40, %v4656_v10  ;;  %v17417_v18 = vunpack.c.l.b16 %v17416_v21  ;;  %v17418_v31 = vunpack.c.l.b16 %v13928_v46  ;;  %v4665_v63 = vrot.slane %v4567_v39, 1 }
 0x157   : > { %v4660_v30 = vsel %vm3098_vm15, %v4659_v38, %v4658_v13  ;;  %v17419_v0 = vunpack.c.l.b16 %v13931_v25  ;;  %v17421_v33 = vunpack.c.l.b16 %v17420_v59  ;;  %11750 = vmatprep.mubr.msk.bf16.mxu0 %vm3211_vm8, %v4683_v3  ;;  %v17423_v52 = vunpack.c.l.b16 %v17422_v61 }
 0x158   : > { %v4663_v4 = vrot.slane %v17417_v18, 2  ;;  %v4667_v56 = vrot.slane %v17418_v31, 7  ;;  %v4662_v54 = vsel %vm3101_vm5, %v4661_v51, %v4660_v30  ;;  %v17424_v17 = vunpack.c.l.b16 %v13939_v62 }
 0x159   : > { %v4669_v2 = vrot.slane %v17419_v0, 6  ;;  %v4671_v60 = vrot.slane %v17421_v33, 5  ;;  %v17425_v25 = vunpack.c.l.b16 %v13942_v57  ;;  %v17426_v55 = vunpack.c.l.b16 %v13946_v23  ;;  %v14237_v57 = vld [vmem:[%s16861_s1] ss:$0 sm:$0xff] }
 0x15a   : > { %v4668_v46 = vsel %vm3089_vm10, %v4667_v56, %v17423_v52  ;;  %v4673_v9 = vrot.slane %v17424_v17, 4  ;;  %v4664_v16 = vsel %vm3104_vm2, %v4663_v4, %v4662_v54  ;;  %v4679_v28 = vrot.slane %v4568_v12, 1 }
 0x15b   : > { %v4675_v35 = vrot.slane %v17425_v25, 3  ;;  %v4670_v53 = vsel %vm3092_vm11, %v4669_v2, %v4668_v46  ;;  %v4677_v43 = vrot.slane %v17426_v55, 2  ;;  %v14231_v62 = vsel %vm3107_vm6, %v4665_v63, %v4664_v16  ;;  %v901_v55 = vld [vmem:[#allocation2 + $0xc] sm:$0xf] }
 0x15c   : > { %17427 = vst [vmem:[#allocation25_spill] sm:$0xff] %v14231_v62  ;;  %v4672_v49 = vsel %vm3095_vm13, %v4671_v60, %v4670_v53  ;;  %v319_v50 = vmul.f32 %v14237_v57, %v280_v32  ;;  %v320_v20 = vmul.f32 %v14237_v57, %v281_v26  ;;  %v323_v34 = vmul.f32 %v14237_v57, %v284_v11 }
 0x15d   : > { %v4674_v23 = vsel %vm3098_vm15, %v4673_v9, %v4672_v49  ;;  %v324_v40 = vmul.f32 %v14237_v57, %v285_v5  ;;  %v327_v15 = vmul.f32 %v14237_v57, %v288_v44  ;;  %v328_v38 = vmul.f32 %v14237_v57, %v289_v19 }
 0x15e   : > { %v4676_v7 = vsel %vm3101_vm5, %v4675_v35, %v4674_v23  ;;  %v358_v6 = vadd.f32 %v14251_v41, %v319_v50  ;;  %v359_v14 = vadd.f32 %v14251_v41, %v320_v20  ;;  %v362_v51 = vadd.f32 %v14251_v41, %v323_v34  ;;  %v917_v20 = vld [vmem:[#allocation2 + $0x24] sm:$0xf] }
 0x15f   : > { %v4678_v22 = vsel %vm3104_vm2, %v4677_v43, %v4676_v7  ;;  %v363_v39 = vadd.f32 %v14251_v41, %v324_v40  ;;  %v331_v12 = vmul.f32 %v14237_v57, %v292_v29  ;;  %v332_v21 = vmul.f32 %v14237_v57, %v293_v37 }
 0x160   : > { %v14261_v10 = vsel %vm3107_vm6, %v4679_v28, %v4678_v22  ;;  %v390_v3 = vmax.f32 %v358_v6, 0.0  ;;  %v391_v13 = vmax.f32 %v359_v14, 0.0  ;;  %v394_v4 = vmax.f32 %v362_v51, 0.0 }
 0x161   : > { %17428 = vst [vmem:[#allocation15_spill] sm:$0xff] %v14261_v10  ;;  %v4684_v18 = vpack.c.b16 %v14261_v10, %v14231_v62  ;;  %v395_v31 = vmax.f32 %v363_v39, 0.0  ;;  %v366_v56 = vadd.f32 %v14251_v41, %v327_v15  ;;  %v367_v0 = vadd.f32 %v14251_v41, %v328_v38 }
 0x162   : > { %v11589_v30 = vpack.c.bf16 %v390_v3, %v390_v3  ;;  %v11590_v63 = vpack.c.bf16 %v391_v13, %v391_v13  ;;  %v370_v2 = vadd.f32 %v14251_v41, %v331_v12  ;;  %v11593_v59 = vpack.c.bf16 %v394_v4, %v394_v4  ;;  %v931_v13 = vld [vmem:[#allocation2 + $0x3c] sm:$0xf] }
 0x163   : > { %11751 = vmatmul.mubr.msk.bf16.gmra.mrb[4].mxu0 %vm3211_vm8, %v4684_v18  ;;  %v11594_v33 = vpack.c.bf16 %v395_v31, %v395_v31  ;;  %v371_v60 = vadd.f32 %v14251_v41, %v332_v21  ;;  %v398_v32 = vmax.f32 %v366_v56, 0.0  ;;  %v399_v5 = vmax.f32 %v367_v0, 0.0  ;;  %v296_v21 = vld [vmem:[%s12292_s10 + $0x80] sm:$0xff] }
 0x164   : > { %v578_v26 = vshrl.u32 %v11589_v30, 16  ;;  %v581_v54 = vshll.u32 %v11589_v30, 16  ;;  %v586_v61 = vshrl.u32 %v11590_v63, 16  ;;  %v589_v52 = vshll.u32 %v11590_v63, 16  ;;  %v297_v30 = vld [vmem:[%s12292_s10 + $0x88] sm:$0xff]  ;;  %v300_v63 = vld [vmem:[%s12292_s10 + $0xa0] sm:$0xff] }
 0x165   : > { %v612_v46 = vshrl.u32 %v11593_v59, 16  ;;  %v615_v17 = vshll.u32 %v11593_v59, 16  ;;  %v620_v9 = vshrl.u32 %v11594_v33, 16  ;;  %v623_v25 = vshll.u32 %v11594_v33, 16 }
 0x166   : > { %v580_v35 = vrot.slane %v578_v26, 7  ;;  %v14271_v11 = vrot.slane %v586_v61, 7  ;;  %v402_v44 = vmax.f32 %v370_v2, 0.0  ;;  %v403_v43 = vmax.f32 %v371_v60, 0.0  ;;  %v301_v60 = vld [vmem:[%s12292_s10 + $0xa8] sm:$0xff] }
 0x167   : > { %v614_v16 = vrot.slane %v612_v46, 7  ;;  %v14273_v53 = vrot.slane %v620_v9, 7  ;;  %v11597_v28 = vpack.c.bf16 %v398_v32, %v398_v32  ;;  %v11598_v29 = vpack.c.bf16 %v399_v5, %v399_v5 }
 0x168   : > { %v583_v19 = vor.u32 %v581_v54, %v580_v35  ;;  %v584_v49 = vrot.slane %v580_v35, 4  ;;  %v591_v50 = vor.u32 %v589_v52, %v14271_v11  ;;  %v11601_v37 = vpack.c.bf16 %v402_v44, %v402_v44  ;;  %v304_v35 = vld [vmem:[%s12292_s10 + $0xc0] sm:$0xff] }
 0x169   : > { %v617_v23 = vor.u32 %v615_v17, %v614_v16  ;;  %v618_v34 = vrot.slane %v614_v16, 4  ;;  %v625_v40 = vor.u32 %v623_v25, %v14273_v53  ;;  %v11602_v38 = vpack.c.bf16 %v403_v43, %v403_v43  ;;  %v945_v17 = vld [vmem:[#allocation2 + $0x54] sm:$0xf] }
 0x16a   : > { %v592_v7 = vsel %vm12328_vm12, %v584_v49, %v591_v50  ;;  %v902_v14 = vsel %vm12334_vm14, %v583_v19, %v901_v55  ;;  %v646_v22 = vshrl.u32 %v11597_v28, 16  ;;  %v649_v12 = vshll.u32 %v11597_v28, 16 }
 0x16b   : > { %v626_v51 = vsel %vm12328_vm12, %v618_v34, %v625_v40  ;;  %903 = vst [vmem:[#allocation2 + $0xc] sm:$0xf] %v902_v14  ;;  %904 = vst.msk [vmem:[#allocation2 + $0x10] sm:$0xf] %vm422_vm1, %v592_v7  ;;  %v918_v39 = vsel %vm12334_vm14, %v617_v23, %v917_v20  ;;  %v654_v3 = vshrl.u32 %v11598_v29, 16  ;;  %v657_v4 = vshll.u32 %v11598_v29, 16 }
 0x16c   : > { %919 = vst [vmem:[#allocation2 + $0x24] sm:$0xf] %v918_v39  ;;  %920 = vst.msk [vmem:[#allocation2 + $0x28] sm:$0xf] %vm422_vm1, %v626_v51  ;;  %v648_v18 = vrot.slane %v646_v22, 7  ;;  %v680_v31 = vshrl.u32 %v11601_v37, 16  ;;  %v335_v61 = vmul.f32 %v14237_v57, %v296_v21  ;;  %v336_v9 = vmul.f32 %v14237_v57, %v297_v30 }
 0x16d   : > { %v683_v56 = vshll.u32 %v11601_v37, 16  ;;  %v14290_v0 = vrot.slane %v654_v3, 7  ;;  %v688_v2 = vshrl.u32 %v11602_v38, 16  ;;  %v691_v59 = vshll.u32 %v11602_v38, 16 }
 0x16e   : > { %v14294_v33 = vsel %vm3224_vm0, %v14150_v27, 0  ;;  %v651_v32 = vor.u32 %v649_v12, %v648_v18  ;;  %v652_v26 = vrot.slane %v648_v18, 4  ;;  %v682_v54 = vrot.slane %v680_v31, 7 }
 0x16f   : > { %v659_v52 = vor.u32 %v657_v4, %v14290_v0  ;;  %v14299_v46 = vrot.slane %v688_v2, 7  ;;  %v339_v25 = vmul.f32 %v14237_v57, %v300_v63  ;;  %v340_v16 = vmul.f32 %v14237_v57, %v301_v60 }
 0x170   : > { %v685_v5 = vor.u32 %v683_v56, %v682_v54  ;;  %v686_v44 = vrot.slane %v682_v54, 4  ;;  %v932_v27 = vsel %vm12334_vm14, %v651_v32, %v931_v13  ;;  %v14311_v28 = vadd.f32 %v14251_v41, %v335_v61 }
 0x171   : > { %v660_v55 = vsel %vm12328_vm12, %v652_v26, %v659_v52  ;;  %v693_v43 = vor.u32 %v691_v59, %v14299_v46  ;;  %933 = vst [vmem:[#allocation2 + $0x3c] sm:$0xf] %v932_v27  ;;  %v14314_v19 = vadd.f32 %v14251_v41, %v336_v9  ;;  %v14320_v20 = vadd.f32 %v14251_v41, %v339_v25 }
 0x172   : > { %v11376_v49 = vld.sshfl [vmem:[#allocation2 + $0xc] sm:$0x33 pattern:$0x75316420]  ;;  %934 = vst.msk [vmem:[#allocation2 + $0x40] sm:$0xf] %vm422_vm1, %v660_v55  ;;  %v946_v50 = vsel %vm12334_vm14, %v685_v5, %v945_v17  ;;  %v14323_v29 = vadd.f32 %v14251_v41, %v340_v16  ;;  %v14326_v23 = vmul.f32 %v14237_v57, %v304_v35 }
 0x173   : > { %v11377_v34 = vld.sshfl [vmem:[#allocation2 + $0x10] sm:$0x33 pattern:$0x75316420]  ;;  %v4796_v40 = vcombine.high %v11376_v49, %v11376_v49  ;;  %v14329_v37 = vrot.slane %v11376_v49, %v12306_v24  ;;  %v694_v7 = vsel %vm12328_vm12, %v686_v44, %v693_v43  ;;  %947 = vst [vmem:[#allocation2 + $0x54] sm:$0xf] %v946_v50 }
 0x174   : > { %v11378_v38 = vld.sshfl [vmem:[#allocation2 + $0x24] sm:$0x33 pattern:$0x75316420]  ;;  %v4820_v22 = vcombine.high %v11377_v34, %v11377_v34  ;;  %v14335_v51 = vrot.slane %v11377_v34, %v12306_v24  ;;  %948 = vst.msk [vmem:[#allocation2 + $0x58] sm:$0xf] %vm422_vm1, %v694_v7 }
 0x175   : > { %v11379_v3 = vld.sshfl [vmem:[#allocation2 + $0x28] sm:$0x33 pattern:$0x75316420]  ;;  %v14341_v13 = vrot.slane %v4796_v40, %v12306_v24  ;;  %v14345_v21 = vcombine.high %v14329_v37, %v14329_v37  ;;  %v4844_v18 = vcombine.high %v11378_v38, %v11378_v38  ;;  %v14348_v4 = vrot.slane %v11378_v38, %v12306_v24 }
 0x176   : > { %v14351_v31 = vrot.slane %v4820_v22, %v12306_v24  ;;  %v14355_v56 = vcombine.high %v14335_v51, %v14335_v51  ;;  %v4868_v30 = vcombine.high %v11379_v3, %v11379_v3  ;;  %v14358_v63 = vrot.slane %v11379_v3, %v12306_v24 }
 0x177   : > { %v14362_v2 = vcombine.high %v14341_v13, %v14341_v13  ;;  %v14365_v59 = vrot.slane %v4844_v18, %v12306_v24  ;;  %v14369_v60 = vcombine.high %v14348_v4, %v14348_v4  ;;  %v5179_v32 = vrot.slane %v14329_v37, %v12306_v24 }
 0x178   : > { %v14375_v26 = vcombine.high %v14351_v31, %v14351_v31  ;;  %v14378_v54 = vrot.slane %v4868_v30, %v12306_v24  ;;  %v14382_v61 = vcombine.high %v14358_v63, %v14358_v63  ;;  %v5193_v52 = vrot.slane %v14341_v13, %v12306_v24 }
 0x179   : > { %v14388_v17 = vcombine.high %v14365_v59, %v14365_v59  ;;  %v5186_v9 = vrot.slane %v5179_v32, %v12306_v24  ;;  %v5207_v25 = vrot.slane %v14345_v21, %v12306_v24  ;;  %v5221_v35 = vrot.slane %v14362_v2, %v12306_v24  ;;  %v11381_v45 = vld.sshfl [vmem:[#allocation2 + $0x40] sm:$0x33 pattern:$0x75316420] }
 0x17a   : > { %v14397_v5 = vcombine.high %v14378_v54, %v14378_v54  ;;  %v14400_v44 = vrot.slane %v5193_v52, %v12306_v24  ;;  %v5235_v27 = vrot.slane %v14335_v51, %v12306_v24  ;;  %v5249_v16 = vrot.slane %v14351_v31, %v12306_v24 }
 0x17b   : > { %v14407_v55 = vrot.slane %v5207_v25, %v12306_v24  ;;  %v14410_v43 = vrot.slane %v5221_v35, %v12306_v24  ;;  %v5263_v49 = vrot.slane %v14355_v56, %v12306_v24  ;;  %v5277_v50 = vrot.slane %v14375_v26, %v12306_v24 }
 0x17c   : > { %17431 = vst [vmem:[#allocation54_spill] sm:$0xff] %v14400_v44  ;;  %v14417_v34 = vrot.slane %v5235_v27, %v12306_v24  ;;  %v14420_v40 = vrot.slane %v5249_v16, %v12306_v24  ;;  %v5291_v7 = vrot.slane %v14348_v4, %v12306_v24  ;;  %v5305_v38 = vrot.slane %v14365_v59, %v12306_v24 }
 0x17d   : > { %17432 = vst [vmem:[#allocation19_spill] sm:$0xff] %v14407_v55  ;;  %17433 = vst [vmem:[#allocation55_spill] sm:$0xff] %v14410_v43  ;;  %v14427_v22 = vrot.slane %v5263_v49, %v12306_v24  ;;  %v14430_v3 = vrot.slane %v5277_v50, %v12306_v24  ;;  %v5319_v18 = vrot.slane %v14369_v60, %v12306_v24  ;;  %v6069_v36 = vunpack.c.l.b16 %v5186_v9 }
 0x17e   : > { %17434 = vst [vmem:[#allocation57_spill] sm:$0xff] %v14417_v34  ;;  %17435 = vst [vmem:[#allocation59_spill] sm:$0xff] %v14420_v40  ;;  %v5333_v30 = vrot.slane %v14388_v17, %v12306_v24  ;;  %v5298_v32 = vrot.slane %v5291_v7, %v12306_v24  ;;  %v14438_v52 = vrot.slane %v5305_v38, %v12306_v24  ;;  %v17447_v12 = vunpack.c.l.b16 %v14410_v43 }
 0x17f   : > { %17436 = vst [vmem:[#allocation10_spill] sm:$0xff] %v14427_v22  ;;  %17437 = vst [vmem:[#allocation23_spill] sm:$0xff] %v14430_v3  ;;  %v5347_v25 = vrot.slane %v14358_v63, %v12306_v24  ;;  %v5361_v35 = vrot.slane %v14378_v54, %v12306_v24  ;;  %v14445_v27 = vrot.slane %v5319_v18, %v12306_v24  ;;  %v17449_v39 = vunpack.c.l.b16 %v14420_v40 }
 0x180   : > { %17438 = vst [vmem:[#allocation34_spill] sm:$0xff] %v14438_v52  ;;  %v14448_v16 = vrot.slane %v5333_v30, %v12306_v24  ;;  %v5375_v49 = vrot.slane %v14382_v61, %v12306_v24  ;;  %v5389_v50 = vrot.slane %v14397_v5, %v12306_v24  ;;  %v6077_v42 = vunpack.c.l.b16 %v5298_v32 }
 0x181   : > { %17439 = vst [vmem:[#allocation52_spill] sm:$0xff] %v14445_v27  ;;  %v14455_v7 = vrot.slane %v5347_v25, %v12306_v24  ;;  %v14458_v38 = vrot.slane %v5361_v35, %v12306_v24  ;;  %v11380_v25 = vld.sshfl [vmem:[#allocation2 + $0x3c] sm:$0x33 pattern:$0x75316420]  ;;  %v17445_v35 = vunpack.c.l.b16 %v14400_v44  ;;  %v17446_v32 = vunpack.c.l.b16 %v14407_v55 }
 0x182   : > { %17440 = vst [vmem:[#allocation43_spill] sm:$0xff] %v14448_v16  ;;  %v14462_v18 = vrot.slane %v5375_v49, %v12306_v24  ;;  %v14465_v30 = vrot.slane %v5389_v50, %v12306_v24  ;;  %v6137_v49 = vrot.slane %v17447_v12, 5  ;;  %v17448_v50 = vunpack.c.l.b16 %v14417_v34 }
 0x183   : > { %17441 = vst [vmem:[#allocation9_spill] sm:$0xff] %v14455_v7  ;;  %17442 = vst [vmem:[#allocation17_spill] sm:$0xff] %v14458_v38  ;;  %v6133_v62 = vrot.slane %v17445_v35, 7  ;;  %v6135_v9 = vrot.slane %v17446_v32, 6  ;;  %v6141_v8 = vrot.slane %v17449_v39, 3  ;;  %v17450_v14 = vunpack.c.l.b16 %v14427_v22 }
 0x184   : > { %17443 = vst [vmem:[#allocation30_spill] sm:$0xff] %v14462_v18  ;;  %17444 = vst [vmem:[#allocation32_spill] sm:$0xff] %v14465_v30  ;;  %v6139_v48 = vrot.slane %v17448_v50, 4  ;;  %v17451_v47 = vunpack.c.l.b16 %v14430_v3  ;;  %v17452_v35 = vunpack.c.l.b16 %v14438_v52  ;;  %v17453_v12 = vunpack.c.l.b16 %v14445_v27 }
 0x185   : > { %v6143_v10 = vrot.slane %v17450_v14, 2  ;;  %v6134_v32 = vsel %vm3089_vm10, %v6133_v62, %v6069_v36  ;;  %v17454_v50 = vunpack.c.l.b16 %v14448_v16  ;;  %v17455_v40 = vunpack.c.l.b16 %v14455_v7 }
 0x186   : > { %v6145_v58 = vrot.slane %v17451_v47, 1  ;;  %v6147_v1 = vrot.slane %v17452_v35, 7  ;;  %v6149_v44 = vrot.slane %v17453_v12, 6  ;;  %v6136_v22 = vsel %vm3092_vm11, %v6135_v9, %v6134_v32 }
 0x187   : > { %v6151_v34 = vrot.slane %v17454_v50, 5  ;;  %v6153_v39 = vrot.slane %v17455_v40, 4  ;;  %v17456_v47 = vunpack.c.l.b16 %v14458_v38  ;;  %v17457_v35 = vunpack.c.l.b16 %v14462_v18 }
 0x188   : > { %v6148_v14 = vsel %vm3089_vm10, %v6147_v1, %v6077_v42  ;;  %v6138_v36 = vsel %vm3095_vm13, %v6137_v49, %v6136_v22  ;;  %v17458_v12 = vunpack.c.l.b16 %v14465_v30  ;;  %v4892_v16 = vcombine.high %v11380_v25, %v11380_v25 }
 0x189   : > { %v6155_v3 = vrot.slane %v17456_v47, 3  ;;  %v6157_v52 = vrot.slane %v17457_v35, 2  ;;  %v6150_v62 = vsel %vm3092_vm11, %v6149_v44, %v6148_v14  ;;  %v6140_v40 = vsel %vm3098_vm15, %v6139_v48, %v6138_v36  ;;  %v11382_v35 = vld.sshfl [vmem:[#allocation2 + $0x54] sm:$0x33 pattern:$0x75316420] }
 0x18a   : > { %v6159_v50 = vrot.slane %v17458_v12, 1  ;;  %v6152_v9 = vsel %vm3095_vm13, %v6151_v34, %v6150_v62  ;;  %v14516_v1 = vrot.slane %v11380_v25, %v12306_v24  ;;  %v4916_v42 = vcombine.high %v11381_v45, %v11381_v45  ;;  %v11383_v34 = vld.sshfl [vmem:[#allocation2 + $0x58] sm:$0x33 pattern:$0x75316420] }
 0x18b   : > { %v6142_v32 = vsel %vm3101_vm5, %v6141_v8, %v6140_v40  ;;  %v6154_v47 = vsel %vm3098_vm15, %v6153_v39, %v6152_v9  ;;  %v14521_v22 = vrot.slane %v4892_v16, %v12306_v24  ;;  %v14524_v44 = vrot.slane %v11381_v45, %v12306_v24 }
 0x18c   : > { %v6144_v49 = vsel %vm3104_vm2, %v6143_v10, %v6142_v32  ;;  %v6156_v48 = vsel %vm3101_vm5, %v6155_v3, %v6154_v47  ;;  %v14530_v25 = vcombine.high %v14516_v1, %v14516_v1  ;;  %v14533_v8 = vrot.slane %v4916_v42, %v12306_v24 }
 0x18d   : > { %17459 = vst [vmem:[#allocation38_spill] sm:$0xff] %v14524_v44  ;;  %v6146_v39 = vsel %vm3107_vm6, %v6145_v58, %v6144_v49  ;;  %v6158_v16 = vsel %vm3104_vm2, %v6157_v52, %v6156_v48  ;;  %v14539_v45 = vcombine.high %v14521_v22, %v14521_v22  ;;  %v14543_v10 = vcombine.high %v14524_v44, %v14524_v44 }
 0x18e   : > { %17460 = vst [vmem:[#allocation31_spill] sm:$0xff] %v14533_v8  ;;  %v6160_v3 = vsel %vm3107_vm6, %v6159_v50, %v6158_v16  ;;  %v14548_v14 = vcombine.high %v14533_v8, %v14533_v8  ;;  %v4940_v36 = vcombine.high %v11382_v35, %v11382_v35  ;;  %v14551_v62 = vrot.slane %v11382_v35, %v12306_v24 }
 0x18f   : > { %17461 = vst [vmem:[#allocation33_spill] sm:$0xff] %v14539_v45  ;;  %17462 = vst [vmem:[#allocation35_spill] sm:$0xff] %v14543_v10  ;;  %v6245_v58 = vpack.c.b16 %v6160_v3, %v6146_v39  ;;  %v4964_v52 = vcombine.high %v11383_v34, %v11383_v34  ;;  %v14554_v12 = vrot.slane %v11383_v34, %v12306_v24 }
 0x190   : > { %17463 = vst [vmem:[#allocation36_spill] sm:$0xff] %v14548_v14  ;;  %17464 = vst [vmem:[#allocation40_spill] sm:$0xff] %v14551_v62  ;;  %v5403_v40 = vrot.slane %v14516_v1, %v12306_v24  ;;  %v14559_v9 = vrot.slane %v4940_v36, %v12306_v24  ;;  %v14563_v50 = vcombine.high %v14551_v62, %v14551_v62 }
 0x191   : > { %17465 = vst [vmem:[#allocation56_spill] sm:$0xff] %v14554_v12  ;;  %v5417_v42 = vrot.slane %v14521_v22, %v12306_v24  ;;  %v5431_v32 = vrot.slane %v14530_v25, %v12306_v24  ;;  %11756 = vmatprep.mubr.msk.bf16.mxu0 %vm3211_vm8, %v6245_v58  ;;  %v14571_v47 = vrot.slane %v4964_v52, %v12306_v24 }
 0x192   : > { %17466 = vst [vmem:[#allocation58_spill] sm:$0xff] %v14559_v9  ;;  %17467 = vst [vmem:[#allocation41_spill] sm:$0xff] %v14563_v50  ;;  %v14575_v35 = vcombine.high %v14554_v12, %v14554_v12  ;;  %v5410_v49 = vrot.slane %v5403_v40, %v12306_v24  ;;  %v5445_v48 = vrot.slane %v14539_v45, %v12306_v24 }
 0x193   : > { %17468 = vst [vmem:[#allocation46_spill] sm:$0xff] %v14571_v47  ;;  %v14582_v34 = vcombine.high %v14559_v9, %v14559_v9  ;;  %v14585_v39 = vrot.slane %v5417_v42, %v12306_v24  ;;  %v14588_v16 = vrot.slane %v5431_v32, %v12306_v24  ;;  %v5459_v3 = vrot.slane %v14524_v44, %v12306_v24 }
 0x194   : > { %17469 = vst [vmem:[#allocation44_spill] sm:$0xff] %v14575_v35  ;;  %v14594_v36 = vcombine.high %v14571_v47, %v14571_v47  ;;  %v14597_v58 = vrot.slane %v5445_v48, %v12306_v24  ;;  %v5473_v52 = vrot.slane %v14533_v8, %v12306_v24  ;;  %v5487_v40 = vrot.slane %v14543_v10, %v12306_v24 }
 0x195   : > { %17470 = vst [vmem:[#allocation37_spill] sm:$0xff] %v14582_v34  ;;  %17471 = vst [vmem:[#allocation45_spill] sm:$0xff] %v14585_v39  ;;  %v14604_v42 = vrot.slane %v5459_v3, %v12306_v24  ;;  %v5501_v32 = vrot.slane %v14548_v14, %v12306_v24  ;;  %v5515_v30 = vrot.slane %v14551_v62, %v12306_v24 }
 0x196   : > { %17472 = vst [vmem:[#allocation47_spill] sm:$0xff] %v14588_v16  ;;  %17473 = vst [vmem:[#allocation14_spill] sm:$0xff] %v14594_v36  ;;  %v5529_v18 = vrot.slane %v14559_v9, %v12306_v24  ;;  %v14613_v48 = vrot.slane %v5473_v52, %v12306_v24  ;;  %v14616_v38 = vrot.slane %v5487_v40, %v12306_v24  ;;  %v17488_v14 = vunpack.c.l.b16 %v14597_v58 }
 0x197   : > { %17474 = vst [vmem:[#allocation11_spill] sm:$0xff] %v14597_v58  ;;  %17475 = vst [vmem:[#allocation60_spill] sm:$0xff] %v14604_v42  ;;  %v5543_v7 = vrot.slane %v14563_v50, %v12306_v24  ;;  %v5557_v3 = vrot.slane %v14582_v34, %v12306_v24  ;;  %v14623_v27 = vrot.slane %v5501_v32, %v12306_v24  ;;  %v6085_v50 = vunpack.c.l.b16 %v5410_v49 }
 0x198   : > { %17476 = vst [vmem:[#allocation61_spill] sm:$0xff] %v14613_v48  ;;  %17477 = vst [vmem:[#allocation62_spill] sm:$0xff] %v14616_v38  ;;  %v5522_v43 = vrot.slane %v5515_v30, %v12306_v24  ;;  %v14627_v55 = vrot.slane %v5529_v18, %v12306_v24  ;;  %v5571_v52 = vrot.slane %v14554_v12, %v12306_v24  ;;  %v17487_v12 = vunpack.c.l.b16 %v14588_v16 }
 0x199   : > { %17478 = vst [vmem:[#allocation63_spill] sm:$0xff] %v14623_v27  ;;  %v14632_v40 = vrot.slane %v5543_v7, %v12306_v24  ;;  %v14635_v9 = vrot.slane %v5557_v3, %v12306_v24  ;;  %v5585_v34 = vrot.slane %v14571_v47, %v12306_v24  ;;  %v5599_v32 = vrot.slane %v14575_v35, %v12306_v24 }
 0x19a   : > { %17479 = vst [vmem:[#allocation64_spill] sm:$0xff] %v14627_v55  ;;  %v14642_v30 = vrot.slane %v5571_v52, %v12306_v24  ;;  %v5613_v18 = vrot.slane %v14594_v36, %v12306_v24  ;;  %v17486_v36 = vunpack.c.l.b16 %v14585_v39  ;;  %v6165_v8 = vrot.slane %v17488_v14, 5 }
 0x19b   : > { %17480 = vst [vmem:[#allocation65_spill] sm:$0xff] %v14632_v40  ;;  %17481 = vst [vmem:[#allocation66_spill] sm:$0xff] %v14635_v9  ;;  %v14648_v7 = vrot.slane %v5585_v34, %v12306_v24  ;;  %v14651_v3 = vrot.slane %v5599_v32, %v12306_v24  ;;  %v6093_v34 = vunpack.c.l.b16 %v5522_v43  ;;  %v6163_v43 = vrot.slane %v17487_v12, 6 }
 0x19c   : > { %17482 = vst [vmem:[#allocation67_spill] sm:$0xff] %v14642_v30  ;;  %v14656_v35 = vrot.slane %v5613_v18, %v12306_v24  ;;  %v6161_v49 = vrot.slane %v17486_v36, 7  ;;  %v17489_v32 = vunpack.c.l.b16 %v14604_v42  ;;  %v17490_v62 = vunpack.c.l.b16 %v14613_v48 }
 0x19d   : > { %17483 = vst [vmem:[#allocation68_spill] sm:$0xff] %v14648_v7  ;;  %17484 = vst [vmem:[#allocation69_spill] sm:$0xff] %v14651_v3  ;;  %v17491_v18 = vunpack.c.l.b16 %v14616_v38  ;;  %v17492_v52 = vunpack.c.l.b16 %v14623_v27  ;;  %v17493_v39 = vunpack.c.l.b16 %v14627_v55  ;;  %v17494_v58 = vunpack.c.l.b16 %v14632_v40 }
 0x19e   : > { %17485 = vst [vmem:[#allocation70_spill] sm:$0xff] %v14656_v35  ;;  %v6167_v47 = vrot.slane %v17489_v32, 4  ;;  %v6169_v44 = vrot.slane %v17490_v62, 3  ;;  %v6162_v36 = vsel %vm3089_vm10, %v6161_v49, %v6085_v50  ;;  %v17495_v42 = vunpack.c.l.b16 %v14635_v9 }
 0x19f   : > { %v6171_v10 = vrot.slane %v17491_v18, 2  ;;  %v6173_v45 = vrot.slane %v17492_v52, 1  ;;  %v6175_v12 = vrot.slane %v17493_v39, 7  ;;  %v6177_v14 = vrot.slane %v17494_v58, 6 }
 0x1a0   : > { %v6179_v32 = vrot.slane %v17495_v42, 5  ;;  %v6164_v48 = vsel %vm3092_vm11, %v6163_v43, %v6162_v36  ;;  %v17496_v62 = vunpack.c.l.b16 %v14642_v30  ;;  %v17497_v18 = vunpack.c.l.b16 %v14648_v7 }
 0x1a1   : > { %v17498_v52 = vunpack.c.l.b16 %v14651_v3  ;;  %v6166_v49 = vsel %vm3095_vm13, %v6165_v8, %v6164_v48  ;;  %v6176_v39 = vsel %vm3089_vm10, %v6175_v12, %v6093_v34  ;;  %v17499_v58 = vunpack.c.l.b16 %v14656_v35 }
 0x1a2   : > { %v6181_v38 = vrot.slane %v17496_v62, 4  ;;  %v6183_v27 = vrot.slane %v17497_v18, 3  ;;  %v411_v42 = vmax.f32 %v14323_v29, 0.0  ;;  %v6168_v43 = vsel %vm3098_vm15, %v6167_v47, %v6166_v49 }
 0x1a3   : > { %v6185_v50 = vrot.slane %v17498_v52, 2  ;;  %v6187_v55 = vrot.slane %v17499_v58, 1  ;;  %v6178_v36 = vsel %vm3092_vm11, %v6177_v14, %v6176_v39  ;;  %v17500_v62 = vmax.f32 %v14311_v28, 0.0 }
 0x1a4   : > { %v17501_v3 = vmax.f32 %v14314_v19, 0.0  ;;  %v6170_v8 = vsel %vm3101_vm5, %v6169_v44, %v6168_v43  ;;  %v6180_v48 = vsel %vm3095_vm13, %v6179_v32, %v6178_v36  ;;  %v17502_v34 = vmax.f32 %v14320_v20, 0.0  ;;  %v305_v36 = vld [vmem:[%s12292_s10 + $0xc8] sm:$0xff] }
 0x1a5   : > { %v11605_v18 = vpack.c.bf16 %v17500_v62, %v17500_v62  ;;  %v11610_v47 = vpack.c.bf16 %v411_v42, %v411_v42  ;;  %v6172_v12 = vsel %vm3104_vm2, %v6171_v10, %v6170_v8  ;;  %v6182_v28 = vsel %vm3098_vm15, %v6181_v38, %v6180_v48  ;;  %v308_v42 = vld [vmem:[%s12292_s10 + $0xe0] sm:$0xff]  ;;  %v959_v8 = vld [vmem:[#allocation2 + $0x6c] sm:$0xf] }
 0x1a6   : > { %v11606_v52 = vpack.c.bf16 %v17501_v3, %v17501_v3  ;;  %v11609_v29 = vpack.c.bf16 %v17502_v34, %v17502_v34  ;;  %v6174_v19 = vsel %vm3107_vm6, %v6173_v45, %v6172_v12  ;;  %v6184_v44 = vsel %vm3101_vm5, %v6183_v27, %v6182_v28  ;;  %v309_v48 = vld [vmem:[%s12292_s10 + $0xe8] sm:$0xff]  ;;  %v973_v28 = vld [vmem:[#allocation2 + $0x84] sm:$0xf] }
 0x1a7   : > { %v714_v14 = vshrl.u32 %v11605_v18, 16  ;;  %v717_v49 = vshll.u32 %v11605_v18, 16  ;;  %v6186_v32 = vsel %vm3104_vm2, %v6185_v50, %v6184_v44  ;;  %v756_v38 = vshrl.u32 %v11610_v47, 16 }
 0x1a8   : > { %v722_v3 = vshrl.u32 %v11606_v52, 16  ;;  %v725_v39 = vshll.u32 %v11606_v52, 16  ;;  %v748_v58 = vshrl.u32 %v11609_v29, 16  ;;  %v751_v43 = vshll.u32 %v11609_v29, 16 }
 0x1a9   : > { %v716_v20 = vrot.slane %v714_v14, 7  ;;  %v6188_v10 = vsel %vm3107_vm6, %v6187_v55, %v6186_v32  ;;  %v759_v18 = vshll.u32 %v11610_v47, 16  ;;  %v14727_v50 = vrot.slane %v756_v38, 7  ;;  %v1071_v55 = vld [vmem:[%s16863_s3 + $0xa] sm:$0x3] }
 0x1aa   : > { %v14723_v62 = vrot.slane %v722_v3, 7  ;;  %v6246_v45 = vpack.c.b16 %v6188_v10, %v6174_v19  ;;  %v750_v12 = vrot.slane %v748_v58, 7  ;;  %v344_v29 = vmul.f32 %v14237_v57, %v305_v36  ;;  %v907_v58 = vld [vmem:[#allocation2 + $0x14] sm:$0x1] }
 0x1ab   : > { %v719_v34 = vor.u32 %v717_v49, %v716_v20  ;;  %v720_v27 = vrot.slane %v716_v20, 4  ;;  %17503 = vst [vmem:[#allocation71_spill] sm:$0xff] %v14727_v50  ;;  %v347_v14 = vmul.f32 %v14237_v57, %v308_v42  ;;  %v348_v44 = vmul.f32 %v14237_v57, %v309_v48  ;;  %v921_v42 = vld [vmem:[#allocation2 + $0x2c] sm:$0x1] }
 0x1ac   : > { %v727_v52 = vor.u32 %v725_v39, %v14723_v62  ;;  %11757 = vmatmul.mubr.msk.bf16.vlgmr.msra.gmra.mrb[0].mxu0 %vm3211_vm8, %v6246_v45  ;;  %v753_v47 = vor.u32 %v751_v43, %v750_v12  ;;  %v754_v19 = vrot.slane %v750_v12, 4  ;;  %v761_v39 = vor.u32 %v759_v18, %v14727_v50 }
 0x1ad   : > { %v960_v49 = vsel %vm12334_vm14, %v719_v34, %v959_v8  ;;  %11765 = vmatpush3.bf16.msra.mxu0 %v14294_v33  ;;  %v382_v32 = vadd.f32 %v14251_v41, %v14326_v23  ;;  %v383_v20 = vadd.f32 %v14251_v41, %v344_v29  ;;  %v386_v57 = vadd.f32 %v14251_v41, %v347_v14 }
 0x1ae   : > { %v728_v3 = vsel %vm12328_vm12, %v720_v27, %v727_v52  ;;  %961 = vst [vmem:[#allocation2 + $0x6c] sm:$0xf] %v960_v49  ;;  %v974_v43 = vsel %vm12334_vm14, %v753_v47, %v973_v28  ;;  %v387_v33 = vadd.f32 %v14251_v41, %v348_v44  ;;  %v593_v36 = vrot.slane %v14271_v11, 4  ;;  %12057 = vmatprep.subr.msk.bf16.mxu0 %vm3224_vm0, %v1071_v55 }
 0x1af   : > { %962 = vst.msk [vmem:[#allocation2 + $0x70] sm:$0xf] %vm422_vm1, %v728_v3  ;;  %v762_v23 = vsel %vm12328_vm12, %v754_v19, %v761_v39  ;;  %975 = vst [vmem:[#allocation2 + $0x84] sm:$0xf] %v974_v43  ;;  %v414_v10 = vmax.f32 %v382_v32, 0.0  ;;  %v415_v38 = vmax.f32 %v383_v20, 0.0 }
 0x1b0   : > { %v627_v18 = vrot.slane %v14273_v53, 4  ;;  %976 = vst.msk [vmem:[#allocation2 + $0x88] sm:$0xf] %vm422_vm1, %v762_v23  ;;  %v418_v8 = vmax.f32 %v386_v57, 0.0  ;;  %v419_v48 = vmax.f32 %v387_v33, 0.0  ;;  %v908_v41 = vsel %vm12350_vm4, %v593_v36, %v907_v58 }
 0x1b1   : > { %v6458_v11 = vshrl.u32 %v14329_v37, 16  ;;  %v14759_v34 = vpack.c.bf16 %v414_v10, %v414_v10  ;;  %v14761_v27 = vpack.c.bf16 %v415_v38, %v415_v38  ;;  %909 = vst [vmem:[#allocation2 + $0x14] sm:$0x1] %v908_v41  ;;  %v6463_v52 = vshll.u32 %v14341_v13, 16 }
 0x1b2   : > { %v922_v12 = vsel %vm12350_vm4, %v627_v18, %v921_v42  ;;  %v14766_v53 = vpack.c.bf16 %v418_v8, %v418_v8  ;;  %v14768_v28 = vpack.c.bf16 %v419_v48, %v419_v48  ;;  %v6466_v29 = vshrl.u32 %v14341_v13, 16 }
 0x1b3   : > { %923 = vst [vmem:[#allocation2 + $0x2c] sm:$0x1] %v922_v12  ;;  %v6471_v14 = vshll.u32 %v14345_v21, 16  ;;  %v782_v37 = vshrl.u32 %v14759_v34, 16  ;;  %v790_v47 = vshrl.u32 %v14761_v27, 16  ;;  %v14780_v32 = vsel %vm12457_vm9, %v6458_v11, %v6463_v52 }
 0x1b4   : > { %v816_v44 = vshrl.u32 %v14766_v53, 16 }
 0x1b5   : > { %v11384_v49 = vld.sshfl [vmem:[#allocation2 + $0x6c] sm:$0x33 pattern:$0x75316420]  ;;  %v14784_v13 = vsel %vm12457_vm9, %v6466_v29, %v6471_v14  ;;  %v14789_v57 = vrot.slane %v782_v37, 7  ;;  %v14791_v33 = vrot.slane %v790_v47, 7 }
 0x1b6   : > { %v11385_v20 = vld.sshfl [vmem:[#allocation2 + $0x70] sm:$0x33 pattern:$0x75316420]  ;;  %v4988_v58 = vcombine.high %v11384_v49, %v11384_v49  ;;  %v14787_v43 = vrot.slane %v11384_v49, %v12306_v24  ;;  %v14796_v10 = vrot.slane %v816_v44, 7 }
 0x1b7   : > { %v11386_v36 = vld.sshfl [vmem:[#allocation2 + $0x84] sm:$0x33 pattern:$0x75316420]  ;;  %v5012_v42 = vcombine.high %v11385_v20, %v11385_v20  ;;  %v14794_v23 = vrot.slane %v11385_v20, %v12306_v24 }
 0x1b8   : > { %17506 = vst [vmem:[#allocation7_spill] sm:$0xff] %v14787_v43  ;;  %v11387_v18 = vld.sshfl [vmem:[#allocation2 + $0x88] sm:$0x33 pattern:$0x75316420]  ;;  %v14800_v8 = vrot.slane %v4988_v58, %v12306_v24  ;;  %v14804_v48 = vcombine.high %v14787_v43, %v14787_v43  ;;  %v5036_v41 = vcombine.high %v11386_v36, %v11386_v36  ;;  %v14807_v11 = vrot.slane %v11386_v36, %v12306_v24 }
 0x1b9   : > { %17507 = vst [vmem:[#allocation21_spill] sm:$0xff] %v14794_v23  ;;  %v14810_v12 = vrot.slane %v5012_v42, %v12306_v24  ;;  %v14814_v52 = vcombine.high %v14794_v23, %v14794_v23  ;;  %v5060_v29 = vcombine.high %v11387_v18, %v11387_v18  ;;  %v14817_v14 = vrot.slane %v11387_v18, %v12306_v24 }
 0x1ba   : > { %17508 = vst [vmem:[#allocation72_spill] sm:$0xff] %v14800_v8  ;;  %17509 = vst [vmem:[#allocation73_spill] sm:$0xff] %v14804_v48  ;;  %v14821_v37 = vcombine.high %v14800_v8, %v14800_v8  ;;  %v14824_v47 = vrot.slane %v5036_v41, %v12306_v24  ;;  %v14828_v49 = vcombine.high %v14807_v11, %v14807_v11 }
 0x1bb   : > { %17510 = vst [vmem:[#allocation74_spill] sm:$0xff] %v14807_v11  ;;  %17511 = vst [vmem:[#allocation75_spill] sm:$0xff] %v14810_v12  ;;  %v5627_v44 = vrot.slane %v14787_v43, %v12306_v24  ;;  %v14834_v20 = vcombine.high %v14810_v12, %v14810_v12  ;;  %v14837_v58 = vrot.slane %v5060_v29, %v12306_v24 }
 0x1bc   : > { %17512 = vst [vmem:[#allocation76_spill] sm:$0xff] %v14814_v52  ;;  %17513 = vst [vmem:[#allocation77_spill] sm:$0xff] %v14817_v14  ;;  %v14841_v36 = vcombine.high %v14817_v14, %v14817_v14  ;;  %v5641_v42 = vrot.slane %v14800_v8, %v12306_v24  ;;  %v14847_v18 = vcombine.high %v14824_v47, %v14824_v47 }
 0x1bd   : > { %17514 = vst [vmem:[#allocation78_spill] sm:$0xff] %v14821_v37  ;;  %17515 = vst [vmem:[#allocation79_spill] sm:$0xff] %v14824_v47  ;;  %v5634_v41 = vrot.slane %v5627_v44, %v12306_v24  ;;  %v5655_v38 = vrot.slane %v14804_v48, %v12306_v24  ;;  %v5669_v29 = vrot.slane %v14821_v37, %v12306_v24 }
 0x1be   : > { %17516 = vst [vmem:[#allocation80_spill] sm:$0xff] %v14828_v49  ;;  %17517 = vst [vmem:[#allocation81_spill] sm:$0xff] %v14834_v20  ;;  %v14856_v3 = vcombine.high %v14837_v58, %v14837_v58  ;;  %v14859_v19 = vrot.slane %v5641_v42, %v12306_v24  ;;  %v5683_v55 = vrot.slane %v14794_v23, %v12306_v24 }
 0x1bf   : > { %17518 = vst [vmem:[#allocation82_spill] sm:$0xff] %v14837_v58  ;;  %17519 = vst [vmem:[#allocation83_spill] sm:$0xff] %v14841_v36  ;;  %v5697_v35 = vrot.slane %v14810_v12, %v12306_v24  ;;  %v14866_v44 = vrot.slane %v5655_v38, %v12306_v24  ;;  %v14869_v7 = vrot.slane %v5669_v29, %v12306_v24 }
 0x1c0   : > { %17520 = vst [vmem:[#allocation84_spill] sm:$0xff] %v14847_v18  ;;  %17521 = vst [vmem:[#allocation85_spill] sm:$0xff] %v14856_v3  ;;  %v5711_v30 = vrot.slane %v14814_v52, %v12306_v24  ;;  %v5725_v9 = vrot.slane %v14834_v20, %v12306_v24  ;;  %v14876_v42 = vrot.slane %v5683_v55, %v12306_v24 }
 0x1c1   : > { %17522 = vst [vmem:[#allocation86_spill] sm:$0xff] %v14859_v19  ;;  %17523 = vst [vmem:[#allocation87_spill] sm:$0xff] %v14866_v44  ;;  %v14879_v40 = vrot.slane %v5697_v35, %v12306_v24  ;;  %v5739_v16 = vrot.slane %v14807_v11, %v12306_v24  ;;  %v5753_v38 = vrot.slane %v14824_v47, %v12306_v24 }
 0x1c2   : > { %17524 = vst [vmem:[#allocation88_spill] sm:$0xff] %v14869_v7  ;;  %17525 = vst [vmem:[#allocation89_spill] sm:$0xff] %v14876_v42  ;;  %v14886_v29 = vrot.slane %v5711_v30, %v12306_v24  ;;  %v14889_v52 = vrot.slane %v5725_v9, %v12306_v24  ;;  %v5767_v20 = vrot.slane %v14828_v49, %v12306_v24  ;;  %v6101_v49 = vunpack.c.l.b16 %v5634_v41 }
 0x1c3   : > { %17526 = vst [vmem:[#allocation90_spill] sm:$0xff] %v14879_v40  ;;  %v5781_v55 = vrot.slane %v14847_v18, %v12306_v24  ;;  %v5746_v35 = vrot.slane %v5739_v16, %v12306_v24  ;;  %v14897_v12 = vrot.slane %v5753_v38, %v12306_v24  ;;  %v5795_v47 = vrot.slane %v14817_v14, %v12306_v24 }
 0x1c4   : > { %17527 = vst [vmem:[#allocation91_spill] sm:$0xff] %v14886_v29  ;;  %17528 = vst [vmem:[#allocation92_spill] sm:$0xff] %v14889_v52  ;;  %v5809_v30 = vrot.slane %v14837_v58, %v12306_v24  ;;  %v14904_v9 = vrot.slane %v5767_v20, %v12306_v24  ;;  %v5823_v18 = vrot.slane %v14841_v36, %v12306_v24  ;;  %v17537_v41 = vunpack.c.l.b16 %v14866_v44 }
 0x1c5   : > { %17529 = vst [vmem:[#allocation93_spill] sm:$0xff] %v14897_v12  ;;  %v14907_v11 = vrot.slane %v5781_v55, %v12306_v24  ;;  %v5837_v16 = vrot.slane %v14856_v3, %v12306_v24  ;;  %v14914_v38 = vrot.slane %v5795_v47, %v12306_v24  ;;  %v6109_v37 = vunpack.c.l.b16 %v5746_v35 }
 0x1c6   : > { %17530 = vst [vmem:[#allocation94_spill] sm:$0xff] %v14904_v9  ;;  %v14917_v14 = vrot.slane %v5809_v30, %v12306_v24  ;;  %v14921_v20 = vrot.slane %v5823_v18, %v12306_v24  ;;  %v17536_v47 = vunpack.c.l.b16 %v14859_v19  ;;  %v6191_v35 = vrot.slane %v17537_v41, 6 }
 0x1c7   : > { %17531 = vst [vmem:[#allocation95_spill] sm:$0xff] %v14907_v11  ;;  %17532 = vst [vmem:[#allocation96_spill] sm:$0xff] %v14914_v38  ;;  %v14924_v55 = vrot.slane %v5837_v16, %v12306_v24  ;;  %v17538_v58 = vunpack.c.l.b16 %v14869_v7  ;;  %v17539_v18 = vunpack.c.l.b16 %v14876_v42  ;;  %v17540_v48 = vunpack.c.l.b16 %v14879_v40 }
 0x1c8   : > { %17533 = vst [vmem:[#allocation97_spill] sm:$0xff] %v14917_v14  ;;  %17534 = vst [vmem:[#allocation98_spill] sm:$0xff] %v14921_v20  ;;  %v6189_v30 = vrot.slane %v17536_v47, 7  ;;  %v17541_v36 = vunpack.c.l.b16 %v14886_v29  ;;  %v17542_v3 = vunpack.c.l.b16 %v14889_v52  ;;  %v17543_v47 = vunpack.c.l.b16 %v14897_v12 }
 0x1c9   : > { %17535 = vst [vmem:[#allocation99_spill] sm:$0xff] %v14924_v55  ;;  %v6193_v8 = vrot.slane %v17538_v58, 5  ;;  %v6195_v16 = vrot.slane %v17539_v18, 4  ;;  %v6197_v43 = vrot.slane %v17540_v48, 3  ;;  %v17544_v7 = vunpack.c.l.b16 %v14904_v9 }
 0x1ca   : > { %v6199_v23 = vrot.slane %v17541_v36, 2  ;;  %v6201_v50 = vrot.slane %v17542_v3, 1  ;;  %v6203_v19 = vrot.slane %v17543_v47, 7  ;;  %v6190_v41 = vsel %vm3089_vm10, %v6189_v30, %v6101_v49 }
 0x1cb   : > { %v6205_v58 = vrot.slane %v17544_v7, 6  ;;  %v17545_v42 = vunpack.c.l.b16 %v14907_v11  ;;  %v17546_v40 = vunpack.c.l.b16 %v14914_v38  ;;  %v6192_v29 = vsel %vm3092_vm11, %v6191_v35, %v6190_v41  ;;  %v987_v35 = vld [vmem:[#allocation2 + $0x9c] sm:$0xf]  ;;  %v1001_v41 = vld [vmem:[#allocation2 + $0xb4] sm:$0xf] }
 0x1cc   : > { %v6204_v36 = vsel %vm3089_vm10, %v6203_v19, %v6109_v37  ;;  %v17547_v3 = vunpack.c.l.b16 %v14917_v14  ;;  %v17548_v47 = vunpack.c.l.b16 %v14921_v20  ;;  %v6194_v49 = vsel %vm3095_vm13, %v6193_v8, %v6192_v29 }
 0x1cd   : > { %v6207_v18 = vrot.slane %v17545_v42, 5  ;;  %v6209_v48 = vrot.slane %v17546_v40, 4  ;;  %v6206_v7 = vsel %vm3092_vm11, %v6205_v58, %v6204_v36  ;;  %v17549_v30 = vunpack.c.l.b16 %v14924_v55  ;;  %v11396_v58 = vld.sshfl [vmem:[#allocation2 + $0x14] sm:$0x1 pattern:$0x75316420] }
 0x1ce   : > { %v6211_v52 = vrot.slane %v17547_v3, 3  ;;  %v6213_v12 = vrot.slane %v17548_v47, 2  ;;  %v17550_v40 = vshll.u32 %v14759_v34, 16  ;;  %v6196_v19 = vsel %vm3098_vm15, %v6195_v16, %v6194_v49 }
 0x1cf   : > { %v6215_v42 = vrot.slane %v17549_v30, 1  ;;  %v6208_v37 = vsel %vm3095_vm13, %v6207_v18, %v6206_v7  ;;  %v788_v3 = vrot.slane %v14789_v57, 4  ;;  %v17551_v8 = vshll.u32 %v14761_v27, 16 }
 0x1d0   : > { %v787_v38 = vor.u32 %v17550_v40, %v14789_v57  ;;  %v6198_v36 = vsel %vm3101_vm5, %v6197_v43, %v6196_v19  ;;  %v6210_v47 = vsel %vm3098_vm15, %v6209_v48, %v6208_v37  ;;  %v17552_v34 = vshll.u32 %v14766_v53, 16  ;;  %v11397_v16 = vld.sshfl [vmem:[#allocation2 + $0x2c] sm:$0x1 pattern:$0x75316420] }
 0x1d1   : > { %v795_v29 = vor.u32 %v17551_v8, %v14791_v33  ;;  %v822_v40 = vrot.slane %v14796_v10, 4  ;;  %v6200_v18 = vsel %vm3104_vm2, %v6199_v23, %v6198_v36  ;;  %v6212_v57 = vsel %vm3101_vm5, %v6211_v52, %v6210_v47 }
 0x1d2   : > { %v821_v30 = vor.u32 %v17552_v34, %v14796_v10  ;;  %v17553_v49 = vshrl.u32 %v14768_v28, 16  ;;  %v6202_v43 = vsel %vm3107_vm6, %v6201_v50, %v6200_v18  ;;  %v6214_v48 = vsel %vm3104_vm2, %v6213_v12, %v6212_v57 }
 0x1d3   : > { %v796_v27 = vsel %vm12328_vm12, %v788_v3, %v795_v29  ;;  %v827_v53 = vshll.u32 %v14768_v28, 16  ;;  %v988_v10 = vsel %vm12334_vm14, %v787_v38, %v987_v35  ;;  %v6216_v23 = vsel %vm3107_vm6, %v6215_v42, %v6214_v48 }
 0x1d4   : > { %v14993_v7 = vrot.slane %v17553_v49, 7  ;;  %990 = vst.msk [vmem:[#allocation2 + $0xa0] sm:$0xf] %vm422_vm1, %v796_v27  ;;  %989 = vst [vmem:[#allocation2 + $0x9c] sm:$0xf] %v988_v10  ;;  %v1002_v52 = vsel %vm12334_vm14, %v821_v30, %v1001_v41  ;;  %v15005_v19 = vrot.slane %v11396_v58, %v12306_v24  ;;  %v15008_v50 = vrot.slane %v11397_v16, %v12306_v24 }
 0x1d5   : > { %v6247_v12 = vpack.c.b16 %v6216_v23, %v6202_v43  ;;  %1003 = vst [vmem:[#allocation2 + $0xb4] sm:$0xf] %v1002_v52  ;;  %v6474_v38 = vshrl.u32 %v14345_v21, 16  ;;  %v6479_v35 = vshll.u32 %v14362_v2, 16  ;;  %v6482_v42 = vshrl.u32 %v14362_v2, 16 }
 0x1d6   : > { %17554 = vst [vmem:[#allocation100_spill] sm:$0xff] %v15005_v19  ;;  %v829_v28 = vor.u32 %v827_v53, %v14993_v7  ;;  %v6487_v37 = vshll.u32 %v14335_v51, 16  ;;  %v6490_v41 = vshrl.u32 %v14335_v51, 16  ;;  %v6495_v3 = vshll.u32 %v14351_v31, 16 }
 0x1d7   : > { %11760 = vmatprep.mubr.msk.bf16.mxu0 %vm3211_vm8, %v6247_v12  ;;  %v15022_v29 = vsel %vm12457_vm9, %v6474_v38, %v6479_v35  ;;  %v6498_v21 = vshrl.u32 %v14351_v31, 16  ;;  %v6503_v58 = vshll.u32 %v14355_v56, 16  ;;  %v6506_v36 = vshrl.u32 %v14355_v56, 16 }
 0x1d8   : > { %v830_v8 = vsel %vm12328_vm12, %v822_v40, %v829_v28  ;;  %v15029_v51 = vsel %vm12457_vm9, %v6482_v42, %v6487_v37  ;;  %v15033_v2 = vsel %vm12457_vm9, %v6490_v41, %v6495_v3  ;;  %v6511_v47 = vshll.u32 %v14375_v26, 16 }
 0x1d9   : > { %1004 = vst.msk [vmem:[#allocation2 + $0xb8] sm:$0xf] %vm422_vm1, %v830_v8  ;;  %v15039_v34 = vsel %vm12457_vm9, %v6498_v21, %v6503_v58  ;;  %v6514_v31 = vshrl.u32 %v14375_v26, 16  ;;  %v6519_v30 = vshll.u32 %v15005_v19, 16  ;;  %v6523_v40 = vshrl.u32 %v14348_v4, 16 }
 0x1da   : > { %v15046_v18 = vsel %vm12457_vm9, %v6506_v36, %v6511_v47  ;;  %v6528_v57 = vshll.u32 %v14365_v59, 16 }
 0x1db   : > { %v11389_v16 = vld.sshfl [vmem:[#allocation2 + $0xa0] sm:$0x33 pattern:$0x75316420]  ;;  %v15057_v4 = vsel %vm12457_vm9, %v6514_v31, %v6519_v30 }
 0x1dc   : > { %v11388_v49 = vld.sshfl [vmem:[#allocation2 + $0x9c] sm:$0x33 pattern:$0x75316420]  ;;  %v5108_v43 = vcombine.high %v11389_v16, %v11389_v16  ;;  %v15053_v26 = vrot.slane %v11389_v16, %v12306_v24  ;;  %v15065_v52 = vsel %vm12457_vm9, %v6523_v40, %v6528_v57 }
 0x1dd   : > { %v11390_v53 = vld.sshfl [vmem:[#allocation2 + $0xb4] sm:$0x33 pattern:$0x75316420]  ;;  %v5084_v10 = vcombine.high %v11388_v49, %v11388_v49  ;;  %v15061_v23 = vrot.slane %v11388_v49, %v12306_v24 }
 0x1de   : > { %v15069_v28 = vrot.slane %v5108_v43, %v12306_v24  ;;  %v15073_v38 = vcombine.high %v15053_v26, %v15053_v26  ;;  %v5132_v35 = vcombine.high %v11390_v53, %v11390_v53  ;;  %v15076_v42 = vrot.slane %v11390_v53, %v12306_v24 }
 0x1df   : > { %v15079_v37 = vrot.slane %v5084_v10, %v12306_v24  ;;  %v15083_v41 = vcombine.high %v15061_v23, %v15061_v23  ;;  %v5851_v3 = vrot.slane %v15061_v23, %v12306_v24  ;;  %v5907_v8 = vrot.slane %v15053_v26, %v12306_v24 }
 0x1e0   : > { %17555 = vst [vmem:[#allocation101_spill] sm:$0xff] %v15073_v38  ;;  %17556 = vst [vmem:[#allocation102_spill] sm:$0xff] %v15076_v42  ;;  %v11391_v21 = vld.sshfl [vmem:[#allocation2 + $0xb8] sm:$0x33 pattern:$0x75316420]  ;;  %v15091_v58 = vcombine.high %v15069_v28, %v15069_v28  ;;  %v15094_v36 = vrot.slane %v5132_v35, %v12306_v24  ;;  %v15098_v47 = vcombine.high %v15076_v42, %v15076_v42 }
 0x1e1   : > { %v5921_v31 = vrot.slane %v15069_v28, %v12306_v24  ;;  %v15104_v30 = vcombine.high %v15079_v37, %v15079_v37  ;;  %v5156_v40 = vcombine.high %v11391_v21, %v11391_v21  ;;  %v15107_v16 = vrot.slane %v11391_v21, %v12306_v24 }
 0x1e2   : > { %17557 = vst [vmem:[#allocation103_spill] sm:$0xff] %v15091_v58  ;;  %17558 = vst [vmem:[#allocation104_spill] sm:$0xff] %v15094_v36  ;;  %v5858_v57 = vrot.slane %v5851_v3, %v12306_v24  ;;  %v15112_v49 = vcombine.high %v15094_v36, %v15094_v36  ;;  %v5865_v43 = vrot.slane %v15079_v37, %v12306_v24 }
 0x1e3   : > { %17559 = vst [vmem:[#allocation105_spill] sm:$0xff] %v15098_v47  ;;  %17560 = vst [vmem:[#allocation106_spill] sm:$0xff] %v15107_v16  ;;  %v5879_v53 = vrot.slane %v15083_v41, %v12306_v24  ;;  %v15119_v10 = vrot.slane %v5907_v8, %v12306_v24  ;;  %v15122_v35 = vrot.slane %v5156_v40, %v12306_v24 }
 0x1e4   : > { %17561 = vst [vmem:[#allocation107_spill] sm:$0xff] %v15112_v49  ;;  %v15126_v21 = vcombine.high %v15107_v16, %v15107_v16  ;;  %v5893_v3 = vrot.slane %v15104_v30, %v12306_v24  ;;  %v15131_v27 = vrot.slane %v5921_v31, %v12306_v24  ;;  %v15134_v12 = vrot.slane %v5865_v43, %v12306_v24 }
 0x1e5   : > { %17562 = vst [vmem:[#allocation108_spill] sm:$0xff] %v15119_v10  ;;  %17563 = vst [vmem:[#allocation109_spill] sm:$0xff] %v15122_v35  ;;  %v15137_v56 = vrot.slane %v5879_v53, %v12306_v24  ;;  %v5935_v8 = vrot.slane %v15073_v38, %v12306_v24  ;;  %v5949_v40 = vrot.slane %v15091_v58, %v12306_v24 }
 0x1e6   : > { %17564 = vst [vmem:[#allocation110_spill] sm:$0xff] %v15126_v21  ;;  %17565 = vst [vmem:[#allocation111_spill] sm:$0xff] %v15131_v27  ;;  %v15145_v48 = vcombine.high %v15122_v35, %v15122_v35  ;;  %v15148_v6 = vrot.slane %v5893_v3, %v12306_v24  ;;  %v5963_v31 = vrot.slane %v15076_v42, %v12306_v24 }
 0x1e7   : > { %17566 = vst [vmem:[#allocation112_spill] sm:$0xff] %v15134_v12  ;;  %v5977_v43 = vrot.slane %v15094_v36, %v12306_v24  ;;  %v15155_v53 = vrot.slane %v5935_v8, %v12306_v24  ;;  %v15158_v15 = vrot.slane %v5949_v40, %v12306_v24  ;;  %v5991_v55 = vrot.slane %v15098_v47, %v12306_v24 }
 0x1e8   : > { %17567 = vst [vmem:[#allocation113_spill] sm:$0xff] %v15145_v48  ;;  %17568 = vst [vmem:[#allocation114_spill] sm:$0xff] %v15148_v6  ;;  %v6005_v20 = vrot.slane %v15112_v49, %v12306_v24  ;;  %v5970_v3 = vrot.slane %v5963_v31, %v12306_v24  ;;  %v6019_v11 = vrot.slane %v15107_v16, %v12306_v24  ;;  %v6117_v16 = vunpack.c.l.b16 %v5858_v57 }
 0x1e9   : > { %17569 = vst [vmem:[#allocation115_spill] sm:$0xff] %v15155_v53  ;;  %17570 = vst [vmem:[#allocation116_spill] sm:$0xff] %v15158_v15  ;;  %v15166_v14 = vrot.slane %v5977_v43, %v12306_v24  ;;  %v6033_v8 = vrot.slane %v15122_v35, %v12306_v24  ;;  %v15173_v40 = vrot.slane %v5991_v55, %v12306_v24  ;;  %v17574_v57 = vunpack.c.l.b16 %v15137_v56 }
 0x1ea   : > { %v15176_v9 = vrot.slane %v6005_v20, %v12306_v24  ;;  %v6047_v44 = vrot.slane %v15126_v21, %v12306_v24  ;;  %v6061_v31 = vrot.slane %v15145_v48, %v12306_v24  ;;  %v15183_v43 = vrot.slane %v6019_v11, %v12306_v24 }
 0x1eb   : > { %17571 = vst [vmem:[#allocation117_spill] sm:$0xff] %v15166_v14  ;;  %v15186_v19 = vrot.slane %v6033_v8, %v12306_v24  ;;  %v6125_v47 = vunpack.c.l.b16 %v5970_v3  ;;  %v17573_v11 = vunpack.c.l.b16 %v15134_v12  ;;  %v6219_v3 = vrot.slane %v17574_v57, 6 }
 0x1ec   : > { %17572 = vst [vmem:[#allocation118_spill] sm:$0xff] %v15183_v43  ;;  %v15190_v55 = vrot.slane %v6047_v44, %v12306_v24  ;;  %v15193_v20 = vrot.slane %v6061_v31, %v12306_v24  ;;  %v17575_v35 = vunpack.c.l.b16 %v15148_v6  ;;  %v17576_v44 = vunpack.c.l.b16 %v15119_v10 }
 0x1ed   : > { %v6217_v8 = vrot.slane %v17573_v11, 7  ;;  %v17577_v36 = vunpack.c.l.b16 %v15131_v27  ;;  %v17578_v21 = vunpack.c.l.b16 %v15155_v53  ;;  %v17579_v48 = vunpack.c.l.b16 %v15158_v15 }
 0x1ee   : > { %v6221_v42 = vrot.slane %v17575_v35, 5  ;;  %v6223_v31 = vrot.slane %v17576_v44, 4  ;;  %v17580_v11 = vunpack.c.l.b16 %v15166_v14  ;;  %v17581_v6 = vunpack.c.l.b16 %v15173_v40 }
 0x1ef   : > { %v6225_v58 = vrot.slane %v17577_v36, 3  ;;  %v6227_v49 = vrot.slane %v17578_v21, 2  ;;  %v6229_v38 = vrot.slane %v17579_v48, 1  ;;  %v6218_v57 = vsel %vm3089_vm10, %v6217_v8, %v6117_v16 }
 0x1f0   : > { %v6231_v12 = vrot.slane %v17580_v11, 7  ;;  %v6233_v35 = vrot.slane %v17581_v6, 6  ;;  %v17582_v10 = vunpack.c.l.b16 %v15176_v9  ;;  %v17583_v27 = vunpack.c.l.b16 %v15183_v43 }
 0x1f1   : > { %v6220_v53 = vsel %vm3092_vm11, %v6219_v3, %v6218_v57  ;;  %v17584_v48 = vunpack.c.l.b16 %v15186_v19  ;;  %v17585_v11 = vunpack.c.l.b16 %v15190_v55  ;;  %v17586_v8 = vunpack.c.l.b16 %v15193_v20 }
 0x1f2   : > { %v6235_v44 = vrot.slane %v17582_v10, 5  ;;  %v6237_v36 = vrot.slane %v17583_v27, 4  ;;  %v6232_v21 = vsel %vm3089_vm10, %v6231_v12, %v6125_v47  ;;  %v6222_v16 = vsel %vm3095_vm13, %v6221_v42, %v6220_v53 }
 0x1f3   : > { %v6239_v15 = vrot.slane %v17584_v48, 3  ;;  %v6241_v14 = vrot.slane %v17585_v11, 2  ;;  %v6234_v6 = vsel %vm3092_vm11, %v6233_v35, %v6232_v21  ;;  %v6243_v10 = vrot.slane %v17586_v8, 1 }
 0x1f4   : > { %v17587_v43 = vshll.u32 %v14369_v60, 16  ;;  %v17588_v27 = vshrl.u32 %v14365_v59, 16  ;;  %v6224_v47 = vsel %vm3098_vm15, %v6223_v31, %v6222_v16  ;;  %v6236_v3 = vsel %vm3095_vm13, %v6235_v44, %v6234_v6 }
 0x1f5   : > { %v6544_v57 = vshll.u32 %v14388_v17, 16  ;;  %v6547_v42 = vshrl.u32 %v14388_v17, 16  ;;  %v6226_v53 = vsel %vm3101_vm5, %v6225_v58, %v6224_v47  ;;  %v6238_v35 = vsel %vm3098_vm15, %v6237_v36, %v6236_v3 }
 0x1f6   : > { %v6538_v12 = vsel %vm12457_vm9, %v17588_v27, %v17587_v43  ;;  %v6552_v21 = vshll.u32 %v14358_v63, 16  ;;  %v6555_v48 = vshrl.u32 %v14358_v63, 16  ;;  %v6228_v59 = vsel %vm3104_vm2, %v6227_v49, %v6226_v53 }
 0x1f7   : > { %v6240_v43 = vsel %vm3101_vm5, %v6239_v15, %v6238_v35  ;;  %v17589_v31 = vshrl.u32 %v14369_v60, 16  ;;  %v6560_v11 = vshll.u32 %v14378_v54, 16  ;;  %v6230_v17 = vsel %vm3107_vm6, %v6229_v38, %v6228_v59 }
 0x1f8   : > { %v6242_v58 = vsel %vm3104_vm2, %v6241_v14, %v6240_v43  ;;  %v6554_v36 = vsel %vm12457_vm9, %v6547_v42, %v6552_v21  ;;  %v6563_v63 = vshrl.u32 %v14378_v54, 16  ;;  %v6568_v60 = vshll.u32 %v14382_v61, 16 }
 0x1f9   : > { %v6546_v44 = vsel %vm12457_vm9, %v17589_v31, %v6544_v57  ;;  %v6244_v49 = vsel %vm3107_vm6, %v6243_v10, %v6242_v58  ;;  %v6562_v15 = vsel %vm12457_vm9, %v6555_v48, %v6560_v11  ;;  %v6571_v16 = vshrl.u32 %v14382_v61, 16 }
 0x1fa   : > { %v6248_v6 = vpack.c.b16 %v6244_v49, %v6230_v17  ;;  %v6576_v8 = vshll.u32 %v14397_v5, 16  ;;  %v6579_v38 = vshrl.u32 %v14397_v5, 16  ;;  %v6584_v14 = vshll.u32 %v15008_v50, 16 }
 0x1fb   : > { %v6570_v27 = vsel %vm12457_vm9, %v6563_v63, %v6568_v60  ;;  %v17590_v54 = vrot.slane %v14780_v32, %v12306_v24  ;;  %v6997_v47 = vrot.slane %v14784_v13, %v12306_v24  ;;  %v7011_v61 = vrot.slane %v15022_v29, %v12306_v24 }
 0x1fc   : > { %11761 = vmatmul.mubr.msk.bf16.gmra.mrb[4].mxu0 %vm3211_vm8, %v6248_v6  ;;  %v6578_v5 = vsel %vm12457_vm9, %v6571_v16, %v6576_v8  ;;  %v6586_v3 = vsel %vm12457_vm9, %v6579_v38, %v6584_v14  ;;  %v7025_v57 = vrot.slane %v15029_v51, %v12306_v24  ;;  %v7039_v32 = vrot.slane %v15033_v2, %v12306_v24 }
 0x1fd   : > { %v6990_v10 = vrot.slane %v17590_v54, %v12306_v24  ;;  %v7004_v42 = vrot.slane %v6997_v47, %v12306_v24  ;;  %v7018_v13 = vrot.slane %v7011_v61, %v12306_v24  ;;  %v7053_v29 = vrot.slane %v15039_v34, %v12306_v24 }
 0x1fe   : > { %v7067_v53 = vrot.slane %v15046_v18, %v12306_v24  ;;  %v7032_v35 = vrot.slane %v7025_v57, %v12306_v24  ;;  %v7046_v21 = vrot.slane %v7039_v32, %v12306_v24  ;;  %v7081_v51 = vrot.slane %v15057_v4, %v12306_v24 }
 0x1ff   : > { %v7095_v2 = vrot.slane %v15065_v52, %v12306_v24  ;;  %v7060_v48 = vrot.slane %v7053_v29, %v12306_v24  ;;  %v7109_v43 = vrot.slane %v6538_v12, %v12306_v24  ;;  %v7123_v34 = vrot.slane %v6546_v44, %v12306_v24 }
 0x200   : > { %v7074_v59 = vrot.slane %v7067_v53, %v12306_v24  ;;  %v7088_v18 = vrot.slane %v7081_v51, %v12306_v24  ;;  %v7137_v11 = vrot.slane %v6554_v36, %v12306_v24  ;;  %v7151_v17 = vrot.slane %v6562_v15, %v12306_v24 }
 0x201   : > { %v7102_v31 = vrot.slane %v7095_v2, %v12306_v24  ;;  %v7116_v4 = vrot.slane %v7109_v43, %v12306_v24  ;;  %v7130_v52 = vrot.slane %v7123_v34, %v12306_v24  ;;  %v7165_v58 = vrot.slane %v6570_v27, %v12306_v24 }
 0x202   : > { %v7179_v63 = vrot.slane %v6578_v5, %v12306_v24  ;;  %v7144_v12 = vrot.slane %v7137_v11, %v12306_v24  ;;  %v7158_v44 = vrot.slane %v7151_v17, %v12306_v24  ;;  %v7193_v49 = vrot.slane %v6586_v3, %v12306_v24 }
 0x203   : > { %v7873_v60 = vunpack.c.l.b16 %v6990_v10  ;;  %v7172_v16 = vrot.slane %v7165_v58, %v12306_v24  ;;  %v7874_v15 = vunpack.c.l.b16 %v7004_v42  ;;  %v7875_v6 = vunpack.c.l.b16 %v7018_v13 }
 0x204   : > { %v7186_v36 = vrot.slane %v7179_v63, %v12306_v24  ;;  %v7200_v8 = vrot.slane %v7193_v49, %v12306_v24  ;;  %v7876_v38 = vunpack.c.l.b16 %v7032_v35  ;;  %v7877_v14 = vunpack.c.l.b16 %v7046_v21 }
 0x205   : > { %v7878_v27 = vunpack.c.l.b16 %v7060_v48  ;;  %v7879_v54 = vunpack.c.l.b16 %v7074_v59  ;;  %v7880_v47 = vunpack.c.l.b16 %v7088_v18  ;;  %v7881_v61 = vunpack.c.l.b16 %v7102_v31 }
 0x206   : > { %v7882_v5 = vunpack.c.l.b16 %v7116_v4  ;;  %v7883_v57 = vunpack.c.l.b16 %v7130_v52  ;;  %v7884_v32 = vunpack.c.l.b16 %v7144_v12  ;;  %v7885_v29 = vunpack.c.l.b16 %v7158_v44  ;;  %v935_v12 = vld [vmem:[#allocation2 + $0x44] sm:$0x1]  ;;  %v949_v44 = vld [vmem:[#allocation2 + $0x5c] sm:$0x1] }
 0x207   : > { %v7886_v3 = vunpack.c.l.b16 %v7172_v16  ;;  %v7887_v10 = vunpack.c.l.b16 %v7186_v36  ;;  %v7888_v53 = vunpack.c.l.b16 %v7200_v8  ;;  %v7937_v51 = vrot.slane %v7874_v15, 7 }
 0x208   : > { %v7939_v2 = vrot.slane %v7875_v6, 6  ;;  %v7941_v43 = vrot.slane %v7876_v38, 5  ;;  %v7943_v42 = vrot.slane %v7877_v14, 4  ;;  %v7945_v13 = vrot.slane %v7878_v27, 3 }
 0x209   : > { %v7947_v34 = vrot.slane %v7879_v54, 2  ;;  %v7938_v35 = vsel %vm3089_vm10, %v7937_v51, %v7873_v60  ;;  %v7949_v21 = vrot.slane %v7880_v47, 1  ;;  %v7951_v48 = vrot.slane %v7882_v5, 7  ;;  %v17592_v51 = vld [vmem:[#allocation38_spill] sm:$0xff] }
 0x20a   : > { %v7953_v59 = vrot.slane %v7883_v57, 6  ;;  %v7940_v18 = vsel %vm3092_vm11, %v7939_v2, %v7938_v35  ;;  %v7955_v31 = vrot.slane %v7884_v32, 5  ;;  %v7957_v11 = vrot.slane %v7885_v29, 4  ;;  %v17591_v29 = vld [vmem:[#allocation33_spill] sm:$0xff] }
 0x20b   : > { %v7959_v17 = vrot.slane %v7886_v3, 3  ;;  %v7942_v4 = vsel %vm3095_vm13, %v7941_v43, %v7940_v18  ;;  %v7952_v52 = vsel %vm3089_vm10, %v7951_v48, %v7881_v61  ;;  %v7961_v58 = vrot.slane %v7887_v10, 2  ;;  %v17594_v48 = vld [vmem:[#allocation35_spill] sm:$0xff] }
 0x20c   : > { %v7963_v63 = vrot.slane %v7888_v53, 1  ;;  %v7944_v49 = vsel %vm3098_vm15, %v7943_v42, %v7942_v4  ;;  %v7954_v60 = vsel %vm3092_vm11, %v7953_v59, %v7952_v52  ;;  %v661_v16 = vrot.slane %v14290_v0, 4  ;;  %v17596_v52 = vld [vmem:[#allocation40_spill] sm:$0xff] }
 0x20d   : > { %v695_v36 = vrot.slane %v14299_v46, 4  ;;  %v7946_v15 = vsel %vm3101_vm5, %v7945_v13, %v7944_v49  ;;  %v7956_v6 = vsel %vm3095_vm13, %v7955_v31, %v7954_v60  ;;  %v6588_v8 = vshrl.u32 %v14516_v1, 16  ;;  %v17598_v60 = vld [vmem:[#allocation41_spill] sm:$0xff] }
 0x20e   : > { %v6593_v38 = vshll.u32 %v14521_v22, 16  ;;  %v7948_v14 = vsel %vm3104_vm2, %v7947_v34, %v7946_v15  ;;  %v7958_v27 = vsel %vm3098_vm15, %v7957_v11, %v7956_v6  ;;  %v936_v54 = vsel %vm12350_vm4, %v661_v16, %v935_v12  ;;  %v17593_v34 = vld [vmem:[#allocation31_spill] sm:$0xff]  ;;  %v17595_v11 = vld [vmem:[#allocation36_spill] sm:$0xff]  ;;  %v17597_v12 = vld [vmem:[#allocation58_spill] sm:$0xff] }
 0x20f   : > { %v950_v0 = vsel %vm12350_vm4, %v695_v36, %v949_v44  ;;  %v7950_v46 = vsel %vm3107_vm6, %v7949_v21, %v7948_v14  ;;  %v7960_v47 = vsel %vm3101_vm5, %v7959_v17, %v7958_v27  ;;  %937 = vst [vmem:[#allocation2 + $0x44] sm:$0x1] %v936_v54  ;;  %v6596_v61 = vshrl.u32 %v14521_v22, 16 }
 0x210   : > { %951 = vst [vmem:[#allocation2 + $0x5c] sm:$0x1] %v950_v0  ;;  %v6595_v1 = vsel %vm12457_vm9, %v6588_v8, %v6593_v38  ;;  %v7962_v5 = vsel %vm3104_vm2, %v7961_v58, %v7960_v47  ;;  %v6601_v57 = vshll.u32 %v14530_v25, 16  ;;  %v6604_v32 = vshrl.u32 %v14530_v25, 16  ;;  %v17599_v8 = vld [vmem:[#allocation37_spill] sm:$0xff] }
 0x211   : > { %v6609_v3 = vshll.u32 %v17591_v29, 16  ;;  %v7964_v10 = vsel %vm3107_vm6, %v7963_v63, %v7962_v5  ;;  %v6612_v53 = vshrl.u32 %v17591_v29, 16  ;;  %v6617_v2 = vshll.u32 %v17592_v51, 16 }
 0x212   : > { %v6620_v43 = vshrl.u32 %v17592_v51, 16  ;;  %v8049_v42 = vpack.c.b16 %v7964_v10, %v7950_v46  ;;  %v6603_v22 = vsel %vm12457_vm9, %v6596_v61, %v6601_v57  ;;  %v6625_v35 = vshll.u32 %v17593_v34, 16  ;;  %v17600_v57 = vld [vmem:[#allocation56_spill] sm:$0xff] }
 0x213   : > { %v6611_v13 = vsel %vm12457_vm9, %v6604_v32, %v6609_v3  ;;  %v6619_v25 = vsel %vm12457_vm9, %v6612_v53, %v6617_v2  ;;  %v6628_v21 = vshrl.u32 %v17593_v34, 16  ;;  %v6633_v59 = vshll.u32 %v17594_v48, 16  ;;  %v17601_v3 = vld [vmem:[#allocation46_spill] sm:$0xff]  ;;  %v17602_v51 = vld [vmem:[#allocation44_spill] sm:$0xff] }
 0x214   : > { %v6636_v18 = vshrl.u32 %v17594_v48, 16  ;;  %11766 = vmatprep.mubr.msk.bf16.mxu0 %vm3211_vm8, %v8049_v42  ;;  %v6627_v31 = vsel %vm12457_vm9, %v6620_v43, %v6625_v35  ;;  %v6641_v17 = vshll.u32 %v17595_v11, 16  ;;  %v6644_v4 = vshrl.u32 %v17595_v11, 16  ;;  %v17603_v34 = vld [vmem:[#allocation14_spill] sm:$0xff] }
 0x215   : > { %v6653_v58 = vshrl.u32 %v17596_v52, 16  ;;  %v6635_v63 = vsel %vm12457_vm9, %v6628_v21, %v6633_v59  ;;  %v6658_v44 = vshll.u32 %v17597_v12, 16  ;;  %v6661_v49 = vshrl.u32 %v17597_v12, 16 }
 0x216   : > { %v6666_v16 = vshll.u32 %v17598_v60, 16  ;;  %v11398_v36 = vld.sshfl [vmem:[#allocation2 + $0x44] sm:$0x1 pattern:$0x75316420]  ;;  %v6643_v15 = vsel %vm12457_vm9, %v6636_v18, %v6641_v17  ;;  %v6669_v6 = vshrl.u32 %v17598_v60, 16  ;;  %v7207_v14 = vrot.slane %v6595_v1, %v12306_v24 }
 0x217   : > { %v6674_v38 = vshll.u32 %v17599_v8, 16  ;;  %v11399_v27 = vld.sshfl [vmem:[#allocation2 + $0x5c] sm:$0x1 pattern:$0x75316420]  ;;  %v15382_v54 = vrot.slane %v11398_v36, %v12306_v24  ;;  %v6660_v0 = vsel %vm12457_vm9, %v6653_v58, %v6658_v44  ;;  %v6677_v47 = vshrl.u32 %v17599_v8, 16 }
 0x218   : > { %v6668_v46 = vsel %vm12457_vm9, %v6661_v49, %v6666_v16  ;;  %v15390_v61 = vrot.slane %v11399_v27, %v12306_v24  ;;  %v6682_v1 = vshll.u32 %v17600_v57, 16  ;;  %v6685_v32 = vshrl.u32 %v17600_v57, 16 }
 0x219   : > { %v6676_v5 = vsel %vm12457_vm9, %v6669_v6, %v6674_v38  ;;  %v6649_v29 = vshll.u32 %v15382_v54, 16  ;;  %v6690_v10 = vshll.u32 %v17601_v3, 16  ;;  %v6693_v53 = vshrl.u32 %v17601_v3, 16 }
 0x21a   : > { %v6698_v2 = vshll.u32 %v17602_v51, 16  ;;  %v6684_v43 = vsel %vm12457_vm9, %v6677_v47, %v6682_v1  ;;  %v6701_v42 = vshrl.u32 %v17602_v51, 16  ;;  %v6706_v35 = vshll.u32 %v17603_v34, 16 }
 0x21b   : > { %v6709_v21 = vshrl.u32 %v17603_v34, 16  ;;  %v6651_v48 = vsel %vm12457_vm9, %v6644_v4, %v6649_v29  ;;  %v6692_v59 = vsel %vm12457_vm9, %v6685_v32, %v6690_v10  ;;  %v6714_v11 = vshll.u32 %v15390_v61, 16 }
 0x21c   : > { %v6700_v18 = vsel %vm12457_vm9, %v6693_v53, %v6698_v2  ;;  %v6708_v17 = vsel %vm12457_vm9, %v6701_v42, %v6706_v35  ;;  %v7214_v52 = vrot.slane %v7207_v14, %v12306_v24  ;;  %v7221_v58 = vrot.slane %v6603_v22, %v12306_v24 }
 0x21d   : > { %v7235_v12 = vrot.slane %v6611_v13, %v12306_v24  ;;  %v6716_v4 = vsel %vm12457_vm9, %v6709_v21, %v6714_v11  ;;  %v7249_v44 = vrot.slane %v6619_v25, %v12306_v24  ;;  %v7263_v49 = vrot.slane %v6627_v31, %v12306_v24 }
 0x21e   : > { %v7277_v60 = vrot.slane %v6635_v63, %v12306_v24  ;;  %v7228_v16 = vrot.slane %v7221_v58, %v12306_v24  ;;  %v7291_v6 = vrot.slane %v6643_v15, %v12306_v24  ;;  %v7305_v8 = vrot.slane %v6651_v48, %v12306_v24 }
 0x21f   : > { %v7242_v36 = vrot.slane %v7235_v12, %v12306_v24  ;;  %v7256_v22 = vrot.slane %v7249_v44, %v12306_v24  ;;  %v7270_v13 = vrot.slane %v7263_v49, %v12306_v24  ;;  %v7319_v25 = vrot.slane %v6660_v0, %v12306_v24 }
 0x220   : > { %v7284_v38 = vrot.slane %v7277_v60, %v12306_v24  ;;  %v7298_v31 = vrot.slane %v7291_v6, %v12306_v24  ;;  %v7312_v63 = vrot.slane %v7305_v8, %v12306_v24  ;;  %v7333_v14 = vrot.slane %v6668_v46, %v12306_v24 }
 0x221   : > { %v7347_v27 = vrot.slane %v6676_v5, %v12306_v24  ;;  %v7326_v15 = vrot.slane %v7319_v25, %v12306_v24  ;;  %v7361_v47 = vrot.slane %v6684_v43, %v12306_v24  ;;  %v7375_v57 = vrot.slane %v6692_v59, %v12306_v24 }
 0x222   : > { %v7389_v1 = vrot.slane %v6700_v18, %v12306_v24  ;;  %v7340_v32 = vrot.slane %v7333_v14, %v12306_v24  ;;  %v7403_v29 = vrot.slane %v6708_v17, %v12306_v24  ;;  %v7417_v3 = vrot.slane %v6716_v4, %v12306_v24 }
 0x223   : > { %v7354_v0 = vrot.slane %v7347_v27, %v12306_v24  ;;  %v7368_v46 = vrot.slane %v7361_v47, %v12306_v24  ;;  %v7382_v5 = vrot.slane %v7375_v57, %v12306_v24  ;;  %v7889_v53 = vunpack.c.l.b16 %v7214_v52 }
 0x224   : > { %v7396_v10 = vrot.slane %v7389_v1, %v12306_v24  ;;  %v7410_v51 = vrot.slane %v7403_v29, %v12306_v24  ;;  %v7424_v2 = vrot.slane %v7417_v3, %v12306_v24  ;;  %v7890_v43 = vunpack.c.l.b16 %v7228_v16  ;;  %v963_v29 = vld [vmem:[#allocation2 + $0x74] sm:$0x1]  ;;  %v977_v3 = vld [vmem:[#allocation2 + $0x8c] sm:$0x1] }
 0x225   : > { %v7891_v42 = vunpack.c.l.b16 %v7242_v36  ;;  %v7892_v34 = vunpack.c.l.b16 %v7256_v22  ;;  %v7893_v35 = vunpack.c.l.b16 %v7270_v13  ;;  %v7894_v21 = vunpack.c.l.b16 %v7284_v38 }
 0x226   : > { %v7895_v48 = vunpack.c.l.b16 %v7298_v31  ;;  %v7896_v59 = vunpack.c.l.b16 %v7312_v63  ;;  %v7897_v18 = vunpack.c.l.b16 %v7326_v15  ;;  %v7898_v11 = vunpack.c.l.b16 %v7340_v32  ;;  %v12096_v32 = vld [vmem:[%s16863_s3 + $0xa] sm:$0x3] }
 0x227   : > { %v7899_v17 = vunpack.c.l.b16 %v7354_v0  ;;  %v7900_v58 = vunpack.c.l.b16 %v7368_v46  ;;  %v7901_v12 = vunpack.c.l.b16 %v7382_v5  ;;  %v7902_v4 = vunpack.c.l.b16 %v7396_v10 }
 0x228   : > { %v7903_v44 = vunpack.c.l.b16 %v7410_v51  ;;  %v7904_v49 = vunpack.c.l.b16 %v7424_v2  ;;  %v7965_v52 = vrot.slane %v7890_v43, 7  ;;  %v7967_v60 = vrot.slane %v7891_v42, 6  ;;  %v17605_v42 = vld [vmem:[#allocation7_spill] sm:$0xff] }
 0x229   : > { %v7969_v6 = vrot.slane %v7892_v34, 5  ;;  %v7971_v8 = vrot.slane %v7893_v35, 4  ;;  %v7973_v25 = vrot.slane %v7894_v21, 3  ;;  %v7975_v16 = vrot.slane %v7895_v48, 2  ;;  %v17606_v35 = vld [vmem:[#allocation72_spill] sm:$0xff] }
 0x22a   : > { %v7977_v36 = vrot.slane %v7896_v59, 1  ;;  %v7966_v22 = vsel %vm3089_vm10, %v7965_v52, %v7889_v53  ;;  %v7979_v13 = vrot.slane %v7898_v11, 7  ;;  %v7981_v38 = vrot.slane %v7899_v17, 6  ;;  %v17604_v53 = vld [vmem:[#allocation71_spill] sm:$0xff] }
 0x22b   : > { %v7983_v31 = vrot.slane %v7900_v58, 5  ;;  %v7968_v63 = vsel %vm3092_vm11, %v7967_v60, %v7966_v22  ;;  %v7985_v14 = vrot.slane %v7901_v12, 4  ;;  %v7987_v27 = vrot.slane %v7902_v4, 3  ;;  %v17608_v60 = vld [vmem:[#allocation78_spill] sm:$0xff] }
 0x22c   : > { %v7989_v15 = vrot.slane %v7903_v44, 2  ;;  %v7970_v47 = vsel %vm3095_vm13, %v7969_v6, %v7968_v63  ;;  %v7980_v57 = vsel %vm3089_vm10, %v7979_v13, %v7897_v18  ;;  %v7991_v1 = vrot.slane %v7904_v49, 1  ;;  %v17607_v44 = vld [vmem:[#allocation73_spill] sm:$0xff]  ;;  %v17610_v63 = vld [vmem:[#allocation75_spill] sm:$0xff] }
 0x22d   : > { %v8390_v0 = vsel %vm3224_vm0, %v12096_v32, 0  ;;  %v7972_v46 = vsel %vm3098_vm15, %v7971_v8, %v7970_v47  ;;  %v7982_v5 = vsel %vm3092_vm11, %v7981_v38, %v7980_v57  ;;  %v729_v10 = vrot.slane %v14723_v62, 4  ;;  %v17611_v47 = vld [vmem:[#allocation76_spill] sm:$0xff] }
 0x22e   : > { %v763_v51 = vrot.slane %v17604_v53, 4  ;;  %v7974_v2 = vsel %vm3101_vm5, %v7973_v25, %v7972_v46  ;;  %v7984_v43 = vsel %vm3095_vm13, %v7983_v31, %v7982_v5  ;;  %v6718_v34 = vshrl.u32 %v17605_v42, 16  ;;  %v15495_v32 = vld [vmem:[%s16863_s3 + $0xc] sm:$0x3] }
 0x22f   : > { %v6723_v21 = vshll.u32 %v17606_v35, 16  ;;  %v7976_v48 = vsel %vm3104_vm2, %v7975_v16, %v7974_v2  ;;  %v7986_v59 = vsel %vm3098_vm15, %v7985_v14, %v7984_v43  ;;  %v964_v18 = vsel %vm12350_vm4, %v729_v10, %v963_v29  ;;  %v17609_v16 = vld [vmem:[#allocation21_spill] sm:$0xff]  ;;  %v17613_v10 = vld [vmem:[#allocation74_spill] sm:$0xff]  ;;  %v17614_v2 = vld [vmem:[#allocation79_spill] sm:$0xff] }
 0x230   : > { %v978_v62 = vsel %vm12350_vm4, %v763_v51, %v977_v3  ;;  %v7978_v11 = vsel %vm3107_vm6, %v7977_v36, %v7976_v48  ;;  %v7988_v17 = vsel %vm3101_vm5, %v7987_v27, %v7986_v59  ;;  %965 = vst [vmem:[#allocation2 + $0x74] sm:$0x1] %v964_v18  ;;  %v6726_v12 = vshrl.u32 %v17606_v35, 16  ;;  %v17612_v3 = vld [vmem:[#allocation81_spill] sm:$0xff]  ;;  %v17616_v18 = vld [vmem:[#allocation84_spill] sm:$0xff] }
 0x231   : > { %979 = vst [vmem:[#allocation2 + $0x8c] sm:$0x1] %v978_v62  ;;  %v6725_v58 = vsel %vm12457_vm9, %v6718_v34, %v6723_v21  ;;  %v7990_v4 = vsel %vm3104_vm2, %v7989_v15, %v7988_v17  ;;  %v6731_v49 = vshll.u32 %v17607_v44, 16  ;;  %v6734_v52 = vshrl.u32 %v17607_v44, 16  ;;  %v17615_v34 = vld [vmem:[#allocation80_spill] sm:$0xff] }
 0x232   : > { %v6739_v6 = vshll.u32 %v17608_v60, 16  ;;  %v7992_v8 = vsel %vm3107_vm6, %v7991_v1, %v7990_v4  ;;  %v6742_v25 = vshrl.u32 %v17608_v60, 16  ;;  %v6747_v36 = vshll.u32 %v17609_v16, 16 }
 0x233   : > { %v6750_v22 = vshrl.u32 %v17609_v16, 16  ;;  %v8050_v13 = vpack.c.b16 %v7992_v8, %v7978_v11  ;;  %v6733_v38 = vsel %vm12457_vm9, %v6726_v12, %v6731_v49  ;;  %v6755_v14 = vshll.u32 %v17610_v63, 16 }
 0x234   : > { %v6741_v31 = vsel %vm12457_vm9, %v6734_v52, %v6739_v6  ;;  %v6749_v27 = vsel %vm12457_vm9, %v6742_v25, %v6747_v36  ;;  %v6758_v15 = vshrl.u32 %v17610_v63, 16  ;;  %v6763_v57 = vshll.u32 %v17611_v47, 16  ;;  %v17617_v52 = vld [vmem:[#allocation77_spill] sm:$0xff]  ;;  %v17618_v25 = vld [vmem:[#allocation82_spill] sm:$0xff] }
 0x235   : > { %v6766_v1 = vshrl.u32 %v17611_v47, 16  ;;  %11767 = vmatmul.mubr.msk.bf16.vlgmr.msra.gmra.mrb[0].mxu0 %vm3211_vm8, %v8050_v13  ;;  %v6757_v29 = vsel %vm12457_vm9, %v6750_v22, %v6755_v14  ;;  %v6771_v46 = vshll.u32 %v17612_v3, 16  ;;  %v6774_v5 = vshrl.u32 %v17612_v3, 16  ;;  %v17619_v22 = vld [vmem:[#allocation83_spill] sm:$0xff] }
 0x236   : > { %v6783_v53 = vshrl.u32 %v17613_v10, 16  ;;  %11775 = vmatpush3.bf16.msra.mxu0 %v8390_v0  ;;  %v6765_v51 = vsel %vm12457_vm9, %v6758_v15, %v6763_v57  ;;  %v6788_v43 = vshll.u32 %v17614_v2, 16  ;;  %v6791_v42 = vshrl.u32 %v17614_v2, 16  ;;  %v17620_v15 = vld [vmem:[#allocation85_spill] sm:$0xff] }
 0x237   : > { %v6796_v35 = vshll.u32 %v17615_v34, 16  ;;  %v11400_v21 = vld.sshfl [vmem:[#allocation2 + $0x74] sm:$0x1 pattern:$0x75316420]  ;;  %v6773_v48 = vsel %vm12457_vm9, %v6766_v1, %v6771_v46  ;;  %v6799_v59 = vshrl.u32 %v17615_v34, 16  ;;  %v7431_v11 = vrot.slane %v6725_v58, %v12306_v24  ;;  %12058 = vmatprep.subr.msk.bf16.mxu0 %vm3224_vm0, %v15495_v32 }
 0x238   : > { %v6804_v62 = vshll.u32 %v17616_v18, 16  ;;  %v11401_v0 = vld.sshfl [vmem:[#allocation2 + $0x8c] sm:$0x1 pattern:$0x75316420]  ;;  %v15516_v17 = vrot.slane %v11400_v21, %v12306_v24  ;;  %v6790_v12 = vsel %vm12457_vm9, %v6783_v53, %v6788_v43  ;;  %v6807_v44 = vshrl.u32 %v17616_v18, 16 }
 0x239   : > { %v6798_v4 = vsel %vm12457_vm9, %v6791_v42, %v6796_v35  ;;  %v15524_v49 = vrot.slane %v11401_v0, %v12306_v24  ;;  %v6812_v60 = vshll.u32 %v17617_v52, 16  ;;  %v6815_v6 = vshrl.u32 %v17617_v52, 16 }
 0x23a   : > { %v6806_v58 = vsel %vm12457_vm9, %v6799_v59, %v6804_v62  ;;  %v6779_v8 = vshll.u32 %v15516_v17, 16  ;;  %v6820_v16 = vshll.u32 %v17618_v25, 16  ;;  %v6823_v36 = vshrl.u32 %v17618_v25, 16 }
 0x23b   : > { %v6828_v13 = vshll.u32 %v17619_v22, 16  ;;  %v6814_v63 = vsel %vm12457_vm9, %v6807_v44, %v6812_v60  ;;  %v6831_v14 = vshrl.u32 %v17619_v22, 16  ;;  %v6836_v47 = vshll.u32 %v17620_v15, 16 }
 0x23c   : > { %v6839_v57 = vshrl.u32 %v17620_v15, 16  ;;  %v6781_v1 = vsel %vm12457_vm9, %v6774_v5, %v6779_v8  ;;  %v6822_v3 = vsel %vm12457_vm9, %v6815_v6, %v6820_v16  ;;  %v6844_v10 = vshll.u32 %v15524_v49, 16 }
 0x23d   : > { %v6830_v46 = vsel %vm12457_vm9, %v6823_v36, %v6828_v13  ;;  %v6838_v53 = vsel %vm12457_vm9, %v6831_v14, %v6836_v47  ;;  %v7438_v2 = vrot.slane %v7431_v11, %v12306_v24  ;;  %v7445_v43 = vrot.slane %v6733_v38, %v12306_v24 }
 0x23e   : > { %v7459_v42 = vrot.slane %v6741_v31, %v12306_v24  ;;  %v6846_v5 = vsel %vm12457_vm9, %v6839_v57, %v6844_v10  ;;  %v7473_v34 = vrot.slane %v6749_v27, %v12306_v24  ;;  %v7487_v35 = vrot.slane %v6757_v29, %v12306_v24 }
 0x23f   : > { %v7501_v21 = vrot.slane %v6765_v51, %v12306_v24  ;;  %v7452_v59 = vrot.slane %v7445_v43, %v12306_v24  ;;  %v7515_v62 = vrot.slane %v6773_v48, %v12306_v24  ;;  %v7529_v11 = vrot.slane %v6781_v1, %v12306_v24 }
 0x240   : > { %v7466_v18 = vrot.slane %v7459_v42, %v12306_v24  ;;  %v7480_v38 = vrot.slane %v7473_v34, %v12306_v24  ;;  %v7494_v31 = vrot.slane %v7487_v35, %v12306_v24  ;;  %v7543_v27 = vrot.slane %v6790_v12, %v12306_v24 }
 0x241   : > { %v7508_v0 = vrot.slane %v7501_v21, %v12306_v24  ;;  %v7522_v29 = vrot.slane %v7515_v62, %v12306_v24  ;;  %v7536_v51 = vrot.slane %v7529_v11, %v12306_v24  ;;  %v7557_v44 = vrot.slane %v6798_v4, %v12306_v24 }
 0x242   : > { %v7571_v52 = vrot.slane %v6806_v58, %v12306_v24  ;;  %v7550_v48 = vrot.slane %v7543_v27, %v12306_v24  ;;  %v7585_v60 = vrot.slane %v6814_v63, %v12306_v24  ;;  %v7599_v6 = vrot.slane %v6822_v3, %v12306_v24 }
 0x243   : > { %v7613_v8 = vrot.slane %v6830_v46, %v12306_v24  ;;  %v7564_v25 = vrot.slane %v7557_v44, %v12306_v24  ;;  %v7627_v16 = vrot.slane %v6838_v53, %v12306_v24  ;;  %v7641_v36 = vrot.slane %v6846_v5, %v12306_v24 }
 0x244   : > { %v7578_v12 = vrot.slane %v7571_v52, %v12306_v24  ;;  %v7592_v4 = vrot.slane %v7585_v60, %v12306_v24  ;;  %v7606_v58 = vrot.slane %v7599_v6, %v12306_v24  ;;  %v7905_v13 = vunpack.c.l.b16 %v7438_v2 }
 0x245   : > { %v7620_v22 = vrot.slane %v7613_v8, %v12306_v24  ;;  %v7634_v63 = vrot.slane %v7627_v16, %v12306_v24  ;;  %v7648_v14 = vrot.slane %v7641_v36, %v12306_v24  ;;  %v7906_v15 = vunpack.c.l.b16 %v7452_v59  ;;  %v991_v8 = vld [vmem:[#allocation2 + $0xa4] sm:$0x1] }
 0x246   : > { %v7907_v47 = vunpack.c.l.b16 %v7466_v18  ;;  %v7908_v57 = vunpack.c.l.b16 %v7480_v38  ;;  %v7909_v1 = vunpack.c.l.b16 %v7494_v31  ;;  %v7910_v3 = vunpack.c.l.b16 %v7508_v0 }
 0x247   : > { %v7911_v46 = vunpack.c.l.b16 %v7522_v29  ;;  %v7912_v10 = vunpack.c.l.b16 %v7536_v51  ;;  %v7913_v53 = vunpack.c.l.b16 %v7550_v48  ;;  %v7914_v43 = vunpack.c.l.b16 %v7564_v25 }
 0x248   : > { %v7915_v42 = vunpack.c.l.b16 %v7578_v12  ;;  %v7916_v5 = vunpack.c.l.b16 %v7592_v4  ;;  %v7917_v34 = vunpack.c.l.b16 %v7606_v58  ;;  %v7918_v35 = vunpack.c.l.b16 %v7620_v22  ;;  %v1005_v4 = vld [vmem:[#allocation2 + $0xbc] sm:$0x1] }
 0x249   : > { %v7919_v21 = vunpack.c.l.b16 %v7634_v63  ;;  %v7920_v62 = vunpack.c.l.b16 %v7648_v14  ;;  %v7993_v2 = vrot.slane %v7906_v15, 7  ;;  %v7995_v11 = vrot.slane %v7907_v47, 6 }
 0x24a   : > { %v7997_v27 = vrot.slane %v7908_v57, 5  ;;  %v7999_v44 = vrot.slane %v7909_v1, 4  ;;  %v8001_v52 = vrot.slane %v7910_v3, 3  ;;  %v8003_v59 = vrot.slane %v7911_v46, 2 }
 0x24b   : > { %v8005_v18 = vrot.slane %v7912_v10, 1  ;;  %v7994_v38 = vsel %vm3089_vm10, %v7993_v2, %v7905_v13  ;;  %v8007_v31 = vrot.slane %v7914_v43, 7  ;;  %v8009_v0 = vrot.slane %v7915_v42, 6 }
 0x24c   : > { %v8011_v29 = vrot.slane %v7916_v5, 5  ;;  %v7996_v51 = vsel %vm3092_vm11, %v7995_v11, %v7994_v38  ;;  %v8013_v48 = vrot.slane %v7917_v34, 4  ;;  %v8015_v60 = vrot.slane %v7918_v35, 3 }
 0x24d   : > { %v8017_v6 = vrot.slane %v7919_v21, 2  ;;  %v7998_v25 = vsel %vm3095_vm13, %v7997_v27, %v7996_v51  ;;  %v8008_v12 = vsel %vm3089_vm10, %v8007_v31, %v7913_v53  ;;  %v8019_v16 = vrot.slane %v7920_v62, 1  ;;  %v17624_v51 = vld [vmem:[#allocation104_spill] sm:$0xff] }
 0x24e   : > { %v797_v36 = vrot.slane %v14791_v33, 4  ;;  %v8000_v58 = vsel %vm3098_vm15, %v7999_v44, %v7998_v25  ;;  %v8010_v22 = vsel %vm3092_vm11, %v8009_v0, %v8008_v12  ;;  %v831_v13 = vrot.slane %v14993_v7, 4  ;;  %v17621_v44 = vld [vmem:[#allocation101_spill] sm:$0xff]  ;;  %v17623_v0 = vld [vmem:[#allocation102_spill] sm:$0xff] }
 0x24f   : > { %v6848_v63 = vshrl.u32 %v15061_v23, 16  ;;  %v8002_v14 = vsel %vm3101_vm5, %v8001_v52, %v8000_v58  ;;  %v8012_v15 = vsel %vm3095_vm13, %v8011_v29, %v8010_v22  ;;  %v6853_v57 = vshll.u32 %v15079_v37, 16  ;;  %v17625_v25 = vld [vmem:[#allocation105_spill] sm:$0xff]  ;;  %v17626_v22 = vld [vmem:[#allocation107_spill] sm:$0xff] }
 0x250   : > { %v992_v47 = vsel %vm12350_vm4, %v797_v36, %v991_v8  ;;  %v8004_v33 = vsel %vm3104_vm2, %v8003_v59, %v8002_v14  ;;  %v8014_v1 = vsel %vm3098_vm15, %v8013_v48, %v8012_v15  ;;  %v1006_v3 = vsel %vm12350_vm4, %v831_v13, %v1005_v4 }
 0x251   : > { %993 = vst [vmem:[#allocation2 + $0xa4] sm:$0x1] %v992_v47  ;;  %v6856_v7 = vshrl.u32 %v15079_v37, 16  ;;  %v8006_v23 = vsel %vm3107_vm6, %v8005_v18, %v8004_v33  ;;  %v8016_v46 = vsel %vm3101_vm5, %v8015_v60, %v8014_v1  ;;  %1007 = vst [vmem:[#allocation2 + $0xbc] sm:$0x1] %v1006_v3  ;;  %v6855_v10 = vsel %vm12457_vm9, %v6848_v63, %v6853_v57  ;;  %v17622_v18 = vld [vmem:[#allocation103_spill] sm:$0xff] }
 0x252   : > { %v6861_v53 = vshll.u32 %v15083_v41, 16  ;;  %v8018_v43 = vsel %vm3104_vm2, %v8017_v6, %v8016_v46  ;;  %v6864_v42 = vshrl.u32 %v15083_v41, 16  ;;  %v6869_v5 = vshll.u32 %v15104_v30, 16  ;;  %v17627_v47 = vld [vmem:[#allocation106_spill] sm:$0xff] }
 0x253   : > { %v6872_v34 = vshrl.u32 %v15104_v30, 16  ;;  %v8020_v37 = vsel %vm3107_vm6, %v8019_v16, %v8018_v43  ;;  %v6877_v21 = vshll.u32 %v15053_v26, 16  ;;  %v6880_v62 = vshrl.u32 %v15053_v26, 16  ;;  %v17629_v43 = vld [vmem:[#allocation110_spill] sm:$0xff] }
 0x254   : > { %v6863_v35 = vsel %vm12457_vm9, %v6856_v7, %v6861_v53  ;;  %v8051_v2 = vpack.c.b16 %v8020_v37, %v8006_v23  ;;  %v6871_v11 = vsel %vm12457_vm9, %v6864_v42, %v6869_v5  ;;  %v6885_v27 = vshll.u32 %v15069_v28, 16  ;;  %v17628_v7 = vld [vmem:[#allocation109_spill] sm:$0xff] }
 0x255   : > { %v6888_v41 = vshrl.u32 %v15069_v28, 16  ;;  %v6879_v30 = vsel %vm12457_vm9, %v6872_v34, %v6877_v21  ;;  %v6893_v52 = vshll.u32 %v17621_v44, 16  ;;  %v6896_v59 = vshrl.u32 %v17621_v44, 16  ;;  %v17630_v21 = vld [vmem:[#allocation113_spill] sm:$0xff] }
 0x256   : > { %v6901_v38 = vshll.u32 %v17622_v18, 16  ;;  %11770 = vmatprep.mubr.msk.bf16.mxu0 %vm3211_vm8, %v8051_v2  ;;  %v6887_v26 = vsel %vm12457_vm9, %v6880_v62, %v6885_v27  ;;  %v6904_v31 = vshrl.u32 %v17622_v18, 16  ;;  %v6913_v29 = vshrl.u32 %v17623_v0, 16 }
 0x257   : > { %v6918_v28 = vshll.u32 %v17624_v51, 16  ;;  %v6895_v60 = vsel %vm12457_vm9, %v6888_v41, %v6893_v52  ;;  %v6921_v8 = vshrl.u32 %v17624_v51, 16  ;;  %v6926_v12 = vshll.u32 %v17625_v25, 16 }
 0x258   : > { %v11402_v48 = vld.sshfl [vmem:[#allocation2 + $0xa4] sm:$0x1 pattern:$0x75316420]  ;;  %v6903_v6 = vsel %vm12457_vm9, %v6896_v59, %v6901_v38  ;;  %v6929_v58 = vshrl.u32 %v17625_v25, 16  ;;  %v6934_v13 = vshll.u32 %v17626_v22, 16  ;;  %v7655_v44 = vrot.slane %v6855_v10, %v12306_v24 }
 0x259   : > { %v11403_v16 = vld.sshfl [vmem:[#allocation2 + $0xbc] sm:$0x1 pattern:$0x75316420]  ;;  %v15636_v36 = vrot.slane %v11402_v48, %v12306_v24  ;;  %v6920_v4 = vsel %vm12457_vm9, %v6913_v29, %v6918_v28  ;;  %v6928_v14 = vsel %vm12457_vm9, %v6921_v8, %v6926_v12  ;;  %v6937_v15 = vshrl.u32 %v17626_v22, 16 }
 0x25a   : > { %v15643_v63 = vrot.slane %v11403_v16, %v12306_v24  ;;  %v6942_v57 = vshll.u32 %v17627_v47, 16  ;;  %v6936_v1 = vsel %vm12457_vm9, %v6929_v58, %v6934_v13  ;;  %v6945_v3 = vshrl.u32 %v17627_v47, 16 }
 0x25b   : > { %v6909_v33 = vshll.u32 %v15636_v36, 16  ;;  %v6950_v23 = vshll.u32 %v17628_v7, 16  ;;  %v6953_v53 = vshrl.u32 %v17628_v7, 16  ;;  %v6958_v42 = vshll.u32 %v17629_v43, 16 }
 0x25c   : > { %v6944_v46 = vsel %vm12457_vm9, %v6937_v15, %v6942_v57  ;;  %v6961_v5 = vshrl.u32 %v17629_v43, 16  ;;  %v6966_v62 = vshll.u32 %v17630_v21, 16  ;;  %v6969_v2 = vshrl.u32 %v17630_v21, 16 }
 0x25d   : > { %v6911_v34 = vsel %vm12457_vm9, %v6904_v31, %v6909_v33  ;;  %v6952_v37 = vsel %vm12457_vm9, %v6945_v3, %v6950_v23  ;;  %v6960_v27 = vsel %vm12457_vm9, %v6953_v53, %v6958_v42  ;;  %v6974_v41 = vshll.u32 %v15643_v63, 16 }
 0x25e   : > { %v7669_v52 = vrot.slane %v6863_v35, %v12306_v24  ;;  %v6968_v59 = vsel %vm12457_vm9, %v6961_v5, %v6966_v62  ;;  %v7683_v18 = vrot.slane %v6871_v11, %v12306_v24  ;;  %v7697_v38 = vrot.slane %v6879_v30, %v12306_v24 }
 0x25f   : > { %v7711_v31 = vrot.slane %v6887_v26, %v12306_v24  ;;  %v6976_v0 = vsel %vm12457_vm9, %v6969_v2, %v6974_v41  ;;  %v7662_v29 = vrot.slane %v7655_v44, %v12306_v24  ;;  %v7725_v10 = vrot.slane %v6895_v60, %v12306_v24 }
 0x260   : > { %v7676_v51 = vrot.slane %v7669_v52, %v12306_v24  ;;  %v7690_v35 = vrot.slane %v7683_v18, %v12306_v24  ;;  %v7704_v28 = vrot.slane %v7697_v38, %v12306_v24  ;;  %v7739_v11 = vrot.slane %v6903_v6, %v12306_v24 }
 0x261   : > { %v7718_v48 = vrot.slane %v7711_v31, %v12306_v24  ;;  %v7732_v30 = vrot.slane %v7725_v10, %v12306_v24  ;;  %v7753_v26 = vrot.slane %v6911_v34, %v12306_v24  ;;  %v7767_v8 = vrot.slane %v6920_v4, %v12306_v24 }
 0x262   : > { %v7781_v25 = vrot.slane %v6928_v14, %v12306_v24  ;;  %v7746_v12 = vrot.slane %v7739_v11, %v12306_v24  ;;  %v7795_v60 = vrot.slane %v6936_v1, %v12306_v24  ;;  %v7809_v16 = vrot.slane %v6944_v46, %v12306_v24 }
 0x263   : > { %v7823_v58 = vrot.slane %v6952_v37, %v12306_v24  ;;  %v7760_v22 = vrot.slane %v7753_v26, %v12306_v24  ;;  %v7774_v6 = vrot.slane %v7767_v8, %v12306_v24  ;;  %v7837_v15 = vrot.slane %v6960_v27, %v12306_v24 }
 0x264   : > { %v7788_v13 = vrot.slane %v7781_v25, %v12306_v24  ;;  %v7802_v4 = vrot.slane %v7795_v60, %v12306_v24  ;;  %v7816_v14 = vrot.slane %v7809_v16, %v12306_v24  ;;  %v7851_v57 = vrot.slane %v6968_v59, %v12306_v24 }
 0x265   : > { %v7830_v47 = vrot.slane %v7823_v58, %v12306_v24  ;;  %v7844_v33 = vrot.slane %v7837_v15, %v12306_v24  ;;  %v7865_v1 = vrot.slane %v6976_v0, %v12306_v24  ;;  %v7921_v3 = vunpack.c.l.b16 %v7662_v29 }
 0x266   : > { %v7922_v7 = vunpack.c.l.b16 %v7676_v51  ;;  %v7858_v23 = vrot.slane %v7851_v57, %v12306_v24  ;;  %v7923_v46 = vunpack.c.l.b16 %v7690_v35  ;;  %v7924_v53 = vunpack.c.l.b16 %v7704_v28 }
 0x267   : > { %v7925_v43 = vunpack.c.l.b16 %v7718_v48  ;;  %v7872_v42 = vrot.slane %v7865_v1, %v12306_v24  ;;  %v7926_v5 = vunpack.c.l.b16 %v7732_v30  ;;  %v7927_v34 = vunpack.c.l.b16 %v7746_v12 }
 0x268   : > { %v7928_v37 = vunpack.c.l.b16 %v7760_v22  ;;  %v7929_v21 = vunpack.c.l.b16 %v7774_v6  ;;  %v7930_v62 = vunpack.c.l.b16 %v7788_v13  ;;  %v7931_v2 = vunpack.c.l.b16 %v7802_v4  ;;  %v17631_v22 = vld [vmem:[#allocation100_spill] sm:$0xff] }
 0x269   : > { %v7932_v27 = vunpack.c.l.b16 %v7816_v14  ;;  %v7933_v41 = vunpack.c.l.b16 %v7830_v47  ;;  %v7934_v44 = vunpack.c.l.b16 %v7844_v33  ;;  %v7935_v52 = vunpack.c.l.b16 %v7858_v23  ;;  %v17632_v14 = vld [vmem:[#allocation19_spill] sm:$0xff] }
 0x26a   : > { %v7936_v59 = vunpack.c.l.b16 %v7872_v42  ;;  %v8021_v18 = vrot.slane %v7922_v7, 7  ;;  %v8023_v38 = vrot.slane %v7923_v46, 6  ;;  %v8025_v31 = vrot.slane %v7924_v53, 5  ;;  %v17634_v7 = vld [vmem:[#allocation55_spill] sm:$0xff] }
 0x26b   : > { %v8027_v0 = vrot.slane %v7925_v43, 4  ;;  %v8029_v29 = vrot.slane %v7926_v5, 3  ;;  %v8031_v51 = vrot.slane %v7927_v34, 2  ;;  %v8033_v10 = vrot.slane %v7928_v37, 1  ;;  %v17636_v5 = vld [vmem:[#allocation54_spill] sm:$0xff] }
 0x26c   : > { %v8035_v35 = vrot.slane %v7930_v62, 7  ;;  %v8022_v28 = vsel %vm3089_vm10, %v8021_v18, %v7921_v3  ;;  %v8037_v48 = vrot.slane %v7931_v2, 6  ;;  %v8039_v11 = vrot.slane %v7932_v27, 5  ;;  %v17640_v18 = vld [vmem:[#allocation59_spill] sm:$0xff] }
 0x26d   : > { %v8041_v30 = vrot.slane %v7933_v41, 4  ;;  %v8024_v26 = vsel %vm3092_vm11, %v8023_v38, %v8022_v28  ;;  %v8043_v25 = vrot.slane %v7934_v44, 3  ;;  %v8045_v12 = vrot.slane %v7935_v52, 2  ;;  %v17638_v44 = vld [vmem:[#allocation57_spill] sm:$0xff]  ;;  %v17644_v28 = vld [vmem:[#allocation23_spill] sm:$0xff] }
 0x26e   : > { %v8036_v8 = vsel %vm3089_vm10, %v8035_v35, %v7929_v21  ;;  %v8026_v60 = vsel %vm3095_vm13, %v8025_v31, %v8024_v26  ;;  %v8047_v58 = vrot.slane %v7936_v59, 1  ;;  %v8147_v6 = vrot.slane %v17631_v22, %v12306_v24  ;;  %v17646_v26 = vld [vmem:[#allocation52_spill] sm:$0xff] }
 0x26f   : > { %v8038_v16 = vsel %vm3092_vm11, %v8037_v48, %v8036_v8  ;;  %v8028_v13 = vsel %vm3098_vm15, %v8027_v0, %v8026_v60  ;;  %v8161_v4 = vrot.slane %v15008_v50, %v12306_v24  ;;  %v17633_v47 = vunpack.c.l.b16 %v17632_v14 }
 0x270   : > { %v8040_v15 = vsel %vm3095_vm13, %v8039_v11, %v8038_v16  ;;  %v8030_v33 = vsel %vm3101_vm5, %v8029_v29, %v8028_v13  ;;  %v8154_v3 = vrot.slane %v8147_v6, %v12306_v24  ;;  %v17635_v23 = vunpack.c.l.b16 %v17634_v7  ;;  %v17642_v29 = vld [vmem:[#allocation10_spill] sm:$0xff] }
 0x271   : > { %v8261_v57 = vrot.slane %v17633_v47, 7  ;;  %v8042_v1 = vsel %vm3098_vm15, %v8041_v30, %v8040_v15  ;;  %v8032_v53 = vsel %vm3104_vm2, %v8031_v51, %v8030_v33  ;;  %v8168_v42 = vrot.slane %v8161_v4, %v12306_v24  ;;  %v17652_v15 = vld [vmem:[#allocation17_spill] sm:$0xff]  ;;  %v17654_v47 = vld [vmem:[#allocation30_spill] sm:$0xff] }
 0x272   : > { %v8263_v46 = vrot.slane %v17635_v23, 6  ;;  %v8044_v43 = vsel %vm3101_vm5, %v8043_v25, %v8042_v1  ;;  %v17637_v50 = vunpack.c.l.b16 %v17636_v5  ;;  %v8034_v37 = vsel %vm3107_vm6, %v8033_v10, %v8032_v53  ;;  %v17656_v1 = vld [vmem:[#allocation32_spill] sm:$0xff] }
 0x273   : > { %v8046_v21 = vsel %vm3104_vm2, %v8045_v12, %v8044_v43  ;;  %v8253_v62 = vunpack.c.l.b16 %v8154_v3  ;;  %v8254_v41 = vunpack.c.l.b16 %v8168_v42  ;;  %v17639_v52 = vunpack.c.l.b16 %v17638_v44  ;;  %v17648_v12 = vld [vmem:[#allocation43_spill] sm:$0xff] }
 0x274   : > { %v8262_v34 = vsel %vm3089_vm10, %v8261_v57, %v17637_v50  ;;  %v8048_v27 = vsel %vm3107_vm6, %v8047_v58, %v8046_v21  ;;  %v17641_v38 = vunpack.c.l.b16 %v17640_v18  ;;  %v17643_v51 = vunpack.c.l.b16 %v17642_v29  ;;  %v17650_v58 = vld [vmem:[#allocation9_spill] sm:$0xff]  ;;  %v17660_v21 = vld [vmem:[#allocation47_spill] sm:$0xff]  ;;  %v17666_v29 = vld [vmem:[#allocation60_spill] sm:$0xff] }
 0x275   : > { %v8264_v2 = vsel %vm3092_vm11, %v8263_v46, %v8262_v34  ;;  %v8265_v59 = vrot.slane %v17639_v52, 5  ;;  %v8052_v0 = vpack.c.b16 %v8048_v27, %v8034_v37  ;;  %v17645_v10 = vunpack.c.l.b16 %v17644_v28  ;;  %v17658_v46 = vld [vmem:[#allocation34_spill] sm:$0xff] }
 0x276   : > { %v8267_v31 = vrot.slane %v17641_v38, 4  ;;  %v8269_v35 = vrot.slane %v17643_v51, 3  ;;  %v8273_v11 = vrot.slane %v8253_v62, 1  ;;  %v17647_v8 = vunpack.c.l.b16 %v17646_v26 }
 0x277   : > { %v8271_v48 = vrot.slane %v17645_v10, 2  ;;  %v8266_v30 = vsel %vm3095_vm13, %v8265_v59, %v8264_v2  ;;  %v17649_v60 = vunpack.c.l.b16 %v17648_v12  ;;  %v17651_v22 = vunpack.c.l.b16 %v17650_v58  ;;  %11771 = vmatmul.mubr.msk.bf16.gmra.mrb[4].mxu0 %vm3211_vm8, %v8052_v0 }
 0x278   : > { %v8275_v25 = vrot.slane %v17647_v8, 7  ;;  %v8268_v13 = vsel %vm3098_vm15, %v8267_v31, %v8266_v30  ;;  %v17653_v4 = vunpack.c.l.b16 %v17652_v15  ;;  %v17655_v57 = vunpack.c.l.b16 %v17654_v47  ;;  %v17664_v31 = vld [vmem:[#allocation45_spill] sm:$0xff] }
 0x279   : > { %v8277_v16 = vrot.slane %v17649_v60, 6  ;;  %v8279_v6 = vrot.slane %v17651_v22, 5  ;;  %v17657_v3 = vunpack.c.l.b16 %v17656_v1  ;;  %v8270_v23 = vsel %vm3101_vm5, %v8269_v35, %v8268_v13  ;;  %v17670_v60 = vld [vmem:[#allocation62_spill] sm:$0xff]  ;;  %v17672_v13 = vld [vmem:[#allocation63_spill] sm:$0xff] }
 0x27a   : > { %v8281_v14 = vrot.slane %v17653_v4, 4  ;;  %v8283_v33 = vrot.slane %v17655_v57, 3  ;;  %v17659_v53 = vunpack.c.l.b16 %v17658_v46  ;;  %v8287_v42 = vrot.slane %v8254_v41, 1  ;;  %v17662_v41 = vld [vmem:[#allocation11_spill] sm:$0xff] }
 0x27b   : > { %v8285_v7 = vrot.slane %v17657_v3, 2  ;;  %v8175_v5 = vrot.slane %v15382_v54, %v12306_v24  ;;  %v8272_v50 = vsel %vm3104_vm2, %v8271_v48, %v8270_v23  ;;  %v8189_v37 = vrot.slane %v15390_v61, %v12306_v24 }
 0x27c   : > { %v8276_v43 = vsel %vm3089_vm10, %v8275_v25, %v17659_v53  ;;  %v17661_v62 = vunpack.c.l.b16 %v17660_v21  ;;  %v8274_v27 = vsel %vm3107_vm6, %v8273_v11, %v8272_v50  ;;  %v17663_v59 = vunpack.c.l.b16 %v17662_v41  ;;  %v17668_v11 = vld [vmem:[#allocation61_spill] sm:$0xff]  ;;  %v17680_v50 = vld [vmem:[#allocation68_spill] sm:$0xff] }
 0x27d   : > { %v8278_v34 = vsel %vm3092_vm11, %v8277_v16, %v8276_v43  ;;  %v8182_v52 = vrot.slane %v8175_v5, %v12306_v24  ;;  %v8196_v38 = vrot.slane %v8189_v37, %v12306_v24  ;;  %v17665_v0 = vunpack.c.l.b16 %v17664_v31  ;;  %v17678_v43 = vld [vmem:[#allocation67_spill] sm:$0xff]  ;;  %v17682_v21 = vld [vmem:[#allocation69_spill] sm:$0xff] }
 0x27e   : > { %v8289_v2 = vrot.slane %v17661_v62, 7  ;;  %v8280_v44 = vsel %vm3095_vm13, %v8279_v6, %v8278_v34  ;;  %v8291_v18 = vrot.slane %v17663_v59, 6  ;;  %v17667_v51 = vunpack.c.l.b16 %v17666_v29  ;;  %v17686_v59 = vld [vmem:[#allocation70_spill] sm:$0xff] }
 0x27f   : > { %v8282_v54 = vsel %vm3098_vm15, %v8281_v14, %v8280_v44  ;;  %v8255_v10 = vunpack.c.l.b16 %v8182_v52  ;;  %v17669_v30 = vunpack.c.l.b16 %v17668_v11  ;;  %v8256_v25 = vunpack.c.l.b16 %v8196_v38  ;;  %v17684_v44 = vld [vmem:[#allocation64_spill] sm:$0xff] }
 0x280   : > { %v8290_v61 = vsel %vm3089_vm10, %v8289_v2, %v17665_v0  ;;  %v8293_v35 = vrot.slane %v17667_v51, 5  ;;  %v8284_v28 = vsel %vm3101_vm5, %v8283_v33, %v8282_v54  ;;  %v17671_v16 = vunpack.c.l.b16 %v17670_v60  ;;  %v17674_v33 = vld [vmem:[#allocation65_spill] sm:$0xff]  ;;  %v17694_v60 = vld [vmem:[#allocation90_spill] sm:$0xff] }
 0x281   : > { %v8292_v48 = vsel %vm3092_vm11, %v8291_v18, %v8290_v61  ;;  %v8295_v26 = vrot.slane %v17669_v30, 4  ;;  %v8286_v8 = vsel %vm3104_vm2, %v8285_v7, %v8284_v28  ;;  %v17673_v15 = vunpack.c.l.b16 %v17672_v13  ;;  %v17676_v7 = vld [vmem:[#allocation66_spill] sm:$0xff] }
 0x282   : > { %v8294_v12 = vsel %vm3095_vm13, %v8293_v35, %v8292_v48  ;;  %v8297_v58 = vrot.slane %v17671_v16, 3  ;;  %v8288_v22 = vsel %vm3107_vm6, %v8287_v42, %v8286_v8  ;;  %v8301_v14 = vrot.slane %v8255_v10, 1  ;;  %v17688_v35 = vld [vmem:[#allocation87_spill] sm:$0xff]  ;;  %v17690_v48 = vld [vmem:[#allocation88_spill] sm:$0xff] }
 0x283   : > { %v8296_v6 = vsel %vm3098_vm15, %v8295_v26, %v8294_v12  ;;  %v8299_v4 = vrot.slane %v17673_v15, 2  ;;  %v8373_v47 = vpack.c.b16 %v8288_v22, %v8274_v27  ;;  %v17675_v1 = vunpack.c.l.b16 %v17674_v33  ;;  %v17692_v26 = vld [vmem:[#allocation89_spill] sm:$0xff]  ;;  %v17696_v22 = vld [vmem:[#allocation86_spill] sm:$0xff]  ;;  %v17698_v15 = vld [vmem:[#allocation91_spill] sm:$0xff] }
 0x284   : > { %v8298_v57 = vsel %vm3101_vm5, %v8297_v58, %v8296_v6  ;;  %v17677_v23 = vunpack.c.l.b16 %v17676_v7  ;;  %v17679_v5 = vunpack.c.l.b16 %v17678_v43  ;;  %v17681_v34 = vunpack.c.l.b16 %v17680_v50  ;;  %v17702_v43 = vld [vmem:[#allocation94_spill] sm:$0xff]  ;;  %v17704_v50 = vld [vmem:[#allocation95_spill] sm:$0xff] }
 0x285   : > { %v8303_v3 = vrot.slane %v17675_v1, 7  ;;  %v8300_v53 = vsel %vm3104_vm2, %v8299_v4, %v8298_v57  ;;  %v17683_v62 = vunpack.c.l.b16 %v17682_v21  ;;  %11776 = vmatprep.mubr.msk.bf16.mxu0 %vm3211_vm8, %v8373_v47  ;;  %v17685_v52 = vunpack.c.l.b16 %v17684_v44  ;;  %v17700_v47 = vld [vmem:[#allocation92_spill] sm:$0xff] }
 0x286   : > { %v8305_v46 = vrot.slane %v17677_v23, 6  ;;  %v8307_v42 = vrot.slane %v17679_v5, 5  ;;  %v8309_v37 = vrot.slane %v17681_v34, 4  ;;  %v8302_v27 = vsel %vm3107_vm6, %v8301_v14, %v8300_v53  ;;  %v17706_v44 = vld [vmem:[#allocation96_spill] sm:$0xff] }
 0x287   : > { %v8311_v2 = vrot.slane %v17683_v62, 3  ;;  %v8304_v41 = vsel %vm3089_vm10, %v8303_v3, %v17685_v52  ;;  %v17687_v18 = vunpack.c.l.b16 %v17686_v59  ;;  %v8315_v38 = vrot.slane %v8256_v25, 1 }
 0x288   : > { %v8306_v31 = vsel %vm3092_vm11, %v8305_v46, %v8304_v41  ;;  %v8666_v0 = vsel %vm3224_vm0, %v15495_v32, 0  ;;  %v8203_v61 = vrot.slane %v15516_v17, %v12306_v24  ;;  %v8217_v29 = vrot.slane %v15524_v49, %v12306_v24 }
 0x289   : > { %v8313_v54 = vrot.slane %v17687_v18, 2  ;;  %v8308_v51 = vsel %vm3095_vm13, %v8307_v42, %v8306_v31  ;;  %v17689_v28 = vunpack.c.l.b16 %v17688_v35  ;;  %v17691_v11 = vunpack.c.l.b16 %v17690_v48  ;;  %v17708_v18 = vld [vmem:[#allocation93_spill] sm:$0xff] }
 0x28a   : > { %v17693_v8 = vunpack.c.l.b16 %v17692_v26  ;;  %v8310_v12 = vsel %vm3098_vm15, %v8309_v37, %v8308_v51  ;;  %v8210_v32 = vrot.slane %v8203_v61, %v12306_v24  ;;  %v8224_v17 = vrot.slane %v8217_v29, %v12306_v24  ;;  %v17710_v31 = vld [vmem:[#allocation97_spill] sm:$0xff]  ;;  %v17712_v51 = vld [vmem:[#allocation98_spill] sm:$0xff] }
 0x28b   : > { %v8317_v10 = vrot.slane %v17689_v28, 7  ;;  %v8319_v30 = vrot.slane %v17691_v11, 6  ;;  %v17695_v16 = vunpack.c.l.b16 %v17694_v60  ;;  %v8312_v58 = vsel %vm3101_vm5, %v8311_v2, %v8310_v12  ;;  %v17714_v11 = vld [vmem:[#allocation99_spill] sm:$0xff] }
 0x28c   : > { %v8321_v25 = vrot.slane %v17693_v8, 5  ;;  %v17697_v6 = vunpack.c.l.b16 %v17696_v22  ;;  %v17699_v4 = vunpack.c.l.b16 %v17698_v15  ;;  %v17701_v57 = vunpack.c.l.b16 %v17700_v47 }
 0x28d   : > { %v8323_v49 = vrot.slane %v17695_v16, 4  ;;  %v8314_v1 = vsel %vm3104_vm2, %v8313_v54, %v8312_v58  ;;  %v8257_v3 = vunpack.c.l.b16 %v8210_v32  ;;  %v8258_v7 = vunpack.c.l.b16 %v8224_v17  ;;  %v17717_v58 = vld [vmem:[#allocation114_spill] sm:$0xff] }
 0x28e   : > { %v8318_v13 = vsel %vm3089_vm10, %v8317_v10, %v17697_v6  ;;  %v8325_v14 = vrot.slane %v17699_v4, 3  ;;  %v8327_v33 = vrot.slane %v17701_v57, 2  ;;  %v8316_v46 = vsel %vm3107_vm6, %v8315_v38, %v8314_v1 }
 0x28f   : > { %v8320_v23 = vsel %vm3092_vm11, %v8319_v30, %v8318_v13  ;;  %v17703_v5 = vunpack.c.l.b16 %v17702_v43  ;;  %v17705_v34 = vunpack.c.l.b16 %v17704_v50  ;;  %v8374_v21 = vpack.c.b16 %v8316_v46, %v8302_v27  ;;  %v15859_v27 = vld [vmem:[%s16863_s3 + $0xe] sm:$0x3] }
 0x290   : > { %v8322_v53 = vsel %vm3095_vm13, %v8321_v25, %v8320_v23  ;;  %v8329_v2 = vrot.slane %v8257_v3, 1  ;;  %v17707_v52 = vunpack.c.l.b16 %v17706_v44  ;;  %v17709_v54 = vunpack.c.l.b16 %v17708_v18  ;;  %v17719_v13 = vld [vmem:[#allocation108_spill] sm:$0xff]  ;;  %v17731_v18 = vld [vmem:[#allocation118_spill] sm:$0xff] }
 0x291   : > { %v8331_v42 = vrot.slane %v17703_v5, 7  ;;  %v8333_v37 = vrot.slane %v17705_v34, 6  ;;  %v8324_v62 = vsel %vm3098_vm15, %v8323_v49, %v8322_v53  ;;  %v17711_v61 = vunpack.c.l.b16 %v17710_v31  ;;  %11777 = vmatmul.mubr.msk.bf16.vlgmr.msra.gmra.mrb[0].mxu0 %vm3211_vm8, %v8374_v21  ;;  %v17727_v53 = vld [vmem:[#allocation116_spill] sm:$0xff] }
 0x292   : > { %v8335_v41 = vrot.slane %v17707_v52, 5  ;;  %v8326_v59 = vsel %vm3101_vm5, %v8325_v14, %v8324_v62  ;;  %v17713_v35 = vunpack.c.l.b16 %v17712_v51  ;;  %v17715_v30 = vunpack.c.l.b16 %v17714_v11  ;;  %11785 = vmatpush3.bf16.msra.mxu0 %v8666_v0  ;;  %v17721_v14 = vld [vmem:[#allocation111_spill] sm:$0xff]  ;;  %v311_v11 = vld [vmem:[%s12292_s10 + $0xf8] sm:$0xff] }
 0x293   : > { %v8332_v38 = vsel %vm3089_vm10, %v8331_v42, %v17709_v54  ;;  %v8337_v29 = vrot.slane %v17711_v61, 4  ;;  %v8328_v10 = vsel %vm3104_vm2, %v8327_v33, %v8326_v59  ;;  %v8343_v8 = vrot.slane %v8258_v7, 1  ;;  %12059 = vmatprep.subr.msk.bf16.mxu0 %vm3224_vm0, %v15859_v27  ;;  %v17723_v33 = vld [vmem:[#allocation112_spill] sm:$0xff]  ;;  %v17725_v7 = vld [vmem:[#allocation115_spill] sm:$0xff] }
 0x294   : > { %v8339_v28 = vrot.slane %v17713_v35, 3  ;;  %v8334_v48 = vsel %vm3092_vm11, %v8333_v37, %v8332_v38  ;;  %v8341_v26 = vrot.slane %v17715_v30, 2  ;;  %v8330_v25 = vsel %vm3107_vm6, %v8329_v2, %v8328_v10  ;;  %v17734_v35 = vld [vmem:[#allocation117_spill] sm:$0xff] }
 0x295   : > { %v8336_v12 = vsel %vm3095_vm13, %v8335_v41, %v8334_v48  ;;  %v8231_v32 = vrot.slane %v15636_v36, %v12306_v24  ;;  %v8245_v17 = vrot.slane %v15643_v63, %v12306_v24  ;;  %v17716_v16 = vunpack.c.l.b16 %v15137_v56  ;;  %v310_v48 = vld [vmem:[%s12292_s10 + $0xf0] sm:$0xff] }
 0x296   : > { %v8338_v60 = vsel %vm3098_vm15, %v8337_v29, %v8336_v12  ;;  %v17718_v22 = vunpack.c.l.b16 %v17717_v58  ;;  %v17720_v0 = vunpack.c.l.b16 %v17719_v13  ;;  %v17722_v47 = vunpack.c.l.b16 %v17721_v14 }
 0x297   : > { %v8345_v49 = vrot.slane %v17716_v16, 7  ;;  %v8340_v4 = vsel %vm3101_vm5, %v8339_v28, %v8338_v60  ;;  %v8238_v36 = vrot.slane %v8231_v32, %v12306_v24  ;;  %v8252_v63 = vrot.slane %v8245_v17, %v12306_v24  ;;  %v12097_v17 = vld [vmem:[%s16861_s1] ss:$0 sm:$0xff] }
 0x298   : > { %v8347_v6 = vrot.slane %v17718_v22, 6  ;;  %v8349_v15 = vrot.slane %v17720_v0, 5  ;;  %v8351_v57 = vrot.slane %v17722_v47, 4  ;;  %v8342_v56 = vsel %vm3104_vm2, %v8341_v26, %v8340_v4  ;;  %v17738_v0 = vld [vmem:[#allocation27_spill] sm:$0xff] }
 0x299   : > { %v17724_v1 = vunpack.c.l.b16 %v17723_v33  ;;  %v17726_v23 = vunpack.c.l.b16 %v17725_v7  ;;  %v17728_v43 = vunpack.c.l.b16 %v17727_v53  ;;  %v8344_v42 = vsel %vm3107_vm6, %v8343_v8, %v8342_v56  ;;  %v17740_v53 = vld [vmem:[#allocation39_spill] sm:$0xff] }
 0x29a   : > { %v8259_v50 = vunpack.c.l.b16 %v8238_v36  ;;  %v8260_v34 = vunpack.c.l.b16 %v8252_v63  ;;  %v8375_v21 = vpack.c.b16 %v8344_v42, %v8330_v25  ;;  %v17729_v2 = vunpack.c.l.b16 %v15173_v40  ;;  %v1008_v42 = vld [vmem:[#allocation2 + $0xc0] sm:$0xf] }
 0x29b   : > { %v8346_v3 = vsel %vm3089_vm10, %v8345_v49, %v17724_v1  ;;  %v8353_v46 = vrot.slane %v17726_v23, 3  ;;  %v8355_v5 = vrot.slane %v17728_v43, 2  ;;  %v17730_v52 = vunpack.c.l.b16 %v15176_v9  ;;  %v17741_v43 = vld [vmem:[#allocation8_spill] sm:$0xff] }
 0x29c   : > { %v8348_v37 = vsel %vm3092_vm11, %v8347_v6, %v8346_v3  ;;  %v8359_v44 = vrot.slane %v17729_v2, 7  ;;  %v17732_v54 = vunpack.c.l.b16 %v17731_v18  ;;  %v17733_v31 = vunpack.c.l.b16 %v15186_v19  ;;  %11780 = vmatprep.mubr.msk.bf16.mxu0 %vm3211_vm8, %v8375_v21  ;;  %v15942_v2 = vld [vmem:[%s16863_s3 + $0x10] sm:$0x3] }
 0x29d   : > { %v8350_v62 = vsel %vm3095_vm13, %v8349_v15, %v8348_v37  ;;  %v8361_v41 = vrot.slane %v17730_v52, 6  ;;  %v8357_v51 = vrot.slane %v8259_v50, 1  ;;  %v17735_v28 = vunpack.c.l.b16 %v17734_v35  ;;  %v17739_v15 = vld [vmem:[#allocation29_spill] sm:$0xff]  ;;  %v1012_v50 = vld [vmem:[#allocation2 + $0xc8] sm:$0x1]  ;;  %v17743_v52 = vld [vmem:[#allocation22_spill] sm:$0xff] }
 0x29e   : > { %v8352_v59 = vsel %vm3098_vm15, %v8351_v57, %v8350_v62  ;;  %v8363_v38 = vrot.slane %v17732_v54, 5  ;;  %v8365_v61 = vrot.slane %v17733_v31, 4  ;;  %v17736_v9 = vunpack.c.l.b16 %v15190_v55 }
 0x29f   : > { %v8354_v29 = vsel %vm3101_vm5, %v8353_v46, %v8352_v59  ;;  %v8360_v40 = vsel %vm3089_vm10, %v8359_v44, %v17735_v28  ;;  %v17737_v19 = vunpack.c.l.b16 %v15193_v20  ;;  %v8371_v12 = vrot.slane %v8260_v34, 1  ;;  %v12098_v20 = vld [vmem:[%s16862_s2] ss:$0 sm:$0xff]  ;;  %v17742_v44 = vld [vmem:[#allocation42_spill] sm:$0xff] }
 0x2a0   : > { %v8367_v10 = vrot.slane %v17736_v9, 3  ;;  %v8356_v30 = vsel %vm3104_vm2, %v8355_v5, %v8354_v29  ;;  %v8362_v26 = vsel %vm3092_vm11, %v8361_v41, %v8360_v40  ;;  %v349_v55 = vmul.f32 %v12097_v17, %v310_v48 }
 0x2a1   : > { %v8369_v8 = vrot.slane %v17737_v19, 2  ;;  %v8364_v25 = vsel %vm3095_vm13, %v8363_v38, %v8362_v26  ;;  %v350_v60 = vmul.f32 %v12097_v17, %v311_v11  ;;  %v8358_v16 = vsel %vm3107_vm6, %v8357_v51, %v8356_v30 }
 0x2a2   : > { %v8366_v32 = vsel %vm3098_vm15, %v8365_v61, %v8364_v25  ;;  %v388_v22 = vadd.f32 %v12098_v20, %v349_v55  ;;  %v8649_v4 = vpack.c.b16 %v17739_v15, %v17738_v0  ;;  %v8972_v46 = vsel %vm3224_vm0, %v15859_v27, 0 }
 0x2a3   : > { %v8368_v49 = vsel %vm3101_vm5, %v8367_v10, %v8366_v32  ;;  %v389_v6 = vadd.f32 %v12098_v20, %v350_v60  ;;  %v8651_v5 = vpack.c.b16 %v17741_v43, %v17740_v53  ;;  %v17744_v41 = vpack.c.b16 %v17742_v44, %v17743_v52 }
 0x2a4   : > { %v8370_v58 = vsel %vm3104_vm2, %v8369_v8, %v8368_v49  ;;  %v420_v63 = vmax.f32 %v388_v22, 0.0 }
 0x2a5   : > { %v8372_v13 = vsel %vm3107_vm6, %v8371_v12, %v8370_v58  ;;  %v421_v14 = vmax.f32 %v389_v6, 0.0 }
 0x2a6   : > { %v8376_v36 = vpack.c.b16 %v8372_v13, %v8358_v16  ;;  %v11619_v47 = vpack.c.bf16 %v420_v63, %v420_v63 }
 0x2a7   : > { %v11620_v57 = vpack.c.bf16 %v421_v14, %v421_v14 }
 0x2a8   : > { %11781 = vmatmul.mubr.msk.bf16.gmra.mrb[4].mxu0 %vm3211_vm8, %v8376_v36  ;;  %v833_v56 = vshrl.u32 %v11619_v47, 16  ;;  %v836_v33 = vshll.u32 %v11619_v47, 16 }
 0x2a9   : > { %11786 = vmatprep.mubr.msk.bf16.mxu0 %vm3211_vm8, %v8649_v4  ;;  %v841_v1 = vshrl.u32 %v11620_v57, 16  ;;  %v844_v3 = vshll.u32 %v11620_v57, 16 }
 0x2aa   : > { %v835_v7 = vrot.slane %v833_v56, 7 }
 0x2ab   : > { %v843_v23 = vrot.slane %v841_v1, 7 }
 0x2ac   : > { %v838_v34 = vor.u32 %v836_v33, %v835_v7  ;;  %v839_v37 = vrot.slane %v835_v7, 4 }
 0x2ad   : > { %v846_v21 = vor.u32 %v844_v3, %v843_v23  ;;  %v848_v62 = vrot.slane %v843_v23, 4 }
 0x2ae   : > { %v1009_v54 = vsel %vm12334_vm14, %v838_v34, %v1008_v42  ;;  %vm9857_vm14 = vcmask 1043456  }
 0x2af   : > { %v847_v59 = vsel %vm12328_vm12, %v839_v37, %v846_v21  ;;  %v1013_v38 = vsel %vm12350_vm4, %v848_v62, %v1012_v50  ;;  %1010 = vst [vmem:[#allocation2 + $0xc0] sm:$0xf] %v1009_v54  ;;  %vm9193_vm12 = vcmask 57344  }
 0x2b0   : > { %11787 = vmatmul.mubr.msk.bf16.vlgmr.msra.gmra.mrb[0].mxu0 %vm3211_vm8, %v17744_v41  ;;  %1011 = vst.msk [vmem:[#allocation2 + $0xc4] sm:$0xf] %vm422_vm1, %v847_v59  ;;  %1014 = vst [vmem:[#allocation2 + $0xc8] sm:$0x1] %v1013_v38  ;;  %vm9191_vm1 = vcmask 60416  }
 0x2b1   : > { %11795 = vmatpush3.bf16.msra.mxu0 %v8972_v46  ;;  %11790 = vmatprep.mubr.msk.bf16.mxu0 %vm3211_vm8, %v8651_v5  ;;  %vm16429_vm4 = vmand %vm9193_vm12, %vm574_vm3  ;;  %vm9844_vm3 = vcmask 64512  }
 0x2b2   : > { %12060 = vmatprep.subr.msk.bf16.mxu0 %vm3224_vm0, %v15942_v2 }
 0x2b6   : > { %v11476_v31 = vld.sshfl [vmem:[#allocation2 + $0xc0] sm:$0x33 pattern:$0x75316420] }
 0x2b7   : > { %v11477_v61 = vld.sshfl [vmem:[#allocation2 + $0xc4] sm:$0x33 pattern:$0x75316420]  ;;  %v8474_v29 = vcombine.high %v11476_v31, %v11476_v31  ;;  %v8481_v51 = vrot.slane %v11476_v31, %v12306_v24 }
 0x2b8   : > { %v8498_v35 = vcombine.high %v11477_v61, %v11477_v61  ;;  %v15960_v28 = vrot.slane %v11477_v61, %v12306_v24  ;;  %v11482_v45 = vld.sshfl [vmem:[#allocation2 + $0xc8] sm:$0x1 pattern:$0x75316420] }
 0x2b9   : > { %v8488_v40 = vrot.slane %v8474_v29, %v12306_v24  ;;  %v8489_v9 = vcombine.high %v8481_v51, %v8481_v51  ;;  %v8521_v10 = vrot.slane %v8481_v51, %v12306_v24  ;;  %v15965_v48 = vrot.slane %v11482_v45, %v12306_v24 }
 0x2ba   : > { %v15968_v11 = vrot.slane %v8498_v35, %v12306_v24  ;;  %v15972_v30 = vcombine.high %v15960_v28, %v15960_v28  ;;  %v8577_v26 = vrot.slane %v15960_v28, %v12306_v24  ;;  %v8757_v19 = vshrl.u32 %v8481_v51, 16 }
 0x2bb   : > { %v8490_v8 = vcombine.high %v8488_v40, %v8488_v40  ;;  %v8528_v25 = vrot.slane %v8521_v10, %v12306_v24  ;;  %v8535_v12 = vrot.slane %v8488_v40, %v12306_v24  ;;  %v8549_v32 = vrot.slane %v8489_v9, %v12306_v24 }
 0x2bc   : > { %v8514_v17 = vcombine.high %v15968_v11, %v15968_v11  ;;  %v15982_v55 = vrot.slane %v8577_v26, %v12306_v24  ;;  %v8591_v60 = vrot.slane %v15968_v11, %v12306_v24  ;;  %v8605_v16 = vrot.slane %v15972_v30, %v12306_v24 }
 0x2bd   : > { %v15989_v49 = vrot.slane %v8535_v12, %v12306_v24  ;;  %v15992_v58 = vrot.slane %v8549_v32, %v12306_v24  ;;  %v8563_v20 = vrot.slane %v8490_v8, %v12306_v24  ;;  %v8627_v22 = vunpack.c.l.b16 %v8528_v25  ;;  %v17747_v25 = vld [vmem:[#allocation13_spill] sm:$0xff] }
 0x2be   : > { %v15996_v6 = vrot.slane %v8591_v60, %v12306_v24  ;;  %v15999_v13 = vrot.slane %v8605_v16, %v12306_v24  ;;  %v8619_v0 = vrot.slane %v8514_v17, %v12306_v24  ;;  %v8631_v15 = vunpack.c.l.b16 %v15982_v55 }
 0x2bf   : > { %v16004_v4 = vrot.slane %v8563_v20, %v12306_v24  ;;  %v8628_v36 = vunpack.c.l.b16 %v15989_v49  ;;  %v8629_v63 = vunpack.c.l.b16 %v15992_v58  ;;  %v8762_v14 = vshll.u32 %v8488_v40, 16 }
 0x2c0   : > { %v16009_v47 = vrot.slane %v8619_v0, %v12306_v24  ;;  %v8632_v57 = vunpack.c.l.b16 %v15996_v6  ;;  %v8633_v56 = vunpack.c.l.b16 %v15999_v13  ;;  %v8641_v33 = vrot.slane %v8631_v15, 4  ;;  %v17761_v13 = vld [vmem:[#allocation28_spill] sm:$0xff] }
 0x2c1   : > { %v8630_v1 = vunpack.c.l.b16 %v16004_v4  ;;  %v8635_v3 = vrot.slane %v8628_v36, 7  ;;  %v8637_v7 = vrot.slane %v8629_v63, 6  ;;  %v8764_v23 = vsel %vm12457_vm9, %v8757_v19, %v8762_v14 }
 0x2c2   : > { %v8634_v46 = vunpack.c.l.b16 %v16009_v47  ;;  %v8643_v53 = vrot.slane %v8632_v57, 3  ;;  %v8645_v43 = vrot.slane %v8633_v56, 2  ;;  %v8765_v5 = vshrl.u32 %v8488_v40, 16 }
 0x2c3   : > { %v8636_v42 = vsel %vm3089_vm10, %v8635_v3, %v8627_v22  ;;  %v8639_v50 = vrot.slane %v8630_v1, 5  ;;  %v8770_v34 = vshll.u32 %v8489_v9, 16  ;;  %v8773_v37 = vshrl.u32 %v8489_v9, 16 }
 0x2c4   : > { %v8638_v21 = vsel %vm3092_vm11, %v8637_v7, %v8636_v42  ;;  %v8647_v62 = vrot.slane %v8634_v46, 1  ;;  %v8778_v44 = vshll.u32 %v8490_v8, 16  ;;  %v8781_v52 = vshrl.u32 %v8490_v8, 16  ;;  %v17748_v7 = vld [vmem:[#allocation49_spill] sm:$0xff] }
 0x2c5   : > { %v8640_v41 = vsel %vm3095_vm13, %v8639_v50, %v8638_v21  ;;  %v8772_v27 = vsel %vm12457_vm9, %v8765_v5, %v8770_v34  ;;  %v8786_v59 = vshll.u32 %v15960_v28, 16  ;;  %v8789_v18 = vshrl.u32 %v15960_v28, 16 }
 0x2c6   : > { %v8642_v54 = vsel %vm3098_vm15, %v8641_v33, %v8640_v41  ;;  %v8780_v38 = vsel %vm12457_vm9, %v8773_v37, %v8778_v44  ;;  %v8794_v31 = vshll.u32 %v15968_v11, 16  ;;  %v8797_v61 = vshrl.u32 %v15968_v11, 16 }
 0x2c7   : > { %v8644_v29 = vsel %vm3101_vm5, %v8643_v53, %v8642_v54  ;;  %v8788_v51 = vsel %vm12457_vm9, %v8781_v52, %v8786_v59  ;;  %v8802_v35 = vshll.u32 %v15972_v30, 16  ;;  %v8805_v45 = vshrl.u32 %v15972_v30, 16  ;;  %v17751_v54 = vld [vmem:[#allocation53_spill] sm:$0xff] }
 0x2c8   : > { %v8646_v28 = vsel %vm3104_vm2, %v8645_v43, %v8644_v29  ;;  %v8796_v40 = vsel %vm12457_vm9, %v8789_v18, %v8794_v31  ;;  %v8810_v9 = vshll.u32 %v8514_v17, 16  ;;  %v8813_v10 = vshrl.u32 %v8514_v17, 16 }
 0x2c9   : > { %v8648_v26 = vsel %vm3107_vm6, %v8647_v62, %v8646_v28  ;;  %v8804_v11 = vsel %vm12457_vm9, %v8797_v61, %v8802_v35  ;;  %v8818_v19 = vshll.u32 %v15965_v48, 16  ;;  %v8827_v8 = vrot.slane %v8764_v23, %v12306_v24  ;;  %v17749_v23 = vld [vmem:[#allocation48_spill] sm:$0xff] }
 0x2ca   : > { %v8652_v12 = vpack.c.b16 %v8648_v26, %v17747_v25  ;;  %v8812_v30 = vsel %vm12457_vm9, %v8805_v45, %v8810_v9  ;;  %v8841_v32 = vrot.slane %v8772_v27, %v12306_v24  ;;  %v8855_v60 = vrot.slane %v8780_v38, %v12306_v24  ;;  %v17752_v38 = vld [vmem:[#allocation20_spill] sm:$0xff] }
 0x2cb   : > { %v8820_v17 = vsel %vm12457_vm9, %v8813_v10, %v8818_v19  ;;  %v8834_v16 = vrot.slane %v8827_v8, %v12306_v24  ;;  %v8869_v20 = vrot.slane %v8788_v51, %v12306_v24  ;;  %v8883_v22 = vrot.slane %v8796_v40, %v12306_v24  ;;  %v17754_v19 = vld [vmem:[#allocation50_spill] sm:$0xff] }
 0x2cc   : > { %11791 = vmatmul.mubr.msk.bf16.gmra.mrb[4].mxu0 %vm3211_vm8, %v8652_v12  ;;  %v8848_v0 = vrot.slane %v8841_v32, %v12306_v24  ;;  %v8862_v14 = vrot.slane %v8855_v60, %v12306_v24  ;;  %v8897_v33 = vrot.slane %v8804_v11, %v12306_v24  ;;  %v8911_v3 = vrot.slane %v8812_v30, %v12306_v24  ;;  %v17753_v11 = vld [vmem:[#allocation51_spill] sm:$0xff]  ;;  %v17756_v60 = vld [vmem:[#allocation26_spill] sm:$0xff] }
 0x2cd   : > { %v17750_v39 = vpack.c.b16 %v17748_v7, %v17749_v23  ;;  %v8876_v53 = vrot.slane %v8869_v20, %v12306_v24  ;;  %v8890_v43 = vrot.slane %v8883_v22, %v12306_v24  ;;  %v8925_v5 = vrot.slane %v8820_v17, %v12306_v24  ;;  %v17758_v20 = vld [vmem:[#allocation16_spill] sm:$0xff] }
 0x2ce   : > { %v8933_v42 = vunpack.c.l.b16 %v8834_v16  ;;  %v8904_v50 = vrot.slane %v8897_v33, %v12306_v24  ;;  %v8918_v34 = vrot.slane %v8911_v3, %v12306_v24  ;;  %v8934_v37 = vunpack.c.l.b16 %v8848_v0  ;;  %v17757_v16 = vld [vmem:[#allocation12_spill] sm:$0xff]  ;;  %v17759_v33 = vld [vmem:[#allocation18_spill] sm:$0xff]  ;;  %v17760_v3 = vld [vmem:[#allocation25_spill] sm:$0xff] }
 0x2cf   : > { %11796 = vmatprep.mubr.msk.bf16.mxu0 %vm3211_vm8, %v17750_v39  ;;  %v8935_v21 = vunpack.c.l.b16 %v8862_v14  ;;  %v8932_v62 = vrot.slane %v8925_v5, %v12306_v24  ;;  %v8936_v44 = vunpack.c.l.b16 %v8876_v53  ;;  %v8937_v52 = vunpack.c.l.b16 %v8890_v43  ;;  %v17764_v43 = vld [vmem:[#allocation15_spill] sm:$0xff] }
 0x2d0   : > { %v8938_v41 = vunpack.c.l.b16 %v8904_v50  ;;  %v8939_v27 = vunpack.c.l.b16 %v8918_v34  ;;  %v8941_v59 = vrot.slane %v8934_v37, 7  ;;  %v8957_v31 = vpack.c.b16 %v17752_v38, %v17751_v54  ;;  %v9815_v5 = vld [vmem:[%s16865_s5] sm:$0xf] }
 0x2d1   : > { %v8943_v18 = vrot.slane %v8935_v21, 6  ;;  %v8940_v61 = vunpack.c.l.b16 %v8932_v62  ;;  %v8945_v29 = vrot.slane %v8936_v44, 5  ;;  %v8947_v51 = vrot.slane %v8937_v52, 4  ;;  %12062 = vmatprep.subr.msk.bf16.mxu1 %vm9857_vm14, %v9815_v5  ;;  %v16184_v50 = vld [vmem:[%s16866_s6] sm:$0x3]  ;;  %v17766_v62 = vld [vmem:[#allocation4_spill] sm:$0xff] }
 0x2d2   : > { %v9093_v35 = vsel %vm3224_vm0, %v15942_v2, 0  ;;  %v8942_v45 = vsel %vm3089_vm10, %v8941_v59, %v8933_v42  ;;  %v8949_v28 = vrot.slane %v8938_v41, 3  ;;  %v9062_v40 = vrot.slane %v8629_v63, 7  ;;  %v12099_v52 = vld [vmem:[%s12292_s10] sm:$0xff] }
 0x2d3   : > { %v8944_v9 = vsel %vm3092_vm11, %v8943_v18, %v8942_v45  ;;  %v8951_v10 = vrot.slane %v8939_v27, 2  ;;  %v9064_v26 = vrot.slane %v8630_v1, 6  ;;  %v17755_v8 = vpack.c.b16 %v17753_v11, %v17754_v19  ;;  %v12100_v27 = vld [vmem:[%s12292_s10 + $0x20] sm:$0xff] }
 0x2d4   : > { %v8946_v25 = vsel %vm3095_vm13, %v8945_v29, %v8944_v9  ;;  %v8953_v2 = vrot.slane %v8940_v61, 1  ;;  %v9063_v12 = vsel %vm3089_vm10, %v9062_v40, %v8628_v36  ;;  %v9053_v4 = vrot.slane %v15965_v48, %v12306_v24  ;;  %v12101_v40 = vld [vmem:[%s12292_s10 + $0x8] sm:$0xff] }
 0x2d5   : > { %11797 = vmatmul.mubr.msk.bf16.vlgmr.msra.gmra.mrb[0].mxu0 %vm3211_vm8, %v17755_v8  ;;  %v8948_v58 = vsel %vm3098_vm15, %v8947_v51, %v8946_v25  ;;  %v9066_v63 = vrot.slane %v8631_v15, 5  ;;  %v9065_v30 = vsel %vm3092_vm11, %v9064_v26, %v9063_v12  ;;  %v9068_v36 = vrot.slane %v8632_v57, 4 }
 0x2d6   : > { %11805 = vmatpush3.bf16.msra.mxu0 %v9093_v35  ;;  %11800 = vmatprep.mubr.msk.bf16.mxu0 %vm3211_vm8, %v8957_v31  ;;  %v8950_v1 = vsel %vm3101_vm5, %v8949_v28, %v8948_v58  ;;  %v9076_v22 = vpack.c.b16 %v17758_v20, %v17757_v16  ;;  %v9060_v48 = vrot.slane %v9053_v4, %v12306_v24  ;;  %v9070_v15 = vrot.slane %v8633_v56, 3  ;;  %v17762_v56 = vld [vmem:[#allocation24_spill] sm:$0xff] }
 0x2d7   : > { %v8952_v32 = vsel %vm3104_vm2, %v8951_v10, %v8950_v1  ;;  %v9067_v55 = vsel %vm3095_vm13, %v9066_v63, %v9065_v30  ;;  %v9072_v57 = vrot.slane %v8634_v46, 2  ;;  %v9078_v24 = vpack.c.b16 %v17760_v3, %v17759_v33  ;;  %12061 = vmatprep.subr.msk.bf16.mxu0 %vm9857_vm14, %v9815_v5  ;;  %v12102_v10 = vld [vmem:[%s12292_s10 + $0x28] sm:$0xff] }
 0x2d8   : > { %v8954_v49 = vsel %vm3107_vm6, %v8953_v2, %v8952_v32  ;;  %v9069_v0 = vsel %vm3098_vm15, %v9068_v36, %v9067_v55  ;;  %v9061_v6 = vunpack.c.l.b16 %v9060_v48  ;;  %v17763_v39 = vpack.c.b16 %v17761_v13, %v17762_v56 }
 0x2d9   : > { %v8958_v17 = vpack.c.b16 %v8954_v49, %v17756_v60  ;;  %v9071_v14 = vsel %vm3101_vm5, %v9070_v15, %v9069_v0  ;;  %v17765_v46 = vmov 0   ;;  %v9859_v42 = vsel %vm9857_vm14, %v9815_v5, 0 }
 0x2da   : > { %v9074_v7 = vrot.slane %v9061_v6, 1  ;;  %v9073_v23 = vsel %vm3104_vm2, %v9072_v57, %v9071_v14  ;;  %9199 = vst.msk [vmem:[#allocation3 + $0x18] sm:$0xf] %vm9191_vm1, %v17765_v46  ;;  %9192 = vst.msk [vmem:[#allocation3] sm:$0xf] %vm9191_vm1, %v17765_v46  ;;  %11915 = vmatpush3.bf16.msra.mxu1 %v9859_v42  ;;  %v9414_v18 = vcombine.high %v12099_v52, %v12099_v52 }
 0x2db   : > { %9200 = vst.msk [vmem:[#allocation3 + $0x1c] sm:$0x1] %vm9193_vm12, %v17765_v46  ;;  %9194 = vst.msk [vmem:[#allocation3 + $0x4] sm:$0x1] %vm9193_vm12, %v17765_v46  ;;  %12063 = vmatprep.subr.msk.bf16.mxu1 %vm3224_vm0, %v16184_v50  ;;  %v12125_v34 = vmov 1983009808   ;;  %v9448_v54 = vcombine.high %v12100_v27, %v12100_v27  ;;  %v9431_v58 = vcombine.high %v12101_v40, %v12101_v40  ;;  %v9465_v4 = vcombine.high %v12102_v10, %v12102_v10 }
 0x2dc   : > { %v9075_v53 = vsel %vm3107_vm6, %v9074_v7, %v9073_v23  ;;  %9195 = vst.msk [vmem:[#allocation3 + $0x8] sm:$0xf] %vm9191_vm1, %v17765_v46  ;;  %9197 = vst.msk [vmem:[#allocation3 + $0x10] sm:$0xf] %vm9191_vm1, %v17765_v46  ;;  %v9416_v37 = vunpack.c.l.s4 %v12125_v34  ;;  %vm10251_vm9 = vsmask.f32 7440 }
 0x2dd   : > { %11801 = vmatmul.mubr.msk.bf16.gmra.mrb[4].mxu0 %vm3211_vm8, %v8958_v17  ;;  %v9079_v47 = vpack.c.b16 %v9075_v53, %v17764_v43  ;;  %9196 = vst.msk [vmem:[#allocation3 + $0xc] sm:$0x1] %vm9193_vm12, %v17765_v46  ;;  %9198 = vst.msk [vmem:[#allocation3 + $0x14] sm:$0x1] %vm9193_vm12, %v17765_v46 }
 0x2de   : > { %11806 = vmatprep.mubr.msk.bf16.mxu0 %vm3211_vm8, %v9076_v22  ;;  %9201 = vst.msk [vmem:[#allocation3 + $0x20] sm:$0xf] %vm9191_vm1, %v17765_v46  ;;  %9203 = vst.msk [vmem:[#allocation3 + $0x28] sm:$0xf] %vm9191_vm1, %v17765_v46  ;;  %v9417_v21 = vunpack.c.0.s8 %v9416_v37 }
 0x2df   : > { %9202 = vst.msk [vmem:[#allocation3 + $0x24] sm:$0x1] %vm9193_vm12, %v17765_v46  ;;  %9204 = vst.msk [vmem:[#allocation3 + $0x2c] sm:$0x1] %vm9193_vm12, %v17765_v46 }
 0x2e0   : > { %9205 = vst.msk [vmem:[#allocation3 + $0x30] sm:$0xf] %vm9191_vm1, %v17765_v46  ;;  %9207 = vst.msk [vmem:[#allocation3 + $0x38] sm:$0xf] %vm9191_vm1, %v17765_v46  ;;  %v16189_v44 = vsub.s32 %v9417_v21, %v17766_v62 }
 0x2e1   : > { %9206 = vst.msk [vmem:[#allocation3 + $0x34] sm:$0x1] %vm9193_vm12, %v17765_v46  ;;  %9208 = vst.msk [vmem:[#allocation3 + $0x3c] sm:$0x1] %vm9193_vm12, %v17765_v46 }
 0x2e2   : > { %9209 = vst.msk [vmem:[#allocation3 + $0x40] sm:$0xf] %vm9191_vm1, %v17765_v46  ;;  %9211 = vst.msk [vmem:[#allocation3 + $0x48] sm:$0xf] %vm9191_vm1, %v17765_v46  ;;  %v9421_v41 = vrot.slane %v12099_v52, %v16189_v44  ;;  %v9455_v59 = vrot.slane %v12100_v27, %v16189_v44  ;;  %v9428_v61 = vrot.slane %v9414_v18, %v16189_v44 }
 0x2e3   : > { %9210 = vst.msk [vmem:[#allocation3 + $0x44] sm:$0x1] %vm9193_vm12, %v17765_v46  ;;  %9212 = vst.msk [vmem:[#allocation3 + $0x4c] sm:$0x1] %vm9193_vm12, %v17765_v46  ;;  %v9462_v29 = vrot.slane %v9448_v54, %v16189_v44  ;;  %v9438_v9 = vrot.slane %v12101_v40, %v16189_v44  ;;  %v9472_v26 = vrot.slane %v12102_v10, %v16189_v44 }
 0x2e4   : > { %v9429_v38 = vcombine.high %v9421_v41, %v9421_v41  ;;  %v9463_v31 = vcombine.high %v9455_v59, %v9455_v59  ;;  %v9430_v45 = vcombine.high %v9428_v61, %v9428_v61  ;;  %v9752_v11 = vpack.c.bf16 %v9428_v61, %v9428_v61 }
 0x2e5   : > { %11807 = vmatmul.mubr.msk.bf16.vlgmr.msra.gmra.mrb[0].mxu0 %vm3211_vm8, %v17763_v39  ;;  %v9464_v28 = vcombine.high %v9462_v29, %v9462_v29  ;;  %v9760_v19 = vpack.c.bf16 %v9462_v29, %v9462_v29  ;;  %v9750_v8 = vpack.c.bf16 %v9421_v41, %v9421_v41  ;;  %v9758_v25 = vpack.c.bf16 %v9455_v59, %v9455_v59 }
 0x2e6   : > { %11810 = vmatprep.mubr.msk.bf16.mxu0 %vm3211_vm8, %v9078_v24  ;;  %11815 = vmatpush3.bf16.msra.mxu0 %v9859_v42  ;;  %v9751_v51 = vpack.c.bf16 %v9429_v38, %v9429_v38  ;;  %v9759_v35 = vpack.c.bf16 %v9463_v31, %v9463_v31  ;;  %v9753_v63 = vpack.c.bf16 %v9430_v45, %v9430_v45  ;;  %v9992_v49 = vunpack.c.l.b16 %v9752_v11 }
 0x2e7   : > { %v9761_v1 = vpack.c.bf16 %v9464_v28, %v9464_v28  ;;  %v9446_v30 = vcombine.high %v9438_v9, %v9438_v9  ;;  %v9480_v32 = vcombine.high %v9472_v26, %v9472_v26  ;;  %v10000_v36 = vunpack.c.l.b16 %v9760_v19 }
 0x2e8   : > { %v9991_v2 = vunpack.c.l.b16 %v9751_v51  ;;  %v9999_v12 = vunpack.c.l.b16 %v9759_v35  ;;  %v9990_v60 = vunpack.c.l.b16 %v9750_v8  ;;  %v9998_v17 = vunpack.c.l.b16 %v9758_v25  ;;  %v12103_v51 = vld [vmem:[%s12292_s10 + $0x40] sm:$0xff] }
 0x2e9   : > { %v9754_v22 = vpack.c.bf16 %v9438_v9, %v9438_v9  ;;  %v9762_v48 = vpack.c.bf16 %v9472_v26, %v9472_v26  ;;  %v9445_v55 = vrot.slane %v9431_v58, %v16189_v44  ;;  %v9479_v15 = vrot.slane %v9465_v4, %v16189_v44  ;;  %v12104_v26 = vld [vmem:[%s12292_s10 + $0x48] sm:$0xff]  ;;  %v12105_v25 = vld [vmem:[%s12292_s10 + $0x60] sm:$0xff] }
 0x2ea   : > { %v10054_v16 = vrot.slane %v9991_v2, 7  ;;  %v10068_v20 = vrot.slane %v9999_v12, 7  ;;  %v9993_v0 = vunpack.c.l.b16 %v9753_v63  ;;  %v10001_v6 = vunpack.c.l.b16 %v9761_v1  ;;  %v12106_v1 = vld [vmem:[%s12292_s10 + $0x68] sm:$0xff] }
 0x2eb   : > { %v10056_v57 = vrot.slane %v9992_v49, 6  ;;  %v10070_v14 = vrot.slane %v10000_v36, 6  ;;  %v9755_v33 = vpack.c.bf16 %v9446_v30, %v9446_v30  ;;  %v9763_v3 = vpack.c.bf16 %v9480_v32, %v9480_v32 }
 0x2ec   : > { %v10055_v24 = vsel %vm3089_vm10, %v10054_v16, %v9990_v60  ;;  %v10069_v7 = vsel %vm3089_vm10, %v10068_v20, %v9998_v17  ;;  %v9994_v23 = vunpack.c.l.b16 %v9754_v22  ;;  %v10002_v13 = vunpack.c.l.b16 %v9762_v48  ;;  %v16225_v20 = vld [vmem:[#allocation3] sm:$0xf] }
 0x2ed   : > { %11811 = vmatmul.mubr.msk.bf16.gmra.mrb[4].mxu0 %vm3211_vm8, %v9079_v47  ;;  %v9447_v56 = vcombine.high %v9445_v55, %v9445_v55  ;;  %v9481_v39 = vcombine.high %v9479_v15, %v9479_v15  ;;  %v10058_v53 = vrot.slane %v9993_v0, 5  ;;  %v10072_v43 = vrot.slane %v10001_v6, 5 }
 0x2ee   : > { %v9756_v47 = vpack.c.bf16 %v9445_v55, %v9445_v55  ;;  %v9764_v46 = vpack.c.bf16 %v9479_v15, %v9479_v15  ;;  %v10057_v5 = vsel %vm3092_vm11, %v10056_v57, %v10055_v24  ;;  %v10071_v42 = vsel %vm3092_vm11, %v10070_v14, %v10069_v7 }
 0x2ef   : > { %v9995_v34 = vunpack.c.l.b16 %v9755_v33  ;;  %v10003_v37 = vunpack.c.l.b16 %v9763_v3  ;;  %v10060_v21 = vrot.slane %v9994_v23, 4  ;;  %v10074_v62 = vrot.slane %v10002_v13, 4 }
 0x2f0   : > { %v9757_v52 = vpack.c.bf16 %v9447_v56, %v9447_v56  ;;  %v9765_v41 = vpack.c.bf16 %v9481_v39, %v9481_v39  ;;  %v10059_v27 = vsel %vm3095_vm13, %v10058_v53, %v10057_v5  ;;  %v10073_v59 = vsel %vm3095_vm13, %v10072_v43, %v10071_v42 }
 0x2f1   : > { %v9996_v18 = vunpack.c.l.b16 %v9756_v47  ;;  %v10004_v54 = vunpack.c.l.b16 %v9764_v46  ;;  %v10062_v38 = vrot.slane %v9995_v34, 3  ;;  %v10076_v31 = vrot.slane %v10003_v37, 3 }
 0x2f2   : > { %v10061_v61 = vsel %vm3098_vm15, %v10060_v21, %v10059_v27  ;;  %v10075_v29 = vsel %vm3098_vm15, %v10074_v62, %v10073_v59  ;;  %v9482_v35 = vcombine.high %v12103_v51, %v12103_v51  ;;  %v9997_v45 = vunpack.c.l.b16 %v9757_v52  ;;  %v12107_v59 = vld [vmem:[%s12292_s10 + $0x80] sm:$0xff] }
 0x2f3   : > { %v10005_v28 = vunpack.c.l.b16 %v9765_v41  ;;  %v9489_v40 = vrot.slane %v12103_v51, %v16189_v44  ;;  %v10064_v9 = vrot.slane %v9996_v18, 2  ;;  %v10078_v10 = vrot.slane %v10004_v54, 2  ;;  %v12108_v54 = vld [vmem:[%s12292_s10 + $0xa0] sm:$0xff] }
 0x2f4   : > { %v9499_v11 = vcombine.high %v12104_v26, %v12104_v26  ;;  %v10063_v19 = vsel %vm3101_vm5, %v10062_v38, %v10061_v61  ;;  %v10077_v8 = vsel %vm3101_vm5, %v10076_v31, %v10075_v29  ;;  %v9516_v2 = vcombine.high %v12105_v25, %v12105_v25 }
 0x2f5   : > { %v9496_v12 = vrot.slane %v9482_v35, %v16189_v44  ;;  %v10066_v58 = vrot.slane %v9997_v45, 1  ;;  %v10080_v4 = vrot.slane %v10005_v28, 1  ;;  %v9497_v63 = vcombine.high %v9489_v40, %v9489_v40 }
 0x2f6   : > { %v9533_v30 = vcombine.high %v12106_v1, %v12106_v1  ;;  %v10065_v32 = vsel %vm3104_vm2, %v10064_v9, %v10063_v19  ;;  %v10079_v49 = vsel %vm3104_vm2, %v10078_v10, %v10077_v8  ;;  %v9506_v36 = vrot.slane %v12104_v26, %v16189_v44 }
 0x2f7   : > { %v9513_v60 = vrot.slane %v9499_v11, %v16189_v44  ;;  %v9523_v17 = vrot.slane %v12105_v25, %v16189_v44  ;;  %v9530_v16 = vrot.slane %v9516_v2, %v16189_v44  ;;  %v9540_v22 = vrot.slane %v12106_v1, %v16189_v44 }
 0x2f8   : > { %v16229_v48 = vsel %vm3107_vm6, %v10066_v58, %v10065_v32  ;;  %v16232_v55 = vsel %vm3107_vm6, %v10080_v4, %v10079_v49  ;;  %v9498_v15 = vcombine.high %v9496_v12, %v9496_v12  ;;  %v9547_v0 = vrot.slane %v9533_v30, %v16189_v44 }
 0x2f9   : > { %v9514_v6 = vcombine.high %v9506_v36, %v9506_v36  ;;  %v9515_v57 = vcombine.high %v9513_v60, %v9513_v60  ;;  %v9767_v14 = vpack.c.bf16 %v9497_v63, %v9497_v63  ;;  %v9531_v24 = vcombine.high %v9523_v17, %v9523_v17 }
 0x2fa   : > { %v9532_v7 = vcombine.high %v9530_v16, %v9530_v16  ;;  %v16239_v23 = vsel %vm3224_vm0, %v16184_v50, 0  ;;  %v9548_v56 = vcombine.high %v9540_v22, %v9540_v22  ;;  %v9766_v39 = vpack.c.bf16 %v9489_v40, %v9489_v40  ;;  %vm16422_vm0 = vmand %vm9191_vm1, %vm899_vm7 }
 0x2fb   : > { %v9549_v53 = vcombine.high %v9547_v0, %v9547_v0  ;;  %v9768_v43 = vpack.c.bf16 %v9496_v12, %v9496_v12  ;;  %v9769_v47 = vpack.c.bf16 %v9498_v15, %v9498_v15  ;;  %v9770_v46 = vpack.c.bf16 %v9506_v36, %v9506_v36 }
 0x2fc   : > { %v9771_v5 = vpack.c.bf16 %v9514_v6, %v9514_v6  ;;  %v9772_v42 = vpack.c.bf16 %v9513_v60, %v9513_v60  ;;  %v9773_v34 = vpack.c.bf16 %v9515_v57, %v9515_v57  ;;  %v10007_v37 = vunpack.c.l.b16 %v9767_v14 }
 0x2fd   : > { %v9774_v21 = vpack.c.bf16 %v9523_v17, %v9523_v17  ;;  %v9775_v62 = vpack.c.bf16 %v9531_v24, %v9531_v24  ;;  %v9776_v52 = vpack.c.bf16 %v9530_v16, %v9530_v16  ;;  %v9777_v50 = vpack.c.bf16 %v9532_v7, %v9532_v7 }
 0x2fe   : > { %v9778_v41 = vpack.c.bf16 %v9540_v22, %v9540_v22  ;;  %v9779_v27 = vpack.c.bf16 %v9548_v56, %v9548_v56  ;;  %v16245_v18 = vrot.slane %v12107_v59, %v16189_v44  ;;  %v16249_v38 = vrot.slane %v12108_v54, %v16189_v44 }
 0x2ff   : > { %v9780_v31 = vpack.c.bf16 %v9547_v0, %v9547_v0  ;;  %v9781_v61 = vpack.c.bf16 %v9549_v53, %v9549_v53  ;;  %v10006_v29 = vunpack.c.l.b16 %v9766_v39  ;;  %v10008_v51 = vunpack.c.l.b16 %v9768_v43  ;;  %v12109_v39 = vld [vmem:[%s12292_s10 + $0x88] sm:$0xff] }
 0x300   : > { %v10009_v35 = vunpack.c.l.b16 %v9769_v47  ;;  %v10082_v45 = vrot.slane %v10007_v37, 7  ;;  %v9550_v28 = vcombine.high %v12107_v59, %v12107_v59  ;;  %v9584_v40 = vcombine.high %v12108_v54, %v12108_v54 }
 0x301   : > { %v16251_v9 = vunpack.c.l.b16 %v9770_v46  ;;  %v16253_v10 = vunpack.c.l.b16 %v9771_v5  ;;  %v16255_v26 = vunpack.c.l.b16 %v9772_v42  ;;  %v16257_v11 = vunpack.c.l.b16 %v9773_v34  ;;  %v12110_v46 = vld [vmem:[%s12292_s10 + $0xa8] sm:$0xff] }
 0x302   : > { %v10014_v19 = vunpack.c.l.b16 %v9774_v21  ;;  %v10015_v8 = vunpack.c.l.b16 %v9775_v62  ;;  %v9565_v25 = vcombine.high %v16245_v18, %v16245_v18  ;;  %v9599_v2 = vcombine.high %v16249_v38, %v16249_v38 }
 0x303   : > { %v10016_v12 = vunpack.c.l.b16 %v9776_v52  ;;  %v16263_v58 = vunpack.c.l.b16 %v9777_v50  ;;  %v16265_v4 = vunpack.c.l.b16 %v9778_v41  ;;  %v10084_v63 = vrot.slane %v10008_v51, 6 }
 0x304   : > { %v16267_v1 = vunpack.c.l.b16 %v9779_v27  ;;  %v10083_v30 = vsel %vm3089_vm10, %v10082_v45, %v10006_v29  ;;  %v9564_v32 = vrot.slane %v9550_v28, %v16189_v44  ;;  %v9598_v49 = vrot.slane %v9584_v40, %v16189_v44 }
 0x305   : > { %v16272_v36 = vunpack.c.l.b16 %v9780_v31  ;;  %v16274_v60 = vunpack.c.l.b16 %v9781_v61  ;;  %v10086_v17 = vrot.slane %v10009_v35, 5  ;;  %v10088_v16 = vrot.slane %v16251_v9, 4 }
 0x306   : > { %v10090_v22 = vrot.slane %v16253_v10, 3  ;;  %v10092_v15 = vrot.slane %v16255_v26, 2  ;;  %v9783_v0 = vpack.c.bf16 %v9565_v25, %v9565_v25  ;;  %v9791_v6 = vpack.c.bf16 %v9599_v2, %v9599_v2 }
 0x307   : > { %v10085_v57 = vsel %vm3092_vm11, %v10084_v63, %v10083_v30  ;;  %v10094_v14 = vrot.slane %v16257_v11, 1  ;;  %v10096_v24 = vrot.slane %v10015_v8, 7  ;;  %v10098_v7 = vrot.slane %v10016_v12, 6  ;;  %v16342_v11 = vld [vmem:[%s16864_s4] ss:$0 sm:$0xff] }
 0x308   : > { %v9566_v56 = vcombine.high %v9564_v32, %v9564_v32  ;;  %v9567_v53 = vcombine.high %v12109_v39, %v12109_v39  ;;  %v9574_v43 = vrot.slane %v12109_v39, %v16189_v44  ;;  %v9600_v47 = vcombine.high %v9598_v49, %v9598_v49 }
 0x309   : > { %v9601_v5 = vcombine.high %v12110_v46, %v12110_v46  ;;  %v9608_v42 = vrot.slane %v12110_v46, %v16189_v44  ;;  %v9784_v34 = vpack.c.bf16 %v9564_v32, %v9564_v32  ;;  %v9792_v37 = vpack.c.bf16 %v9598_v49, %v9598_v49 }
 0x30a   : > { %v9782_v21 = vpack.c.bf16 %v16245_v18, %v16245_v18  ;;  %v9790_v62 = vpack.c.bf16 %v16249_v38, %v16249_v38  ;;  %v10023_v52 = vunpack.c.l.b16 %v9783_v0  ;;  %v10031_v50 = vunpack.c.l.b16 %v9791_v6 }
 0x30b   : > { %v10087_v41 = vsel %vm3095_vm13, %v10086_v17, %v10085_v57  ;;  %v10097_v27 = vsel %vm3089_vm10, %v10096_v24, %v10014_v19  ;;  %v10100_v59 = vrot.slane %v16263_v58, 5  ;;  %v10102_v54 = vrot.slane %v16265_v4, 4 }
 0x30c   : > { %v9581_v31 = vrot.slane %v9567_v53, %v16189_v44  ;;  %v9582_v61 = vcombine.high %v9574_v43, %v9574_v43  ;;  %v9785_v29 = vpack.c.bf16 %v9566_v56, %v9566_v56  ;;  %v9793_v51 = vpack.c.bf16 %v9600_v47, %v9600_v47 }
 0x30d   : > { %v9615_v18 = vrot.slane %v9601_v5, %v16189_v44  ;;  %v9616_v35 = vcombine.high %v9608_v42, %v9608_v42  ;;  %v10024_v45 = vunpack.c.l.b16 %v9784_v34  ;;  %v10032_v38 = vunpack.c.l.b16 %v9792_v37 }
 0x30e   : > { %v10022_v28 = vunpack.c.l.b16 %v9782_v21  ;;  %v10030_v40 = vunpack.c.l.b16 %v9790_v62  ;;  %v10110_v9 = vrot.slane %v10023_v52, 7  ;;  %v10124_v10 = vrot.slane %v10031_v50, 7 }
 0x30f   : > { %v10104_v19 = vrot.slane %v16267_v1, 3  ;;  %v10106_v8 = vrot.slane %v16272_v36, 2  ;;  %v9786_v25 = vpack.c.bf16 %v9574_v43, %v9574_v43  ;;  %v9794_v2 = vpack.c.bf16 %v9608_v42, %v9608_v42 }
 0x310   : > { %v10089_v12 = vsel %vm3098_vm15, %v10088_v16, %v10087_v41  ;;  %v10099_v58 = vsel %vm3092_vm11, %v10098_v7, %v10097_v27  ;;  %v10025_v4 = vunpack.c.l.b16 %v9785_v29  ;;  %v10033_v63 = vunpack.c.l.b16 %v9793_v51  ;;  %v12111_v41 = vld [vmem:[%s12292_s10 + $0xc0] sm:$0xff]  ;;  %v12112_v29 = vld [vmem:[%s12292_s10 + $0xc8] sm:$0xff] }
 0x311   : > { %v9583_v30 = vcombine.high %v9581_v31, %v9581_v31  ;;  %v9617_v32 = vcombine.high %v9615_v18, %v9615_v18  ;;  %v10112_v49 = vrot.slane %v10024_v45, 6  ;;  %v10126_v17 = vrot.slane %v10032_v38, 6 }
 0x312   : > { %v9787_v0 = vpack.c.bf16 %v9582_v61, %v9582_v61  ;;  %v9795_v6 = vpack.c.bf16 %v9616_v35, %v9616_v35  ;;  %v10111_v57 = vsel %vm3089_vm10, %v10110_v9, %v10022_v28  ;;  %v10125_v1 = vsel %vm3089_vm10, %v10124_v10, %v10030_v40 }
 0x313   : > { %v10101_v36 = vsel %vm3095_vm13, %v10100_v59, %v10099_v58  ;;  %v10026_v56 = vunpack.c.l.b16 %v9786_v25  ;;  %v10034_v16 = vunpack.c.l.b16 %v9794_v2  ;;  %v10091_v7 = vsel %vm3101_vm5, %v10090_v22, %v10089_v12  ;;  %v12113_v12 = vld [vmem:[%s12292_s10 + $0xe0] sm:$0xff]  ;;  %v9351_v25 = vld [vmem:[#allocation3 + $0x24] sm:$0x1] }
 0x314   : > { %v9788_v39 = vpack.c.bf16 %v9581_v31, %v9581_v31  ;;  %v10114_v53 = vrot.slane %v10025_v4, 5  ;;  %v10128_v43 = vrot.slane %v10033_v63, 5  ;;  %v9789_v47 = vpack.c.bf16 %v9583_v30, %v9583_v30 }
 0x315   : > { %v9796_v46 = vpack.c.bf16 %v9615_v18, %v9615_v18  ;;  %v10113_v5 = vsel %vm3092_vm11, %v10112_v49, %v10111_v57  ;;  %v10127_v42 = vsel %vm3092_vm11, %v10126_v17, %v10125_v1  ;;  %v10103_v34 = vsel %vm3098_vm15, %v10102_v54, %v10101_v36 }
 0x316   : > { %v9797_v37 = vpack.c.bf16 %v9617_v32, %v9617_v32  ;;  %v10027_v21 = vunpack.c.l.b16 %v9787_v0  ;;  %v10035_v62 = vunpack.c.l.b16 %v9795_v6  ;;  %v10093_v52 = vsel %vm3104_vm2, %v10092_v15, %v10091_v7  ;;  %v12114_v6 = vld [vmem:[%s12292_s10 + $0xe8] sm:$0xff] }
 0x317   : > { %v10116_v22 = vrot.slane %v10026_v56, 4  ;;  %v10130_v50 = vrot.slane %v10034_v16, 4  ;;  %v9618_v27 = vcombine.high %v12111_v41, %v12111_v41  ;;  %v16311_v59 = vunpack.c.l.b16 %v9788_v39 }
 0x318   : > { %v10115_v31 = vsel %vm3095_vm13, %v10114_v53, %v10113_v5  ;;  %v10129_v61 = vsel %vm3095_vm13, %v10128_v43, %v10127_v42  ;;  %v9635_v51 = vcombine.high %v12112_v29, %v12112_v29  ;;  %v10105_v54 = vsel %vm3101_vm5, %v10104_v19, %v10103_v34 }
 0x319   : > { %v16317_v18 = vunpack.c.l.b16 %v9789_v47  ;;  %v16319_v26 = vunpack.c.l.b16 %v9796_v46  ;;  %v16322_v15 = vrot.slane %v12111_v41, %v16189_v44  ;;  %v16327_v35 = vsel %vm3107_vm6, %v10094_v14, %v10093_v52 }
 0x31a   : > { %v16329_v45 = vunpack.c.l.b16 %v9797_v37  ;;  %v10118_v38 = vrot.slane %v10027_v21, 3  ;;  %v10132_v28 = vrot.slane %v10035_v62, 3  ;;  %v10117_v40 = vsel %vm3098_vm15, %v10116_v22, %v10115_v31 }
 0x31b   : > { %v10131_v9 = vsel %vm3098_vm15, %v10130_v50, %v10129_v61  ;;  %v16334_v10 = vrot.slane %v9618_v27, %v16189_v44  ;;  %v16337_v19 = vrot.slane %v12112_v29, %v16189_v44  ;;  %v16345_v14 = vsel %vm3104_vm2, %v10106_v8, %v10105_v54  ;;  %v9336_v50 = vld [vmem:[#allocation3 + $0x10] sm:$0xf] }
 0x31c   : > { %v16349_v2 = vrot.slane %v9635_v51, %v16189_v44  ;;  %v9652_v58 = vcombine.high %v12113_v12, %v12113_v12  ;;  %v16356_v30 = vcombine.high %v16322_v15, %v16322_v15  ;;  %v16359_v32 = vrot.slane %v12113_v12, %v16189_v44 }
 0x31d   : > { %v16362_v49 = vsel %vm3101_vm5, %v10118_v38, %v10117_v40  ;;  %v16365_v17 = vsel %vm3101_vm5, %v10132_v28, %v10131_v9  ;;  %v9669_v57 = vcombine.high %v12114_v6, %v12114_v6  ;;  %v16372_v56 = vcombine.high %v16334_v10, %v16334_v10 }
 0x31e   : > { %v16376_v16 = vcombine.high %v16337_v19, %v16337_v19  ;;  %v16379_v7 = vrot.slane %v12114_v6, %v16189_v44  ;;  %v16384_v43 = vcombine.high %v16349_v2, %v16349_v2  ;;  %v16387_v47 = vrot.slane %v9652_v58, %v16189_v44  ;;  %v9342_v58 = vld [vmem:[#allocation3 + $0x18] sm:$0xf] }
 0x31f   : > { %v9798_v46 = vpack.c.bf16 %v16322_v15, %v16322_v15  ;;  %v16394_v37 = vcombine.high %v16359_v32, %v16359_v32  ;;  %v9799_v21 = vpack.c.bf16 %v16356_v30, %v16356_v30  ;;  %v16400_v22 = vrot.slane %v9669_v57, %v16189_v44 }
 0x320   : > { %v16406_v31 = vcombine.high %v16379_v7, %v16379_v7  ;;  %v16412_v54 = vcombine.high %v16387_v47, %v16387_v47  ;;  %v17771_v15 = vpack.c.bf16 %v16334_v10, %v16334_v10  ;;  %vm10250_vm7 = vsmask.f32 3328 }
 0x321   : > { %v17772_v30 = vpack.c.bf16 %v16394_v37, %v16394_v37 }
 0x3b8   : > { %v11808_v8 = vpop.f32.mrb[0].mxu0 }
 0x3b9   : > { %v9177_v1 = vadd.f32 %v11808_v8, %v16342_v11  ;;  %v9129_v36 = vpop.f32.mrb[1].mxu0  ;;  %v9345_v8 = vld [vmem:[#allocation3 + $0x1c] sm:$0x1] }
 0x3ba   : > { %v9175_v39 = vadd.f32 %v16342_v11, %v9129_v36  ;;  %v11809_v53 = vpop.f32.mrb[2].mxu0 }
 0x3bb   : > { %v9185_v5 = vmax.f32 %v9177_v1, 0.0  ;;  %v9178_v42 = vadd.f32 %v11809_v53, %v16342_v11  ;;  %v9132_v34 = vpop.f32.mrb[3].mxu0  ;;  %v17775_v53 = vrot.slane %v16311_v59, 2 }
 0x3bc   : > { %v9183_v62 = vmax.f32 %v9175_v39, 0.0  ;;  %v9176_v52 = vadd.f32 %v16342_v11, %v9132_v34 }
 0x3bd   : > { %v11623_v41 = vpack.c.bf16 %v9185_v5, %v9185_v5  ;;  %v9186_v27 = vmax.f32 %v9178_v42, 0.0  ;;  %v9328_v5 = vld [vmem:[#allocation3 + $0x8] sm:$0xf] }
 0x3be   : > { %v11621_v29 = vpack.c.bf16 %v9183_v62, %v9183_v62  ;;  %v9184_v51 = vmax.f32 %v9176_v52, 0.0 }
 0x3bf   : > { %v9262_v38 = vshrl.u32 %v11623_v41, 16  ;;  %v11624_v28 = vpack.c.bf16 %v9186_v27, %v9186_v27  ;;  %v9265_v12 = vshll.u32 %v11623_v41, 16  ;;  %v10121_v41 = vsel %vm3104_vm2, %v17775_v53, %v16362_v49 }
 0x3c0   : > { %v9246_v6 = vshrl.u32 %v11621_v29, 16  ;;  %v9249_v57 = vshll.u32 %v11621_v29, 16  ;;  %v11622_v1 = vpack.c.bf16 %v9184_v51, %v9184_v51  ;;  %v11812_v36 = vpop.f32.mrb[4].mxu0  ;;  %v9333_v29 = vld [vmem:[#allocation3 + $0xc] sm:$0x1]  ;;  %v9804_v49 = vpack.c.bf16 %v16349_v2, %v16349_v2 }
 0x3c1   : > { %v9264_v39 = vrot.slane %v9262_v38, 7  ;;  %v9270_v42 = vshrl.u32 %v11624_v28, 16  ;;  %v9273_v34 = vshll.u32 %v11624_v28, 16  ;;  %v9181_v62 = vadd.f32 %v11812_v36, %v16342_v11  ;;  %v9145_v52 = vpop.f32.mrb[5].mxu0  ;;  %v9348_v28 = vld [vmem:[#allocation3 + $0x20] sm:$0xf] }
 0x3c2   : > { %v9248_v27 = vrot.slane %v9246_v6, 7  ;;  %v9254_v51 = vshrl.u32 %v11622_v1, 16  ;;  %v9257_v38 = vshll.u32 %v11622_v1, 16  ;;  %v9179_v13 = vadd.f32 %v16342_v11, %v9145_v52  ;;  %v11813_v3 = vpop.f32.mrb[6].mxu0 }
 0x3c3   : > { %v9267_v33 = vor.u32 %v9265_v12, %v9264_v39  ;;  %v9268_v0 = vrot.slane %v9264_v39, 4  ;;  %v9272_v4 = vrot.slane %v9270_v42, 7  ;;  %v9189_v24 = vmax.f32 %v9181_v62, 0.0  ;;  %v9148_v36 = vpop.f32.mrb[7].mxu0  ;;  %v9339_v12 = vld [vmem:[#allocation3 + $0x14] sm:$0x1] }
 0x3c4   : > { %v9251_v63 = vor.u32 %v9249_v57, %v9248_v27  ;;  %v9252_v44 = vrot.slane %v9248_v27, 4  ;;  %v9256_v61 = vrot.slane %v9254_v51, 7  ;;  %v9187_v40 = vmax.f32 %v9179_v13, 0.0  ;;  %v9366_v27 = vld [vmem:[#allocation3 + $0x38] sm:$0xf] }
 0x3c5   : > { %v9343_v6 = vsel %vm16422_vm0, %v9267_v33, %v9342_v58  ;;  %v9346_v1 = vsel %vm16429_vm4, %v9268_v0, %v9345_v8  ;;  %v9275_v9 = vor.u32 %v9273_v34, %v9272_v4  ;;  %v9276_v52 = vrot.slane %v9272_v4, 4  ;;  %v9369_v51 = vld [vmem:[#allocation3 + $0x3c] sm:$0x1] }
 0x3c6   : > { %9344 = vst [vmem:[#allocation3 + $0x18] sm:$0xf] %v9343_v6  ;;  %9347 = vst [vmem:[#allocation3 + $0x1c] sm:$0x1] %v9346_v1  ;;  %v9329_v39 = vsel %vm16422_vm0, %v9251_v63, %v9328_v5  ;;  %v9334_v57 = vsel %vm16429_vm4, %v9252_v44, %v9333_v29  ;;  %v9259_v42 = vor.u32 %v9257_v38, %v9256_v61  ;;  %v9260_v13 = vrot.slane %v9256_v61, 4 }
 0x3c7   : > { %9330 = vst [vmem:[#allocation3 + $0x8] sm:$0xf] %v9329_v39  ;;  %9335 = vst [vmem:[#allocation3 + $0xc] sm:$0x1] %v9334_v57  ;;  %v9349_v33 = vsel %vm16422_vm0, %v9275_v9, %v9348_v28  ;;  %v9352_v4 = vsel %vm16429_vm4, %v9276_v52, %v9351_v25  ;;  %v11627_v0 = vpack.c.bf16 %v9189_v24, %v9189_v24  ;;  %v9354_v38 = vld [vmem:[#allocation3 + $0x28] sm:$0xf] }
 0x3c8   : > { %v11625_v58 = vpack.c.bf16 %v9187_v40, %v9187_v40  ;;  %9350 = vst [vmem:[#allocation3 + $0x20] sm:$0xf] %v9349_v33  ;;  %9353 = vst [vmem:[#allocation3 + $0x24] sm:$0x1] %v9352_v4  ;;  %v9337_v63 = vsel %vm16422_vm0, %v9259_v42, %v9336_v50  ;;  %v9340_v44 = vsel %vm16429_vm4, %v9260_v13, %v9339_v12  ;;  %v16459_v50 = vunpack.c.l.b16 %v9798_v46 }
 0x3c9   : > { %v9182_v61 = vadd.f32 %v11813_v3, %v16342_v11  ;;  %v9180_v8 = vadd.f32 %v16342_v11, %v9148_v36  ;;  %9338 = vst [vmem:[#allocation3 + $0x10] sm:$0xf] %v9337_v63  ;;  %9341 = vst [vmem:[#allocation3 + $0x14] sm:$0x1] %v9340_v44  ;;  %v9294_v9 = vshrl.u32 %v11627_v0, 16  ;;  %v9808_v24 = vpack.c.bf16 %v16387_v47, %v16387_v47 }
 0x3ca   : > { %v9278_v5 = vshrl.u32 %v11625_v58, 16  ;;  %v9809_v25 = vpack.c.bf16 %v16412_v54, %v16412_v54  ;;  %v16464_v3 = vunpack.c.l.b16 %v9799_v21  ;;  %v9297_v62 = vshll.u32 %v11627_v0, 16  ;;  %v9357_v54 = vld [vmem:[#allocation3 + $0x2c] sm:$0x1]  ;;  %v9372_v63 = vld [vmem:[#allocation3 + $0x40] sm:$0xf] }
 0x3cb   : > { %v9190_v40 = vmax.f32 %v9182_v61, 0.0  ;;  %v9188_v34 = vmax.f32 %v9180_v8, 0.0  ;;  %v9296_v11 = vrot.slane %v9294_v9, 7  ;;  %v9281_v47 = vshll.u32 %v11625_v58, 16  ;;  %v9375_v44 = vld [vmem:[#allocation3 + $0x44] sm:$0x1] }
 0x3cc   : > { %v9280_v29 = vrot.slane %v9278_v5, 7  ;;  %v16469_v46 = vunpack.c.l.b16 %v17771_v15  ;;  %v10047_v21 = vunpack.c.l.b16 %v17772_v30  ;;  %v17773_v33 = vpack.c.bf16 %v16359_v32, %v16359_v32 }
 0x3cd   : > { %v11628_v28 = vpack.c.bf16 %v9190_v40, %v9190_v40  ;;  %v11626_v36 = vpack.c.bf16 %v9188_v34, %v9188_v34  ;;  %v9299_v6 = vor.u32 %v9297_v62, %v9296_v11  ;;  %v9300_v1 = vrot.slane %v9296_v11, 4  ;;  %v16487_v61 = vld [vmem:[#allocation3 + $0x18] sm:$0xf]  ;;  %v9360_v34 = vld [vmem:[#allocation3 + $0x30] sm:$0xf] }
 0x3ce   : > { %v9283_v52 = vor.u32 %v9281_v47, %v9280_v29  ;;  %v9284_v12 = vrot.slane %v9280_v29, 4  ;;  %v16474_v13 = vld [vmem:[#allocation3 + $0x8] sm:$0xf]  ;;  %v10046_v4 = vunpack.c.l.b16 %v17773_v33  ;;  %v9363_v11 = vld [vmem:[#allocation3 + $0x34] sm:$0x1]  ;;  %v10138_v29 = vrot.slane %v16464_v3, 7 }
 0x3cf   : > { %v9302_v39 = vshrl.u32 %v11628_v28, 16  ;;  %v9305_v57 = vshll.u32 %v11628_v28, 16  ;;  %v9286_v42 = vshrl.u32 %v11626_v36, 16  ;;  %v9367_v10 = vsel %vm16422_vm0, %v9299_v6, %v9366_v27  ;;  %v16531_v33 = vld [vmem:[#allocation3 + $0x20] sm:$0xf] }
 0x3d0   : > { %v9370_v37 = vsel %vm16429_vm4, %v9300_v1, %v9369_v51  ;;  %v9355_v0 = vsel %vm16422_vm0, %v9283_v52, %v9354_v38  ;;  %v9358_v58 = vsel %vm16429_vm4, %v9284_v12, %v9357_v54  ;;  %9368 = vst [vmem:[#allocation3 + $0x38] sm:$0xf] %v9367_v10  ;;  %v9289_v9 = vshll.u32 %v11626_v36, 16  ;;  %v16491_v40 = vld [vmem:[#allocation3 + $0x10] sm:$0xf] }
 0x3d1   : > { %9371 = vst [vmem:[#allocation3 + $0x3c] sm:$0x1] %v9370_v37  ;;  %9356 = vst [vmem:[#allocation3 + $0x28] sm:$0xf] %v9355_v0  ;;  %v9304_v32 = vrot.slane %v9302_v39, 7  ;;  %v9288_v8 = vrot.slane %v9286_v42, 7  ;;  %v11508_v5 = vcombine.low %v16225_v20, %v16474_v13  ;;  %v16495_v62 = vcombine.low %v16491_v40, %v16487_v61 }
 0x3d2   : > { %9359 = vst [vmem:[#allocation3 + $0x2c] sm:$0x1] %v9358_v58  ;;  %v10048_v27 = vunpack.c.l.b16 %v9808_v24  ;;  %v10152_v47 = vrot.slane %v10047_v21, 7  ;;  %v9810_v36 = vpack.c.bf16 %v16379_v7, %v16379_v7  ;;  %v17774_v15 = vpack.c.bf16 %v16372_v56, %v16372_v56 }
 0x3d3   : > { %v9307_v51 = vor.u32 %v9305_v57, %v9304_v32  ;;  %v9308_v38 = vrot.slane %v9304_v32, 4  ;;  %v9291_v54 = vor.u32 %v9289_v9, %v9288_v8  ;;  %v9292_v28 = vrot.slane %v9288_v8, 4  ;;  %11816 = vmatprep.mubr.msk.bf16.mxu0 %vm9844_vm3, %v11508_v5  ;;  %v9816_v9 = vld [vmem:[%s16865_s5 + $0x4] sm:$0xf] }
 0x3d4   : > { %11817 = vmatmul.mubr.msk.bf16.vlgmr.msra.gmra.mrb[8].mxu0 %vm9844_vm3, %v16495_v62  ;;  %v10041_v30 = vunpack.c.l.b16 %v17774_v15  ;;  %v10049_v24 = vunpack.c.l.b16 %v9809_v25  ;;  %v10140_v3 = vrot.slane %v16469_v46, 6  ;;  %v9685_v56 = vcombine.high %v16400_v22, %v16400_v22 }
 0x3d5   : > { %v9373_v21 = vsel %vm16422_vm0, %v9307_v51, %v9372_v63  ;;  %v9376_v6 = vsel %vm16429_vm4, %v9308_v38, %v9375_v44  ;;  %v9361_v1 = vsel %vm16422_vm0, %v9291_v54, %v9360_v34  ;;  %v9364_v52 = vsel %vm16429_vm4, %v9292_v28, %v9363_v11 }
 0x3d6   : > { %9374 = vst [vmem:[#allocation3 + $0x40] sm:$0xf] %v9373_v21  ;;  %9377 = vst [vmem:[#allocation3 + $0x44] sm:$0x1] %v9376_v6  ;;  %v9803_v7 = vpack.c.bf16 %v16376_v16, %v16376_v16  ;;  %v10139_v25 = vsel %vm3089_vm10, %v10138_v29, %v16459_v50  ;;  %v10154_v46 = vrot.slane %v10048_v27, 6  ;;  %v9811_v12 = vpack.c.bf16 %v16406_v31, %v16406_v31 }
 0x3d7   : > { %9362 = vst [vmem:[#allocation3 + $0x30] sm:$0xf] %v9361_v1  ;;  %9365 = vst [vmem:[#allocation3 + $0x34] sm:$0x1] %v9364_v52  ;;  %v17776_v39 = vpack.c.bf16 %v16337_v19, %v16337_v19  ;;  %v10153_v42 = vsel %vm3089_vm10, %v10152_v47, %v10046_v4  ;;  %v17777_v50 = vrot.slane %v16319_v26, 2  ;;  %v10050_v10 = vunpack.c.l.b16 %v9810_v36 }
 0x3d8   : > { %v16533_v16 = vld [vmem:[#allocation3 + $0x28] sm:$0xf]  ;;  %v10142_v31 = vrot.slane %v10041_v30, 5  ;;  %v9805_v4 = vpack.c.bf16 %v16384_v43, %v16384_v43  ;;  %v10141_v37 = vsel %vm3092_vm11, %v10140_v3, %v10139_v25  ;;  %v10156_v0 = vrot.slane %v10049_v24, 5  ;;  %v16572_v27 = vld [vmem:[#allocation3 + $0x38] sm:$0xf]  ;;  %vm16627_vm10 = vmor %vm10250_vm7, %vm10251_vm9 }
 0x3d9   : > { %v10042_v57 = vunpack.c.l.b16 %v17776_v39  ;;  %v10135_v59 = vsel %vm3104_vm2, %v17777_v50, %v16365_v17  ;;  %v16543_v19 = vcombine.low %v16531_v33, %v16533_v16  ;;  %v9812_v26 = vpack.c.bf16 %v16400_v22, %v16400_v22  ;;  %v16601_v50 = vld [vmem:[#allocation3 + $0x4] sm:$0x1] }
 0x3da   : > { %v9813_v58 = vpack.c.bf16 %v9685_v56, %v9685_v56  ;;  %v10043_v17 = vunpack.c.l.b16 %v9803_v7  ;;  %v10155_v63 = vsel %vm3092_vm11, %v10154_v46, %v10153_v42  ;;  %v17778_v2 = vrot.slane %v16274_v60, 1 }
 0x3db   : > { %11820 = vmatprep.mubr.msk.bf16.mxu1 %vm9844_vm3, %v16543_v19  ;;  %v17779_v43 = vrot.slane %v16317_v18, 1  ;;  %v10051_v8 = vunpack.c.l.b16 %v9811_v12  ;;  %v10144_v22 = vrot.slane %v10042_v57, 4  ;;  %v10143_v5 = vsel %vm3095_vm13, %v10142_v31, %v10141_v37 }
 0x3dc   : > { %v16557_v44 = vsel %vm3107_vm6, %v17778_v2, %v16345_v14  ;;  %v10158_v34 = vrot.slane %v10050_v10, 4  ;;  %v10268_v11 = vshrl.u32 %v16474_v13, 16  ;;  %v10271_v60 = vshll.u32 %v16474_v13, 16 }
 0x3dd   : > { %v16562_v32 = vsel %vm3107_vm6, %v17779_v43, %v10121_v41  ;;  %v17780_v18 = vrot.slane %v16329_v45, 1  ;;  %v10044_v47 = vunpack.c.l.b16 %v9804_v49  ;;  %v10045_v51 = vunpack.c.l.b16 %v9805_v4  ;;  %v9817_v43 = vld [vmem:[%s16865_s5 + $0x8] sm:$0xf] }
 0x3de   : > { %v16570_v14 = vld [vmem:[#allocation3 + $0x30] sm:$0xf]  ;;  %v10157_v38 = vsel %vm3095_vm13, %v10156_v0, %v10155_v63  ;;  %v10052_v28 = vunpack.c.l.b16 %v9812_v26  ;;  %v10053_v36 = vunpack.c.l.b16 %v9813_v58  ;;  %v10146_v15 = vrot.slane %v10043_v17, 3 }
 0x3df   : > { %v10137_v29 = vsel %vm3107_vm6, %v17780_v18, %v10135_v59  ;;  %v16580_v54 = vcombine.low %v16570_v14, %v16572_v27  ;;  %v10390_v30 = vsel %vm9857_vm14, %v9816_v9, 0  ;;  %v10145_v24 = vsel %vm3098_vm15, %v10144_v22, %v10143_v5 }
 0x3e0   : > { %v10160_v3 = vrot.slane %v10051_v8, 3  ;;  %v17781_v45 = vshrl.u32 %v16225_v20, 16  ;;  %v10159_v6 = vsel %vm3098_vm15, %v10158_v34, %v10157_v38  ;;  %v17782_v1 = vshll.u32 %v16225_v20, 16 }
 0x3e1   : > { %11821 = vmatmul.mubr.msk.bf16.vlgmr.msra.gmra.mrb[0].mxu1 %vm9844_vm3, %v16580_v54  ;;  %v10270_v56 = vrot.slane %v10268_v11, 4  ;;  %v10273_v7 = vrot.slane %v10271_v60, 5  ;;  %v17783_v25 = vpack.c.b16 %v16232_v55, %v16229_v48  ;;  %v10167_v46 = vpack.c.b16 %v16557_v44, %v16327_v35  ;;  %v16604_v55 = vld [vmem:[#allocation3 + $0xc] sm:$0x1] }
 0x3e2   : > { %v10256_v21 = vrot.slane %v17781_v45, 4  ;;  %v10259_v52 = vrot.slane %v17782_v1, 5  ;;  %11825 = vmatpush3.bf16.msra.mxu1 %v16239_v23  ;;  %v10168_v53 = vpack.c.b16 %v10137_v29, %v16562_v32  ;;  %v10148_v41 = vrot.slane %v10044_v47, 2 }
 0x3e3   : > { %11826 = vmatprep.mubr.msk.bf16.mxu1 %vm3211_vm8, %v17783_v25  ;;  %v10150_v12 = vrot.slane %v10045_v51, 1  ;;  %12064 = vmatprep.subr.msk.bf16.mxu1 %vm9857_vm14, %v9816_v9  ;;  %v10147_v39 = vsel %vm3101_vm5, %v10146_v15, %v10145_v24  ;;  %v10162_v57 = vrot.slane %v10052_v28, 2  ;;  %v10164_v42 = vrot.slane %v10053_v36, 1  ;;  %v16632_v36 = vld [vmem:[#allocation3 + $0x14] sm:$0x1] }
 0x3e4   : > { %v10161_v48 = vsel %vm3101_vm5, %v10160_v3, %v10159_v6  ;;  %v10263_v23 = vshll.u32 %v16601_v50, 16  ;;  %v10282_v35 = vshrl.u32 %v16491_v40, 16  ;;  %v10285_v59 = vshll.u32 %v16491_v40, 16  ;;  %v16634_v15 = vld [vmem:[#allocation3 + $0x1c] sm:$0x1] }
 0x3e5   : > { %v10324_v49 = vshrl.u32 %v16533_v16, 16  ;;  %v10327_v10 = vshll.u32 %v16533_v16, 16  ;;  %v10260_v31 = vor.u32 %v10259_v52, %v10256_v21  ;;  %v10274_v4 = vor.u32 %v10273_v7, %v10270_v56  ;;  %v16636_v24 = vld [vmem:[#allocation3 + $0x2c] sm:$0x1]  ;;  %v16647_v25 = vld [vmem:[#allocation3 + $0x24] sm:$0x1] }
 0x3e6   : > { %v10149_v37 = vsel %vm3104_vm2, %v10148_v41, %v10147_v39  ;;  %v10296_v0 = vshrl.u32 %v16487_v61, 16  ;;  %v10299_v26 = vshll.u32 %v16487_v61, 16  ;;  %v10310_v58 = vshrl.u32 %v16531_v33, 16 }
 0x3e7   : > { %v10313_v17 = vshll.u32 %v16531_v33, 16  ;;  %v10163_v63 = vsel %vm3104_vm2, %v10162_v57, %v10161_v48  ;;  %v10277_v2 = vshll.u32 %v16604_v55, 16  ;;  %v10265_v44 = vrot.slane %v10263_v23, 5 }
 0x3e8   : > { %v10284_v32 = vrot.slane %v10282_v35, 4  ;;  %v10287_v8 = vrot.slane %v10285_v59, 5  ;;  %v10326_v22 = vrot.slane %v10324_v49, 4  ;;  %v10329_v9 = vrot.slane %v10327_v10, 5 }
 0x3e9   : > { %11827 = vmatmul.mubr.msk.bf16.vlgmr.msra.gmra.mrb[4].mxu1 %vm3211_vm8, %v10167_v46  ;;  %v10261_v5 = vrot.slane %v10260_v31, 4  ;;  %v10275_v34 = vrot.slane %v10274_v4, 4  ;;  %v10151_v11 = vsel %vm3107_vm6, %v10150_v12, %v10149_v37  ;;  %v10165_v60 = vsel %vm3107_vm6, %v10164_v42, %v10163_v63 }
 0x3ea   : > { %11835 = vmatpush3.bf16.msra.mxu1 %v10390_v30  ;;  %11830 = vmatprep.mubr.msk.bf16.mxu1 %vm3211_vm8, %v10168_v53  ;;  %v10298_v29 = vrot.slane %v10296_v0, 4  ;;  %v10301_v47 = vrot.slane %v10299_v26, 5  ;;  %v10312_v51 = vrot.slane %v10310_v58, 4  ;;  %v10315_v38 = vrot.slane %v10313_v17, 5  ;;  %v16657_v26 = vld [vmem:[#allocation3 + $0x34] sm:$0x1] }
 0x3eb   : > { %v10279_v28 = vrot.slane %v10277_v2, 5  ;;  %12065 = vmatprep.subr.msk.bf16.mxu1 %vm9857_vm14, %v9817_v43  ;;  %v10288_v30 = vor.u32 %v10287_v8, %v10284_v32  ;;  %v10338_v3 = vshrl.u32 %v16570_v14, 16  ;;  %v10341_v45 = vshll.u32 %v16570_v14, 16  ;;  %v9393_v32 = vld [vmem:[#allocation3 + $0x3c] sm:$0x1] }
 0x3ec   : > { %v10169_v21 = vpack.c.b16 %v10165_v60, %v10151_v11  ;;  %v10266_v6 = vsel %vm16627_vm10, %v10261_v5, %v10265_v44  ;;  %v10330_v52 = vor.u32 %v10329_v9, %v10326_v22  ;;  %v10291_v56 = vshll.u32 %v16632_v36, 16 }
 0x3ed   : > { %v16644_v1 = vsel %vm16627_vm10, %v10275_v34, %v10279_v28  ;;  %v10302_v7 = vor.u32 %v10301_v47, %v10298_v29  ;;  %v10352_v46 = vshrl.u32 %v16572_v27, 16  ;;  %v10355_v53 = vshll.u32 %v16572_v27, 16 }
 0x3ee   : > { %v10305_v41 = vshll.u32 %v16634_v15, 16  ;;  %v10316_v12 = vor.u32 %v10315_v38, %v10312_v51  ;;  %v10333_v39 = vshll.u32 %v16636_v24, 16  ;;  %v11520_v57 = vcombine.low %v10266_v6, %v16644_v1 }
 0x3ef   : > { %v10289_v42 = vrot.slane %v10288_v30, 4  ;;  %v10340_v48 = vrot.slane %v10338_v3, 4  ;;  %v10343_v23 = vrot.slane %v10341_v45, 5  ;;  %v10319_v35 = vshll.u32 %v16647_v25, 16 }
 0x3f0   : > { %v10331_v59 = vrot.slane %v10330_v52, 4  ;;  %v10293_v49 = vrot.slane %v10291_v56, 5  ;;  %v10303_v10 = vrot.slane %v10302_v7, 4  ;;  %v10354_v31 = vrot.slane %v10352_v46, 4 }
 0x3f1   : > { %11831 = vmatmul.mubr.msk.bf16.gmra.mrb[0].mxu1 %vm3211_vm8, %v10169_v21  ;;  %v10357_v4 = vrot.slane %v10355_v53, 5  ;;  %v10317_v37 = vrot.slane %v10316_v12, 4  ;;  %v10335_v0 = vrot.slane %v10333_v39, 5  ;;  %v10307_v17 = vrot.slane %v10305_v41, 5 }
 0x3f2   : > { %11836 = vmatprep.mubr.msk.bf16.mxu1 %vm9844_vm3, %v11520_v57  ;;  %v16661_v58 = vsel %vm16627_vm10, %v10289_v42, %v10293_v49  ;;  %v10344_v63 = vor.u32 %v10343_v23, %v10340_v48  ;;  %v10321_v2 = vrot.slane %v10319_v35, 5  ;;  %v10533_v22 = vsel %vm9857_vm14, %v9817_v43, 0  ;;  %v9818_v43 = vld [vmem:[%s16865_s5 + $0xc] sm:$0xf] }
 0x3f3   : > { %v16665_v44 = vsel %vm16627_vm10, %v10331_v59, %v10335_v0  ;;  %v16669_v8 = vsel %vm16627_vm10, %v10303_v10, %v10307_v17  ;;  %v10347_v9 = vshll.u32 %v16657_v26, 16  ;;  %v10358_v5 = vor.u32 %v10357_v4, %v10354_v31  ;;  %v9819_v31 = vld [vmem:[%s16865_s5 + $0x10] sm:$0xf] }
 0x3f4   : > { %v16675_v34 = vcombine.low %v16661_v58, %v16669_v8  ;;  %v16679_v11 = vsel %vm16627_vm10, %v10317_v37, %v10321_v2  ;;  %vm10473_vm11 = vcmask 1042432   ;;  %vm10474_vm13 = vcmask 1046532  }
 0x3f5   : > { %v16683_v60 = vcombine.low %v16679_v11, %v16665_v44  ;;  %v10345_v29 = vrot.slane %v10344_v63, 4  ;;  %v10361_v47 = vshll.u32 %v9393_v32, 16  ;;  %v11528_v51 = vrot.slane %v16225_v20, 9  ;;  %vm16697_vm15 = vmor %vm10473_vm11, %vm10474_vm13 }
 0x3f6   : > { %v10478_v38 = vrot.slane %v16601_v50, 5  ;;  %v11529_v28 = vrot.slane %v16474_v13, 9  ;;  %v10482_v30 = vrot.slane %v16604_v55, 5  ;;  %v10349_v3 = vrot.slane %v10347_v9, 5  ;;  %v9820_v9 = vld [vmem:[%s16865_s5 + $0x14] sm:$0xf] }
 0x3f7   : > { %v10359_v45 = vrot.slane %v10358_v5, 4  ;;  %v10363_v50 = vrot.slane %v10361_v47, 5  ;;  %v11530_v46 = vrot.slane %v16491_v40, 9  ;;  %v10486_v53 = vrot.slane %v16632_v36, 5 }
 0x3f8   : > { %v16704_v20 = vsel %vm16627_vm10, %v10345_v29, %v10349_v3  ;;  %v10479_v55 = vsel %vm16697_vm15, %v11528_v51, %v10478_v38  ;;  %v16710_v6 = vsel %vm16697_vm15, %v11529_v28, %v10482_v30  ;;  %v11533_v41 = vrot.slane %v16533_v16, 9  ;;  %v9395_v29 = vld [vmem:[#allocation3 + $0x44] sm:$0x1] }
 0x3f9   : > { %11837 = vmatmul.mubr.msk.bf16.vlgmr.msra.gmra.mrb[4].mxu1 %vm9844_vm3, %v16675_v34  ;;  %v16714_v52 = vsel %vm16627_vm10, %v10359_v45, %v10363_v50  ;;  %v11536_v7 = vcombine.low %v10479_v55, %v16710_v6  ;;  %v10498_v12 = vrot.slane %v16636_v24, 5  ;;  %v11531_v39 = vrot.slane %v16487_v61, 9  ;;  %v9822_v55 = vld [vmem:[%s16865_s5 + $0x1c] sm:$0xf] }
 0x3fa   : > { %11845 = vmatpush3.bf16.msra.mxu1 %v10533_v22  ;;  %11840 = vmatprep.mubr.msk.bf16.mxu1 %vm9844_vm3, %v16683_v60  ;;  %v16718_v56 = vcombine.low %v16704_v20, %v16714_v52  ;;  %v10490_v57 = vrot.slane %v16634_v15, 5  ;;  %v11532_v42 = vrot.slane %v16531_v33, 9  ;;  %v10494_v48 = vrot.slane %v16647_v25, 5 }
 0x3fb   : > { %12066 = vmatprep.subr.msk.bf16.mxu1 %vm9857_vm14, %v9818_v43  ;;  %v10487_v36 = vsel %vm16697_vm15, %v11530_v46, %v10486_v53  ;;  %v16736_v23 = vsel %vm16697_vm15, %v11533_v41, %v10498_v12  ;;  %v10627_v59 = vsel %vm9857_vm14, %v9818_v43, 0  ;;  %v11534_v25 = vrot.slane %v16570_v14, 9  ;;  %v9823_v46 = vld [vmem:[%s16865_s5 + $0x20] sm:$0xf] }
 0x3fc   : > { %v10491_v24 = vsel %vm16697_vm15, %v11531_v39, %v10490_v57  ;;  %v10495_v15 = vsel %vm16697_vm15, %v11532_v42, %v10494_v48  ;;  %v10502_v10 = vrot.slane %v16657_v26, 5  ;;  %v11535_v4 = vrot.slane %v16572_v27, 9  ;;  %v9396_v53 = vld [vmem:[#allocation3 + $0x48] sm:$0xf]  ;;  %v9397_v42 = vld [vmem:[#allocation3 + $0x4c] sm:$0x1] }
 0x3fd   : > { %v16740_v35 = vcombine.low %v10487_v36, %v10491_v24  ;;  %v16746_v49 = vcombine.low %v10495_v15, %v16736_v23  ;;  %v10506_v37 = vrot.slane %v9393_v32, 5  ;;  %v11544_v63 = vcombine.low %v16474_v13, %v16491_v40  ;;  %v9394_v13 = vld [vmem:[#allocation3 + $0x40] sm:$0xf] }
 0x3fe   : > { %v10503_v0 = vsel %vm16697_vm15, %v11534_v25, %v10502_v10  ;;  %v11545_v2 = vcombine.low %v16487_v61, %v16531_v33  ;;  %v10734_v32 = vsel %vm9857_vm14, %v9819_v31, 0  ;;  %v11546_v22 = vcombine.low %v16533_v16, %v16570_v14 }
 0x3ff   : > { %v10507_v26 = vsel %vm16697_vm15, %v11535_v4, %v10506_v37  ;;  %v10703_v40 = vshrl.u32 %v9394_v13, 16  ;;  %v10706_v5 = vshll.u32 %v9394_v13, 16  ;;  %v11547_v61 = vcombine.low %v16572_v27, %v9394_v13 }
 0x400   : > { %v16763_v17 = vcombine.low %v10503_v0, %v10507_v26  ;;  %v11552_v33 = vcombine.low %v16644_v1, %v16661_v58  ;;  %v10712_v43 = vshll.u32 %v9395_v29, 16  ;;  %v11553_v51 = vcombine.low %v16669_v8, %v16679_v11  ;;  %v9821_v1 = vld [vmem:[%s16865_s5 + $0x18] sm:$0xf] }
 0x401   : > { %11841 = vmatmul.mubr.msk.bf16.gmra.mrb[0].mxu1 %vm9844_vm3, %v16718_v56  ;;  %v10705_v16 = vrot.slane %v10703_v40, 4  ;;  %v10708_v14 = vrot.slane %v10706_v5, 5  ;;  %v10832_v38 = vsel %vm9857_vm14, %v9820_v9, 0  ;;  %v11554_v27 = vcombine.low %v16665_v44, %v16704_v20 }
 0x402   : > { %11846 = vmatprep.mubr.msk.bf16.mxu1 %vm9844_vm3, %v11536_v7  ;;  %v10714_v58 = vrot.slane %v10712_v43, 5  ;;  %v11561_v44 = vcombine.low %v16710_v6, %v10487_v36  ;;  %v11562_v30 = vcombine.low %v10491_v24, %v10495_v15  ;;  %v10914_v3 = vsel %vm9857_vm14, %v9821_v1, 0 }
 0x403   : > { %v10709_v47 = vor.u32 %v10708_v14, %v10705_v16  ;;  %v11563_v45 = vcombine.low %v16736_v23, %v10503_v0  ;;  %v11560_v20 = vrot.slane %v9394_v13, 9  ;;  %v10812_v50 = vrot.slane %v9395_v29, 5 }
 0x404   : > { %v11009_v7 = vsel %vm9857_vm14, %v9822_v55, 0  ;;  %v10990_v41 = vshrl.u32 %v9396_v53, 16  ;;  %v10993_v12 = vshll.u32 %v9396_v53, 16  ;;  %v11569_v39 = vcombine.low %v9394_v13, %v9396_v53 }
 0x405   : > { %v10710_v28 = vrot.slane %v10709_v47, 4  ;;  %v10813_v6 = vsel %vm16697_vm15, %v11560_v20, %v10812_v50  ;;  %v11095_v36 = vsel %vm9857_vm14, %v9823_v46, 0  ;;  %v11087_v15 = vrot.slane %v9397_v42, 5 }
 0x406   : > { %v10995_v57 = vrot.slane %v10993_v12, 5 }
 0x407   : > { %v10715_v8 = vsel %vm16627_vm10, %v10710_v28, %v10714_v58 }
 0x408   : > { %v11555_v11 = vcombine.low %v16714_v52, %v10715_v8  ;;  %v11564_v52 = vcombine.low %v10507_v26, %v10813_v6 }
 0x409   : > { %11847 = vmatmul.mubr.msk.bf16.vlgmr.msra.gmra.mrb[4].mxu1 %vm9844_vm3, %v16740_v35 }
 0x40a   : > { %11855 = vmatpush3.bf16.msra.mxu1 %v10627_v59  ;;  %11850 = vmatprep.mubr.msk.bf16.mxu1 %vm9844_vm3, %v16746_v49 }
 0x40b   : > { %12067 = vmatprep.subr.msk.bf16.mxu1 %vm9857_vm14, %v9819_v31 }
 0x411   : > { %11851 = vmatmul.mubr.msk.bf16.gmra.mrb[0].mxu1 %vm9844_vm3, %v16763_v17 }
 0x412   : > { %11856 = vmatprep.mubr.msk.bf16.mxu1 %vm9844_vm3, %v11544_v63 }
 0x419   : > { %11857 = vmatmul.mubr.msk.bf16.vlgmr.msra.gmra.mrb[4].mxu1 %vm9844_vm3, %v11545_v2 }
 0x41a   : > { %11865 = vmatpush3.bf16.msra.mxu1 %v10734_v32  ;;  %11860 = vmatprep.mubr.msk.bf16.mxu1 %vm9844_vm3, %v11546_v22 }
 0x41b   : > { %12068 = vmatprep.subr.msk.bf16.mxu1 %vm9857_vm14, %v9820_v9 }
 0x421   : > { %11861 = vmatmul.mubr.msk.bf16.gmra.mrb[0].mxu1 %vm9844_vm3, %v11547_v61 }
 0x422   : > { %11866 = vmatprep.mubr.msk.bf16.mxu1 %vm9844_vm3, %v11552_v33 }
 0x429   : > { %11867 = vmatmul.mubr.msk.bf16.vlgmr.msra.gmra.mrb[4].mxu1 %vm9844_vm3, %v11553_v51 }
 0x42a   : > { %11875 = vmatpush3.bf16.msra.mxu1 %v10832_v38  ;;  %11870 = vmatprep.mubr.msk.bf16.mxu1 %vm9844_vm3, %v11554_v27 }
 0x42b   : > { %12069 = vmatprep.subr.msk.bf16.mxu1 %vm9857_vm14, %v9821_v1 }
 0x431   : > { %11871 = vmatmul.mubr.msk.bf16.gmra.mrb[0].mxu1 %vm9844_vm3, %v11555_v11 }
 0x432   : > { %11876 = vmatprep.mubr.msk.bf16.mxu1 %vm9844_vm3, %v11561_v44 }
 0x439   : > { %11877 = vmatmul.mubr.msk.bf16.vlgmr.msra.gmra.mrb[4].mxu1 %vm9844_vm3, %v11562_v30 }
 0x43a   : > { %11885 = vmatpush3.bf16.msra.mxu1 %v10914_v3  ;;  %11880 = vmatprep.mubr.msk.bf16.mxu1 %vm9844_vm3, %v11563_v45 }
 0x43b   : > { %12070 = vmatprep.subr.msk.bf16.mxu1 %vm9857_vm14, %v9822_v55 }
 0x441   : > { %11881 = vmatmul.mubr.msk.bf16.gmra.mrb[0].mxu1 %vm9844_vm3, %v11564_v52 }
 0x442   : > { %11886 = vmatprep.mubr.msk.bf16.mxu1 %vm9844_vm3, %v16495_v62  ;;  %v10992_v62 = vrot.slane %v10990_v41, 4 }
 0x444   : > { %v10996_v48 = vor.u32 %v10995_v57, %v10992_v62 }
 0x446   : > { %v10997_v23 = vrot.slane %v10996_v48, 4 }
 0x449   : > { %11887 = vmatmul.mubr.msk.bf16.vlgmr.msra.gmra.mrb[4].mxu1 %vm9844_vm3, %v16543_v19  ;;  %v10999_v19 = vshll.u32 %v9397_v42, 16 }
 0x44a   : > { %11895 = vmatpush3.bf16.msra.mxu1 %v11009_v7  ;;  %11890 = vmatprep.mubr.msk.bf16.mxu1 %vm9844_vm3, %v16580_v54 }
 0x44b   : > { %12071 = vmatprep.subr.msk.bf16.mxu1 %vm9857_vm14, %v9823_v46  ;;  %v11001_v24 = vrot.slane %v10999_v19, 5 }
 0x44d   : > { %v11002_v54 = vsel %vm16627_vm10, %v10997_v23, %v11001_v24 }
 0x44e   : > { %v11574_v59 = vcombine.low %v10715_v8, %v11002_v54 }
 0x451   : > { %11891 = vmatmul.mubr.msk.bf16.gmra.mrb[0].mxu1 %vm9844_vm3, %v11569_v39 }
 0x452   : > { %11896 = vmatprep.mubr.msk.bf16.mxu1 %vm9844_vm3, %v16675_v34  ;;  %v11579_v34 = vrot.slane %v9396_v53, 9 }
 0x459   : > { %11897 = vmatmul.mubr.msk.bf16.vlgmr.msra.gmra.mrb[4].mxu1 %vm9844_vm3, %v16683_v60  ;;  %v11088_v60 = vsel %vm16697_vm15, %v11579_v34, %v11087_v15 }
 0x45a   : > { %11905 = vmatpush3.bf16.msra.mxu1 %v11095_v36  ;;  %11900 = vmatprep.mubr.msk.bf16.mxu1 %vm9844_vm3, %v16718_v56  ;;  %v11580_v18 = vcombine.low %v10813_v6, %v11088_v60 }
 0x461   : > { %11901 = vmatmul.mubr.msk.bf16.gmra.mrb[0].mxu1 %vm9844_vm3, %v11574_v59 }
 0x462   : > { %11906 = vmatprep.mubr.msk.bf16.mxu1 %vm9844_vm3, %v16740_v35 }
 0x469   : > { %11907 = vmatmul.mubr.msk.bf16.vlgmr.msra.gmra.mrb[4].mxu1 %vm9844_vm3, %v16746_v49 }
 0x46a   : > { %11910 = vmatprep.mubr.msk.bf16.mxu1 %vm9844_vm3, %v16763_v17 }
 0x471   : > { %11911 = vmatmul.mubr.msk.bf16.gmra.mrb[0].mxu1 %vm9844_vm3, %v11580_v18 }
 0x4a7   : > { %v11818_v56 = vpop.f32.mrb[8].mxu0 }
 0x4a8   : > { %v9895_v25 = vpop.f32.mrb[9].mxu0 }
 0x4a9   : > { %v11819_v10 = vpop.f32.mrb[10].mxu0 }
 0x4aa   : > { %v9898_v31 = vpop.f32.mrb[11].mxu0 }
 0x53c   : > { %v11908_v35 = vpop.f32.mrb[4].mxu1 }
 0x53d   : > { %v11916_v49 = vadd.f32 %v11908_v35, %v11818_v56  ;;  %v11131_v4 = vpop.f32.mrb[5].mxu1 }
 0x53e   : > { %v11917_v37 = vadd.f32 %v11131_v4, %v9895_v25  ;;  %v11909_v0 = vpop.f32.mrb[6].mxu1 }
 0x53f   : > { %11172 = vst.msk [vmem:[%s278_s29 + $0x10] sm:$0xff] %vm9844_vm3, %v11916_v49  ;;  %v11918_v21 = vadd.f32 %v11909_v0, %v11819_v10  ;;  %v11134_v26 = vpop.f32.mrb[7].mxu1 }
 0x540   : > { %11170 = vst.msk [vmem:[%s278_s29] sm:$0xff] %vm9844_vm3, %v11917_v37  ;;  %v11919_v17 = vadd.f32 %v11134_v26, %v9898_v31 }
 0x541   : > { %11173 = vst.msk [vmem:[%s278_s29 + $0x18] sm:$0xff] %vm9844_vm3, %v11918_v21 }
 0x542   : > { %11171 = vst.msk [vmem:[%s278_s29 + $0x8] sm:$0xff] %vm9844_vm3, %v11919_v17 }
 0x544   : > { %v11912_v63 = vpop.f32.mrb[0].mxu1 }
 0x545   : > { %11176 = vst.msk [vmem:[%s278_s29 + $0x30] sm:$0xff] %vm9844_vm3, %v11912_v63  ;;  %v11147_v2 = vpop.f32.mrb[1].mxu1 }
 0x546   : > { %11174 = vst.msk [vmem:[%s278_s29 + $0x20] sm:$0xff] %vm9844_vm3, %v11147_v2  ;;  %v11913_v32 = vpop.f32.mrb[2].mxu1 }
 0x547   : > { %11177 = vst.msk [vmem:[%s278_s29 + $0x38] sm:$0xff] %vm9844_vm3, %v11913_v32  ;;  %v11150_v22 = vpop.f32.mrb[3].mxu1 }
 0x548   : > { %11175 = vst.msk [vmem:[%s278_s29 + $0x28] sm:$0xff] %vm9844_vm3, %v11150_v22 }
 0x549 PF: > { %s17_s24 = sadd.s32 1, %s12121_s24  }
 0x54a   : > { %p14_p4 = scmp.ge.s32.totalorder %s17_s24, 4  }
 0x54c   :  { %16 = sbr.rel (!%p14_p4) target bundleno = 1 (0x1), region = 80 }

</bundles_post_ra>
